<compile_context>
chip_gen: v7x
topology: tpu7x:2x2x1
jax: 0.10.0
libtpu: 0.0.40
codegen_flags: <defaults>
</compile_context>

<pallas_src>
import jax
import jax.numpy as jnp
from jax.experimental import pallas as pl
from jax.experimental.pallas import tpu as pltpu

EPS = 1e-5


def _bottleneck_kernel(xp_ref, w1_ref, g1_ref, b1_ref, w2_ref, g2_ref, b2_ref,
                       out_ref, col1_ref, pad2_ref, col2_ref):
    """Fused conv1+bn1+relu+conv2+bn2+residual+relu.

    xp_ref  : (B, H+2, W+2, Cin)   pre-padded activations (NHWC)
    w1_ref  : (9*Cin, Cout)        conv1 weights, im2col-flattened (kh,kw,ci)
    g1_ref  : (1, Cout)            bn1 gamma
    b1_ref  : (1, Cout)            bn1 beta
    w2_ref  : (9*Cout, Cin)        conv2 weights, im2col-flattened (kh,kw,co)
    g2_ref  : (1, Cin)             bn2 gamma
    b2_ref  : (1, Cin)             bn2 beta
    out_ref : (B, H, W, Cin)
    col1_ref: (B*H*W, 9*Cin)       im2col scratch for conv1
    pad2_ref: (B, H+2, W+2, Cout)  zero-halo scratch for conv2 input
    col2_ref: (B*H*W, 9*Cout)      im2col scratch for conv2
    """
    B, Hp, Wp, Cin = xp_ref.shape
    H, W = Hp - 2, Wp - 2
    Cout = w1_ref.shape[1]
    N = B * H * W
    inv_n = 1.0 / N

    # ------------- conv1: im2col (9 static taps) + ONE matmul (K=9*Cin) ----
    for kh in range(3):
        for kw in range(3):
            t = kh * 3 + kw
            col1_ref[:, t * Cin:(t + 1) * Cin] = (
                xp_ref[:, kh:kh + H, kw:kw + W, :].reshape(N, Cin))
    acc1 = jnp.dot(col1_ref[...], w1_ref[...],
                   preferred_element_type=jnp.float32)          # (N, Cout)

    # ------------- bn1: single-pass batch stats (biased var) + relu --------
    s1 = jnp.sum(acc1, axis=0, keepdims=True)
    q1 = jnp.sum(acc1 * acc1, axis=0, keepdims=True)
    m1 = s1 * inv_n
    v1 = q1 * inv_n - m1 * m1
    y1 = jnp.maximum(
        (acc1 - m1) * jax.lax.rsqrt(v1 + EPS) * g1_ref[...] + b1_ref[...],
        0.0)                                                    # (N, Cout)

    # ------------- pad2: zero only the 1-px halo ring, write interior ------
    zrow = jnp.zeros((B, 1, Wp, Cout), jnp.float32)
    zcol = jnp.zeros((B, H, 1, Cout), jnp.float32)
    pad2_ref[:, 0:1, :, :] = zrow
    pad2_ref[:, H + 1:H + 2, :, :] = zrow
    pad2_ref[:, 1:H + 1, 0:1, :] = zcol
    pad2_ref[:, 1:H + 1, W + 1:W + 2, :] = zcol
    pad2_ref[:, 1:H + 1, 1:W + 1, :] = y1.reshape(B, H, W, Cout)

    # ------------- conv2: im2col + ONE matmul (K=9*Cout) -------------------
    for kh in range(3):
        for kw in range(3):
            t = kh * 3 + kw
            col2_ref[:, t * Cout:(t + 1) * Cout] = (
                pad2_ref[:, kh:kh + H, kw:kw + W, :].reshape(N, Cout))
    acc2 = jnp.dot(col2_ref[...], w2_ref[...],
                   preferred_element_type=jnp.float32)          # (N, Cin)

    # ------------- bn2 (single-pass) + residual add + relu -----------------
    s2 = jnp.sum(acc2, axis=0, keepdims=True)
    q2 = jnp.sum(acc2 * acc2, axis=0, keepdims=True)
    m2 = s2 * inv_n
    v2 = q2 * inv_n - m2 * m2
    y2 = (acc2 - m2) * jax.lax.rsqrt(v2 + EPS) * g2_ref[...] + b2_ref[...]

    res = xp_ref[:, 1:H + 1, 1:W + 1, :].reshape(N, Cin)        # residual
    out = jnp.maximum(y2 + res, 0.0)
    out_ref[...] = out.reshape(B, H, W, Cin).astype(out_ref.dtype)


def bottleneck_pallas(x_nchw, w1_oihw, g1, b1, w2_oihw, g2, b2):
    """Wrapper: NCHW in / NCHW out (matches the PyTorch module)."""
    B, Cin, H, W = x_nchw.shape
    Cout = w1_oihw.shape[0]

    # layout plumbing (NCHW -> NHWC), halo padding done here so it becomes
    # part of the HBM->VMEM DMA instead of in-kernel VMEM traffic.
    x_nhwc = jnp.transpose(x_nchw, (0, 2, 3, 1)).astype(jnp.float32)
    xp = jnp.pad(x_nhwc, ((0, 0), (1, 1), (1, 1), (0, 0)))

    # OIHW -> HWIO -> im2col-flattened weights (row index = kh*3*C + kw*C + c)
    w1 = jnp.transpose(w1_oihw, (2, 3, 1, 0)).astype(jnp.float32)
    w1 = w1.reshape(9 * Cin, Cout)
    w2 = jnp.transpose(w2_oihw, (2, 3, 1, 0)).astype(jnp.float32)
    w2 = w2.reshape(9 * Cout, Cin)

    g1r = g1.reshape(1, Cout).astype(jnp.float32)
    b1r = b1.reshape(1, Cout).astype(jnp.float32)
    g2r = g2.reshape(1, Cin).astype(jnp.float32)
    b2r = b2.reshape(1, Cin).astype(jnp.float32)

    N = B * H * W
    vmem = pl.BlockSpec(memory_space=pltpu.MemorySpace.VMEM)
    out_nhwc = pl.pallas_call(
        _bottleneck_kernel,
        out_shape=jax.ShapeDtypeStruct((B, H, W, Cin), jnp.float32),
        in_specs=[vmem] * 7,
        out_specs=vmem,
        scratch_shapes=[
            pltpu.VMEM((N, 9 * Cin), jnp.float32),               # col1
            pltpu.VMEM((B, H + 2, W + 2, Cout), jnp.float32),    # pad2
            pltpu.VMEM((N, 9 * Cout), jnp.float32),              # col2
        ],
    )(xp, w1, g1r, b1r, w2, g2r, b2r)

    return jnp.transpose(out_nhwc, (0, 3, 1, 2))  # back to NCHW


# ----------------------- pure-JAX reference (for checking) -----------------
def bottleneck_ref(x, w1, g1, b1, w2, g2, b2):
    def conv(a, w):
        return jax.lax.conv_general_dilated(
            a, w, window_strides=(1, 1), padding=((1, 1), (1, 1)),
            dimension_numbers=("NCHW", "OIHW", "NCHW"))

    def bn(a, g, b):
        m = a.mean(axis=(0, 2, 3), keepdims=True)
        v = ((a - m) ** 2).mean(axis=(0, 2, 3), keepdims=True)
        return ((a - m) * jax.lax.rsqrt(v + EPS) * g.reshape(1, -1, 1, 1)
                + b.reshape(1, -1, 1, 1))

    out = jax.nn.relu(bn(conv(x, w1), g1, b1))
    out = bn(conv(out, w2), g2, b2) + x
    return jax.nn.relu(out)


if __name__ == "__main__":
    B, inplanes, planes, H, W = 2, 4, 8, 16, 16

    key = jax.random.PRNGKey(0)
    k = jax.random.split(key, 7)
    x = jax.random.normal(k[0], (B, inplanes, H, W), jnp.float32)
    # deterministic synthetic parameters (PyTorch shapes: OIHW conv weights)
    w1 = jax.random.normal(k[1], (planes, inplanes, 3, 3), jnp.float32) * 0.1
    w2 = jax.random.normal(k[2], (inplanes, planes, 3, 3), jnp.float32) * 0.1
    g1 = 1.0 + 0.1 * jax.random.normal(k[3], (planes,), jnp.float32)
    b1 = 0.1 * jax.random.normal(k[4], (planes,), jnp.float32)
    g2 = 1.0 + 0.1 * jax.random.normal(k[5], (inplanes,), jnp.float32)
    b2 = 0.1 * jax.random.normal(k[6], (inplanes,), jnp.float32)

    out = bottleneck_pallas(x, w1, g1, b1, w2, g2, b2)
    out = jax.block_until_ready(out)

    ref = bottleneck_ref(x, w1, g1, b1, w2, g2, b2)
    assert out.shape == (B, inplanes, H, W)
    assert jnp.allclose(out, ref, atol=1e-4, rtol=1e-4), \
        f"max abs err = {jnp.max(jnp.abs(out - ref))}"

    print("KERNEL_OK")
</pallas_src>

<mosaic_0001>
module attributes {stable_mosaic.version = 11 : i64} {
  func.func @_bottleneck_kernel(%arg0: memref<2x18x18x4xf32, #tpu.memory_space<vmem>>, %arg1: memref<36x8xf32, #tpu.memory_space<vmem>>, %arg2: memref<1x8xf32, #tpu.memory_space<vmem>>, %arg3: memref<1x8xf32, #tpu.memory_space<vmem>>, %arg4: memref<72x4xf32, #tpu.memory_space<vmem>>, %arg5: memref<1x4xf32, #tpu.memory_space<vmem>>, %arg6: memref<1x4xf32, #tpu.memory_space<vmem>>, %arg7: memref<2x16x16x4xf32, #tpu.memory_space<vmem>>, %arg8: memref<512x36xf32, #tpu.memory_space<vmem>>, %arg9: memref<2x18x18x8xf32, #tpu.memory_space<vmem>>, %arg10: memref<512x72xf32, #tpu.memory_space<vmem>>) attributes {dimension_semantics = [], scalar_prefetch = 0 : i64, scratch_operands = 3 : i64, tpu.core_type = #tpu.core_type<tc>} {
    %c0 = arith.constant 0 : index
    %c0_0 = arith.constant 0 : index
    %c0_1 = arith.constant 0 : index
    %c0_2 = arith.constant 0 : index
    %0 = vector.load %arg0[%c0, %c0_0, %c0_1, %c0_2] : memref<2x18x18x4xf32, #tpu.memory_space<vmem>>, vector<2x16x16x4xf32>
    %1 = vector.shape_cast %0 : vector<2x16x16x4xf32> to vector<512x4xf32>
    %c0_3 = arith.constant 0 : index
    %c0_4 = arith.constant 0 : index
    %2 = vector.load %arg8[%c0_3, %c0_4] : memref<512x36xf32, #tpu.memory_space<vmem>>, vector<512x4xf32>
    tpu.vector_store %arg8[%c0_3, %c0_4], %1 {strides = array<i32>} : memref<512x36xf32, #tpu.memory_space<vmem>>, vector<512x4xf32>,
    %c0_5 = arith.constant 0 : index
    %c0_6 = arith.constant 0 : index
    %c1 = arith.constant 1 : index
    %c0_7 = arith.constant 0 : index
    %3 = vector.load %arg0[%c0_5, %c0_6, %c1, %c0_7] : memref<2x18x18x4xf32, #tpu.memory_space<vmem>>, vector<2x16x16x4xf32>
    %4 = vector.shape_cast %3 : vector<2x16x16x4xf32> to vector<512x4xf32>
    %c0_8 = arith.constant 0 : index
    %c4 = arith.constant 4 : index
    %5 = vector.load %arg8[%c0_8, %c4] : memref<512x36xf32, #tpu.memory_space<vmem>>, vector<512x4xf32>
    tpu.vector_store %arg8[%c0_8, %c4], %4 {strides = array<i32>} : memref<512x36xf32, #tpu.memory_space<vmem>>, vector<512x4xf32>,
    %c0_9 = arith.constant 0 : index
    %c0_10 = arith.constant 0 : index
    %c2 = arith.constant 2 : index
    %c0_11 = arith.constant 0 : index
    %6 = vector.load %arg0[%c0_9, %c0_10, %c2, %c0_11] : memref<2x18x18x4xf32, #tpu.memory_space<vmem>>, vector<2x16x16x4xf32>
    %7 = vector.shape_cast %6 : vector<2x16x16x4xf32> to vector<512x4xf32>
    %c0_12 = arith.constant 0 : index
    %c8 = arith.constant 8 : index
    %8 = vector.load %arg8[%c0_12, %c8] : memref<512x36xf32, #tpu.memory_space<vmem>>, vector<512x4xf32>
    tpu.vector_store %arg8[%c0_12, %c8], %7 {strides = array<i32>} : memref<512x36xf32, #tpu.memory_space<vmem>>, vector<512x4xf32>,
    %c0_13 = arith.constant 0 : index
    %c1_14 = arith.constant 1 : index
    %c0_15 = arith.constant 0 : index
    %c0_16 = arith.constant 0 : index
    %9 = vector.load %arg0[%c0_13, %c1_14, %c0_15, %c0_16] : memref<2x18x18x4xf32, #tpu.memory_space<vmem>>, vector<2x16x16x4xf32>
    %10 = vector.shape_cast %9 : vector<2x16x16x4xf32> to vector<512x4xf32>
    %c0_17 = arith.constant 0 : index
    %c12 = arith.constant 12 : index
    %11 = vector.load %arg8[%c0_17, %c12] : memref<512x36xf32, #tpu.memory_space<vmem>>, vector<512x4xf32>
    tpu.vector_store %arg8[%c0_17, %c12], %10 {strides = array<i32>} : memref<512x36xf32, #tpu.memory_space<vmem>>, vector<512x4xf32>,
    %c0_18 = arith.constant 0 : index
    %c1_19 = arith.constant 1 : index
    %c1_20 = arith.constant 1 : index
    %c0_21 = arith.constant 0 : index
    %12 = vector.load %arg0[%c0_18, %c1_19, %c1_20, %c0_21] : memref<2x18x18x4xf32, #tpu.memory_space<vmem>>, vector<2x16x16x4xf32>
    %13 = vector.shape_cast %12 : vector<2x16x16x4xf32> to vector<512x4xf32>
    %c0_22 = arith.constant 0 : index
    %c16 = arith.constant 16 : index
    %14 = vector.load %arg8[%c0_22, %c16] : memref<512x36xf32, #tpu.memory_space<vmem>>, vector<512x4xf32>
    tpu.vector_store %arg8[%c0_22, %c16], %13 {strides = array<i32>} : memref<512x36xf32, #tpu.memory_space<vmem>>, vector<512x4xf32>,
    %c0_23 = arith.constant 0 : index
    %c1_24 = arith.constant 1 : index
    %c2_25 = arith.constant 2 : index
    %c0_26 = arith.constant 0 : index
    %15 = vector.load %arg0[%c0_23, %c1_24, %c2_25, %c0_26] : memref<2x18x18x4xf32, #tpu.memory_space<vmem>>, vector<2x16x16x4xf32>
    %16 = vector.shape_cast %15 : vector<2x16x16x4xf32> to vector<512x4xf32>
    %c0_27 = arith.constant 0 : index
    %c20 = arith.constant 20 : index
    %17 = vector.load %arg8[%c0_27, %c20] : memref<512x36xf32, #tpu.memory_space<vmem>>, vector<512x4xf32>
    tpu.vector_store %arg8[%c0_27, %c20], %16 {strides = array<i32>} : memref<512x36xf32, #tpu.memory_space<vmem>>, vector<512x4xf32>,
    %c0_28 = arith.constant 0 : index
    %c2_29 = arith.constant 2 : index
    %c0_30 = arith.constant 0 : index
    %c0_31 = arith.constant 0 : index
    %18 = vector.load %arg0[%c0_28, %c2_29, %c0_30, %c0_31] : memref<2x18x18x4xf32, #tpu.memory_space<vmem>>, vector<2x16x16x4xf32>
    %19 = vector.shape_cast %18 : vector<2x16x16x4xf32> to vector<512x4xf32>
    %c0_32 = arith.constant 0 : index
    %c24 = arith.constant 24 : index
    %20 = vector.load %arg8[%c0_32, %c24] : memref<512x36xf32, #tpu.memory_space<vmem>>, vector<512x4xf32>
    tpu.vector_store %arg8[%c0_32, %c24], %19 {strides = array<i32>} : memref<512x36xf32, #tpu.memory_space<vmem>>, vector<512x4xf32>,
    %c0_33 = arith.constant 0 : index
    %c2_34 = arith.constant 2 : index
    %c1_35 = arith.constant 1 : index
    %c0_36 = arith.constant 0 : index
    %21 = vector.load %arg0[%c0_33, %c2_34, %c1_35, %c0_36] : memref<2x18x18x4xf32, #tpu.memory_space<vmem>>, vector<2x16x16x4xf32>
    %22 = vector.shape_cast %21 : vector<2x16x16x4xf32> to vector<512x4xf32>
    %c0_37 = arith.constant 0 : index
    %c28 = arith.constant 28 : index
    %23 = vector.load %arg8[%c0_37, %c28] : memref<512x36xf32, #tpu.memory_space<vmem>>, vector<512x4xf32>
    tpu.vector_store %arg8[%c0_37, %c28], %22 {strides = array<i32>} : memref<512x36xf32, #tpu.memory_space<vmem>>, vector<512x4xf32>,
    %c0_38 = arith.constant 0 : index
    %c2_39 = arith.constant 2 : index
    %c2_40 = arith.constant 2 : index
    %c0_41 = arith.constant 0 : index
    %24 = vector.load %arg0[%c0_38, %c2_39, %c2_40, %c0_41] : memref<2x18x18x4xf32, #tpu.memory_space<vmem>>, vector<2x16x16x4xf32>
    %25 = vector.shape_cast %24 : vector<2x16x16x4xf32> to vector<512x4xf32>
    %c0_42 = arith.constant 0 : index
    %c32 = arith.constant 32 : index
    %26 = vector.load %arg8[%c0_42, %c32] : memref<512x36xf32, #tpu.memory_space<vmem>>, vector<512x4xf32>
    tpu.vector_store %arg8[%c0_42, %c32], %25 {strides = array<i32>} : memref<512x36xf32, #tpu.memory_space<vmem>>, vector<512x4xf32>,
    %c0_43 = arith.constant 0 : index
    %c0_44 = arith.constant 0 : index
    %27 = vector.load %arg8[%c0_43, %c0_44] : memref<512x36xf32, #tpu.memory_space<vmem>>, vector<512x36xf32>
    %c0_45 = arith.constant 0 : index
    %c0_46 = arith.constant 0 : index
    %28 = vector.load %arg1[%c0_45, %c0_46] : memref<36x8xf32, #tpu.memory_space<vmem>>, vector<36x8xf32>
    %cst = arith.constant dense<0.000000e+00> : vector<512x8xf32>
    %29 = tpu.matmul %27, %28, %cst {dimension_numbers = #tpu.dot_dimension_numbers<[1], [0], [0], [1], [0, 0, 1, 1], [], []>} : vector<512x36xf32>, vector<36x8xf32>, vector<512x8xf32> -> vector<512x8xf32>
    %cst_47 = arith.constant dense<0.000000e+00> : vector<8xf32>
    %30 = vector.multi_reduction <add>, %29, %cst_47 [0] : vector<512x8xf32> to vector<8xf32>
    %31 = vector.shape_cast %30 : vector<8xf32> to vector<1x8xf32>
    %32 = arith.mulf %29, %29 : vector<512x8xf32>
    %cst_48 = arith.constant dense<0.000000e+00> : vector<8xf32>
    %33 = vector.multi_reduction <add>, %32, %cst_48 [0] : vector<512x8xf32> to vector<8xf32>
    %34 = vector.shape_cast %33 : vector<8xf32> to vector<1x8xf32>
    %cst_49 = arith.constant 0.001953125 : f32
    %35 = vector.broadcast %cst_49 : f32 to vector<1x8xf32>
    %36 = arith.mulf %31, %35 : vector<1x8xf32>
    %cst_50 = arith.constant 0.001953125 : f32
    %37 = vector.broadcast %cst_50 : f32 to vector<1x8xf32>
    %38 = arith.mulf %34, %37 : vector<1x8xf32>
    %39 = arith.mulf %36, %36 : vector<1x8xf32>
    %40 = arith.subf %38, %39 : vector<1x8xf32>
    %41 = vector.broadcast %36 : vector<1x8xf32> to vector<512x8xf32>
    %42 = arith.subf %29, %41 : vector<512x8xf32>
    %cst_51 = arith.constant 9.99999974E-6 : f32
    %43 = vector.broadcast %cst_51 : f32 to vector<1x8xf32>
    %44 = arith.addf %40, %43 : vector<1x8xf32>
    %45 = math.rsqrt %44 : vector<1x8xf32>
    %46 = vector.broadcast %45 : vector<1x8xf32> to vector<512x8xf32>
    %47 = arith.mulf %42, %46 : vector<512x8xf32>
    %c0_52 = arith.constant 0 : index
    %c0_53 = arith.constant 0 : index
    %48 = vector.load %arg2[%c0_52, %c0_53] : memref<1x8xf32, #tpu.memory_space<vmem>>, vector<1x8xf32>
    %49 = vector.broadcast %48 : vector<1x8xf32> to vector<512x8xf32>
    %50 = arith.mulf %47, %49 : vector<512x8xf32>
    %c0_54 = arith.constant 0 : index
    %c0_55 = arith.constant 0 : index
    %51 = vector.load %arg3[%c0_54, %c0_55] : memref<1x8xf32, #tpu.memory_space<vmem>>, vector<1x8xf32>
    %52 = vector.broadcast %51 : vector<1x8xf32> to vector<512x8xf32>
    %53 = arith.addf %50, %52 : vector<512x8xf32>
    %cst_56 = arith.constant 0.000000e+00 : f32
    %54 = vector.broadcast %cst_56 : f32 to vector<512x8xf32>
    %55 = arith.maximumf %53, %54 : vector<512x8xf32>
    %cst_57 = arith.constant 0.000000e+00 : f32
    %56 = vector.broadcast %cst_57 : f32 to vector<2x1x18x8xf32>
    %cst_58 = arith.constant 0.000000e+00 : f32
    %57 = vector.broadcast %cst_58 : f32 to vector<2x16x1x8xf32>
    %c0_59 = arith.constant 0 : index
    %c0_60 = arith.constant 0 : index
    %c0_61 = arith.constant 0 : index
    %c0_62 = arith.constant 0 : index
    %58 = vector.load %arg9[%c0_59, %c0_60, %c0_61, %c0_62] : memref<2x18x18x8xf32, #tpu.memory_space<vmem>>, vector<2x1x18x8xf32>
    tpu.vector_store %arg9[%c0_59, %c0_60, %c0_61, %c0_62], %56 {strides = array<i32>} : memref<2x18x18x8xf32, #tpu.memory_space<vmem>>, vector<2x1x18x8xf32>,
    %c0_63 = arith.constant 0 : index
    %c17 = arith.constant 17 : index
    %c0_64 = arith.constant 0 : index
    %c0_65 = arith.constant 0 : index
    %59 = vector.load %arg9[%c0_63, %c17, %c0_64, %c0_65] : memref<2x18x18x8xf32, #tpu.memory_space<vmem>>, vector<2x1x18x8xf32>
    tpu.vector_store %arg9[%c0_63, %c17, %c0_64, %c0_65], %56 {strides = array<i32>} : memref<2x18x18x8xf32, #tpu.memory_space<vmem>>, vector<2x1x18x8xf32>,
    %c0_66 = arith.constant 0 : index
    %c1_67 = arith.constant 1 : index
    %c0_68 = arith.constant 0 : index
    %c0_69 = arith.constant 0 : index
    %60 = vector.load %arg9[%c0_66, %c1_67, %c0_68, %c0_69] : memref<2x18x18x8xf32, #tpu.memory_space<vmem>>, vector<2x16x1x8xf32>
    tpu.vector_store %arg9[%c0_66, %c1_67, %c0_68, %c0_69], %57 {strides = array<i32>} : memref<2x18x18x8xf32, #tpu.memory_space<vmem>>, vector<2x16x1x8xf32>,
    %c0_70 = arith.constant 0 : index
    %c1_71 = arith.constant 1 : index
    %c17_72 = arith.constant 17 : index
    %c0_73 = arith.constant 0 : index
    %61 = vector.load %arg9[%c0_70, %c1_71, %c17_72, %c0_73] : memref<2x18x18x8xf32, #tpu.memory_space<vmem>>, vector<2x16x1x8xf32>
    tpu.vector_store %arg9[%c0_70, %c1_71, %c17_72, %c0_73], %57 {strides = array<i32>} : memref<2x18x18x8xf32, #tpu.memory_space<vmem>>, vector<2x16x1x8xf32>,
    %62 = vector.shape_cast %55 : vector<512x8xf32> to vector<2x16x16x8xf32>
    %c0_74 = arith.constant 0 : index
    %c1_75 = arith.constant 1 : index
    %c1_76 = arith.constant 1 : index
    %c0_77 = arith.constant 0 : index
    %63 = vector.load %arg9[%c0_74, %c1_75, %c1_76, %c0_77] : memref<2x18x18x8xf32, #tpu.memory_space<vmem>>, vector<2x16x16x8xf32>
    tpu.vector_store %arg9[%c0_74, %c1_75, %c1_76, %c0_77], %62 {strides = array<i32>} : memref<2x18x18x8xf32, #tpu.memory_space<vmem>>, vector<2x16x16x8xf32>,
    %c0_78 = arith.constant 0 : index
    %c0_79 = arith.constant 0 : index
    %c0_80 = arith.constant 0 : index
    %c0_81 = arith.constant 0 : index
    %64 = vector.load %arg9[%c0_78, %c0_79, %c0_80, %c0_81] : memref<2x18x18x8xf32, #tpu.memory_space<vmem>>, vector<2x16x16x8xf32>
    %65 = vector.shape_cast %64 : vector<2x16x16x8xf32> to vector<512x8xf32>
    %c0_82 = arith.constant 0 : index
    %c0_83 = arith.constant 0 : index
    %66 = vector.load %arg10[%c0_82, %c0_83] : memref<512x72xf32, #tpu.memory_space<vmem>>, vector<512x8xf32>
    tpu.vector_store %arg10[%c0_82, %c0_83], %65 {strides = array<i32>} : memref<512x72xf32, #tpu.memory_space<vmem>>, vector<512x8xf32>,
    %c0_84 = arith.constant 0 : index
    %c0_85 = arith.constant 0 : index
    %c1_86 = arith.constant 1 : index
    %c0_87 = arith.constant 0 : index
    %67 = vector.load %arg9[%c0_84, %c0_85, %c1_86, %c0_87] : memref<2x18x18x8xf32, #tpu.memory_space<vmem>>, vector<2x16x16x8xf32>
    %68 = vector.shape_cast %67 : vector<2x16x16x8xf32> to vector<512x8xf32>
    %c0_88 = arith.constant 0 : index
    %c8_89 = arith.constant 8 : index
    %69 = vector.load %arg10[%c0_88, %c8_89] : memref<512x72xf32, #tpu.memory_space<vmem>>, vector<512x8xf32>
    tpu.vector_store %arg10[%c0_88, %c8_89], %68 {strides = array<i32>} : memref<512x72xf32, #tpu.memory_space<vmem>>, vector<512x8xf32>,
    %c0_90 = arith.constant 0 : index
    %c0_91 = arith.constant 0 : index
    %c2_92 = arith.constant 2 : index
    %c0_93 = arith.constant 0 : index
    %70 = vector.load %arg9[%c0_90, %c0_91, %c2_92, %c0_93] : memref<2x18x18x8xf32, #tpu.memory_space<vmem>>, vector<2x16x16x8xf32>
    %71 = vector.shape_cast %70 : vector<2x16x16x8xf32> to vector<512x8xf32>
    %c0_94 = arith.constant 0 : index
    %c16_95 = arith.constant 16 : index
    %72 = vector.load %arg10[%c0_94, %c16_95] : memref<512x72xf32, #tpu.memory_space<vmem>>, vector<512x8xf32>
    tpu.vector_store %arg10[%c0_94, %c16_95], %71 {strides = array<i32>} : memref<512x72xf32, #tpu.memory_space<vmem>>, vector<512x8xf32>,
    %c0_96 = arith.constant 0 : index
    %c1_97 = arith.constant 1 : index
    %c0_98 = arith.constant 0 : index
    %c0_99 = arith.constant 0 : index
    %73 = vector.load %arg9[%c0_96, %c1_97, %c0_98, %c0_99] : memref<2x18x18x8xf32, #tpu.memory_space<vmem>>, vector<2x16x16x8xf32>
    %74 = vector.shape_cast %73 : vector<2x16x16x8xf32> to vector<512x8xf32>
    %c0_100 = arith.constant 0 : index
    %c24_101 = arith.constant 24 : index
    %75 = vector.load %arg10[%c0_100, %c24_101] : memref<512x72xf32, #tpu.memory_space<vmem>>, vector<512x8xf32>
    tpu.vector_store %arg10[%c0_100, %c24_101], %74 {strides = array<i32>} : memref<512x72xf32, #tpu.memory_space<vmem>>, vector<512x8xf32>,
    %c0_102 = arith.constant 0 : index
    %c1_103 = arith.constant 1 : index
    %c1_104 = arith.constant 1 : index
    %c0_105 = arith.constant 0 : index
    %76 = vector.load %arg9[%c0_102, %c1_103, %c1_104, %c0_105] : memref<2x18x18x8xf32, #tpu.memory_space<vmem>>, vector<2x16x16x8xf32>
    %77 = vector.shape_cast %76 : vector<2x16x16x8xf32> to vector<512x8xf32>
    %c0_106 = arith.constant 0 : index
    %c32_107 = arith.constant 32 : index
    %78 = vector.load %arg10[%c0_106, %c32_107] : memref<512x72xf32, #tpu.memory_space<vmem>>, vector<512x8xf32>
    tpu.vector_store %arg10[%c0_106, %c32_107], %77 {strides = array<i32>} : memref<512x72xf32, #tpu.memory_space<vmem>>, vector<512x8xf32>,
    %c0_108 = arith.constant 0 : index
    %c1_109 = arith.constant 1 : index
    %c2_110 = arith.constant 2 : index
    %c0_111 = arith.constant 0 : index
    %79 = vector.load %arg9[%c0_108, %c1_109, %c2_110, %c0_111] : memref<2x18x18x8xf32, #tpu.memory_space<vmem>>, vector<2x16x16x8xf32>
    %80 = vector.shape_cast %79 : vector<2x16x16x8xf32> to vector<512x8xf32>
    %c0_112 = arith.constant 0 : index
    %c40 = arith.constant 40 : index
    %81 = vector.load %arg10[%c0_112, %c40] : memref<512x72xf32, #tpu.memory_space<vmem>>, vector<512x8xf32>
    tpu.vector_store %arg10[%c0_112, %c40], %80 {strides = array<i32>} : memref<512x72xf32, #tpu.memory_space<vmem>>, vector<512x8xf32>,
    %c0_113 = arith.constant 0 : index
    %c2_114 = arith.constant 2 : index
    %c0_115 = arith.constant 0 : index
    %c0_116 = arith.constant 0 : index
    %82 = vector.load %arg9[%c0_113, %c2_114, %c0_115, %c0_116] : memref<2x18x18x8xf32, #tpu.memory_space<vmem>>, vector<2x16x16x8xf32>
    %83 = vector.shape_cast %82 : vector<2x16x16x8xf32> to vector<512x8xf32>
    %c0_117 = arith.constant 0 : index
    %c48 = arith.constant 48 : index
    %84 = vector.load %arg10[%c0_117, %c48] : memref<512x72xf32, #tpu.memory_space<vmem>>, vector<512x8xf32>
    tpu.vector_store %arg10[%c0_117, %c48], %83 {strides = array<i32>} : memref<512x72xf32, #tpu.memory_space<vmem>>, vector<512x8xf32>,
    %c0_118 = arith.constant 0 : index
    %c2_119 = arith.constant 2 : index
    %c1_120 = arith.constant 1 : index
    %c0_121 = arith.constant 0 : index
    %85 = vector.load %arg9[%c0_118, %c2_119, %c1_120, %c0_121] : memref<2x18x18x8xf32, #tpu.memory_space<vmem>>, vector<2x16x16x8xf32>
    %86 = vector.shape_cast %85 : vector<2x16x16x8xf32> to vector<512x8xf32>
    %c0_122 = arith.constant 0 : index
    %c56 = arith.constant 56 : index
    %87 = vector.load %arg10[%c0_122, %c56] : memref<512x72xf32, #tpu.memory_space<vmem>>, vector<512x8xf32>
    tpu.vector_store %arg10[%c0_122, %c56], %86 {strides = array<i32>} : memref<512x72xf32, #tpu.memory_space<vmem>>, vector<512x8xf32>,
    %c0_123 = arith.constant 0 : index
    %c2_124 = arith.constant 2 : index
    %c2_125 = arith.constant 2 : index
    %c0_126 = arith.constant 0 : index
    %88 = vector.load %arg9[%c0_123, %c2_124, %c2_125, %c0_126] : memref<2x18x18x8xf32, #tpu.memory_space<vmem>>, vector<2x16x16x8xf32>
    %89 = vector.shape_cast %88 : vector<2x16x16x8xf32> to vector<512x8xf32>
    %c0_127 = arith.constant 0 : index
    %c64 = arith.constant 64 : index
    %90 = vector.load %arg10[%c0_127, %c64] : memref<512x72xf32, #tpu.memory_space<vmem>>, vector<512x8xf32>
    tpu.vector_store %arg10[%c0_127, %c64], %89 {strides = array<i32>} : memref<512x72xf32, #tpu.memory_space<vmem>>, vector<512x8xf32>,
    %c0_128 = arith.constant 0 : index
    %c0_129 = arith.constant 0 : index
    %91 = vector.load %arg10[%c0_128, %c0_129] : memref<512x72xf32, #tpu.memory_space<vmem>>, vector<512x72xf32>
    %c0_130 = arith.constant 0 : index
    %c0_131 = arith.constant 0 : index
    %92 = vector.load %arg4[%c0_130, %c0_131] : memref<72x4xf32, #tpu.memory_space<vmem>>, vector<72x4xf32>
    %cst_132 = arith.constant dense<0.000000e+00> : vector<512x4xf32>
    %93 = tpu.matmul %91, %92, %cst_132 {dimension_numbers = #tpu.dot_dimension_numbers<[1], [0], [0], [1], [0, 0, 1, 1], [], []>} : vector<512x72xf32>, vector<72x4xf32>, vector<512x4xf32> -> vector<512x4xf32>
    %cst_133 = arith.constant dense<0.000000e+00> : vector<4xf32>
    %94 = vector.multi_reduction <add>, %93, %cst_133 [0] : vector<512x4xf32> to vector<4xf32>
    %95 = vector.shape_cast %94 : vector<4xf32> to vector<1x4xf32>
    %96 = arith.mulf %93, %93 : vector<512x4xf32>
    %cst_134 = arith.constant dense<0.000000e+00> : vector<4xf32>
    %97 = vector.multi_reduction <add>, %96, %cst_134 [0] : vector<512x4xf32> to vector<4xf32>
    %98 = vector.shape_cast %97 : vector<4xf32> to vector<1x4xf32>
    %cst_135 = arith.constant 0.001953125 : f32
    %99 = vector.broadcast %cst_135 : f32 to vector<1x4xf32>
    %100 = arith.mulf %95, %99 : vector<1x4xf32>
    %cst_136 = arith.constant 0.001953125 : f32
    %101 = vector.broadcast %cst_136 : f32 to vector<1x4xf32>
    %102 = arith.mulf %98, %101 : vector<1x4xf32>
    %103 = arith.mulf %100, %100 : vector<1x4xf32>
    %104 = arith.subf %102, %103 : vector<1x4xf32>
    %105 = vector.broadcast %100 : vector<1x4xf32> to vector<512x4xf32>
    %106 = arith.subf %93, %105 : vector<512x4xf32>
    %cst_137 = arith.constant 9.99999974E-6 : f32
    %107 = vector.broadcast %cst_137 : f32 to vector<1x4xf32>
    %108 = arith.addf %104, %107 : vector<1x4xf32>
    %109 = math.rsqrt %108 : vector<1x4xf32>
    %110 = vector.broadcast %109 : vector<1x4xf32> to vector<512x4xf32>
    %111 = arith.mulf %106, %110 : vector<512x4xf32>
    %c0_138 = arith.constant 0 : index
    %c0_139 = arith.constant 0 : index
    %112 = vector.load %arg5[%c0_138, %c0_139] : memref<1x4xf32, #tpu.memory_space<vmem>>, vector<1x4xf32>
    %113 = vector.broadcast %112 : vector<1x4xf32> to vector<512x4xf32>
    %114 = arith.mulf %111, %113 : vector<512x4xf32>
    %c0_140 = arith.constant 0 : index
    %c0_141 = arith.constant 0 : index
    %115 = vector.load %arg6[%c0_140, %c0_141] : memref<1x4xf32, #tpu.memory_space<vmem>>, vector<1x4xf32>
    %116 = vector.broadcast %115 : vector<1x4xf32> to vector<512x4xf32>
    %117 = arith.addf %114, %116 : vector<512x4xf32>
    %c0_142 = arith.constant 0 : index
    %c1_143 = arith.constant 1 : index
    %c1_144 = arith.constant 1 : index
    %c0_145 = arith.constant 0 : index
    %118 = vector.load %arg0[%c0_142, %c1_143, %c1_144, %c0_145] : memref<2x18x18x4xf32, #tpu.memory_space<vmem>>, vector<2x16x16x4xf32>
    %119 = vector.shape_cast %118 : vector<2x16x16x4xf32> to vector<512x4xf32>
    %120 = arith.addf %117, %119 : vector<512x4xf32>
    %cst_146 = arith.constant 0.000000e+00 : f32
    %121 = vector.broadcast %cst_146 : f32 to vector<512x4xf32>
    %122 = arith.maximumf %120, %121 : vector<512x4xf32>
    %123 = vector.shape_cast %122 : vector<512x4xf32> to vector<2x16x16x4xf32>
    %c0_147 = arith.constant 0 : index
    %c0_148 = arith.constant 0 : index
    %c0_149 = arith.constant 0 : index
    %c0_150 = arith.constant 0 : index
    %124 = vector.load %arg7[%c0_147, %c0_148, %c0_149, %c0_150] : memref<2x16x16x4xf32, #tpu.memory_space<vmem>>, vector<2x16x16x4xf32>
    tpu.vector_store %arg7[%c0_147, %c0_148, %c0_149, %c0_150], %123 {strides = array<i32>} : memref<2x16x16x4xf32, #tpu.memory_space<vmem>>, vector<2x16x16x4xf32>,
    return
  }
}

</mosaic_0001>

<bundles_post_ra>
// kernel: tpu_custom_call.1
= control target key start
LH: loop header
LB: loop body
LE: loop exit
PB: predicated region body
PF: predicated region fallthrough
CT: control target
= control target key end

     0   :  { %s10423_s28 = smov 4   ;;  %vm90_vm0 = vcmask 31744   ;;  %vm475_vm1 = vcmask 64544   ;;  %s10424_s20 = smov 8   ;;  %vm860_vm2 = vcmask 97344   ;;  %vm1246_vm3 = vcmask 130144   ;;  %s18996_s0 = inlined_call_operand.vmem [shape: f32[2,18,18,4], index: 0, kind: input, shape index: {}]   ;;  %s18997_s1 = inlined_call_operand.vmem [shape: f32[36,8], index: 1, kind: input, shape index: {}]   ;;  %s18998_s2 = inlined_call_operand.vmem [shape: f32[1,8], index: 2, kind: input, shape index: {}]   ;;  %s18999_s3 = inlined_call_operand.vmem [shape: f32[1,8], index: 3, kind: input, shape index: {}]   ;;  %s19000_s4 = inlined_call_operand.vmem [shape: f32[72,4], index: 4, kind: input, shape index: {}]   ;;  %s19001_s5 = inlined_call_operand.vmem [shape: f32[1,4], index: 5, kind: input, shape index: {}]   ;;  %s19002_s6 = inlined_call_operand.vmem [shape: f32[1,4], index: 6, kind: input, shape index: {}]   ;;  %s19003_s7 = inlined_call_operand.vmem [shape: f32[2,16,16,4], index: 7, kind: output, shape index: {}]  }
   0x1   :  { %v155_v0 = vld [vmem:[%s18996_s0 + $0x1] sm:$0xff]  ;;  %v157_v1 = vld [vmem:[%s18996_s0 + $0x19] sm:$0xff]  ;;  %v156_v2 = vld [vmem:[%s18996_s0 + $0x9] sm:$0xff]  ;;  %s10425_s12 = smov 12   ;;  %s10426_s25 = smov 16   ;;  %vm1631_vm4 = vcmask 162944  }
   0x2   :  { %283 = vrot.lane.b32.xlu0 %v155_v0, %s10423_s28  ;;  %287 = vrot.lane.b32.xlu1 %v157_v1, %s10423_s28  ;;  %v158_v3 = vld [vmem:[%s18996_s0 + $0x21] sm:$0xff]  ;;  %v159_v4 = vld [vmem:[%s18996_s0 + $0x31] sm:$0xff]  ;;  %s10427_s29 = smov 20   ;;  %vm2016_vm5 = vcmask 195744   ;;  %s10428_s15 = smov 24   ;;  %vm2402_vm6 = vcmask 228544  }
   0x3   :  { %v160_v5 = vld [vmem:[%s18996_s0 + $0x39] sm:$0xff]  ;;  %v161_v6 = vld [vmem:[%s18996_s0 + $0x49] sm:$0xff]  ;;  %v162_v7 = vld [vmem:[%s18996_s0 + $0x51] sm:$0xff]  ;;  %s10429_s23 = smov 28   ;;  %vm2787_vm7 = vcmask 261344   ;;  %vm3499_vm8 = vcmask 1043456  }
   0x4   :  { %v163_v8 = vld [vmem:[%s18996_s0 + $0x61] sm:$0xff]  ;;  %v164_v9 = vld [vmem:[%s18996_s0 + $0x69] sm:$0xff]  ;;  %v165_v10 = vld [vmem:[%s18996_s0 + $0x79] sm:$0xff]  ;;  %s10430_s8 = smov 32   ;;  %vm3172_vm9 = vcmask 294144   ;;  %vm3306_vm10 = vcmask 293888  }
   0x5   :  { %v166_v11 = vld [vmem:[%s18996_s0 + $0x81] sm:$0xff]  ;;  %v10530_v13 = vld [vmem:[%s18996_s0 + $0x18] sm:$0xff]  ;;  %v10555_v18 = vld [vmem:[%s18996_s0 + $0x30] sm:$0xff]  ;;  %vm3888_vm11 = vcmask 64512   ;;  %vm4561_vm12 = vcmask 58368   ;;  %vm4574_vm13 = vcmask 57344  }
   0x6   :  { %285 = vrot.lane.b32.xlu0 %v156_v2, %s10423_s28  ;;  %289 = vrot.lane.b32.xlu1 %v158_v3, %s10423_s28  ;;  %v26_v12 = vld [vmem:[%s18996_s0] sm:$0xff]  ;;  %v167_v14 = vld [vmem:[%s18996_s0 + $0x91] sm:$0xff]  ;;  %93 = vst.msk [vmem:[#allocation2 + $0x10] sm:$0xff] %vm90_vm0, %v10530_v13  ;;  %95 = vst.msk [vmem:[#allocation2 + $0x20] sm:$0xff] %vm90_vm0, %v10555_v18  ;;  %vm5151_vm14 = vcmask 130112   ;;  %vm5536_vm15 = vcmask 195712  }
   0x7   :  { %v168_v15 = vld [vmem:[%s18996_s0 + $0x99] sm:$0xff]  ;;  %91 = vst.msk [vmem:[#allocation2] sm:$0xff] %vm90_vm0, %v26_v12  ;;  %v27_v16 = vld [vmem:[%s18996_s0 + $0x8] sm:$0xff]  ;;  %v170_v22 = vld [vmem:[%s18996_s0 + $0xb1] sm:$0xff]  ;;  %s10433_s19 = smov 48   ;;  %s10435_s11 = smov 64  }
   0x8   :  { %92 = vst.msk [vmem:[#allocation2 + $0x8] sm:$0xff] %vm90_vm0, %v27_v16  ;;  %v10548_v17 = vld [vmem:[%s18996_s0 + $0x20] sm:$0xff]  ;;  %v10560_v19 = vld [vmem:[%s18996_s0 + $0x38] sm:$0xff]  ;;  %v10571_v20 = vld [vmem:[%s18996_s0 + $0x48] sm:$0xff] }
   0x9   :  { %94 = vst.msk [vmem:[#allocation2 + $0x18] sm:$0xff] %vm90_vm0, %v10548_v17  ;;  %96 = vst.msk [vmem:[#allocation2 + $0x28] sm:$0xff] %vm90_vm0, %v10560_v19  ;;  %v169_v21 = vld [vmem:[%s18996_s0 + $0xa9] sm:$0xff]  ;;  %v10591_v24 = vld [vmem:[%s18996_s0 + $0x60] sm:$0xff] }
   0xa   :  { %291 = vrot.lane.b32.xlu0 %v159_v4, %s10423_s28  ;;  %293 = vrot.lane.b32.xlu1 %v160_v5, %s10423_s28  ;;  %97 = vst.msk [vmem:[#allocation2 + $0x30] sm:$0xff] %vm90_vm0, %v10571_v20  ;;  %v10584_v23 = vld [vmem:[%s18996_s0 + $0x50] sm:$0xff]  ;;  %v10596_v25 = vld [vmem:[%s18996_s0 + $0x68] sm:$0xff]  ;;  %99 = vst.msk [vmem:[#allocation2 + $0x40] sm:$0xff] %vm90_vm0, %v10591_v24 }
   0xb   :  { %98 = vst.msk [vmem:[#allocation2 + $0x38] sm:$0xff] %vm90_vm0, %v10584_v23  ;;  %100 = vst.msk [vmem:[#allocation2 + $0x48] sm:$0xff] %vm90_vm0, %v10596_v25  ;;  %v10605_v26 = vld [vmem:[%s18996_s0 + $0x78] sm:$0xff]  ;;  %v10610_v27 = vld [vmem:[%s18996_s0 + $0x80] sm:$0xff] }
   0xc   :  { %v171_v28 = vld [vmem:[%s18996_s0 + $0xc1] sm:$0xff]  ;;  %101 = vst.msk [vmem:[#allocation2 + $0x50] sm:$0xff] %vm90_vm0, %v10605_v26  ;;  %102 = vst.msk [vmem:[#allocation2 + $0x58] sm:$0xff] %vm90_vm0, %v10610_v27  ;;  %v172_v29 = vld [vmem:[%s18996_s0 + $0xc9] sm:$0xff] }
   0xd   :  { %v10627_v30 = vld [vmem:[%s18996_s0 + $0x90] sm:$0xff]  ;;  %v10632_v31 = vld [vmem:[%s18996_s0 + $0x98] sm:$0xff]  ;;  %v10641_v32 = vld [vmem:[%s18996_s0 + $0xa8] sm:$0xff] }
   0xe   :  { %295 = vrot.lane.b32.xlu0 %v161_v6, %s10423_s28  ;;  %297 = vrot.lane.b32.xlu1 %v162_v7, %s10423_s28  ;;  %103 = vst.msk [vmem:[#allocation2 + $0x60] sm:$0xff] %vm90_vm0, %v10627_v30  ;;  %104 = vst.msk [vmem:[#allocation2 + $0x68] sm:$0xff] %vm90_vm0, %v10632_v31  ;;  %v10646_v33 = vld [vmem:[%s18996_s0 + $0xb0] sm:$0xff]  ;;  %v10655_v34 = vld [vmem:[%s18996_s0 + $0xc0] sm:$0xff] }
   0xf   :  { %105 = vst.msk [vmem:[#allocation2 + $0x70] sm:$0xff] %vm90_vm0, %v10641_v32  ;;  %106 = vst.msk [vmem:[#allocation2 + $0x78] sm:$0xff] %vm90_vm0, %v10646_v33  ;;  %v173_v35 = vld [vmem:[%s18996_s0 + $0xd9] sm:$0xff]  ;;  %v10667_v36 = vld [vmem:[%s18996_s0 + $0xc8] sm:$0xff] }
  0x10   :  { %107 = vst.msk [vmem:[#allocation2 + $0x80] sm:$0xff] %vm90_vm0, %v10655_v34  ;;  %v174_v37 = vld [vmem:[%s18996_s0 + $0xe1] sm:$0xff]  ;;  %108 = vst.msk [vmem:[#allocation2 + $0x88] sm:$0xff] %vm90_vm0, %v10667_v36  ;;  %v10677_v38 = vld [vmem:[%s18996_s0 + $0xd8] sm:$0xff] }
  0x11   :  { %v10682_v39 = vld [vmem:[%s18996_s0 + $0xe0] sm:$0xff]  ;;  %109 = vst.msk [vmem:[#allocation2 + $0x90] sm:$0xff] %vm90_vm0, %v10677_v38  ;;  %v10691_v40 = vld [vmem:[%s18996_s0 + $0xf0] sm:$0xff]  ;;  %v10698_v41 = vld [vmem:[%s18996_s0 + $0xf8] sm:$0xff] }
  0x12   :  { %299 = vrot.lane.b32.xlu0 %v163_v8, %s10423_s28  ;;  %301 = vrot.lane.b32.xlu1 %v164_v9, %s10423_s28  ;;  %110 = vst.msk [vmem:[#allocation2 + $0x98] sm:$0xff] %vm90_vm0, %v10682_v39  ;;  %111 = vst.msk [vmem:[#allocation2 + $0xa0] sm:$0xff] %vm90_vm0, %v10691_v40  ;;  %v10707_v42 = vld [vmem:[%s18996_s0 + $0x108] sm:$0xff]  ;;  %v10712_v43 = vld [vmem:[%s18996_s0 + $0x110] sm:$0xff] }
  0x13   :  { %112 = vst.msk [vmem:[#allocation2 + $0xa8] sm:$0xff] %vm90_vm0, %v10698_v41  ;;  %v175_v44 = vld [vmem:[%s18996_s0 + $0xf1] sm:$0xff]  ;;  %v176_v45 = vld [vmem:[%s18996_s0 + $0xf9] sm:$0xff]  ;;  %113 = vst.msk [vmem:[#allocation2 + $0xb0] sm:$0xff] %vm90_vm0, %v10707_v42 }
  0x14   :  { %114 = vst.msk [vmem:[#allocation2 + $0xb8] sm:$0xff] %vm90_vm0, %v10712_v43  ;;  %v10727_v46 = vld [vmem:[%s18996_s0 + $0x120] sm:$0xff]  ;;  %v10734_v47 = vld [vmem:[%s18996_s0 + $0x128] sm:$0xff]  ;;  %v10741_v48 = vld [vmem:[%s18996_s0 + $0x138] sm:$0xff] }
  0x15   :  { %115 = vst.msk [vmem:[#allocation2 + $0xc0] sm:$0xff] %vm90_vm0, %v10727_v46  ;;  %116 = vst.msk [vmem:[#allocation2 + $0xc8] sm:$0xff] %vm90_vm0, %v10734_v47  ;;  %v10746_v49 = vld [vmem:[%s18996_s0 + $0x140] sm:$0xff]  ;;  %v177_v50 = vld [vmem:[%s18996_s0 + $0x109] sm:$0xff] }
  0x16   :  { %303 = vrot.lane.b32.xlu0 %v165_v10, %s10423_s28  ;;  %305 = vrot.lane.b32.xlu1 %v166_v11, %s10423_s28  ;;  %117 = vst.msk [vmem:[#allocation2 + $0xd0] sm:$0xff] %vm90_vm0, %v10741_v48  ;;  %118 = vst.msk [vmem:[#allocation2 + $0xd8] sm:$0xff] %vm90_vm0, %v10746_v49  ;;  %v178_v51 = vld [vmem:[%s18996_s0 + $0x111] sm:$0xff]  ;;  %v179_v54 = vld [vmem:[%s18996_s0 + $0x121] sm:$0xff] }
  0x17   :  { %v10763_v52 = vld [vmem:[%s18996_s0 + $0x150] sm:$0xff]  ;;  %v10770_v53 = vld [vmem:[%s18996_s0 + $0x158] sm:$0xff]  ;;  %v10785_v56 = vld [vmem:[%s18996_s0 + $0x168] sm:$0xff] }
  0x18   :  { %119 = vst.msk [vmem:[#allocation2 + $0xe0] sm:$0xff] %vm90_vm0, %v10763_v52  ;;  %120 = vst.msk [vmem:[#allocation2 + $0xe8] sm:$0xff] %vm90_vm0, %v10770_v53  ;;  %v180_v55 = vld [vmem:[%s18996_s0 + $0x129] sm:$0xff]  ;;  %v181_v58 = vld [vmem:[%s18996_s0 + $0x139] sm:$0xff] }
  0x19   :  { %121 = vst.msk [vmem:[#allocation2 + $0xf0] sm:$0xff] %vm90_vm0, %v10785_v56  ;;  %v10792_v57 = vld [vmem:[%s18996_s0 + $0x170] sm:$0xff]  ;;  %v182_v59 = vld [vmem:[%s18996_s0 + $0x141] sm:$0xff]  ;;  %v59_v61 = vld [vmem:[%s18996_s0 + $0x1b8] sm:$0xff] }
  0x1a   :  { %307 = vrot.lane.b32.xlu0 %v167_v14, %s10423_s28  ;;  %309 = vrot.lane.b32.xlu1 %v168_v15, %s10423_s28  ;;  %122 = vst.msk [vmem:[#allocation2 + $0xf8] sm:$0xff] %vm90_vm0, %v10792_v57  ;;  %v58_v60 = vld [vmem:[%s18996_s0 + $0x1b0] sm:$0xff]  ;;  %124 = vst.msk [vmem:[#allocation2 + $0x108] sm:$0xff] %vm90_vm0, %v59_v61  ;;  %v184_v63 = vld [vmem:[%s18996_s0 + $0x159] sm:$0xff] }
  0x1b   :  { %123 = vst.msk [vmem:[#allocation2 + $0x100] sm:$0xff] %vm90_vm0, %v58_v60  ;;  %v183_v62 = vld [vmem:[%s18996_s0 + $0x151] sm:$0xff]  ;;  %v10823_v0 = vld [vmem:[%s18996_s0 + $0x1c8] sm:$0xff]  ;;  %v10845_v4 = vld [vmem:[%s18996_s0 + $0x1e0] sm:$0xff] }
  0x1c   :  { %125 = vst.msk [vmem:[#allocation2 + $0x110] sm:$0xff] %vm90_vm0, %v10823_v0  ;;  %v10830_v1 = vld [vmem:[%s18996_s0 + $0x1d0] sm:$0xff]  ;;  %127 = vst.msk [vmem:[#allocation2 + $0x120] sm:$0xff] %vm90_vm0, %v10845_v4  ;;  %v10852_v5 = vld [vmem:[%s18996_s0 + $0x1e8] sm:$0xff] }
  0x1d   :  { %126 = vst.msk [vmem:[#allocation2 + $0x118] sm:$0xff] %vm90_vm0, %v10830_v1  ;;  %v185_v2 = vld [vmem:[%s18996_s0 + $0x169] sm:$0xff]  ;;  %v186_v3 = vld [vmem:[%s18996_s0 + $0x171] sm:$0xff]  ;;  %128 = vst.msk [vmem:[#allocation2 + $0x128] sm:$0xff] %vm90_vm0, %v10852_v5 }
  0x1e   :  { %311 = vrot.lane.b32.xlu0 %v169_v21, %s10423_s28  ;;  %313 = vrot.lane.b32.xlu1 %v170_v22, %s10423_s28  ;;  %v187_v6 = vld [vmem:[%s18996_s0 + $0x1b1] sm:$0xff]  ;;  %v188_v7 = vld [vmem:[%s18996_s0 + $0x1b9] sm:$0xff] }
  0x1f   :  { %v10867_v8 = vld [vmem:[%s18996_s0 + $0x1f8] sm:$0xff]  ;;  %v10874_v9 = vld [vmem:[%s18996_s0 + $0x200] sm:$0xff]  ;;  %v189_v10 = vld [vmem:[%s18996_s0 + $0x1c9] sm:$0xff] }
  0x20   :  { %129 = vst.msk [vmem:[#allocation2 + $0x130] sm:$0xff] %vm90_vm0, %v10867_v8  ;;  %130 = vst.msk [vmem:[#allocation2 + $0x138] sm:$0xff] %vm90_vm0, %v10874_v9  ;;  %v190_v11 = vld [vmem:[%s18996_s0 + $0x1d1] sm:$0xff]  ;;  %v191_v15 = vld [vmem:[%s18996_s0 + $0x1e1] sm:$0xff] }
  0x21   :  { %v10889_v12 = vld [vmem:[%s18996_s0 + $0x210] sm:$0xff]  ;;  %v10896_v14 = vld [vmem:[%s18996_s0 + $0x218] sm:$0xff]  ;;  %v10911_v21 = vld [vmem:[%s18996_s0 + $0x228] sm:$0xff] }
  0x22   :  { %315 = vrot.lane.b32.xlu0 %v171_v28, %s10423_s28  ;;  %317 = vrot.lane.b32.xlu1 %v172_v29, %s10423_s28  ;;  %131 = vst.msk [vmem:[#allocation2 + $0x140] sm:$0xff] %vm90_vm0, %v10889_v12  ;;  %132 = vst.msk [vmem:[#allocation2 + $0x148] sm:$0xff] %vm90_vm0, %v10896_v14  ;;  %v192_v16 = vld [vmem:[%s18996_s0 + $0x1e9] sm:$0xff]  ;;  %v193_v28 = vld [vmem:[%s18996_s0 + $0x1f9] sm:$0xff] }
  0x23   :  { %133 = vst.msk [vmem:[#allocation2 + $0x150] sm:$0xff] %vm90_vm0, %v10911_v21  ;;  %v10918_v22 = vld [vmem:[%s18996_s0 + $0x230] sm:$0xff]  ;;  %v194_v29 = vld [vmem:[%s18996_s0 + $0x201] sm:$0xff] }
  0x24   :  { %134 = vst.msk [vmem:[#allocation2 + $0x158] sm:$0xff] %vm90_vm0, %v10918_v22  ;;  %v199_v60 = vld [vmem:[%s18996_s0 + $0x241] sm:$0xff]  ;;  %v200_v61 = vld [vmem:[%s18996_s0 + $0x249] sm:$0xff] }
  0x26   :  { %319 = vrot.lane.b32.xlu0 %v173_v35, %s10423_s28  ;;  %321 = vrot.lane.b32.xlu1 %v174_v37, %s10423_s28  ;;  %v10933_v35 = vld [vmem:[%s18996_s0 + $0x240] sm:$0xff]  ;;  %v10940_v37 = vld [vmem:[%s18996_s0 + $0x248] sm:$0xff] }
  0x27   :  { %135 = vst.msk [vmem:[#allocation2 + $0x160] sm:$0xff] %vm90_vm0, %v10933_v35  ;;  %136 = vst.msk [vmem:[#allocation2 + $0x168] sm:$0xff] %vm90_vm0, %v10940_v37 }
  0x2a   :  { %323 = vrot.lane.b32.xlu0 %v175_v44, %s10423_s28  ;;  %325 = vrot.lane.b32.xlu1 %v176_v45, %s10423_s28  ;;  %v195_v44 = vld [vmem:[%s18996_s0 + $0x211] sm:$0xff]  ;;  %v196_v45 = vld [vmem:[%s18996_s0 + $0x219] sm:$0xff] }
  0x2e   :  { %327 = vrot.lane.b32.xlu0 %v177_v50, %s10423_s28  ;;  %329 = vrot.lane.b32.xlu1 %v178_v51, %s10423_s28  ;;  %v10955_v50 = vld [vmem:[%s18996_s0 + $0x258] sm:$0xff]  ;;  %v10962_v51 = vld [vmem:[%s18996_s0 + $0x260] sm:$0xff] }
  0x2f   :  { %137 = vst.msk [vmem:[#allocation2 + $0x170] sm:$0xff] %vm90_vm0, %v10955_v50  ;;  %138 = vst.msk [vmem:[#allocation2 + $0x178] sm:$0xff] %vm90_vm0, %v10962_v51 }
  0x32   :  { %331 = vrot.lane.b32.xlu0 %v179_v54, %s10423_s28  ;;  %333 = vrot.lane.b32.xlu1 %v180_v55, %s10423_s28  ;;  %v197_v54 = vld [vmem:[%s18996_s0 + $0x229] sm:$0xff]  ;;  %v198_v55 = vld [vmem:[%s18996_s0 + $0x231] sm:$0xff] }
  0x36   :  { %335 = vrot.lane.b32.xlu0 %v181_v58, %s10423_s28  ;;  %337 = vrot.lane.b32.xlu1 %v182_v59, %s10423_s28  ;;  %v10977_v58 = vld [vmem:[%s18996_s0 + $0x270] sm:$0xff]  ;;  %v10984_v59 = vld [vmem:[%s18996_s0 + $0x278] sm:$0xff] }
  0x37   :  { %139 = vst.msk [vmem:[#allocation2 + $0x180] sm:$0xff] %vm90_vm0, %v10977_v58  ;;  %140 = vst.msk [vmem:[#allocation2 + $0x188] sm:$0xff] %vm90_vm0, %v10984_v59 }
  0x3a   :  { %339 = vrot.lane.b32.xlu0 %v183_v62, %s10423_s28  ;;  %341 = vrot.lane.b32.xlu1 %v184_v63, %s10423_s28  ;;  %v10999_v62 = vld [vmem:[%s18996_s0 + $0x288] sm:$0xff]  ;;  %v11006_v63 = vld [vmem:[%s18996_s0 + $0x290] sm:$0xff] }
  0x3b   :  { %141 = vst.msk [vmem:[#allocation2 + $0x190] sm:$0xff] %vm90_vm0, %v10999_v62  ;;  %142 = vst.msk [vmem:[#allocation2 + $0x198] sm:$0xff] %vm90_vm0, %v11006_v63 }
  0x3e   :  { %343 = vrot.lane.b32.xlu0 %v185_v2, %s10423_s28  ;;  %345 = vrot.lane.b32.xlu1 %v186_v3, %s10423_s28  ;;  %v201_v2 = vld [vmem:[%s18996_s0 + $0x259] sm:$0xff]  ;;  %v202_v3 = vld [vmem:[%s18996_s0 + $0x261] sm:$0xff] }
  0x42   :  { %347 = vrot.lane.b32.xlu0 %v187_v6, %s10423_s28  ;;  %349 = vrot.lane.b32.xlu1 %v188_v7, %s10423_s28  ;;  %v11021_v6 = vld [vmem:[%s18996_s0 + $0x2a0] sm:$0xff]  ;;  %v11028_v7 = vld [vmem:[%s18996_s0 + $0x2a8] sm:$0xff] }
  0x43   :  { %143 = vst.msk [vmem:[#allocation2 + $0x1a0] sm:$0xff] %vm90_vm0, %v11021_v6  ;;  %144 = vst.msk [vmem:[#allocation2 + $0x1a8] sm:$0xff] %vm90_vm0, %v11028_v7 }
  0x46   :  { %351 = vrot.lane.b32.xlu0 %v189_v10, %s10423_s28  ;;  %353 = vrot.lane.b32.xlu1 %v190_v11, %s10423_s28  ;;  %v203_v10 = vld [vmem:[%s18996_s0 + $0x271] sm:$0xff]  ;;  %v204_v11 = vld [vmem:[%s18996_s0 + $0x279] sm:$0xff] }
  0x4a   :  { %355 = vrot.lane.b32.xlu0 %v191_v15, %s10423_s28  ;;  %357 = vrot.lane.b32.xlu1 %v192_v16, %s10423_s28  ;;  %v11043_v15 = vld [vmem:[%s18996_s0 + $0x2b8] sm:$0xff]  ;;  %v11050_v16 = vld [vmem:[%s18996_s0 + $0x2c0] sm:$0xff] }
  0x4b   :  { %145 = vst.msk [vmem:[#allocation2 + $0x1b0] sm:$0xff] %vm90_vm0, %v11043_v15  ;;  %146 = vst.msk [vmem:[#allocation2 + $0x1b8] sm:$0xff] %vm90_vm0, %v11050_v16 }
  0x4e   :  { %359 = vrot.lane.b32.xlu0 %v193_v28, %s10423_s28  ;;  %361 = vrot.lane.b32.xlu1 %v194_v29, %s10423_s28  ;;  %v205_v28 = vld [vmem:[%s18996_s0 + $0x289] sm:$0xff]  ;;  %v206_v29 = vld [vmem:[%s18996_s0 + $0x291] sm:$0xff] }
  0x52   :  { %363 = vrot.lane.b32.xlu0 %v195_v44, %s10423_s28  ;;  %365 = vrot.lane.b32.xlu1 %v196_v45, %s10423_s28  ;;  %v11065_v44 = vld [vmem:[%s18996_s0 + $0x2d0] sm:$0xff]  ;;  %v11072_v45 = vld [vmem:[%s18996_s0 + $0x2d8] sm:$0xff] }
  0x53   :  { %147 = vst.msk [vmem:[#allocation2 + $0x1c0] sm:$0xff] %vm90_vm0, %v11065_v44  ;;  %148 = vst.msk [vmem:[#allocation2 + $0x1c8] sm:$0xff] %vm90_vm0, %v11072_v45 }
  0x56   :  { %367 = vrot.lane.b32.xlu0 %v197_v54, %s10423_s28  ;;  %369 = vrot.lane.b32.xlu1 %v198_v55, %s10423_s28  ;;  %v207_v54 = vld [vmem:[%s18996_s0 + $0x2a1] sm:$0xff]  ;;  %v208_v55 = vld [vmem:[%s18996_s0 + $0x2a9] sm:$0xff] }
  0x5a   :  { %371 = vrot.lane.b32.xlu0 %v199_v60, %s10423_s28  ;;  %373 = vrot.lane.b32.xlu1 %v200_v61, %s10423_s28  ;;  %v11087_v60 = vld [vmem:[%s18996_s0 + $0x2e8] sm:$0xff]  ;;  %v11094_v61 = vld [vmem:[%s18996_s0 + $0x2f0] sm:$0xff] }
  0x5b   :  { %149 = vst.msk [vmem:[#allocation2 + $0x1d0] sm:$0xff] %vm90_vm0, %v11087_v60  ;;  %150 = vst.msk [vmem:[#allocation2 + $0x1d8] sm:$0xff] %vm90_vm0, %v11094_v61 }
  0x5e   :  { %375 = vrot.lane.b32.xlu0 %v201_v2, %s10423_s28  ;;  %377 = vrot.lane.b32.xlu1 %v202_v3, %s10423_s28  ;;  %v209_v2 = vld [vmem:[%s18996_s0 + $0x2b9] sm:$0xff]  ;;  %v210_v3 = vld [vmem:[%s18996_s0 + $0x2c1] sm:$0xff] }
  0x62   :  { %379 = vrot.lane.b32.xlu0 %v203_v10, %s10423_s28  ;;  %381 = vrot.lane.b32.xlu1 %v204_v11, %s10423_s28  ;;  %v11109_v10 = vld [vmem:[%s18996_s0 + $0x300] sm:$0xff]  ;;  %v11116_v11 = vld [vmem:[%s18996_s0 + $0x308] sm:$0xff] }
  0x63   :  { %19109 = vst [vmem:[#allocation5_spill] sm:$0xff] %v11109_v10  ;;  %151 = vst.msk [vmem:[#allocation2 + $0x1e0] sm:$0xff] %vm90_vm0, %v11109_v10 }
  0x64   :  { %19110 = vst [vmem:[#allocation6_spill] sm:$0xff] %v11116_v11  ;;  %152 = vst.msk [vmem:[#allocation2 + $0x1e8] sm:$0xff] %vm90_vm0, %v11116_v11 }
  0x66   :  { %383 = vrot.lane.b32.xlu0 %v205_v28, %s10423_s28  ;;  %385 = vrot.lane.b32.xlu1 %v206_v29, %s10423_s28  ;;  %v211_v28 = vld [vmem:[%s18996_s0 + $0x2d1] sm:$0xff]  ;;  %v212_v29 = vld [vmem:[%s18996_s0 + $0x2d9] sm:$0xff] }
  0x6a   :  { %387 = vrot.lane.b32.xlu0 %v207_v54, %s10423_s28  ;;  %389 = vrot.lane.b32.xlu1 %v208_v55, %s10423_s28  ;;  %v11131_v54 = vld [vmem:[%s18996_s0 + $0x318] sm:$0xff]  ;;  %v11138_v55 = vld [vmem:[%s18996_s0 + $0x320] sm:$0xff] }
  0x6b   :  { %19111 = vst [vmem:[#allocation7_spill] sm:$0xff] %v11131_v54  ;;  %153 = vst.msk [vmem:[#allocation2 + $0x1f0] sm:$0xff] %vm90_vm0, %v11131_v54 }
  0x6c   :  { %19112 = vst [vmem:[#allocation8_spill] sm:$0xff] %v11138_v55  ;;  %154 = vst.msk [vmem:[#allocation2 + $0x1f8] sm:$0xff] %vm90_vm0, %v11138_v55 }
  0x6e   :  { %391 = vrot.lane.b32.xlu0 %v209_v2, %s10423_s28  ;;  %393 = vrot.lane.b32.xlu1 %v210_v3, %s10423_s28  ;;  %v213_v2 = vld [vmem:[%s18996_s0 + $0x2e9] sm:$0xff]  ;;  %v214_v3 = vld [vmem:[%s18996_s0 + $0x2f1] sm:$0xff] }
  0x72   :  { %395 = vrot.lane.b32.xlu0 %v211_v28, %s10423_s28  ;;  %397 = vrot.lane.b32.xlu1 %v212_v29, %s10423_s28  ;;  %v215_v28 = vld [vmem:[%s18996_s0 + $0x301] sm:$0xff]  ;;  %v216_v29 = vld [vmem:[%s18996_s0 + $0x309] sm:$0xff] }
  0x74   :  { %v284_v54 = vpop.permute.xlu0 %283  ;;  %v288_v11 = vpop.permute.xlu1 %287 }
  0x75   :  { %476 = vst.msk [vmem:[#allocation2] sm:$0xff] %vm475_vm1, %v284_v54  ;;  %478 = vst.msk [vmem:[#allocation2 + $0x10] sm:$0xff] %vm475_vm1, %v288_v11  ;;  %v217_v11 = vld [vmem:[%s18996_s0 + $0x319] sm:$0xff]  ;;  %v218_v54 = vld [vmem:[%s18996_s0 + $0x321] sm:$0xff] }
  0x76   :  { %399 = vrot.lane.b32.xlu0 %v213_v2, %s10423_s28  ;;  %401 = vrot.lane.b32.xlu1 %v214_v3, %s10423_s28 }
  0x78   :  { %v286_v55 = vpop.permute.xlu0 %285  ;;  %v290_v10 = vpop.permute.xlu1 %289 }
  0x79   :  { %477 = vst.msk [vmem:[#allocation2 + $0x8] sm:$0xff] %vm475_vm1, %v286_v55  ;;  %479 = vst.msk [vmem:[#allocation2 + $0x18] sm:$0xff] %vm475_vm1, %v290_v10  ;;  %v540_v10 = vld [vmem:[%s18996_s0 + $0x2] sm:$0xff]  ;;  %v541_v55 = vld [vmem:[%s18996_s0 + $0xa] sm:$0xff] }
  0x7a   :  { %403 = vrot.lane.b32.xlu0 %v215_v28, %s10423_s28  ;;  %405 = vrot.lane.b32.xlu1 %v216_v29, %s10423_s28 }
  0x7c   :  { %v292_v2 = vpop.permute.xlu0 %291  ;;  %v294_v3 = vpop.permute.xlu1 %293 }
  0x7d   :  { %480 = vst.msk [vmem:[#allocation2 + $0x20] sm:$0xff] %vm475_vm1, %v292_v2  ;;  %481 = vst.msk [vmem:[#allocation2 + $0x28] sm:$0xff] %vm475_vm1, %v294_v3 }
  0x7e   :  { %407 = vrot.lane.b32.xlu0 %v217_v11, %s10423_s28  ;;  %409 = vrot.lane.b32.xlu1 %v218_v54, %s10423_s28  ;;  %v542_v11 = vld [vmem:[%s18996_s0 + $0x1a] sm:$0xff]  ;;  %v543_v54 = vld [vmem:[%s18996_s0 + $0x22] sm:$0xff] }
  0x80   :  { %v296_v28 = vpop.permute.xlu0 %295  ;;  %v298_v29 = vpop.permute.xlu1 %297 }
  0x81   :  { %482 = vst.msk [vmem:[#allocation2 + $0x30] sm:$0xff] %vm475_vm1, %v296_v28  ;;  %483 = vst.msk [vmem:[#allocation2 + $0x38] sm:$0xff] %vm475_vm1, %v298_v29 }
  0x82   :  { %668 = vrot.lane.b32.xlu0 %v540_v10, %s10424_s20  ;;  %670 = vrot.lane.b32.xlu1 %v541_v55, %s10424_s20  ;;  %v544_v10 = vld [vmem:[%s18996_s0 + $0x32] sm:$0xff]  ;;  %v545_v55 = vld [vmem:[%s18996_s0 + $0x3a] sm:$0xff] }
  0x84   :  { %v300_v2 = vpop.permute.xlu0 %299  ;;  %v302_v3 = vpop.permute.xlu1 %301 }
  0x85   :  { %484 = vst.msk [vmem:[#allocation2 + $0x40] sm:$0xff] %vm475_vm1, %v300_v2  ;;  %485 = vst.msk [vmem:[#allocation2 + $0x48] sm:$0xff] %vm475_vm1, %v302_v3 }
  0x86   :  { %672 = vrot.lane.b32.xlu0 %v542_v11, %s10424_s20  ;;  %674 = vrot.lane.b32.xlu1 %v543_v54, %s10424_s20  ;;  %v546_v11 = vld [vmem:[%s18996_s0 + $0x4a] sm:$0xff]  ;;  %v547_v54 = vld [vmem:[%s18996_s0 + $0x52] sm:$0xff] }
  0x88   :  { %v304_v28 = vpop.permute.xlu0 %303  ;;  %v306_v29 = vpop.permute.xlu1 %305 }
  0x89   :  { %486 = vst.msk [vmem:[#allocation2 + $0x50] sm:$0xff] %vm475_vm1, %v304_v28  ;;  %487 = vst.msk [vmem:[#allocation2 + $0x58] sm:$0xff] %vm475_vm1, %v306_v29 }
  0x8a   :  { %676 = vrot.lane.b32.xlu0 %v544_v10, %s10424_s20  ;;  %678 = vrot.lane.b32.xlu1 %v545_v55, %s10424_s20  ;;  %v548_v10 = vld [vmem:[%s18996_s0 + $0x62] sm:$0xff]  ;;  %v549_v55 = vld [vmem:[%s18996_s0 + $0x6a] sm:$0xff] }
  0x8c   :  { %v308_v2 = vpop.permute.xlu0 %307  ;;  %v310_v3 = vpop.permute.xlu1 %309 }
  0x8d   :  { %488 = vst.msk [vmem:[#allocation2 + $0x60] sm:$0xff] %vm475_vm1, %v308_v2  ;;  %489 = vst.msk [vmem:[#allocation2 + $0x68] sm:$0xff] %vm475_vm1, %v310_v3 }
  0x8e   :  { %680 = vrot.lane.b32.xlu0 %v546_v11, %s10424_s20  ;;  %682 = vrot.lane.b32.xlu1 %v547_v54, %s10424_s20  ;;  %v550_v11 = vld [vmem:[%s18996_s0 + $0x7a] sm:$0xff]  ;;  %v551_v54 = vld [vmem:[%s18996_s0 + $0x82] sm:$0xff] }
  0x90   :  { %v312_v28 = vpop.permute.xlu0 %311  ;;  %v314_v29 = vpop.permute.xlu1 %313 }
  0x91   :  { %490 = vst.msk [vmem:[#allocation2 + $0x70] sm:$0xff] %vm475_vm1, %v312_v28  ;;  %491 = vst.msk [vmem:[#allocation2 + $0x78] sm:$0xff] %vm475_vm1, %v314_v29 }
  0x92   :  { %684 = vrot.lane.b32.xlu0 %v548_v10, %s10424_s20  ;;  %686 = vrot.lane.b32.xlu1 %v549_v55, %s10424_s20  ;;  %v552_v10 = vld [vmem:[%s18996_s0 + $0x92] sm:$0xff]  ;;  %v553_v55 = vld [vmem:[%s18996_s0 + $0x9a] sm:$0xff] }
  0x94   :  { %v316_v2 = vpop.permute.xlu0 %315  ;;  %v318_v3 = vpop.permute.xlu1 %317 }
  0x95   :  { %492 = vst.msk [vmem:[#allocation2 + $0x80] sm:$0xff] %vm475_vm1, %v316_v2  ;;  %493 = vst.msk [vmem:[#allocation2 + $0x88] sm:$0xff] %vm475_vm1, %v318_v3 }
  0x96   :  { %688 = vrot.lane.b32.xlu0 %v550_v11, %s10424_s20  ;;  %690 = vrot.lane.b32.xlu1 %v551_v54, %s10424_s20  ;;  %v554_v11 = vld [vmem:[%s18996_s0 + $0xaa] sm:$0xff]  ;;  %v555_v54 = vld [vmem:[%s18996_s0 + $0xb2] sm:$0xff] }
  0x98   :  { %v320_v28 = vpop.permute.xlu0 %319  ;;  %v322_v29 = vpop.permute.xlu1 %321 }
  0x99   :  { %494 = vst.msk [vmem:[#allocation2 + $0x90] sm:$0xff] %vm475_vm1, %v320_v28  ;;  %495 = vst.msk [vmem:[#allocation2 + $0x98] sm:$0xff] %vm475_vm1, %v322_v29 }
  0x9a   :  { %692 = vrot.lane.b32.xlu0 %v552_v10, %s10424_s20  ;;  %694 = vrot.lane.b32.xlu1 %v553_v55, %s10424_s20  ;;  %v556_v10 = vld [vmem:[%s18996_s0 + $0xc2] sm:$0xff]  ;;  %v557_v55 = vld [vmem:[%s18996_s0 + $0xca] sm:$0xff] }
  0x9c   :  { %v324_v2 = vpop.permute.xlu0 %323  ;;  %v326_v3 = vpop.permute.xlu1 %325 }
  0x9d   :  { %496 = vst.msk [vmem:[#allocation2 + $0xa0] sm:$0xff] %vm475_vm1, %v324_v2  ;;  %497 = vst.msk [vmem:[#allocation2 + $0xa8] sm:$0xff] %vm475_vm1, %v326_v3 }
  0x9e   :  { %696 = vrot.lane.b32.xlu0 %v554_v11, %s10424_s20  ;;  %698 = vrot.lane.b32.xlu1 %v555_v54, %s10424_s20  ;;  %v558_v11 = vld [vmem:[%s18996_s0 + $0xda] sm:$0xff]  ;;  %v559_v54 = vld [vmem:[%s18996_s0 + $0xe2] sm:$0xff] }
  0xa0   :  { %v328_v28 = vpop.permute.xlu0 %327  ;;  %v330_v29 = vpop.permute.xlu1 %329 }
  0xa1   :  { %498 = vst.msk [vmem:[#allocation2 + $0xb0] sm:$0xff] %vm475_vm1, %v328_v28  ;;  %499 = vst.msk [vmem:[#allocation2 + $0xb8] sm:$0xff] %vm475_vm1, %v330_v29 }
  0xa2   :  { %700 = vrot.lane.b32.xlu0 %v556_v10, %s10424_s20  ;;  %702 = vrot.lane.b32.xlu1 %v557_v55, %s10424_s20  ;;  %v560_v10 = vld [vmem:[%s18996_s0 + $0xf2] sm:$0xff]  ;;  %v561_v55 = vld [vmem:[%s18996_s0 + $0xfa] sm:$0xff] }
  0xa4   :  { %v332_v2 = vpop.permute.xlu0 %331  ;;  %v334_v3 = vpop.permute.xlu1 %333 }
  0xa5   :  { %500 = vst.msk [vmem:[#allocation2 + $0xc0] sm:$0xff] %vm475_vm1, %v332_v2  ;;  %501 = vst.msk [vmem:[#allocation2 + $0xc8] sm:$0xff] %vm475_vm1, %v334_v3 }
  0xa6   :  { %704 = vrot.lane.b32.xlu0 %v558_v11, %s10424_s20  ;;  %706 = vrot.lane.b32.xlu1 %v559_v54, %s10424_s20  ;;  %v562_v11 = vld [vmem:[%s18996_s0 + $0x10a] sm:$0xff]  ;;  %v563_v54 = vld [vmem:[%s18996_s0 + $0x112] sm:$0xff] }
  0xa8   :  { %v336_v28 = vpop.permute.xlu0 %335  ;;  %v338_v29 = vpop.permute.xlu1 %337 }
  0xa9   :  { %502 = vst.msk [vmem:[#allocation2 + $0xd0] sm:$0xff] %vm475_vm1, %v336_v28  ;;  %503 = vst.msk [vmem:[#allocation2 + $0xd8] sm:$0xff] %vm475_vm1, %v338_v29 }
  0xaa   :  { %708 = vrot.lane.b32.xlu0 %v560_v10, %s10424_s20  ;;  %710 = vrot.lane.b32.xlu1 %v561_v55, %s10424_s20  ;;  %v564_v10 = vld [vmem:[%s18996_s0 + $0x122] sm:$0xff]  ;;  %v565_v55 = vld [vmem:[%s18996_s0 + $0x12a] sm:$0xff] }
  0xac   :  { %v340_v2 = vpop.permute.xlu0 %339  ;;  %v342_v3 = vpop.permute.xlu1 %341 }
  0xad   :  { %504 = vst.msk [vmem:[#allocation2 + $0xe0] sm:$0xff] %vm475_vm1, %v340_v2  ;;  %505 = vst.msk [vmem:[#allocation2 + $0xe8] sm:$0xff] %vm475_vm1, %v342_v3 }
  0xae   :  { %712 = vrot.lane.b32.xlu0 %v562_v11, %s10424_s20  ;;  %714 = vrot.lane.b32.xlu1 %v563_v54, %s10424_s20  ;;  %v566_v11 = vld [vmem:[%s18996_s0 + $0x13a] sm:$0xff]  ;;  %v567_v54 = vld [vmem:[%s18996_s0 + $0x142] sm:$0xff] }
  0xb0   :  { %v344_v28 = vpop.permute.xlu0 %343  ;;  %v346_v29 = vpop.permute.xlu1 %345 }
  0xb1   :  { %506 = vst.msk [vmem:[#allocation2 + $0xf0] sm:$0xff] %vm475_vm1, %v344_v28  ;;  %507 = vst.msk [vmem:[#allocation2 + $0xf8] sm:$0xff] %vm475_vm1, %v346_v29 }
  0xb2   :  { %716 = vrot.lane.b32.xlu0 %v564_v10, %s10424_s20  ;;  %718 = vrot.lane.b32.xlu1 %v565_v55, %s10424_s20  ;;  %v568_v10 = vld [vmem:[%s18996_s0 + $0x152] sm:$0xff]  ;;  %v569_v55 = vld [vmem:[%s18996_s0 + $0x15a] sm:$0xff] }
  0xb4   :  { %v348_v2 = vpop.permute.xlu0 %347  ;;  %v350_v3 = vpop.permute.xlu1 %349 }
  0xb5   :  { %508 = vst.msk [vmem:[#allocation2 + $0x100] sm:$0xff] %vm475_vm1, %v348_v2  ;;  %509 = vst.msk [vmem:[#allocation2 + $0x108] sm:$0xff] %vm475_vm1, %v350_v3 }
  0xb6   :  { %720 = vrot.lane.b32.xlu0 %v566_v11, %s10424_s20  ;;  %722 = vrot.lane.b32.xlu1 %v567_v54, %s10424_s20  ;;  %v570_v11 = vld [vmem:[%s18996_s0 + $0x16a] sm:$0xff]  ;;  %v571_v54 = vld [vmem:[%s18996_s0 + $0x172] sm:$0xff] }
  0xb8   :  { %v352_v28 = vpop.permute.xlu0 %351  ;;  %v354_v29 = vpop.permute.xlu1 %353 }
  0xb9   :  { %510 = vst.msk [vmem:[#allocation2 + $0x110] sm:$0xff] %vm475_vm1, %v352_v28  ;;  %511 = vst.msk [vmem:[#allocation2 + $0x118] sm:$0xff] %vm475_vm1, %v354_v29 }
  0xba   :  { %724 = vrot.lane.b32.xlu0 %v568_v10, %s10424_s20  ;;  %726 = vrot.lane.b32.xlu1 %v569_v55, %s10424_s20  ;;  %v572_v10 = vld [vmem:[%s18996_s0 + $0x1b2] sm:$0xff]  ;;  %v573_v55 = vld [vmem:[%s18996_s0 + $0x1ba] sm:$0xff] }
  0xbc   :  { %v356_v2 = vpop.permute.xlu0 %355  ;;  %v358_v3 = vpop.permute.xlu1 %357 }
  0xbd   :  { %512 = vst.msk [vmem:[#allocation2 + $0x120] sm:$0xff] %vm475_vm1, %v356_v2  ;;  %513 = vst.msk [vmem:[#allocation2 + $0x128] sm:$0xff] %vm475_vm1, %v358_v3 }
  0xbe   :  { %728 = vrot.lane.b32.xlu0 %v570_v11, %s10424_s20  ;;  %730 = vrot.lane.b32.xlu1 %v571_v54, %s10424_s20  ;;  %v574_v11 = vld [vmem:[%s18996_s0 + $0x1ca] sm:$0xff]  ;;  %v575_v54 = vld [vmem:[%s18996_s0 + $0x1d2] sm:$0xff] }
  0xc0   :  { %v360_v28 = vpop.permute.xlu0 %359  ;;  %v362_v29 = vpop.permute.xlu1 %361 }
  0xc1   :  { %514 = vst.msk [vmem:[#allocation2 + $0x130] sm:$0xff] %vm475_vm1, %v360_v28  ;;  %515 = vst.msk [vmem:[#allocation2 + $0x138] sm:$0xff] %vm475_vm1, %v362_v29 }
  0xc2   :  { %732 = vrot.lane.b32.xlu0 %v572_v10, %s10424_s20  ;;  %734 = vrot.lane.b32.xlu1 %v573_v55, %s10424_s20  ;;  %v576_v10 = vld [vmem:[%s18996_s0 + $0x1e2] sm:$0xff]  ;;  %v577_v55 = vld [vmem:[%s18996_s0 + $0x1ea] sm:$0xff] }
  0xc4   :  { %v364_v2 = vpop.permute.xlu0 %363  ;;  %v366_v3 = vpop.permute.xlu1 %365 }
  0xc5   :  { %516 = vst.msk [vmem:[#allocation2 + $0x140] sm:$0xff] %vm475_vm1, %v364_v2  ;;  %517 = vst.msk [vmem:[#allocation2 + $0x148] sm:$0xff] %vm475_vm1, %v366_v3 }
  0xc6   :  { %736 = vrot.lane.b32.xlu0 %v574_v11, %s10424_s20  ;;  %738 = vrot.lane.b32.xlu1 %v575_v54, %s10424_s20  ;;  %v578_v11 = vld [vmem:[%s18996_s0 + $0x1fa] sm:$0xff]  ;;  %v579_v54 = vld [vmem:[%s18996_s0 + $0x202] sm:$0xff] }
  0xc8   :  { %v368_v28 = vpop.permute.xlu0 %367  ;;  %v370_v29 = vpop.permute.xlu1 %369 }
  0xc9   :  { %518 = vst.msk [vmem:[#allocation2 + $0x150] sm:$0xff] %vm475_vm1, %v368_v28  ;;  %519 = vst.msk [vmem:[#allocation2 + $0x158] sm:$0xff] %vm475_vm1, %v370_v29 }
  0xca   :  { %740 = vrot.lane.b32.xlu0 %v576_v10, %s10424_s20  ;;  %742 = vrot.lane.b32.xlu1 %v577_v55, %s10424_s20  ;;  %v580_v10 = vld [vmem:[%s18996_s0 + $0x212] sm:$0xff]  ;;  %v581_v55 = vld [vmem:[%s18996_s0 + $0x21a] sm:$0xff] }
  0xcc   :  { %v372_v2 = vpop.permute.xlu0 %371  ;;  %v374_v3 = vpop.permute.xlu1 %373 }
  0xcd   :  { %520 = vst.msk [vmem:[#allocation2 + $0x160] sm:$0xff] %vm475_vm1, %v372_v2  ;;  %521 = vst.msk [vmem:[#allocation2 + $0x168] sm:$0xff] %vm475_vm1, %v374_v3 }
  0xce   :  { %744 = vrot.lane.b32.xlu0 %v578_v11, %s10424_s20  ;;  %746 = vrot.lane.b32.xlu1 %v579_v54, %s10424_s20  ;;  %v582_v11 = vld [vmem:[%s18996_s0 + $0x22a] sm:$0xff]  ;;  %v583_v54 = vld [vmem:[%s18996_s0 + $0x232] sm:$0xff] }
  0xd0   :  { %v376_v28 = vpop.permute.xlu0 %375  ;;  %v378_v29 = vpop.permute.xlu1 %377 }
  0xd1   :  { %522 = vst.msk [vmem:[#allocation2 + $0x170] sm:$0xff] %vm475_vm1, %v376_v28  ;;  %523 = vst.msk [vmem:[#allocation2 + $0x178] sm:$0xff] %vm475_vm1, %v378_v29 }
  0xd2   :  { %748 = vrot.lane.b32.xlu0 %v580_v10, %s10424_s20  ;;  %750 = vrot.lane.b32.xlu1 %v581_v55, %s10424_s20  ;;  %v584_v10 = vld [vmem:[%s18996_s0 + $0x242] sm:$0xff]  ;;  %v585_v55 = vld [vmem:[%s18996_s0 + $0x24a] sm:$0xff] }
  0xd4   :  { %v380_v2 = vpop.permute.xlu0 %379  ;;  %v382_v3 = vpop.permute.xlu1 %381 }
  0xd5   :  { %524 = vst.msk [vmem:[#allocation2 + $0x180] sm:$0xff] %vm475_vm1, %v380_v2  ;;  %525 = vst.msk [vmem:[#allocation2 + $0x188] sm:$0xff] %vm475_vm1, %v382_v3 }
  0xd6   :  { %752 = vrot.lane.b32.xlu0 %v582_v11, %s10424_s20  ;;  %754 = vrot.lane.b32.xlu1 %v583_v54, %s10424_s20  ;;  %v586_v11 = vld [vmem:[%s18996_s0 + $0x25a] sm:$0xff]  ;;  %v587_v54 = vld [vmem:[%s18996_s0 + $0x262] sm:$0xff] }
  0xd8   :  { %v384_v28 = vpop.permute.xlu0 %383  ;;  %v386_v29 = vpop.permute.xlu1 %385 }
  0xd9   :  { %526 = vst.msk [vmem:[#allocation2 + $0x190] sm:$0xff] %vm475_vm1, %v384_v28  ;;  %527 = vst.msk [vmem:[#allocation2 + $0x198] sm:$0xff] %vm475_vm1, %v386_v29 }
  0xda   :  { %756 = vrot.lane.b32.xlu0 %v584_v10, %s10424_s20  ;;  %758 = vrot.lane.b32.xlu1 %v585_v55, %s10424_s20  ;;  %v588_v10 = vld [vmem:[%s18996_s0 + $0x272] sm:$0xff]  ;;  %v589_v55 = vld [vmem:[%s18996_s0 + $0x27a] sm:$0xff] }
  0xdc   :  { %v388_v2 = vpop.permute.xlu0 %387  ;;  %v390_v3 = vpop.permute.xlu1 %389 }
  0xdd   :  { %528 = vst.msk [vmem:[#allocation2 + $0x1a0] sm:$0xff] %vm475_vm1, %v388_v2  ;;  %529 = vst.msk [vmem:[#allocation2 + $0x1a8] sm:$0xff] %vm475_vm1, %v390_v3 }
  0xde   :  { %760 = vrot.lane.b32.xlu0 %v586_v11, %s10424_s20  ;;  %762 = vrot.lane.b32.xlu1 %v587_v54, %s10424_s20  ;;  %v590_v11 = vld [vmem:[%s18996_s0 + $0x28a] sm:$0xff]  ;;  %v591_v54 = vld [vmem:[%s18996_s0 + $0x292] sm:$0xff] }
  0xe0   :  { %v392_v28 = vpop.permute.xlu0 %391  ;;  %v394_v29 = vpop.permute.xlu1 %393 }
  0xe1   :  { %530 = vst.msk [vmem:[#allocation2 + $0x1b0] sm:$0xff] %vm475_vm1, %v392_v28  ;;  %531 = vst.msk [vmem:[#allocation2 + $0x1b8] sm:$0xff] %vm475_vm1, %v394_v29 }
  0xe2   :  { %764 = vrot.lane.b32.xlu0 %v588_v10, %s10424_s20  ;;  %766 = vrot.lane.b32.xlu1 %v589_v55, %s10424_s20  ;;  %v592_v10 = vld [vmem:[%s18996_s0 + $0x2a2] sm:$0xff]  ;;  %v593_v55 = vld [vmem:[%s18996_s0 + $0x2aa] sm:$0xff] }
  0xe4   :  { %v396_v2 = vpop.permute.xlu0 %395  ;;  %v398_v3 = vpop.permute.xlu1 %397 }
  0xe5   :  { %532 = vst.msk [vmem:[#allocation2 + $0x1c0] sm:$0xff] %vm475_vm1, %v396_v2  ;;  %533 = vst.msk [vmem:[#allocation2 + $0x1c8] sm:$0xff] %vm475_vm1, %v398_v3 }
  0xe6   :  { %768 = vrot.lane.b32.xlu0 %v590_v11, %s10424_s20  ;;  %770 = vrot.lane.b32.xlu1 %v591_v54, %s10424_s20  ;;  %v594_v11 = vld [vmem:[%s18996_s0 + $0x2ba] sm:$0xff]  ;;  %v595_v54 = vld [vmem:[%s18996_s0 + $0x2c2] sm:$0xff] }
  0xe8   :  { %v400_v28 = vpop.permute.xlu0 %399  ;;  %v402_v29 = vpop.permute.xlu1 %401 }
  0xe9   :  { %534 = vst.msk [vmem:[#allocation2 + $0x1d0] sm:$0xff] %vm475_vm1, %v400_v28  ;;  %535 = vst.msk [vmem:[#allocation2 + $0x1d8] sm:$0xff] %vm475_vm1, %v402_v29 }
  0xea   :  { %772 = vrot.lane.b32.xlu0 %v592_v10, %s10424_s20  ;;  %774 = vrot.lane.b32.xlu1 %v593_v55, %s10424_s20  ;;  %v596_v10 = vld [vmem:[%s18996_s0 + $0x2d2] sm:$0xff]  ;;  %v597_v55 = vld [vmem:[%s18996_s0 + $0x2da] sm:$0xff] }
  0xec   :  { %v404_v2 = vpop.permute.xlu0 %403  ;;  %v406_v3 = vpop.permute.xlu1 %405 }
  0xed   :  { %536 = vst.msk [vmem:[#allocation2 + $0x1e0] sm:$0xff] %vm475_vm1, %v404_v2  ;;  %537 = vst.msk [vmem:[#allocation2 + $0x1e8] sm:$0xff] %vm475_vm1, %v406_v3 }
  0xee   :  { %776 = vrot.lane.b32.xlu0 %v594_v11, %s10424_s20  ;;  %778 = vrot.lane.b32.xlu1 %v595_v54, %s10424_s20  ;;  %v598_v11 = vld [vmem:[%s18996_s0 + $0x2ea] sm:$0xff]  ;;  %v599_v54 = vld [vmem:[%s18996_s0 + $0x2f2] sm:$0xff] }
  0xf0   :  { %v408_v28 = vpop.permute.xlu0 %407  ;;  %v410_v29 = vpop.permute.xlu1 %409 }
  0xf1   :  { %538 = vst.msk [vmem:[#allocation2 + $0x1f0] sm:$0xff] %vm475_vm1, %v408_v28  ;;  %539 = vst.msk [vmem:[#allocation2 + $0x1f8] sm:$0xff] %vm475_vm1, %v410_v29  ;;  %vm5921_vm1 = vcmask 261312  }
  0xf2   :  { %780 = vrot.lane.b32.xlu0 %v596_v10, %s10424_s20  ;;  %782 = vrot.lane.b32.xlu1 %v597_v55, %s10424_s20  ;;  %v600_v10 = vld [vmem:[%s18996_s0 + $0x302] sm:$0xff]  ;;  %v601_v55 = vld [vmem:[%s18996_s0 + $0x30a] sm:$0xff] }
  0xf4   :  { %v669_v2 = vpop.permute.xlu0 %668  ;;  %v671_v3 = vpop.permute.xlu1 %670 }
  0xf5   :  { %861 = vst.msk [vmem:[#allocation2] sm:$0xff] %vm860_vm2, %v669_v2  ;;  %862 = vst.msk [vmem:[#allocation2 + $0x8] sm:$0xff] %vm860_vm2, %v671_v3 }
  0xf6   :  { %784 = vrot.lane.b32.xlu0 %v598_v11, %s10424_s20  ;;  %786 = vrot.lane.b32.xlu1 %v599_v54, %s10424_s20  ;;  %v602_v11 = vld [vmem:[%s18996_s0 + $0x31a] sm:$0xff]  ;;  %v603_v54 = vld [vmem:[%s18996_s0 + $0x322] sm:$0xff] }
  0xf8   :  { %v673_v28 = vpop.permute.xlu0 %672  ;;  %v675_v29 = vpop.permute.xlu1 %674 }
  0xf9   :  { %863 = vst.msk [vmem:[#allocation2 + $0x10] sm:$0xff] %vm860_vm2, %v673_v28  ;;  %864 = vst.msk [vmem:[#allocation2 + $0x18] sm:$0xff] %vm860_vm2, %v675_v29 }
  0xfa   :  { %788 = vrot.lane.b32.xlu0 %v600_v10, %s10424_s20  ;;  %790 = vrot.lane.b32.xlu1 %v601_v55, %s10424_s20 }
  0xfc   :  { %v677_v2 = vpop.permute.xlu0 %676  ;;  %v679_v3 = vpop.permute.xlu1 %678 }
  0xfd   :  { %865 = vst.msk [vmem:[#allocation2 + $0x20] sm:$0xff] %vm860_vm2, %v677_v2  ;;  %866 = vst.msk [vmem:[#allocation2 + $0x28] sm:$0xff] %vm860_vm2, %v679_v3 }
  0xfe   :  { %792 = vrot.lane.b32.xlu0 %v602_v11, %s10424_s20  ;;  %794 = vrot.lane.b32.xlu1 %v603_v54, %s10424_s20 }
 0x100   :  { %v681_v10 = vpop.permute.xlu0 %680  ;;  %v683_v55 = vpop.permute.xlu1 %682 }
 0x101   :  { %867 = vst.msk [vmem:[#allocation2 + $0x30] sm:$0xff] %vm860_vm2, %v681_v10  ;;  %868 = vst.msk [vmem:[#allocation2 + $0x38] sm:$0xff] %vm860_vm2, %v683_v55 }
 0x102   :  { %1054 = vrot.lane.b32.xlu0 %v10530_v13, %s10425_s12  ;;  %1056 = vrot.lane.b32.xlu1 %v10548_v17, %s10425_s12 }
 0x104   :  { %v685_v28 = vpop.permute.xlu0 %684  ;;  %v687_v29 = vpop.permute.xlu1 %686 }
 0x105   :  { %869 = vst.msk [vmem:[#allocation2 + $0x40] sm:$0xff] %vm860_vm2, %v685_v28  ;;  %870 = vst.msk [vmem:[#allocation2 + $0x48] sm:$0xff] %vm860_vm2, %v687_v29 }
 0x106   :  { %1058 = vrot.lane.b32.xlu0 %v10555_v18, %s10425_s12  ;;  %1060 = vrot.lane.b32.xlu1 %v10560_v19, %s10425_s12 }
 0x108   :  { %v689_v11 = vpop.permute.xlu0 %688  ;;  %v691_v54 = vpop.permute.xlu1 %690 }
 0x109   :  { %871 = vst.msk [vmem:[#allocation2 + $0x50] sm:$0xff] %vm860_vm2, %v689_v11  ;;  %872 = vst.msk [vmem:[#allocation2 + $0x58] sm:$0xff] %vm860_vm2, %v691_v54  ;;  %v9491_v11 = vld [vmem:[%s18996_s0 + $0x330] sm:$0xff]  ;;  %v9492_v54 = vld [vmem:[%s18996_s0 + $0x338] sm:$0xff] }
 0x10a   :  { %1062 = vrot.lane.b32.xlu0 %v10571_v20, %s10425_s12  ;;  %1064 = vrot.lane.b32.xlu1 %v10584_v23, %s10425_s12 }
 0x10c   :  { %v693_v13 = vpop.permute.xlu0 %692  ;;  %v695_v17 = vpop.permute.xlu1 %694 }
 0x10d   :  { %873 = vst.msk [vmem:[#allocation2 + $0x60] sm:$0xff] %vm860_vm2, %v693_v13  ;;  %874 = vst.msk [vmem:[#allocation2 + $0x68] sm:$0xff] %vm860_vm2, %v695_v17 }
 0x10e   :  { %1066 = vrot.lane.b32.xlu0 %v10591_v24, %s10425_s12  ;;  %1068 = vrot.lane.b32.xlu1 %v10596_v25, %s10425_s12 }
 0x110   :  { %v697_v18 = vpop.permute.xlu0 %696  ;;  %v699_v19 = vpop.permute.xlu1 %698 }
 0x111   :  { %875 = vst.msk [vmem:[#allocation2 + $0x70] sm:$0xff] %vm860_vm2, %v697_v18  ;;  %876 = vst.msk [vmem:[#allocation2 + $0x78] sm:$0xff] %vm860_vm2, %v699_v19  ;;  %v9493_v18 = vld [vmem:[%s18996_s0 + $0x19] sm:$0xff]  ;;  %v9494_v19 = vld [vmem:[%s18996_s0 + $0x21] sm:$0xff] }
 0x112   :  { %1070 = vrot.lane.b32.xlu0 %v10605_v26, %s10425_s12  ;;  %1072 = vrot.lane.b32.xlu1 %v10610_v27, %s10425_s12 }
 0x114   :  { %v701_v20 = vpop.permute.xlu0 %700  ;;  %v703_v23 = vpop.permute.xlu1 %702 }
 0x115   :  { %877 = vst.msk [vmem:[#allocation2 + $0x80] sm:$0xff] %vm860_vm2, %v701_v20  ;;  %878 = vst.msk [vmem:[#allocation2 + $0x88] sm:$0xff] %vm860_vm2, %v703_v23 }
 0x116   :  { %1074 = vrot.lane.b32.xlu0 %v10627_v30, %s10425_s12  ;;  %1076 = vrot.lane.b32.xlu1 %v10632_v31, %s10425_s12 }
 0x118   :  { %v705_v24 = vpop.permute.xlu0 %704  ;;  %v707_v25 = vpop.permute.xlu1 %706 }
 0x119   :  { %879 = vst.msk [vmem:[#allocation2 + $0x90] sm:$0xff] %vm860_vm2, %v705_v24  ;;  %880 = vst.msk [vmem:[#allocation2 + $0x98] sm:$0xff] %vm860_vm2, %v707_v25  ;;  %v9495_v24 = vld [vmem:[%s18996_s0 + $0x31] sm:$0xff]  ;;  %v9496_v25 = vld [vmem:[%s18996_s0 + $0x39] sm:$0xff] }
 0x11a   :  { %1078 = vrot.lane.b32.xlu0 %v10641_v32, %s10425_s12  ;;  %1080 = vrot.lane.b32.xlu1 %v10646_v33, %s10425_s12 }
 0x11c   :  { %v709_v26 = vpop.permute.xlu0 %708  ;;  %v711_v27 = vpop.permute.xlu1 %710 }
 0x11d   :  { %881 = vst.msk [vmem:[#allocation2 + $0xa0] sm:$0xff] %vm860_vm2, %v709_v26  ;;  %882 = vst.msk [vmem:[#allocation2 + $0xa8] sm:$0xff] %vm860_vm2, %v711_v27 }
 0x11e   :  { %1082 = vrot.lane.b32.xlu0 %v10655_v34, %s10425_s12  ;;  %1084 = vrot.lane.b32.xlu1 %v10667_v36, %s10425_s12 }
 0x120   :  { %v713_v30 = vpop.permute.xlu0 %712  ;;  %v715_v31 = vpop.permute.xlu1 %714 }
 0x121   :  { %883 = vst.msk [vmem:[#allocation2 + $0xb0] sm:$0xff] %vm860_vm2, %v713_v30  ;;  %884 = vst.msk [vmem:[#allocation2 + $0xb8] sm:$0xff] %vm860_vm2, %v715_v31  ;;  %v9497_v30 = vld [vmem:[%s18996_s0 + $0x49] sm:$0xff]  ;;  %v9498_v31 = vld [vmem:[%s18996_s0 + $0x51] sm:$0xff] }
 0x122   :  { %1086 = vrot.lane.b32.xlu0 %v10677_v38, %s10425_s12  ;;  %1088 = vrot.lane.b32.xlu1 %v10682_v39, %s10425_s12 }
 0x124   :  { %v717_v32 = vpop.permute.xlu0 %716  ;;  %v719_v33 = vpop.permute.xlu1 %718 }
 0x125   :  { %885 = vst.msk [vmem:[#allocation2 + $0xc0] sm:$0xff] %vm860_vm2, %v717_v32  ;;  %886 = vst.msk [vmem:[#allocation2 + $0xc8] sm:$0xff] %vm860_vm2, %v719_v33 }
 0x126   :  { %1090 = vrot.lane.b32.xlu0 %v10691_v40, %s10425_s12  ;;  %1092 = vrot.lane.b32.xlu1 %v10698_v41, %s10425_s12 }
 0x128   :  { %v721_v34 = vpop.permute.xlu0 %720  ;;  %v723_v36 = vpop.permute.xlu1 %722 }
 0x129   :  { %887 = vst.msk [vmem:[#allocation2 + $0xd0] sm:$0xff] %vm860_vm2, %v721_v34  ;;  %888 = vst.msk [vmem:[#allocation2 + $0xd8] sm:$0xff] %vm860_vm2, %v723_v36  ;;  %v9499_v34 = vld [vmem:[%s18996_s0 + $0x61] sm:$0xff]  ;;  %v9500_v36 = vld [vmem:[%s18996_s0 + $0x69] sm:$0xff] }
 0x12a   :  { %1094 = vrot.lane.b32.xlu0 %v10707_v42, %s10425_s12  ;;  %1096 = vrot.lane.b32.xlu1 %v10712_v43, %s10425_s12 }
 0x12c   :  { %v725_v38 = vpop.permute.xlu0 %724  ;;  %v727_v39 = vpop.permute.xlu1 %726 }
 0x12d   :  { %889 = vst.msk [vmem:[#allocation2 + $0xe0] sm:$0xff] %vm860_vm2, %v725_v38  ;;  %890 = vst.msk [vmem:[#allocation2 + $0xe8] sm:$0xff] %vm860_vm2, %v727_v39 }
 0x12e   :  { %1098 = vrot.lane.b32.xlu0 %v10727_v46, %s10425_s12  ;;  %1100 = vrot.lane.b32.xlu1 %v10734_v47, %s10425_s12 }
 0x130   :  { %v729_v40 = vpop.permute.xlu0 %728  ;;  %v731_v41 = vpop.permute.xlu1 %730 }
 0x131   :  { %891 = vst.msk [vmem:[#allocation2 + $0xf0] sm:$0xff] %vm860_vm2, %v729_v40  ;;  %892 = vst.msk [vmem:[#allocation2 + $0xf8] sm:$0xff] %vm860_vm2, %v731_v41  ;;  %v9501_v40 = vld [vmem:[%s18996_s0 + $0x79] sm:$0xff]  ;;  %v9502_v41 = vld [vmem:[%s18996_s0 + $0x81] sm:$0xff] }
 0x132   :  { %1102 = vrot.lane.b32.xlu0 %v10741_v48, %s10425_s12  ;;  %1104 = vrot.lane.b32.xlu1 %v10746_v49, %s10425_s12  ;;  %v9459_v48 = vld [vmem:[%s18996_s0 + $0x180] sm:$0xff]  ;;  %v9460_v49 = vld [vmem:[%s18996_s0 + $0x188] sm:$0xff] }
 0x134   :  { %v733_v42 = vpop.permute.xlu0 %732  ;;  %v735_v43 = vpop.permute.xlu1 %734 }
 0x135   :  { %893 = vst.msk [vmem:[#allocation2 + $0x100] sm:$0xff] %vm860_vm2, %v733_v42  ;;  %894 = vst.msk [vmem:[#allocation2 + $0x108] sm:$0xff] %vm860_vm2, %v735_v43 }
 0x136   :  { %1106 = vrot.lane.b32.xlu0 %v10763_v52, %s10425_s12  ;;  %1108 = vrot.lane.b32.xlu1 %v10770_v53, %s10425_s12 }
 0x138   :  { %v737_v46 = vpop.permute.xlu0 %736  ;;  %v739_v47 = vpop.permute.xlu1 %738 }
 0x139   :  { %895 = vst.msk [vmem:[#allocation2 + $0x110] sm:$0xff] %vm860_vm2, %v737_v46  ;;  %896 = vst.msk [vmem:[#allocation2 + $0x118] sm:$0xff] %vm860_vm2, %v739_v47  ;;  %v9503_v46 = vld [vmem:[%s18996_s0 + $0x91] sm:$0xff]  ;;  %v9504_v47 = vld [vmem:[%s18996_s0 + $0x99] sm:$0xff] }
 0x13a   :  { %1110 = vrot.lane.b32.xlu0 %v10785_v56, %s10425_s12  ;;  %1112 = vrot.lane.b32.xlu1 %v10792_v57, %s10425_s12 }
 0x13c   :  { %v741_v52 = vpop.permute.xlu0 %740  ;;  %v743_v53 = vpop.permute.xlu1 %742 }
 0x13d   :  { %897 = vst.msk [vmem:[#allocation2 + $0x120] sm:$0xff] %vm860_vm2, %v741_v52  ;;  %898 = vst.msk [vmem:[#allocation2 + $0x128] sm:$0xff] %vm860_vm2, %v743_v53  ;;  %v9505_v52 = vld [vmem:[%s18996_s0 + $0xa9] sm:$0xff]  ;;  %v9506_v53 = vld [vmem:[%s18996_s0 + $0xb1] sm:$0xff] }
 0x13e   :  { %1114 = vrot.lane.b32.xlu0 %v9459_v48, %s10425_s12  ;;  %1116 = vrot.lane.b32.xlu1 %v9460_v49, %s10425_s12 }
 0x140   :  { %v745_v56 = vpop.permute.xlu0 %744  ;;  %v747_v57 = vpop.permute.xlu1 %746 }
 0x141   :  { %899 = vst.msk [vmem:[#allocation2 + $0x130] sm:$0xff] %vm860_vm2, %v745_v56  ;;  %900 = vst.msk [vmem:[#allocation2 + $0x138] sm:$0xff] %vm860_vm2, %v747_v57 }
 0x142   :  { %1118 = vrot.lane.b32.xlu0 %v10823_v0, %s10425_s12  ;;  %1120 = vrot.lane.b32.xlu1 %v10830_v1, %s10425_s12 }
 0x144   :  { %v749_v2 = vpop.permute.xlu0 %748  ;;  %v751_v3 = vpop.permute.xlu1 %750 }
 0x145   :  { %901 = vst.msk [vmem:[#allocation2 + $0x140] sm:$0xff] %vm860_vm2, %v749_v2  ;;  %902 = vst.msk [vmem:[#allocation2 + $0x148] sm:$0xff] %vm860_vm2, %v751_v3  ;;  %v9507_v2 = vld [vmem:[%s18996_s0 + $0xc1] sm:$0xff]  ;;  %v9508_v3 = vld [vmem:[%s18996_s0 + $0xc9] sm:$0xff] }
 0x146   :  { %1122 = vrot.lane.b32.xlu0 %v10845_v4, %s10425_s12  ;;  %1124 = vrot.lane.b32.xlu1 %v10852_v5, %s10425_s12 }
 0x148   :  { %v753_v10 = vpop.permute.xlu0 %752  ;;  %v755_v55 = vpop.permute.xlu1 %754 }
 0x149   :  { %903 = vst.msk [vmem:[#allocation2 + $0x150] sm:$0xff] %vm860_vm2, %v753_v10  ;;  %904 = vst.msk [vmem:[#allocation2 + $0x158] sm:$0xff] %vm860_vm2, %v755_v55 }
 0x14a   :  { %1126 = vrot.lane.b32.xlu0 %v10867_v8, %s10425_s12  ;;  %1128 = vrot.lane.b32.xlu1 %v10874_v9, %s10425_s12 }
 0x14c   :  { %v757_v0 = vpop.permute.xlu0 %756  ;;  %v759_v1 = vpop.permute.xlu1 %758 }
 0x14d   :  { %905 = vst.msk [vmem:[#allocation2 + $0x160] sm:$0xff] %vm860_vm2, %v757_v0  ;;  %906 = vst.msk [vmem:[#allocation2 + $0x168] sm:$0xff] %vm860_vm2, %v759_v1  ;;  %v9509_v0 = vld [vmem:[%s18996_s0 + $0xd9] sm:$0xff]  ;;  %v9510_v1 = vld [vmem:[%s18996_s0 + $0xe1] sm:$0xff] }
 0x14e   :  { %1130 = vrot.lane.b32.xlu0 %v10889_v12, %s10425_s12  ;;  %1132 = vrot.lane.b32.xlu1 %v10896_v14, %s10425_s12 }
 0x150   :  { %v761_v4 = vpop.permute.xlu0 %760  ;;  %v763_v5 = vpop.permute.xlu1 %762 }
 0x151   :  { %907 = vst.msk [vmem:[#allocation2 + $0x170] sm:$0xff] %vm860_vm2, %v761_v4  ;;  %908 = vst.msk [vmem:[#allocation2 + $0x178] sm:$0xff] %vm860_vm2, %v763_v5 }
 0x152   :  { %1134 = vrot.lane.b32.xlu0 %v10911_v21, %s10425_s12  ;;  %1136 = vrot.lane.b32.xlu1 %v10918_v22, %s10425_s12 }
 0x154   :  { %v765_v8 = vpop.permute.xlu0 %764  ;;  %v767_v9 = vpop.permute.xlu1 %766 }
 0x155   :  { %909 = vst.msk [vmem:[#allocation2 + $0x180] sm:$0xff] %vm860_vm2, %v765_v8  ;;  %910 = vst.msk [vmem:[#allocation2 + $0x188] sm:$0xff] %vm860_vm2, %v767_v9  ;;  %v9511_v8 = vld [vmem:[%s18996_s0 + $0xf1] sm:$0xff]  ;;  %v9512_v9 = vld [vmem:[%s18996_s0 + $0xf9] sm:$0xff] }
 0x156   :  { %1138 = vrot.lane.b32.xlu0 %v10933_v35, %s10425_s12  ;;  %1140 = vrot.lane.b32.xlu1 %v10940_v37, %s10425_s12 }
 0x158   :  { %v769_v12 = vpop.permute.xlu0 %768  ;;  %v771_v14 = vpop.permute.xlu1 %770 }
 0x159   :  { %911 = vst.msk [vmem:[#allocation2 + $0x190] sm:$0xff] %vm860_vm2, %v769_v12  ;;  %912 = vst.msk [vmem:[#allocation2 + $0x198] sm:$0xff] %vm860_vm2, %v771_v14 }
 0x15a   :  { %1142 = vrot.lane.b32.xlu0 %v10955_v50, %s10425_s12  ;;  %1144 = vrot.lane.b32.xlu1 %v10962_v51, %s10425_s12 }
 0x15c   :  { %v773_v21 = vpop.permute.xlu0 %772  ;;  %v775_v22 = vpop.permute.xlu1 %774 }
 0x15d   :  { %913 = vst.msk [vmem:[#allocation2 + $0x1a0] sm:$0xff] %vm860_vm2, %v773_v21  ;;  %914 = vst.msk [vmem:[#allocation2 + $0x1a8] sm:$0xff] %vm860_vm2, %v775_v22  ;;  %v9513_v21 = vld [vmem:[%s18996_s0 + $0x109] sm:$0xff]  ;;  %v9514_v22 = vld [vmem:[%s18996_s0 + $0x111] sm:$0xff] }
 0x15e   :  { %1146 = vrot.lane.b32.xlu0 %v10977_v58, %s10425_s12  ;;  %1148 = vrot.lane.b32.xlu1 %v10984_v59, %s10425_s12 }
 0x160   :  { %v777_v35 = vpop.permute.xlu0 %776  ;;  %v779_v37 = vpop.permute.xlu1 %778 }
 0x161   :  { %915 = vst.msk [vmem:[#allocation2 + $0x1b0] sm:$0xff] %vm860_vm2, %v777_v35  ;;  %916 = vst.msk [vmem:[#allocation2 + $0x1b8] sm:$0xff] %vm860_vm2, %v779_v37 }
 0x162   :  { %1150 = vrot.lane.b32.xlu0 %v10999_v62, %s10425_s12  ;;  %1152 = vrot.lane.b32.xlu1 %v11006_v63, %s10425_s12 }
 0x164   :  { %v781_v50 = vpop.permute.xlu0 %780  ;;  %v783_v51 = vpop.permute.xlu1 %782 }
 0x165   :  { %917 = vst.msk [vmem:[#allocation2 + $0x1c0] sm:$0xff] %vm860_vm2, %v781_v50  ;;  %918 = vst.msk [vmem:[#allocation2 + $0x1c8] sm:$0xff] %vm860_vm2, %v783_v51  ;;  %v9515_v50 = vld [vmem:[%s18996_s0 + $0x121] sm:$0xff]  ;;  %v9516_v51 = vld [vmem:[%s18996_s0 + $0x129] sm:$0xff] }
 0x166   :  { %1154 = vrot.lane.b32.xlu0 %v11021_v6, %s10425_s12  ;;  %1156 = vrot.lane.b32.xlu1 %v11028_v7, %s10425_s12 }
 0x168   :  { %v785_v58 = vpop.permute.xlu0 %784  ;;  %v787_v59 = vpop.permute.xlu1 %786 }
 0x169   :  { %919 = vst.msk [vmem:[#allocation2 + $0x1d0] sm:$0xff] %vm860_vm2, %v785_v58  ;;  %920 = vst.msk [vmem:[#allocation2 + $0x1d8] sm:$0xff] %vm860_vm2, %v787_v59 }
 0x16a   :  { %1158 = vrot.lane.b32.xlu0 %v11043_v15, %s10425_s12  ;;  %1160 = vrot.lane.b32.xlu1 %v11050_v16, %s10425_s12 }
 0x16c   :  { %v789_v62 = vpop.permute.xlu0 %788  ;;  %v791_v63 = vpop.permute.xlu1 %790 }
 0x16d   :  { %921 = vst.msk [vmem:[#allocation2 + $0x1e0] sm:$0xff] %vm860_vm2, %v789_v62  ;;  %922 = vst.msk [vmem:[#allocation2 + $0x1e8] sm:$0xff] %vm860_vm2, %v791_v63  ;;  %v9517_v62 = vld [vmem:[%s18996_s0 + $0x139] sm:$0xff]  ;;  %v9518_v63 = vld [vmem:[%s18996_s0 + $0x141] sm:$0xff] }
 0x16e   :  { %1162 = vrot.lane.b32.xlu0 %v11065_v44, %s10425_s12  ;;  %1164 = vrot.lane.b32.xlu1 %v11072_v45, %s10425_s12  ;;  %v19113_v44 = vld [vmem:[#allocation5_spill] sm:$0xff]  ;;  %v19114_v45 = vld [vmem:[#allocation6_spill] sm:$0xff] }
 0x170   :  { %v793_v6 = vpop.permute.xlu0 %792  ;;  %v795_v7 = vpop.permute.xlu1 %794 }
 0x171   :  { %923 = vst.msk [vmem:[#allocation2 + $0x1f0] sm:$0xff] %vm860_vm2, %v793_v6  ;;  %924 = vst.msk [vmem:[#allocation2 + $0x1f8] sm:$0xff] %vm860_vm2, %v795_v7  ;;  %vm6306_vm2 = vcmask 326912  }
 0x172   :  { %1166 = vrot.lane.b32.xlu0 %v11087_v60, %s10425_s12  ;;  %1168 = vrot.lane.b32.xlu1 %v11094_v61, %s10425_s12  ;;  %v19115_v60 = vld [vmem:[#allocation7_spill] sm:$0xff]  ;;  %v19116_v61 = vld [vmem:[#allocation8_spill] sm:$0xff] }
 0x174   :  { %v1055_v15 = vpop.permute.xlu0 %1054  ;;  %v1057_v16 = vpop.permute.xlu1 %1056 }
 0x175   :  { %1247 = vst.msk [vmem:[#allocation2] sm:$0xff] %vm1246_vm3, %v1055_v15  ;;  %1248 = vst.msk [vmem:[#allocation2 + $0x8] sm:$0xff] %vm1246_vm3, %v1057_v16  ;;  %v9519_v15 = vld [vmem:[%s18996_s0 + $0x151] sm:$0xff]  ;;  %v9520_v16 = vld [vmem:[%s18996_s0 + $0x159] sm:$0xff] }
 0x176   :  { %1170 = vrot.lane.b32.xlu0 %v19113_v44, %s10425_s12  ;;  %1172 = vrot.lane.b32.xlu1 %v19114_v45, %s10425_s12 }
 0x178   :  { %v1059_v28 = vpop.permute.xlu0 %1058  ;;  %v1061_v29 = vpop.permute.xlu1 %1060 }
 0x179   :  { %1249 = vst.msk [vmem:[#allocation2 + $0x10] sm:$0xff] %vm1246_vm3, %v1059_v28  ;;  %1250 = vst.msk [vmem:[#allocation2 + $0x18] sm:$0xff] %vm1246_vm3, %v1061_v29  ;;  %v9521_v28 = vld [vmem:[%s18996_s0 + $0x169] sm:$0xff]  ;;  %v9522_v29 = vld [vmem:[%s18996_s0 + $0x171] sm:$0xff] }
 0x17a   :  { %1174 = vrot.lane.b32.xlu0 %v19115_v60, %s10425_s12  ;;  %1176 = vrot.lane.b32.xlu1 %v19116_v61, %s10425_s12 }
 0x17c   :  { %v1063_v13 = vpop.permute.xlu0 %1062  ;;  %v1065_v17 = vpop.permute.xlu1 %1064 }
 0x17d   :  { %1251 = vst.msk [vmem:[#allocation2 + $0x20] sm:$0xff] %vm1246_vm3, %v1063_v13  ;;  %1252 = vst.msk [vmem:[#allocation2 + $0x28] sm:$0xff] %vm1246_vm3, %v1065_v17 }
 0x17e   :  { %1178 = vrot.lane.b32.xlu0 %v9491_v11, %s10425_s12  ;;  %1180 = vrot.lane.b32.xlu1 %v9492_v54, %s10425_s12  ;;  %v9523_v11 = vld [vmem:[%s18996_s0 + $0x181] sm:$0xff]  ;;  %v9524_v54 = vld [vmem:[%s18996_s0 + $0x189] sm:$0xff] }
 0x180   :  { %v1067_v20 = vpop.permute.xlu0 %1066  ;;  %v1069_v23 = vpop.permute.xlu1 %1068 }
 0x181   :  { %1253 = vst.msk [vmem:[#allocation2 + $0x30] sm:$0xff] %vm1246_vm3, %v1067_v20  ;;  %1254 = vst.msk [vmem:[#allocation2 + $0x38] sm:$0xff] %vm1246_vm3, %v1069_v23 }
 0x182   :  { %1439 = vrot.lane.b32.xlu0 %v9493_v18, %s10426_s25  ;;  %1441 = vrot.lane.b32.xlu1 %v9494_v19, %s10426_s25  ;;  %v9525_v18 = vld [vmem:[%s18996_s0 + $0x1c9] sm:$0xff]  ;;  %v9526_v19 = vld [vmem:[%s18996_s0 + $0x1d1] sm:$0xff] }
 0x184   :  { %v1071_v26 = vpop.permute.xlu0 %1070  ;;  %v1073_v27 = vpop.permute.xlu1 %1072 }
 0x185   :  { %1255 = vst.msk [vmem:[#allocation2 + $0x40] sm:$0xff] %vm1246_vm3, %v1071_v26  ;;  %1256 = vst.msk [vmem:[#allocation2 + $0x48] sm:$0xff] %vm1246_vm3, %v1073_v27 }
 0x186   :  { %1443 = vrot.lane.b32.xlu0 %v9495_v24, %s10426_s25  ;;  %1445 = vrot.lane.b32.xlu1 %v9496_v25, %s10426_s25  ;;  %v9527_v24 = vld [vmem:[%s18996_s0 + $0x1e1] sm:$0xff]  ;;  %v9528_v25 = vld [vmem:[%s18996_s0 + $0x1e9] sm:$0xff] }
 0x188   :  { %v1075_v32 = vpop.permute.xlu0 %1074  ;;  %v1077_v33 = vpop.permute.xlu1 %1076 }
 0x189   :  { %1257 = vst.msk [vmem:[#allocation2 + $0x50] sm:$0xff] %vm1246_vm3, %v1075_v32  ;;  %1258 = vst.msk [vmem:[#allocation2 + $0x58] sm:$0xff] %vm1246_vm3, %v1077_v33 }
 0x18a   :  { %1447 = vrot.lane.b32.xlu0 %v9497_v30, %s10426_s25  ;;  %1449 = vrot.lane.b32.xlu1 %v9498_v31, %s10426_s25  ;;  %v9529_v30 = vld [vmem:[%s18996_s0 + $0x1f9] sm:$0xff]  ;;  %v9530_v31 = vld [vmem:[%s18996_s0 + $0x201] sm:$0xff] }
 0x18c   :  { %v1079_v38 = vpop.permute.xlu0 %1078  ;;  %v1081_v39 = vpop.permute.xlu1 %1080 }
 0x18d   :  { %1259 = vst.msk [vmem:[#allocation2 + $0x60] sm:$0xff] %vm1246_vm3, %v1079_v38  ;;  %1260 = vst.msk [vmem:[#allocation2 + $0x68] sm:$0xff] %vm1246_vm3, %v1081_v39 }
 0x18e   :  { %1451 = vrot.lane.b32.xlu0 %v9499_v34, %s10426_s25  ;;  %1453 = vrot.lane.b32.xlu1 %v9500_v36, %s10426_s25  ;;  %v9531_v34 = vld [vmem:[%s18996_s0 + $0x211] sm:$0xff]  ;;  %v9532_v36 = vld [vmem:[%s18996_s0 + $0x219] sm:$0xff] }
 0x190   :  { %v1083_v42 = vpop.permute.xlu0 %1082  ;;  %v1085_v43 = vpop.permute.xlu1 %1084 }
 0x191   :  { %1261 = vst.msk [vmem:[#allocation2 + $0x70] sm:$0xff] %vm1246_vm3, %v1083_v42  ;;  %1262 = vst.msk [vmem:[#allocation2 + $0x78] sm:$0xff] %vm1246_vm3, %v1085_v43 }
 0x192   :  { %1455 = vrot.lane.b32.xlu0 %v9501_v40, %s10426_s25  ;;  %1457 = vrot.lane.b32.xlu1 %v9502_v41, %s10426_s25  ;;  %v9533_v40 = vld [vmem:[%s18996_s0 + $0x229] sm:$0xff]  ;;  %v9534_v41 = vld [vmem:[%s18996_s0 + $0x231] sm:$0xff] }
 0x194   :  { %v1087_v48 = vpop.permute.xlu0 %1086  ;;  %v1089_v49 = vpop.permute.xlu1 %1088 }
 0x195   :  { %1263 = vst.msk [vmem:[#allocation2 + $0x80] sm:$0xff] %vm1246_vm3, %v1087_v48  ;;  %1264 = vst.msk [vmem:[#allocation2 + $0x88] sm:$0xff] %vm1246_vm3, %v1089_v49 }
 0x196   :  { %1459 = vrot.lane.b32.xlu0 %v9503_v46, %s10426_s25  ;;  %1461 = vrot.lane.b32.xlu1 %v9504_v47, %s10426_s25  ;;  %v9535_v46 = vld [vmem:[%s18996_s0 + $0x241] sm:$0xff]  ;;  %v9536_v47 = vld [vmem:[%s18996_s0 + $0x249] sm:$0xff] }
 0x198   :  { %v1091_v56 = vpop.permute.xlu0 %1090  ;;  %v1093_v57 = vpop.permute.xlu1 %1092 }
 0x199   :  { %1265 = vst.msk [vmem:[#allocation2 + $0x90] sm:$0xff] %vm1246_vm3, %v1091_v56  ;;  %1266 = vst.msk [vmem:[#allocation2 + $0x98] sm:$0xff] %vm1246_vm3, %v1093_v57 }
 0x19a   :  { %1463 = vrot.lane.b32.xlu0 %v9505_v52, %s10426_s25  ;;  %1465 = vrot.lane.b32.xlu1 %v9506_v53, %s10426_s25  ;;  %v9537_v52 = vld [vmem:[%s18996_s0 + $0x259] sm:$0xff]  ;;  %v9538_v53 = vld [vmem:[%s18996_s0 + $0x261] sm:$0xff] }
 0x19c   :  { %v1095_v10 = vpop.permute.xlu0 %1094  ;;  %v1097_v55 = vpop.permute.xlu1 %1096 }
 0x19d   :  { %1267 = vst.msk [vmem:[#allocation2 + $0xa0] sm:$0xff] %vm1246_vm3, %v1095_v10  ;;  %1268 = vst.msk [vmem:[#allocation2 + $0xa8] sm:$0xff] %vm1246_vm3, %v1097_v55 }
 0x19e   :  { %1467 = vrot.lane.b32.xlu0 %v9507_v2, %s10426_s25  ;;  %1469 = vrot.lane.b32.xlu1 %v9508_v3, %s10426_s25  ;;  %v9539_v2 = vld [vmem:[%s18996_s0 + $0x271] sm:$0xff]  ;;  %v9540_v3 = vld [vmem:[%s18996_s0 + $0x279] sm:$0xff] }
 0x1a0   :  { %v1099_v4 = vpop.permute.xlu0 %1098  ;;  %v1101_v5 = vpop.permute.xlu1 %1100 }
 0x1a1   :  { %1269 = vst.msk [vmem:[#allocation2 + $0xb0] sm:$0xff] %vm1246_vm3, %v1099_v4  ;;  %1270 = vst.msk [vmem:[#allocation2 + $0xb8] sm:$0xff] %vm1246_vm3, %v1101_v5 }
 0x1a2   :  { %1471 = vrot.lane.b32.xlu0 %v9509_v0, %s10426_s25  ;;  %1473 = vrot.lane.b32.xlu1 %v9510_v1, %s10426_s25  ;;  %v9541_v0 = vld [vmem:[%s18996_s0 + $0x289] sm:$0xff]  ;;  %v9542_v1 = vld [vmem:[%s18996_s0 + $0x291] sm:$0xff] }
 0x1a4   :  { %v1103_v12 = vpop.permute.xlu0 %1102  ;;  %v1105_v14 = vpop.permute.xlu1 %1104 }
 0x1a5   :  { %1271 = vst.msk [vmem:[#allocation2 + $0xc0] sm:$0xff] %vm1246_vm3, %v1103_v12  ;;  %1272 = vst.msk [vmem:[#allocation2 + $0xc8] sm:$0xff] %vm1246_vm3, %v1105_v14 }
 0x1a6   :  { %1475 = vrot.lane.b32.xlu0 %v9511_v8, %s10426_s25  ;;  %1477 = vrot.lane.b32.xlu1 %v9512_v9, %s10426_s25  ;;  %v9543_v8 = vld [vmem:[%s18996_s0 + $0x2a1] sm:$0xff]  ;;  %v9544_v9 = vld [vmem:[%s18996_s0 + $0x2a9] sm:$0xff] }
 0x1a8   :  { %v1107_v35 = vpop.permute.xlu0 %1106  ;;  %v1109_v37 = vpop.permute.xlu1 %1108 }
 0x1a9   :  { %1273 = vst.msk [vmem:[#allocation2 + $0xd0] sm:$0xff] %vm1246_vm3, %v1107_v35  ;;  %1274 = vst.msk [vmem:[#allocation2 + $0xd8] sm:$0xff] %vm1246_vm3, %v1109_v37 }
 0x1aa   :  { %1479 = vrot.lane.b32.xlu0 %v9513_v21, %s10426_s25  ;;  %1481 = vrot.lane.b32.xlu1 %v9514_v22, %s10426_s25  ;;  %v9545_v21 = vld [vmem:[%s18996_s0 + $0x2b9] sm:$0xff]  ;;  %v9546_v22 = vld [vmem:[%s18996_s0 + $0x2c1] sm:$0xff] }
 0x1ac   :  { %v1111_v58 = vpop.permute.xlu0 %1110  ;;  %v1113_v59 = vpop.permute.xlu1 %1112 }
 0x1ad   :  { %1275 = vst.msk [vmem:[#allocation2 + $0xe0] sm:$0xff] %vm1246_vm3, %v1111_v58  ;;  %1276 = vst.msk [vmem:[#allocation2 + $0xe8] sm:$0xff] %vm1246_vm3, %v1113_v59 }
 0x1ae   :  { %1483 = vrot.lane.b32.xlu0 %v9515_v50, %s10426_s25  ;;  %1485 = vrot.lane.b32.xlu1 %v9516_v51, %s10426_s25  ;;  %v9547_v50 = vld [vmem:[%s18996_s0 + $0x2d1] sm:$0xff]  ;;  %v9548_v51 = vld [vmem:[%s18996_s0 + $0x2d9] sm:$0xff] }
 0x1b0   :  { %v1115_v6 = vpop.permute.xlu0 %1114  ;;  %v1117_v7 = vpop.permute.xlu1 %1116 }
 0x1b1   :  { %1277 = vst.msk [vmem:[#allocation2 + $0xf0] sm:$0xff] %vm1246_vm3, %v1115_v6  ;;  %1278 = vst.msk [vmem:[#allocation2 + $0xf8] sm:$0xff] %vm1246_vm3, %v1117_v7 }
 0x1b2   :  { %1487 = vrot.lane.b32.xlu0 %v9517_v62, %s10426_s25  ;;  %1489 = vrot.lane.b32.xlu1 %v9518_v63, %s10426_s25  ;;  %v9549_v62 = vld [vmem:[%s18996_s0 + $0x2e9] sm:$0xff]  ;;  %v9550_v63 = vld [vmem:[%s18996_s0 + $0x2f1] sm:$0xff] }
 0x1b4   :  { %v1119_v44 = vpop.permute.xlu0 %1118  ;;  %v1121_v45 = vpop.permute.xlu1 %1120 }
 0x1b5   :  { %1279 = vst.msk [vmem:[#allocation2 + $0x100] sm:$0xff] %vm1246_vm3, %v1119_v44  ;;  %1280 = vst.msk [vmem:[#allocation2 + $0x108] sm:$0xff] %vm1246_vm3, %v1121_v45 }
 0x1b6   :  { %1491 = vrot.lane.b32.xlu0 %v9519_v15, %s10426_s25  ;;  %1493 = vrot.lane.b32.xlu1 %v9520_v16, %s10426_s25  ;;  %v9551_v15 = vld [vmem:[%s18996_s0 + $0x301] sm:$0xff]  ;;  %v9552_v16 = vld [vmem:[%s18996_s0 + $0x309] sm:$0xff] }
 0x1b8   :  { %v1123_v60 = vpop.permute.xlu0 %1122  ;;  %v1125_v61 = vpop.permute.xlu1 %1124 }
 0x1b9   :  { %1281 = vst.msk [vmem:[#allocation2 + $0x110] sm:$0xff] %vm1246_vm3, %v1123_v60  ;;  %1282 = vst.msk [vmem:[#allocation2 + $0x118] sm:$0xff] %vm1246_vm3, %v1125_v61 }
 0x1ba   :  { %1495 = vrot.lane.b32.xlu0 %v9521_v28, %s10426_s25  ;;  %1497 = vrot.lane.b32.xlu1 %v9522_v29, %s10426_s25  ;;  %v9553_v28 = vld [vmem:[%s18996_s0 + $0x319] sm:$0xff]  ;;  %v9554_v29 = vld [vmem:[%s18996_s0 + $0x321] sm:$0xff] }
 0x1bc   :  { %v1127_v13 = vpop.permute.xlu0 %1126  ;;  %v1129_v17 = vpop.permute.xlu1 %1128 }
 0x1bd   :  { %1283 = vst.msk [vmem:[#allocation2 + $0x120] sm:$0xff] %vm1246_vm3, %v1127_v13  ;;  %1284 = vst.msk [vmem:[#allocation2 + $0x128] sm:$0xff] %vm1246_vm3, %v1129_v17 }
 0x1be   :  { %1499 = vrot.lane.b32.xlu0 %v9523_v11, %s10426_s25  ;;  %1501 = vrot.lane.b32.xlu1 %v9524_v54, %s10426_s25  ;;  %v9555_v11 = vld [vmem:[%s18996_s0 + $0x331] sm:$0xff]  ;;  %v9556_v54 = vld [vmem:[%s18996_s0 + $0x339] sm:$0xff] }
 0x1c0   :  { %v1131_v20 = vpop.permute.xlu0 %1130  ;;  %v1133_v23 = vpop.permute.xlu1 %1132 }
 0x1c1   :  { %1285 = vst.msk [vmem:[#allocation2 + $0x130] sm:$0xff] %vm1246_vm3, %v1131_v20  ;;  %1286 = vst.msk [vmem:[#allocation2 + $0x138] sm:$0xff] %vm1246_vm3, %v1133_v23 }
 0x1c2   :  { %1503 = vrot.lane.b32.xlu0 %v9525_v18, %s10426_s25  ;;  %1505 = vrot.lane.b32.xlu1 %v9526_v19, %s10426_s25  ;;  %v9557_v18 = vld [vmem:[%s18996_s0 + $0x1a] sm:$0xff]  ;;  %v9558_v19 = vld [vmem:[%s18996_s0 + $0x22] sm:$0xff] }
 0x1c4   :  { %v1135_v26 = vpop.permute.xlu0 %1134  ;;  %v1137_v27 = vpop.permute.xlu1 %1136 }
 0x1c5   :  { %1287 = vst.msk [vmem:[#allocation2 + $0x140] sm:$0xff] %vm1246_vm3, %v1135_v26  ;;  %1288 = vst.msk [vmem:[#allocation2 + $0x148] sm:$0xff] %vm1246_vm3, %v1137_v27 }
 0x1c6   :  { %1507 = vrot.lane.b32.xlu0 %v9527_v24, %s10426_s25  ;;  %1509 = vrot.lane.b32.xlu1 %v9528_v25, %s10426_s25  ;;  %v9559_v24 = vld [vmem:[%s18996_s0 + $0x32] sm:$0xff]  ;;  %v9560_v25 = vld [vmem:[%s18996_s0 + $0x3a] sm:$0xff] }
 0x1c8   :  { %v1139_v32 = vpop.permute.xlu0 %1138  ;;  %v1141_v33 = vpop.permute.xlu1 %1140 }
 0x1c9   :  { %1289 = vst.msk [vmem:[#allocation2 + $0x150] sm:$0xff] %vm1246_vm3, %v1139_v32  ;;  %1290 = vst.msk [vmem:[#allocation2 + $0x158] sm:$0xff] %vm1246_vm3, %v1141_v33 }
 0x1ca   :  { %1511 = vrot.lane.b32.xlu0 %v9529_v30, %s10426_s25  ;;  %1513 = vrot.lane.b32.xlu1 %v9530_v31, %s10426_s25  ;;  %v9561_v30 = vld [vmem:[%s18996_s0 + $0x4a] sm:$0xff]  ;;  %v9562_v31 = vld [vmem:[%s18996_s0 + $0x52] sm:$0xff] }
 0x1cc   :  { %v1143_v38 = vpop.permute.xlu0 %1142  ;;  %v1145_v39 = vpop.permute.xlu1 %1144 }
 0x1cd   :  { %1291 = vst.msk [vmem:[#allocation2 + $0x160] sm:$0xff] %vm1246_vm3, %v1143_v38  ;;  %1292 = vst.msk [vmem:[#allocation2 + $0x168] sm:$0xff] %vm1246_vm3, %v1145_v39 }
 0x1ce   :  { %1515 = vrot.lane.b32.xlu0 %v9531_v34, %s10426_s25  ;;  %1517 = vrot.lane.b32.xlu1 %v9532_v36, %s10426_s25  ;;  %v9563_v34 = vld [vmem:[%s18996_s0 + $0x62] sm:$0xff]  ;;  %v9564_v36 = vld [vmem:[%s18996_s0 + $0x6a] sm:$0xff] }
 0x1d0   :  { %v1147_v42 = vpop.permute.xlu0 %1146  ;;  %v1149_v43 = vpop.permute.xlu1 %1148 }
 0x1d1   :  { %1293 = vst.msk [vmem:[#allocation2 + $0x170] sm:$0xff] %vm1246_vm3, %v1147_v42  ;;  %1294 = vst.msk [vmem:[#allocation2 + $0x178] sm:$0xff] %vm1246_vm3, %v1149_v43 }
 0x1d2   :  { %1519 = vrot.lane.b32.xlu0 %v9533_v40, %s10426_s25  ;;  %1521 = vrot.lane.b32.xlu1 %v9534_v41, %s10426_s25  ;;  %v9565_v40 = vld [vmem:[%s18996_s0 + $0x7a] sm:$0xff]  ;;  %v9566_v41 = vld [vmem:[%s18996_s0 + $0x82] sm:$0xff] }
 0x1d4   :  { %v1151_v48 = vpop.permute.xlu0 %1150  ;;  %v1153_v49 = vpop.permute.xlu1 %1152 }
 0x1d5   :  { %1295 = vst.msk [vmem:[#allocation2 + $0x180] sm:$0xff] %vm1246_vm3, %v1151_v48  ;;  %1296 = vst.msk [vmem:[#allocation2 + $0x188] sm:$0xff] %vm1246_vm3, %v1153_v49 }
 0x1d6   :  { %1523 = vrot.lane.b32.xlu0 %v9535_v46, %s10426_s25  ;;  %1525 = vrot.lane.b32.xlu1 %v9536_v47, %s10426_s25  ;;  %v9567_v46 = vld [vmem:[%s18996_s0 + $0x92] sm:$0xff]  ;;  %v9568_v47 = vld [vmem:[%s18996_s0 + $0x9a] sm:$0xff] }
 0x1d8   :  { %v1155_v56 = vpop.permute.xlu0 %1154  ;;  %v1157_v57 = vpop.permute.xlu1 %1156 }
 0x1d9   :  { %1297 = vst.msk [vmem:[#allocation2 + $0x190] sm:$0xff] %vm1246_vm3, %v1155_v56  ;;  %1298 = vst.msk [vmem:[#allocation2 + $0x198] sm:$0xff] %vm1246_vm3, %v1157_v57 }
 0x1da   :  { %1527 = vrot.lane.b32.xlu0 %v9537_v52, %s10426_s25  ;;  %1529 = vrot.lane.b32.xlu1 %v9538_v53, %s10426_s25  ;;  %v9569_v52 = vld [vmem:[%s18996_s0 + $0xaa] sm:$0xff]  ;;  %v9570_v53 = vld [vmem:[%s18996_s0 + $0xb2] sm:$0xff] }
 0x1dc   :  { %v1159_v10 = vpop.permute.xlu0 %1158  ;;  %v1161_v55 = vpop.permute.xlu1 %1160 }
 0x1dd   :  { %1299 = vst.msk [vmem:[#allocation2 + $0x1a0] sm:$0xff] %vm1246_vm3, %v1159_v10  ;;  %1300 = vst.msk [vmem:[#allocation2 + $0x1a8] sm:$0xff] %vm1246_vm3, %v1161_v55 }
 0x1de   :  { %1531 = vrot.lane.b32.xlu0 %v9539_v2, %s10426_s25  ;;  %1533 = vrot.lane.b32.xlu1 %v9540_v3, %s10426_s25  ;;  %v9571_v2 = vld [vmem:[%s18996_s0 + $0xc2] sm:$0xff]  ;;  %v9572_v3 = vld [vmem:[%s18996_s0 + $0xca] sm:$0xff] }
 0x1e0   :  { %v1163_v4 = vpop.permute.xlu0 %1162  ;;  %v1165_v5 = vpop.permute.xlu1 %1164 }
 0x1e1   :  { %1301 = vst.msk [vmem:[#allocation2 + $0x1b0] sm:$0xff] %vm1246_vm3, %v1163_v4  ;;  %1302 = vst.msk [vmem:[#allocation2 + $0x1b8] sm:$0xff] %vm1246_vm3, %v1165_v5 }
 0x1e2   :  { %1535 = vrot.lane.b32.xlu0 %v9541_v0, %s10426_s25  ;;  %1537 = vrot.lane.b32.xlu1 %v9542_v1, %s10426_s25  ;;  %v9573_v0 = vld [vmem:[%s18996_s0 + $0xda] sm:$0xff]  ;;  %v9574_v1 = vld [vmem:[%s18996_s0 + $0xe2] sm:$0xff] }
 0x1e4   :  { %v1167_v12 = vpop.permute.xlu0 %1166  ;;  %v1169_v14 = vpop.permute.xlu1 %1168 }
 0x1e5   :  { %1303 = vst.msk [vmem:[#allocation2 + $0x1c0] sm:$0xff] %vm1246_vm3, %v1167_v12  ;;  %1304 = vst.msk [vmem:[#allocation2 + $0x1c8] sm:$0xff] %vm1246_vm3, %v1169_v14 }
 0x1e6   :  { %1539 = vrot.lane.b32.xlu0 %v9543_v8, %s10426_s25  ;;  %1541 = vrot.lane.b32.xlu1 %v9544_v9, %s10426_s25  ;;  %v9575_v8 = vld [vmem:[%s18996_s0 + $0xf2] sm:$0xff]  ;;  %v9576_v9 = vld [vmem:[%s18996_s0 + $0xfa] sm:$0xff] }
 0x1e8   :  { %v1171_v35 = vpop.permute.xlu0 %1170  ;;  %v1173_v37 = vpop.permute.xlu1 %1172 }
 0x1e9   :  { %1305 = vst.msk [vmem:[#allocation2 + $0x1d0] sm:$0xff] %vm1246_vm3, %v1171_v35  ;;  %1306 = vst.msk [vmem:[#allocation2 + $0x1d8] sm:$0xff] %vm1246_vm3, %v1173_v37 }
 0x1ea   :  { %1543 = vrot.lane.b32.xlu0 %v9545_v21, %s10426_s25  ;;  %1545 = vrot.lane.b32.xlu1 %v9546_v22, %s10426_s25  ;;  %v9577_v21 = vld [vmem:[%s18996_s0 + $0x10a] sm:$0xff]  ;;  %v9578_v22 = vld [vmem:[%s18996_s0 + $0x112] sm:$0xff] }
 0x1ec   :  { %v1175_v58 = vpop.permute.xlu0 %1174  ;;  %v1177_v59 = vpop.permute.xlu1 %1176 }
 0x1ed   :  { %1307 = vst.msk [vmem:[#allocation2 + $0x1e0] sm:$0xff] %vm1246_vm3, %v1175_v58  ;;  %1308 = vst.msk [vmem:[#allocation2 + $0x1e8] sm:$0xff] %vm1246_vm3, %v1177_v59 }
 0x1ee   :  { %1547 = vrot.lane.b32.xlu0 %v9547_v50, %s10426_s25  ;;  %1549 = vrot.lane.b32.xlu1 %v9548_v51, %s10426_s25  ;;  %v9579_v50 = vld [vmem:[%s18996_s0 + $0x122] sm:$0xff]  ;;  %v9580_v51 = vld [vmem:[%s18996_s0 + $0x12a] sm:$0xff] }
 0x1f0   :  { %v1179_v6 = vpop.permute.xlu0 %1178  ;;  %v1181_v7 = vpop.permute.xlu1 %1180 }
 0x1f1   :  { %1309 = vst.msk [vmem:[#allocation2 + $0x1f0] sm:$0xff] %vm1246_vm3, %v1179_v6  ;;  %1310 = vst.msk [vmem:[#allocation2 + $0x1f8] sm:$0xff] %vm1246_vm3, %v1181_v7  ;;  %vm6691_vm3 = vcmask 392512  }
 0x1f2   :  { %1551 = vrot.lane.b32.xlu0 %v9549_v62, %s10426_s25  ;;  %1553 = vrot.lane.b32.xlu1 %v9550_v63, %s10426_s25  ;;  %v9581_v62 = vld [vmem:[%s18996_s0 + $0x13a] sm:$0xff]  ;;  %v9582_v63 = vld [vmem:[%s18996_s0 + $0x142] sm:$0xff] }
 0x1f4   :  { %v1440_v44 = vpop.permute.xlu0 %1439  ;;  %v1442_v45 = vpop.permute.xlu1 %1441 }
 0x1f5   :  { %1632 = vst.msk [vmem:[#allocation2] sm:$0xff] %vm1631_vm4, %v1440_v44  ;;  %1633 = vst.msk [vmem:[#allocation2 + $0x8] sm:$0xff] %vm1631_vm4, %v1442_v45 }
 0x1f6   :  { %1555 = vrot.lane.b32.xlu0 %v9551_v15, %s10426_s25  ;;  %1557 = vrot.lane.b32.xlu1 %v9552_v16, %s10426_s25  ;;  %v9583_v15 = vld [vmem:[%s18996_s0 + $0x152] sm:$0xff]  ;;  %v9584_v16 = vld [vmem:[%s18996_s0 + $0x15a] sm:$0xff] }
 0x1f8   :  { %v1444_v60 = vpop.permute.xlu0 %1443  ;;  %v1446_v61 = vpop.permute.xlu1 %1445 }
 0x1f9   :  { %1634 = vst.msk [vmem:[#allocation2 + $0x10] sm:$0xff] %vm1631_vm4, %v1444_v60  ;;  %1635 = vst.msk [vmem:[#allocation2 + $0x18] sm:$0xff] %vm1631_vm4, %v1446_v61 }
 0x1fa   :  { %1559 = vrot.lane.b32.xlu0 %v9553_v28, %s10426_s25  ;;  %1561 = vrot.lane.b32.xlu1 %v9554_v29, %s10426_s25  ;;  %v9585_v28 = vld [vmem:[%s18996_s0 + $0x16a] sm:$0xff]  ;;  %v9586_v29 = vld [vmem:[%s18996_s0 + $0x172] sm:$0xff] }
 0x1fc   :  { %v1448_v13 = vpop.permute.xlu0 %1447  ;;  %v1450_v17 = vpop.permute.xlu1 %1449 }
 0x1fd   :  { %1636 = vst.msk [vmem:[#allocation2 + $0x20] sm:$0xff] %vm1631_vm4, %v1448_v13  ;;  %1637 = vst.msk [vmem:[#allocation2 + $0x28] sm:$0xff] %vm1631_vm4, %v1450_v17 }
 0x1fe   :  { %1563 = vrot.lane.b32.xlu0 %v9555_v11, %s10426_s25  ;;  %1565 = vrot.lane.b32.xlu1 %v9556_v54, %s10426_s25  ;;  %v9587_v11 = vld [vmem:[%s18996_s0 + $0x182] sm:$0xff]  ;;  %v9588_v54 = vld [vmem:[%s18996_s0 + $0x18a] sm:$0xff] }
 0x200   :  { %v1452_v20 = vpop.permute.xlu0 %1451  ;;  %v1454_v23 = vpop.permute.xlu1 %1453 }
 0x201   :  { %1638 = vst.msk [vmem:[#allocation2 + $0x30] sm:$0xff] %vm1631_vm4, %v1452_v20  ;;  %1639 = vst.msk [vmem:[#allocation2 + $0x38] sm:$0xff] %vm1631_vm4, %v1454_v23 }
 0x202   :  { %1824 = vrot.lane.b32.xlu0 %v9557_v18, %s10427_s29  ;;  %1826 = vrot.lane.b32.xlu1 %v9558_v19, %s10427_s29  ;;  %v9589_v18 = vld [vmem:[%s18996_s0 + $0x1ca] sm:$0xff]  ;;  %v9590_v19 = vld [vmem:[%s18996_s0 + $0x1d2] sm:$0xff] }
 0x204   :  { %v1456_v26 = vpop.permute.xlu0 %1455  ;;  %v1458_v27 = vpop.permute.xlu1 %1457 }
 0x205   :  { %1640 = vst.msk [vmem:[#allocation2 + $0x40] sm:$0xff] %vm1631_vm4, %v1456_v26  ;;  %1641 = vst.msk [vmem:[#allocation2 + $0x48] sm:$0xff] %vm1631_vm4, %v1458_v27 }
 0x206   :  { %1828 = vrot.lane.b32.xlu0 %v9559_v24, %s10427_s29  ;;  %1830 = vrot.lane.b32.xlu1 %v9560_v25, %s10427_s29  ;;  %v9591_v24 = vld [vmem:[%s18996_s0 + $0x1e2] sm:$0xff]  ;;  %v9592_v25 = vld [vmem:[%s18996_s0 + $0x1ea] sm:$0xff] }
 0x208   :  { %v1460_v32 = vpop.permute.xlu0 %1459  ;;  %v1462_v33 = vpop.permute.xlu1 %1461 }
 0x209   :  { %1642 = vst.msk [vmem:[#allocation2 + $0x50] sm:$0xff] %vm1631_vm4, %v1460_v32  ;;  %1643 = vst.msk [vmem:[#allocation2 + $0x58] sm:$0xff] %vm1631_vm4, %v1462_v33 }
 0x20a   :  { %1832 = vrot.lane.b32.xlu0 %v9561_v30, %s10427_s29  ;;  %1834 = vrot.lane.b32.xlu1 %v9562_v31, %s10427_s29  ;;  %v9593_v30 = vld [vmem:[%s18996_s0 + $0x1fa] sm:$0xff]  ;;  %v9594_v31 = vld [vmem:[%s18996_s0 + $0x202] sm:$0xff] }
 0x20c   :  { %v1464_v38 = vpop.permute.xlu0 %1463  ;;  %v1466_v39 = vpop.permute.xlu1 %1465 }
 0x20d   :  { %1644 = vst.msk [vmem:[#allocation2 + $0x60] sm:$0xff] %vm1631_vm4, %v1464_v38  ;;  %1645 = vst.msk [vmem:[#allocation2 + $0x68] sm:$0xff] %vm1631_vm4, %v1466_v39 }
 0x20e   :  { %1836 = vrot.lane.b32.xlu0 %v9563_v34, %s10427_s29  ;;  %1838 = vrot.lane.b32.xlu1 %v9564_v36, %s10427_s29  ;;  %v9595_v34 = vld [vmem:[%s18996_s0 + $0x212] sm:$0xff]  ;;  %v9596_v36 = vld [vmem:[%s18996_s0 + $0x21a] sm:$0xff] }
 0x210   :  { %v1468_v42 = vpop.permute.xlu0 %1467  ;;  %v1470_v43 = vpop.permute.xlu1 %1469 }
 0x211   :  { %1646 = vst.msk [vmem:[#allocation2 + $0x70] sm:$0xff] %vm1631_vm4, %v1468_v42  ;;  %1647 = vst.msk [vmem:[#allocation2 + $0x78] sm:$0xff] %vm1631_vm4, %v1470_v43 }
 0x212   :  { %1840 = vrot.lane.b32.xlu0 %v9565_v40, %s10427_s29  ;;  %1842 = vrot.lane.b32.xlu1 %v9566_v41, %s10427_s29  ;;  %v9597_v40 = vld [vmem:[%s18996_s0 + $0x22a] sm:$0xff]  ;;  %v9598_v41 = vld [vmem:[%s18996_s0 + $0x232] sm:$0xff] }
 0x214   :  { %v1472_v48 = vpop.permute.xlu0 %1471  ;;  %v1474_v49 = vpop.permute.xlu1 %1473 }
 0x215   :  { %1648 = vst.msk [vmem:[#allocation2 + $0x80] sm:$0xff] %vm1631_vm4, %v1472_v48  ;;  %1649 = vst.msk [vmem:[#allocation2 + $0x88] sm:$0xff] %vm1631_vm4, %v1474_v49 }
 0x216   :  { %1844 = vrot.lane.b32.xlu0 %v9567_v46, %s10427_s29  ;;  %1846 = vrot.lane.b32.xlu1 %v9568_v47, %s10427_s29  ;;  %v9599_v46 = vld [vmem:[%s18996_s0 + $0x242] sm:$0xff]  ;;  %v9600_v47 = vld [vmem:[%s18996_s0 + $0x24a] sm:$0xff] }
 0x218   :  { %v1476_v56 = vpop.permute.xlu0 %1475  ;;  %v1478_v57 = vpop.permute.xlu1 %1477 }
 0x219   :  { %1650 = vst.msk [vmem:[#allocation2 + $0x90] sm:$0xff] %vm1631_vm4, %v1476_v56  ;;  %1651 = vst.msk [vmem:[#allocation2 + $0x98] sm:$0xff] %vm1631_vm4, %v1478_v57 }
 0x21a   :  { %1848 = vrot.lane.b32.xlu0 %v9569_v52, %s10427_s29  ;;  %1850 = vrot.lane.b32.xlu1 %v9570_v53, %s10427_s29  ;;  %v9601_v52 = vld [vmem:[%s18996_s0 + $0x25a] sm:$0xff]  ;;  %v9602_v53 = vld [vmem:[%s18996_s0 + $0x262] sm:$0xff] }
 0x21c   :  { %v1480_v10 = vpop.permute.xlu0 %1479  ;;  %v1482_v55 = vpop.permute.xlu1 %1481 }
 0x21d   :  { %1652 = vst.msk [vmem:[#allocation2 + $0xa0] sm:$0xff] %vm1631_vm4, %v1480_v10  ;;  %1653 = vst.msk [vmem:[#allocation2 + $0xa8] sm:$0xff] %vm1631_vm4, %v1482_v55 }
 0x21e   :  { %1852 = vrot.lane.b32.xlu0 %v9571_v2, %s10427_s29  ;;  %1854 = vrot.lane.b32.xlu1 %v9572_v3, %s10427_s29  ;;  %v9603_v2 = vld [vmem:[%s18996_s0 + $0x272] sm:$0xff]  ;;  %v9604_v3 = vld [vmem:[%s18996_s0 + $0x27a] sm:$0xff] }
 0x220   :  { %v1484_v4 = vpop.permute.xlu0 %1483  ;;  %v1486_v5 = vpop.permute.xlu1 %1485 }
 0x221   :  { %1654 = vst.msk [vmem:[#allocation2 + $0xb0] sm:$0xff] %vm1631_vm4, %v1484_v4  ;;  %1655 = vst.msk [vmem:[#allocation2 + $0xb8] sm:$0xff] %vm1631_vm4, %v1486_v5 }
 0x222   :  { %1856 = vrot.lane.b32.xlu0 %v9573_v0, %s10427_s29  ;;  %1858 = vrot.lane.b32.xlu1 %v9574_v1, %s10427_s29  ;;  %v9605_v0 = vld [vmem:[%s18996_s0 + $0x28a] sm:$0xff]  ;;  %v9606_v1 = vld [vmem:[%s18996_s0 + $0x292] sm:$0xff] }
 0x224   :  { %v1488_v12 = vpop.permute.xlu0 %1487  ;;  %v1490_v14 = vpop.permute.xlu1 %1489 }
 0x225   :  { %1656 = vst.msk [vmem:[#allocation2 + $0xc0] sm:$0xff] %vm1631_vm4, %v1488_v12  ;;  %1657 = vst.msk [vmem:[#allocation2 + $0xc8] sm:$0xff] %vm1631_vm4, %v1490_v14 }
 0x226   :  { %1860 = vrot.lane.b32.xlu0 %v9575_v8, %s10427_s29  ;;  %1862 = vrot.lane.b32.xlu1 %v9576_v9, %s10427_s29  ;;  %v9607_v8 = vld [vmem:[%s18996_s0 + $0x2a2] sm:$0xff]  ;;  %v9608_v9 = vld [vmem:[%s18996_s0 + $0x2aa] sm:$0xff] }
 0x228   :  { %v1492_v35 = vpop.permute.xlu0 %1491  ;;  %v1494_v37 = vpop.permute.xlu1 %1493 }
 0x229   :  { %1658 = vst.msk [vmem:[#allocation2 + $0xd0] sm:$0xff] %vm1631_vm4, %v1492_v35  ;;  %1659 = vst.msk [vmem:[#allocation2 + $0xd8] sm:$0xff] %vm1631_vm4, %v1494_v37 }
 0x22a   :  { %1864 = vrot.lane.b32.xlu0 %v9577_v21, %s10427_s29  ;;  %1866 = vrot.lane.b32.xlu1 %v9578_v22, %s10427_s29  ;;  %v9609_v21 = vld [vmem:[%s18996_s0 + $0x2ba] sm:$0xff]  ;;  %v9610_v22 = vld [vmem:[%s18996_s0 + $0x2c2] sm:$0xff] }
 0x22c   :  { %v1496_v58 = vpop.permute.xlu0 %1495  ;;  %v1498_v59 = vpop.permute.xlu1 %1497 }
 0x22d   :  { %1660 = vst.msk [vmem:[#allocation2 + $0xe0] sm:$0xff] %vm1631_vm4, %v1496_v58  ;;  %1661 = vst.msk [vmem:[#allocation2 + $0xe8] sm:$0xff] %vm1631_vm4, %v1498_v59 }
 0x22e   :  { %1868 = vrot.lane.b32.xlu0 %v9579_v50, %s10427_s29  ;;  %1870 = vrot.lane.b32.xlu1 %v9580_v51, %s10427_s29  ;;  %v9611_v50 = vld [vmem:[%s18996_s0 + $0x2d2] sm:$0xff]  ;;  %v9612_v51 = vld [vmem:[%s18996_s0 + $0x2da] sm:$0xff] }
 0x230   :  { %v1500_v6 = vpop.permute.xlu0 %1499  ;;  %v1502_v7 = vpop.permute.xlu1 %1501 }
 0x231   :  { %1662 = vst.msk [vmem:[#allocation2 + $0xf0] sm:$0xff] %vm1631_vm4, %v1500_v6  ;;  %1663 = vst.msk [vmem:[#allocation2 + $0xf8] sm:$0xff] %vm1631_vm4, %v1502_v7 }
 0x232   :  { %1872 = vrot.lane.b32.xlu0 %v9581_v62, %s10427_s29  ;;  %1874 = vrot.lane.b32.xlu1 %v9582_v63, %s10427_s29  ;;  %v9613_v62 = vld [vmem:[%s18996_s0 + $0x2ea] sm:$0xff]  ;;  %v9614_v63 = vld [vmem:[%s18996_s0 + $0x2f2] sm:$0xff] }
 0x234   :  { %v1504_v44 = vpop.permute.xlu0 %1503  ;;  %v1506_v45 = vpop.permute.xlu1 %1505 }
 0x235   :  { %1664 = vst.msk [vmem:[#allocation2 + $0x100] sm:$0xff] %vm1631_vm4, %v1504_v44  ;;  %1665 = vst.msk [vmem:[#allocation2 + $0x108] sm:$0xff] %vm1631_vm4, %v1506_v45 }
 0x236   :  { %1876 = vrot.lane.b32.xlu0 %v9583_v15, %s10427_s29  ;;  %1878 = vrot.lane.b32.xlu1 %v9584_v16, %s10427_s29  ;;  %v9615_v15 = vld [vmem:[%s18996_s0 + $0x302] sm:$0xff]  ;;  %v9616_v16 = vld [vmem:[%s18996_s0 + $0x30a] sm:$0xff] }
 0x238   :  { %v1508_v60 = vpop.permute.xlu0 %1507  ;;  %v1510_v61 = vpop.permute.xlu1 %1509 }
 0x239   :  { %1666 = vst.msk [vmem:[#allocation2 + $0x110] sm:$0xff] %vm1631_vm4, %v1508_v60  ;;  %1667 = vst.msk [vmem:[#allocation2 + $0x118] sm:$0xff] %vm1631_vm4, %v1510_v61 }
 0x23a   :  { %1880 = vrot.lane.b32.xlu0 %v9585_v28, %s10427_s29  ;;  %1882 = vrot.lane.b32.xlu1 %v9586_v29, %s10427_s29  ;;  %v9617_v28 = vld [vmem:[%s18996_s0 + $0x31a] sm:$0xff]  ;;  %v9618_v29 = vld [vmem:[%s18996_s0 + $0x322] sm:$0xff] }
 0x23c   :  { %v1512_v13 = vpop.permute.xlu0 %1511  ;;  %v1514_v17 = vpop.permute.xlu1 %1513 }
 0x23d   :  { %1668 = vst.msk [vmem:[#allocation2 + $0x120] sm:$0xff] %vm1631_vm4, %v1512_v13  ;;  %1669 = vst.msk [vmem:[#allocation2 + $0x128] sm:$0xff] %vm1631_vm4, %v1514_v17 }
 0x23e   :  { %1884 = vrot.lane.b32.xlu0 %v9587_v11, %s10427_s29  ;;  %1886 = vrot.lane.b32.xlu1 %v9588_v54, %s10427_s29  ;;  %v9619_v11 = vld [vmem:[%s18996_s0 + $0x332] sm:$0xff]  ;;  %v9620_v54 = vld [vmem:[%s18996_s0 + $0x33a] sm:$0xff] }
 0x240   :  { %v1516_v20 = vpop.permute.xlu0 %1515  ;;  %v1518_v23 = vpop.permute.xlu1 %1517 }
 0x241   :  { %1670 = vst.msk [vmem:[#allocation2 + $0x130] sm:$0xff] %vm1631_vm4, %v1516_v20  ;;  %1671 = vst.msk [vmem:[#allocation2 + $0x138] sm:$0xff] %vm1631_vm4, %v1518_v23 }
 0x242   :  { %1888 = vrot.lane.b32.xlu0 %v9589_v18, %s10427_s29  ;;  %1890 = vrot.lane.b32.xlu1 %v9590_v19, %s10427_s29  ;;  %v9621_v18 = vld [vmem:[%s18996_s0 + $0x30] sm:$0xff]  ;;  %v9622_v19 = vld [vmem:[%s18996_s0 + $0x38] sm:$0xff] }
 0x244   :  { %v1520_v26 = vpop.permute.xlu0 %1519  ;;  %v1522_v27 = vpop.permute.xlu1 %1521 }
 0x245   :  { %1672 = vst.msk [vmem:[#allocation2 + $0x140] sm:$0xff] %vm1631_vm4, %v1520_v26  ;;  %1673 = vst.msk [vmem:[#allocation2 + $0x148] sm:$0xff] %vm1631_vm4, %v1522_v27 }
 0x246   :  { %1892 = vrot.lane.b32.xlu0 %v9591_v24, %s10427_s29  ;;  %1894 = vrot.lane.b32.xlu1 %v9592_v25, %s10427_s29  ;;  %v9623_v24 = vld [vmem:[%s18996_s0 + $0x48] sm:$0xff]  ;;  %v9624_v25 = vld [vmem:[%s18996_s0 + $0x50] sm:$0xff] }
 0x248   :  { %v1524_v32 = vpop.permute.xlu0 %1523  ;;  %v1526_v33 = vpop.permute.xlu1 %1525 }
 0x249   :  { %1674 = vst.msk [vmem:[#allocation2 + $0x150] sm:$0xff] %vm1631_vm4, %v1524_v32  ;;  %1675 = vst.msk [vmem:[#allocation2 + $0x158] sm:$0xff] %vm1631_vm4, %v1526_v33 }
 0x24a   :  { %1896 = vrot.lane.b32.xlu0 %v9593_v30, %s10427_s29  ;;  %1898 = vrot.lane.b32.xlu1 %v9594_v31, %s10427_s29  ;;  %v9625_v30 = vld [vmem:[%s18996_s0 + $0x60] sm:$0xff]  ;;  %v9626_v31 = vld [vmem:[%s18996_s0 + $0x68] sm:$0xff] }
 0x24c   :  { %v1528_v38 = vpop.permute.xlu0 %1527  ;;  %v1530_v39 = vpop.permute.xlu1 %1529 }
 0x24d   :  { %1676 = vst.msk [vmem:[#allocation2 + $0x160] sm:$0xff] %vm1631_vm4, %v1528_v38  ;;  %1677 = vst.msk [vmem:[#allocation2 + $0x168] sm:$0xff] %vm1631_vm4, %v1530_v39 }
 0x24e   :  { %1900 = vrot.lane.b32.xlu0 %v9595_v34, %s10427_s29  ;;  %1902 = vrot.lane.b32.xlu1 %v9596_v36, %s10427_s29  ;;  %v9627_v34 = vld [vmem:[%s18996_s0 + $0x78] sm:$0xff]  ;;  %v9628_v36 = vld [vmem:[%s18996_s0 + $0x80] sm:$0xff] }
 0x250   :  { %v1532_v42 = vpop.permute.xlu0 %1531  ;;  %v1534_v43 = vpop.permute.xlu1 %1533 }
 0x251   :  { %1678 = vst.msk [vmem:[#allocation2 + $0x170] sm:$0xff] %vm1631_vm4, %v1532_v42  ;;  %1679 = vst.msk [vmem:[#allocation2 + $0x178] sm:$0xff] %vm1631_vm4, %v1534_v43 }
 0x252   :  { %1904 = vrot.lane.b32.xlu0 %v9597_v40, %s10427_s29  ;;  %1906 = vrot.lane.b32.xlu1 %v9598_v41, %s10427_s29  ;;  %v9629_v40 = vld [vmem:[%s18996_s0 + $0x90] sm:$0xff]  ;;  %v9630_v41 = vld [vmem:[%s18996_s0 + $0x98] sm:$0xff] }
 0x254   :  { %v1536_v48 = vpop.permute.xlu0 %1535  ;;  %v1538_v49 = vpop.permute.xlu1 %1537 }
 0x255   :  { %1680 = vst.msk [vmem:[#allocation2 + $0x180] sm:$0xff] %vm1631_vm4, %v1536_v48  ;;  %1681 = vst.msk [vmem:[#allocation2 + $0x188] sm:$0xff] %vm1631_vm4, %v1538_v49 }
 0x256   :  { %1908 = vrot.lane.b32.xlu0 %v9599_v46, %s10427_s29  ;;  %1910 = vrot.lane.b32.xlu1 %v9600_v47, %s10427_s29  ;;  %v9631_v46 = vld [vmem:[%s18996_s0 + $0xa8] sm:$0xff]  ;;  %v9632_v47 = vld [vmem:[%s18996_s0 + $0xb0] sm:$0xff] }
 0x258   :  { %v1540_v56 = vpop.permute.xlu0 %1539  ;;  %v1542_v57 = vpop.permute.xlu1 %1541 }
 0x259   :  { %1682 = vst.msk [vmem:[#allocation2 + $0x190] sm:$0xff] %vm1631_vm4, %v1540_v56  ;;  %1683 = vst.msk [vmem:[#allocation2 + $0x198] sm:$0xff] %vm1631_vm4, %v1542_v57 }
 0x25a   :  { %1912 = vrot.lane.b32.xlu0 %v9601_v52, %s10427_s29  ;;  %1914 = vrot.lane.b32.xlu1 %v9602_v53, %s10427_s29  ;;  %v9633_v52 = vld [vmem:[%s18996_s0 + $0xc0] sm:$0xff]  ;;  %v9634_v53 = vld [vmem:[%s18996_s0 + $0xc8] sm:$0xff] }
 0x25c   :  { %v1544_v10 = vpop.permute.xlu0 %1543  ;;  %v1546_v55 = vpop.permute.xlu1 %1545 }
 0x25d   :  { %1684 = vst.msk [vmem:[#allocation2 + $0x1a0] sm:$0xff] %vm1631_vm4, %v1544_v10  ;;  %1685 = vst.msk [vmem:[#allocation2 + $0x1a8] sm:$0xff] %vm1631_vm4, %v1546_v55 }
 0x25e   :  { %1916 = vrot.lane.b32.xlu0 %v9603_v2, %s10427_s29  ;;  %1918 = vrot.lane.b32.xlu1 %v9604_v3, %s10427_s29  ;;  %v9635_v2 = vld [vmem:[%s18996_s0 + $0xd8] sm:$0xff]  ;;  %v9636_v3 = vld [vmem:[%s18996_s0 + $0xe0] sm:$0xff] }
 0x260   :  { %v1548_v4 = vpop.permute.xlu0 %1547  ;;  %v1550_v5 = vpop.permute.xlu1 %1549 }
 0x261   :  { %1686 = vst.msk [vmem:[#allocation2 + $0x1b0] sm:$0xff] %vm1631_vm4, %v1548_v4  ;;  %1687 = vst.msk [vmem:[#allocation2 + $0x1b8] sm:$0xff] %vm1631_vm4, %v1550_v5 }
 0x262   :  { %1920 = vrot.lane.b32.xlu0 %v9605_v0, %s10427_s29  ;;  %1922 = vrot.lane.b32.xlu1 %v9606_v1, %s10427_s29  ;;  %v9637_v0 = vld [vmem:[%s18996_s0 + $0xf0] sm:$0xff]  ;;  %v9638_v1 = vld [vmem:[%s18996_s0 + $0xf8] sm:$0xff] }
 0x264   :  { %v1552_v12 = vpop.permute.xlu0 %1551  ;;  %v1554_v14 = vpop.permute.xlu1 %1553 }
 0x265   :  { %1688 = vst.msk [vmem:[#allocation2 + $0x1c0] sm:$0xff] %vm1631_vm4, %v1552_v12  ;;  %1689 = vst.msk [vmem:[#allocation2 + $0x1c8] sm:$0xff] %vm1631_vm4, %v1554_v14 }
 0x266   :  { %1924 = vrot.lane.b32.xlu0 %v9607_v8, %s10427_s29  ;;  %1926 = vrot.lane.b32.xlu1 %v9608_v9, %s10427_s29  ;;  %v9639_v8 = vld [vmem:[%s18996_s0 + $0x108] sm:$0xff]  ;;  %v9640_v9 = vld [vmem:[%s18996_s0 + $0x110] sm:$0xff] }
 0x268   :  { %v1556_v35 = vpop.permute.xlu0 %1555  ;;  %v1558_v37 = vpop.permute.xlu1 %1557 }
 0x269   :  { %1690 = vst.msk [vmem:[#allocation2 + $0x1d0] sm:$0xff] %vm1631_vm4, %v1556_v35  ;;  %1691 = vst.msk [vmem:[#allocation2 + $0x1d8] sm:$0xff] %vm1631_vm4, %v1558_v37 }
 0x26a   :  { %1928 = vrot.lane.b32.xlu0 %v9609_v21, %s10427_s29  ;;  %1930 = vrot.lane.b32.xlu1 %v9610_v22, %s10427_s29  ;;  %v9641_v21 = vld [vmem:[%s18996_s0 + $0x120] sm:$0xff]  ;;  %v9642_v22 = vld [vmem:[%s18996_s0 + $0x128] sm:$0xff] }
 0x26c   :  { %v1560_v58 = vpop.permute.xlu0 %1559  ;;  %v1562_v59 = vpop.permute.xlu1 %1561 }
 0x26d   :  { %1692 = vst.msk [vmem:[#allocation2 + $0x1e0] sm:$0xff] %vm1631_vm4, %v1560_v58  ;;  %1693 = vst.msk [vmem:[#allocation2 + $0x1e8] sm:$0xff] %vm1631_vm4, %v1562_v59 }
 0x26e   :  { %1932 = vrot.lane.b32.xlu0 %v9611_v50, %s10427_s29  ;;  %1934 = vrot.lane.b32.xlu1 %v9612_v51, %s10427_s29  ;;  %v9643_v50 = vld [vmem:[%s18996_s0 + $0x138] sm:$0xff]  ;;  %v9644_v51 = vld [vmem:[%s18996_s0 + $0x140] sm:$0xff] }
 0x270   :  { %v1564_v6 = vpop.permute.xlu0 %1563  ;;  %v1566_v7 = vpop.permute.xlu1 %1565 }
 0x271   :  { %1694 = vst.msk [vmem:[#allocation2 + $0x1f0] sm:$0xff] %vm1631_vm4, %v1564_v6  ;;  %1695 = vst.msk [vmem:[#allocation2 + $0x1f8] sm:$0xff] %vm1631_vm4, %v1566_v7  ;;  %vm7077_vm4 = vcmask 458112  }
 0x272   :  { %1936 = vrot.lane.b32.xlu0 %v9613_v62, %s10427_s29  ;;  %1938 = vrot.lane.b32.xlu1 %v9614_v63, %s10427_s29  ;;  %v9645_v62 = vld [vmem:[%s18996_s0 + $0x150] sm:$0xff]  ;;  %v9646_v63 = vld [vmem:[%s18996_s0 + $0x158] sm:$0xff] }
 0x274   :  { %v1825_v44 = vpop.permute.xlu0 %1824  ;;  %v1827_v45 = vpop.permute.xlu1 %1826 }
 0x275   :  { %2017 = vst.msk [vmem:[#allocation2] sm:$0xff] %vm2016_vm5, %v1825_v44  ;;  %2018 = vst.msk [vmem:[#allocation2 + $0x8] sm:$0xff] %vm2016_vm5, %v1827_v45 }
 0x276   :  { %1940 = vrot.lane.b32.xlu0 %v9615_v15, %s10427_s29  ;;  %1942 = vrot.lane.b32.xlu1 %v9616_v16, %s10427_s29  ;;  %v9647_v15 = vld [vmem:[%s18996_s0 + $0x168] sm:$0xff]  ;;  %v9648_v16 = vld [vmem:[%s18996_s0 + $0x170] sm:$0xff] }
 0x278   :  { %v1829_v60 = vpop.permute.xlu0 %1828  ;;  %v1831_v61 = vpop.permute.xlu1 %1830 }
 0x279   :  { %2019 = vst.msk [vmem:[#allocation2 + $0x10] sm:$0xff] %vm2016_vm5, %v1829_v60  ;;  %2020 = vst.msk [vmem:[#allocation2 + $0x18] sm:$0xff] %vm2016_vm5, %v1831_v61 }
 0x27a   :  { %1944 = vrot.lane.b32.xlu0 %v9617_v28, %s10427_s29  ;;  %1946 = vrot.lane.b32.xlu1 %v9618_v29, %s10427_s29  ;;  %v9649_v28 = vld [vmem:[%s18996_s0 + $0x180] sm:$0xff]  ;;  %v9650_v29 = vld [vmem:[%s18996_s0 + $0x188] sm:$0xff] }
 0x27c   :  { %v1833_v13 = vpop.permute.xlu0 %1832  ;;  %v1835_v17 = vpop.permute.xlu1 %1834 }
 0x27d   :  { %2021 = vst.msk [vmem:[#allocation2 + $0x20] sm:$0xff] %vm2016_vm5, %v1833_v13  ;;  %2022 = vst.msk [vmem:[#allocation2 + $0x28] sm:$0xff] %vm2016_vm5, %v1835_v17 }
 0x27e   :  { %1948 = vrot.lane.b32.xlu0 %v9619_v11, %s10427_s29  ;;  %1950 = vrot.lane.b32.xlu1 %v9620_v54, %s10427_s29  ;;  %v9651_v11 = vld [vmem:[%s18996_s0 + $0x198] sm:$0xff]  ;;  %v9652_v54 = vld [vmem:[%s18996_s0 + $0x1a0] sm:$0xff] }
 0x280   :  { %v1837_v20 = vpop.permute.xlu0 %1836  ;;  %v1839_v23 = vpop.permute.xlu1 %1838 }
 0x281   :  { %2023 = vst.msk [vmem:[#allocation2 + $0x30] sm:$0xff] %vm2016_vm5, %v1837_v20  ;;  %2024 = vst.msk [vmem:[#allocation2 + $0x38] sm:$0xff] %vm2016_vm5, %v1839_v23 }
 0x282   :  { %2210 = vrot.lane.b32.xlu0 %v9621_v18, %s10428_s15  ;;  %2212 = vrot.lane.b32.xlu1 %v9622_v19, %s10428_s15  ;;  %v9653_v18 = vld [vmem:[%s18996_s0 + $0x1e0] sm:$0xff]  ;;  %v9654_v19 = vld [vmem:[%s18996_s0 + $0x1e8] sm:$0xff] }
 0x284   :  { %v1841_v26 = vpop.permute.xlu0 %1840  ;;  %v1843_v27 = vpop.permute.xlu1 %1842 }
 0x285   :  { %2025 = vst.msk [vmem:[#allocation2 + $0x40] sm:$0xff] %vm2016_vm5, %v1841_v26  ;;  %2026 = vst.msk [vmem:[#allocation2 + $0x48] sm:$0xff] %vm2016_vm5, %v1843_v27 }
 0x286   :  { %2214 = vrot.lane.b32.xlu0 %v9623_v24, %s10428_s15  ;;  %2216 = vrot.lane.b32.xlu1 %v9624_v25, %s10428_s15  ;;  %v9655_v24 = vld [vmem:[%s18996_s0 + $0x1f8] sm:$0xff]  ;;  %v9656_v25 = vld [vmem:[%s18996_s0 + $0x200] sm:$0xff] }
 0x288   :  { %v1845_v32 = vpop.permute.xlu0 %1844  ;;  %v1847_v33 = vpop.permute.xlu1 %1846 }
 0x289   :  { %2027 = vst.msk [vmem:[#allocation2 + $0x50] sm:$0xff] %vm2016_vm5, %v1845_v32  ;;  %2028 = vst.msk [vmem:[#allocation2 + $0x58] sm:$0xff] %vm2016_vm5, %v1847_v33 }
 0x28a   :  { %2218 = vrot.lane.b32.xlu0 %v9625_v30, %s10428_s15  ;;  %2220 = vrot.lane.b32.xlu1 %v9626_v31, %s10428_s15  ;;  %v9657_v30 = vld [vmem:[%s18996_s0 + $0x210] sm:$0xff]  ;;  %v9658_v31 = vld [vmem:[%s18996_s0 + $0x218] sm:$0xff] }
 0x28c   :  { %v1849_v38 = vpop.permute.xlu0 %1848  ;;  %v1851_v39 = vpop.permute.xlu1 %1850 }
 0x28d   :  { %2029 = vst.msk [vmem:[#allocation2 + $0x60] sm:$0xff] %vm2016_vm5, %v1849_v38  ;;  %2030 = vst.msk [vmem:[#allocation2 + $0x68] sm:$0xff] %vm2016_vm5, %v1851_v39 }
 0x28e   :  { %2222 = vrot.lane.b32.xlu0 %v9627_v34, %s10428_s15  ;;  %2224 = vrot.lane.b32.xlu1 %v9628_v36, %s10428_s15  ;;  %v9659_v34 = vld [vmem:[%s18996_s0 + $0x228] sm:$0xff]  ;;  %v9660_v36 = vld [vmem:[%s18996_s0 + $0x230] sm:$0xff] }
 0x290   :  { %v1853_v42 = vpop.permute.xlu0 %1852  ;;  %v1855_v43 = vpop.permute.xlu1 %1854 }
 0x291   :  { %2031 = vst.msk [vmem:[#allocation2 + $0x70] sm:$0xff] %vm2016_vm5, %v1853_v42  ;;  %2032 = vst.msk [vmem:[#allocation2 + $0x78] sm:$0xff] %vm2016_vm5, %v1855_v43 }
 0x292   :  { %2226 = vrot.lane.b32.xlu0 %v9629_v40, %s10428_s15  ;;  %2228 = vrot.lane.b32.xlu1 %v9630_v41, %s10428_s15  ;;  %v9661_v40 = vld [vmem:[%s18996_s0 + $0x240] sm:$0xff]  ;;  %v9662_v41 = vld [vmem:[%s18996_s0 + $0x248] sm:$0xff] }
 0x294   :  { %v1857_v48 = vpop.permute.xlu0 %1856  ;;  %v1859_v49 = vpop.permute.xlu1 %1858 }
 0x295   :  { %2033 = vst.msk [vmem:[#allocation2 + $0x80] sm:$0xff] %vm2016_vm5, %v1857_v48  ;;  %2034 = vst.msk [vmem:[#allocation2 + $0x88] sm:$0xff] %vm2016_vm5, %v1859_v49 }
 0x296   :  { %2230 = vrot.lane.b32.xlu0 %v9631_v46, %s10428_s15  ;;  %2232 = vrot.lane.b32.xlu1 %v9632_v47, %s10428_s15  ;;  %v9663_v46 = vld [vmem:[%s18996_s0 + $0x258] sm:$0xff]  ;;  %v9664_v47 = vld [vmem:[%s18996_s0 + $0x260] sm:$0xff] }
 0x298   :  { %v1861_v56 = vpop.permute.xlu0 %1860  ;;  %v1863_v57 = vpop.permute.xlu1 %1862 }
 0x299   :  { %2035 = vst.msk [vmem:[#allocation2 + $0x90] sm:$0xff] %vm2016_vm5, %v1861_v56  ;;  %2036 = vst.msk [vmem:[#allocation2 + $0x98] sm:$0xff] %vm2016_vm5, %v1863_v57 }
 0x29a   :  { %2234 = vrot.lane.b32.xlu0 %v9633_v52, %s10428_s15  ;;  %2236 = vrot.lane.b32.xlu1 %v9634_v53, %s10428_s15  ;;  %v9665_v52 = vld [vmem:[%s18996_s0 + $0x270] sm:$0xff]  ;;  %v9666_v53 = vld [vmem:[%s18996_s0 + $0x278] sm:$0xff] }
 0x29c   :  { %v1865_v10 = vpop.permute.xlu0 %1864  ;;  %v1867_v55 = vpop.permute.xlu1 %1866 }
 0x29d   :  { %2037 = vst.msk [vmem:[#allocation2 + $0xa0] sm:$0xff] %vm2016_vm5, %v1865_v10  ;;  %2038 = vst.msk [vmem:[#allocation2 + $0xa8] sm:$0xff] %vm2016_vm5, %v1867_v55 }
 0x29e   :  { %2238 = vrot.lane.b32.xlu0 %v9635_v2, %s10428_s15  ;;  %2240 = vrot.lane.b32.xlu1 %v9636_v3, %s10428_s15  ;;  %v9667_v2 = vld [vmem:[%s18996_s0 + $0x288] sm:$0xff]  ;;  %v9668_v3 = vld [vmem:[%s18996_s0 + $0x290] sm:$0xff] }
 0x2a0   :  { %v1869_v4 = vpop.permute.xlu0 %1868  ;;  %v1871_v5 = vpop.permute.xlu1 %1870 }
 0x2a1   :  { %2039 = vst.msk [vmem:[#allocation2 + $0xb0] sm:$0xff] %vm2016_vm5, %v1869_v4  ;;  %2040 = vst.msk [vmem:[#allocation2 + $0xb8] sm:$0xff] %vm2016_vm5, %v1871_v5 }
 0x2a2   :  { %2242 = vrot.lane.b32.xlu0 %v9637_v0, %s10428_s15  ;;  %2244 = vrot.lane.b32.xlu1 %v9638_v1, %s10428_s15  ;;  %v9669_v0 = vld [vmem:[%s18996_s0 + $0x2a0] sm:$0xff]  ;;  %v9670_v1 = vld [vmem:[%s18996_s0 + $0x2a8] sm:$0xff] }
 0x2a4   :  { %v1873_v12 = vpop.permute.xlu0 %1872  ;;  %v1875_v14 = vpop.permute.xlu1 %1874 }
 0x2a5   :  { %2041 = vst.msk [vmem:[#allocation2 + $0xc0] sm:$0xff] %vm2016_vm5, %v1873_v12  ;;  %2042 = vst.msk [vmem:[#allocation2 + $0xc8] sm:$0xff] %vm2016_vm5, %v1875_v14 }
 0x2a6   :  { %2246 = vrot.lane.b32.xlu0 %v9639_v8, %s10428_s15  ;;  %2248 = vrot.lane.b32.xlu1 %v9640_v9, %s10428_s15  ;;  %v9671_v8 = vld [vmem:[%s18996_s0 + $0x2b8] sm:$0xff]  ;;  %v9672_v9 = vld [vmem:[%s18996_s0 + $0x2c0] sm:$0xff] }
 0x2a8   :  { %v1877_v35 = vpop.permute.xlu0 %1876  ;;  %v1879_v37 = vpop.permute.xlu1 %1878 }
 0x2a9   :  { %2043 = vst.msk [vmem:[#allocation2 + $0xd0] sm:$0xff] %vm2016_vm5, %v1877_v35  ;;  %2044 = vst.msk [vmem:[#allocation2 + $0xd8] sm:$0xff] %vm2016_vm5, %v1879_v37 }
 0x2aa   :  { %2250 = vrot.lane.b32.xlu0 %v9641_v21, %s10428_s15  ;;  %2252 = vrot.lane.b32.xlu1 %v9642_v22, %s10428_s15  ;;  %v9673_v21 = vld [vmem:[%s18996_s0 + $0x2d0] sm:$0xff]  ;;  %v9674_v22 = vld [vmem:[%s18996_s0 + $0x2d8] sm:$0xff] }
 0x2ac   :  { %v1881_v58 = vpop.permute.xlu0 %1880  ;;  %v1883_v59 = vpop.permute.xlu1 %1882 }
 0x2ad   :  { %2045 = vst.msk [vmem:[#allocation2 + $0xe0] sm:$0xff] %vm2016_vm5, %v1881_v58  ;;  %2046 = vst.msk [vmem:[#allocation2 + $0xe8] sm:$0xff] %vm2016_vm5, %v1883_v59 }
 0x2ae   :  { %2254 = vrot.lane.b32.xlu0 %v9643_v50, %s10428_s15  ;;  %2256 = vrot.lane.b32.xlu1 %v9644_v51, %s10428_s15  ;;  %v9675_v50 = vld [vmem:[%s18996_s0 + $0x2e8] sm:$0xff]  ;;  %v9676_v51 = vld [vmem:[%s18996_s0 + $0x2f0] sm:$0xff] }
 0x2b0   :  { %v1885_v6 = vpop.permute.xlu0 %1884  ;;  %v1887_v7 = vpop.permute.xlu1 %1886 }
 0x2b1   :  { %2047 = vst.msk [vmem:[#allocation2 + $0xf0] sm:$0xff] %vm2016_vm5, %v1885_v6  ;;  %2048 = vst.msk [vmem:[#allocation2 + $0xf8] sm:$0xff] %vm2016_vm5, %v1887_v7 }
 0x2b2   :  { %2258 = vrot.lane.b32.xlu0 %v9645_v62, %s10428_s15  ;;  %2260 = vrot.lane.b32.xlu1 %v9646_v63, %s10428_s15  ;;  %v9677_v62 = vld [vmem:[%s18996_s0 + $0x300] sm:$0xff]  ;;  %v9678_v63 = vld [vmem:[%s18996_s0 + $0x308] sm:$0xff] }
 0x2b4   :  { %v1889_v44 = vpop.permute.xlu0 %1888  ;;  %v1891_v45 = vpop.permute.xlu1 %1890 }
 0x2b5   :  { %2049 = vst.msk [vmem:[#allocation2 + $0x100] sm:$0xff] %vm2016_vm5, %v1889_v44  ;;  %2050 = vst.msk [vmem:[#allocation2 + $0x108] sm:$0xff] %vm2016_vm5, %v1891_v45 }
 0x2b6   :  { %2262 = vrot.lane.b32.xlu0 %v9647_v15, %s10428_s15  ;;  %2264 = vrot.lane.b32.xlu1 %v9648_v16, %s10428_s15  ;;  %v9679_v15 = vld [vmem:[%s18996_s0 + $0x318] sm:$0xff]  ;;  %v9680_v16 = vld [vmem:[%s18996_s0 + $0x320] sm:$0xff] }
 0x2b8   :  { %v1893_v60 = vpop.permute.xlu0 %1892  ;;  %v1895_v61 = vpop.permute.xlu1 %1894 }
 0x2b9   :  { %2051 = vst.msk [vmem:[#allocation2 + $0x110] sm:$0xff] %vm2016_vm5, %v1893_v60  ;;  %2052 = vst.msk [vmem:[#allocation2 + $0x118] sm:$0xff] %vm2016_vm5, %v1895_v61 }
 0x2ba   :  { %2266 = vrot.lane.b32.xlu0 %v9649_v28, %s10428_s15  ;;  %2268 = vrot.lane.b32.xlu1 %v9650_v29, %s10428_s15  ;;  %v9681_v28 = vld [vmem:[%s18996_s0 + $0x330] sm:$0xff]  ;;  %v9682_v29 = vld [vmem:[%s18996_s0 + $0x338] sm:$0xff] }
 0x2bc   :  { %v1897_v13 = vpop.permute.xlu0 %1896  ;;  %v1899_v17 = vpop.permute.xlu1 %1898 }
 0x2bd   :  { %2053 = vst.msk [vmem:[#allocation2 + $0x120] sm:$0xff] %vm2016_vm5, %v1897_v13  ;;  %2054 = vst.msk [vmem:[#allocation2 + $0x128] sm:$0xff] %vm2016_vm5, %v1899_v17 }
 0x2be   :  { %2270 = vrot.lane.b32.xlu0 %v9651_v11, %s10428_s15  ;;  %2272 = vrot.lane.b32.xlu1 %v9652_v54, %s10428_s15  ;;  %v9683_v11 = vld [vmem:[%s18996_s0 + $0x348] sm:$0xff]  ;;  %v9684_v54 = vld [vmem:[%s18996_s0 + $0x350] sm:$0xff] }
 0x2c0   :  { %v1901_v20 = vpop.permute.xlu0 %1900  ;;  %v1903_v23 = vpop.permute.xlu1 %1902 }
 0x2c1   :  { %2055 = vst.msk [vmem:[#allocation2 + $0x130] sm:$0xff] %vm2016_vm5, %v1901_v20  ;;  %2056 = vst.msk [vmem:[#allocation2 + $0x138] sm:$0xff] %vm2016_vm5, %v1903_v23 }
 0x2c2   :  { %2274 = vrot.lane.b32.xlu0 %v9653_v18, %s10428_s15  ;;  %2276 = vrot.lane.b32.xlu1 %v9654_v19, %s10428_s15  ;;  %v9685_v18 = vld [vmem:[%s18996_s0 + $0x31] sm:$0xff]  ;;  %v9686_v19 = vld [vmem:[%s18996_s0 + $0x39] sm:$0xff] }
 0x2c4   :  { %v1905_v26 = vpop.permute.xlu0 %1904  ;;  %v1907_v27 = vpop.permute.xlu1 %1906 }
 0x2c5   :  { %2057 = vst.msk [vmem:[#allocation2 + $0x140] sm:$0xff] %vm2016_vm5, %v1905_v26  ;;  %2058 = vst.msk [vmem:[#allocation2 + $0x148] sm:$0xff] %vm2016_vm5, %v1907_v27 }
 0x2c6   :  { %2278 = vrot.lane.b32.xlu0 %v9655_v24, %s10428_s15  ;;  %2280 = vrot.lane.b32.xlu1 %v9656_v25, %s10428_s15  ;;  %v9687_v24 = vld [vmem:[%s18996_s0 + $0x49] sm:$0xff]  ;;  %v9688_v25 = vld [vmem:[%s18996_s0 + $0x51] sm:$0xff] }
 0x2c8   :  { %v1909_v32 = vpop.permute.xlu0 %1908  ;;  %v1911_v33 = vpop.permute.xlu1 %1910 }
 0x2c9   :  { %2059 = vst.msk [vmem:[#allocation2 + $0x150] sm:$0xff] %vm2016_vm5, %v1909_v32  ;;  %2060 = vst.msk [vmem:[#allocation2 + $0x158] sm:$0xff] %vm2016_vm5, %v1911_v33 }
 0x2ca   :  { %2282 = vrot.lane.b32.xlu0 %v9657_v30, %s10428_s15  ;;  %2284 = vrot.lane.b32.xlu1 %v9658_v31, %s10428_s15  ;;  %v9689_v30 = vld [vmem:[%s18996_s0 + $0x61] sm:$0xff]  ;;  %v9690_v31 = vld [vmem:[%s18996_s0 + $0x69] sm:$0xff] }
 0x2cc   :  { %v1913_v38 = vpop.permute.xlu0 %1912  ;;  %v1915_v39 = vpop.permute.xlu1 %1914 }
 0x2cd   :  { %2061 = vst.msk [vmem:[#allocation2 + $0x160] sm:$0xff] %vm2016_vm5, %v1913_v38  ;;  %2062 = vst.msk [vmem:[#allocation2 + $0x168] sm:$0xff] %vm2016_vm5, %v1915_v39 }
 0x2ce   :  { %2286 = vrot.lane.b32.xlu0 %v9659_v34, %s10428_s15  ;;  %2288 = vrot.lane.b32.xlu1 %v9660_v36, %s10428_s15  ;;  %v9691_v34 = vld [vmem:[%s18996_s0 + $0x79] sm:$0xff]  ;;  %v9692_v36 = vld [vmem:[%s18996_s0 + $0x81] sm:$0xff] }
 0x2d0   :  { %v1917_v42 = vpop.permute.xlu0 %1916  ;;  %v1919_v43 = vpop.permute.xlu1 %1918 }
 0x2d1   :  { %2063 = vst.msk [vmem:[#allocation2 + $0x170] sm:$0xff] %vm2016_vm5, %v1917_v42  ;;  %2064 = vst.msk [vmem:[#allocation2 + $0x178] sm:$0xff] %vm2016_vm5, %v1919_v43 }
 0x2d2   :  { %2290 = vrot.lane.b32.xlu0 %v9661_v40, %s10428_s15  ;;  %2292 = vrot.lane.b32.xlu1 %v9662_v41, %s10428_s15  ;;  %v9693_v40 = vld [vmem:[%s18996_s0 + $0x91] sm:$0xff]  ;;  %v9694_v41 = vld [vmem:[%s18996_s0 + $0x99] sm:$0xff] }
 0x2d4   :  { %v1921_v48 = vpop.permute.xlu0 %1920  ;;  %v1923_v49 = vpop.permute.xlu1 %1922 }
 0x2d5   :  { %2065 = vst.msk [vmem:[#allocation2 + $0x180] sm:$0xff] %vm2016_vm5, %v1921_v48  ;;  %2066 = vst.msk [vmem:[#allocation2 + $0x188] sm:$0xff] %vm2016_vm5, %v1923_v49 }
 0x2d6   :  { %2294 = vrot.lane.b32.xlu0 %v9663_v46, %s10428_s15  ;;  %2296 = vrot.lane.b32.xlu1 %v9664_v47, %s10428_s15  ;;  %v9695_v46 = vld [vmem:[%s18996_s0 + $0xa9] sm:$0xff]  ;;  %v9696_v47 = vld [vmem:[%s18996_s0 + $0xb1] sm:$0xff] }
 0x2d8   :  { %v1925_v56 = vpop.permute.xlu0 %1924  ;;  %v1927_v57 = vpop.permute.xlu1 %1926 }
 0x2d9   :  { %2067 = vst.msk [vmem:[#allocation2 + $0x190] sm:$0xff] %vm2016_vm5, %v1925_v56  ;;  %2068 = vst.msk [vmem:[#allocation2 + $0x198] sm:$0xff] %vm2016_vm5, %v1927_v57 }
 0x2da   :  { %2298 = vrot.lane.b32.xlu0 %v9665_v52, %s10428_s15  ;;  %2300 = vrot.lane.b32.xlu1 %v9666_v53, %s10428_s15  ;;  %v9697_v52 = vld [vmem:[%s18996_s0 + $0xc1] sm:$0xff]  ;;  %v9698_v53 = vld [vmem:[%s18996_s0 + $0xc9] sm:$0xff] }
 0x2dc   :  { %v1929_v10 = vpop.permute.xlu0 %1928  ;;  %v1931_v55 = vpop.permute.xlu1 %1930 }
 0x2dd   :  { %2069 = vst.msk [vmem:[#allocation2 + $0x1a0] sm:$0xff] %vm2016_vm5, %v1929_v10  ;;  %2070 = vst.msk [vmem:[#allocation2 + $0x1a8] sm:$0xff] %vm2016_vm5, %v1931_v55 }
 0x2de   :  { %2302 = vrot.lane.b32.xlu0 %v9667_v2, %s10428_s15  ;;  %2304 = vrot.lane.b32.xlu1 %v9668_v3, %s10428_s15  ;;  %v9699_v2 = vld [vmem:[%s18996_s0 + $0xd9] sm:$0xff]  ;;  %v9700_v3 = vld [vmem:[%s18996_s0 + $0xe1] sm:$0xff] }
 0x2e0   :  { %v1933_v4 = vpop.permute.xlu0 %1932  ;;  %v1935_v5 = vpop.permute.xlu1 %1934 }
 0x2e1   :  { %2071 = vst.msk [vmem:[#allocation2 + $0x1b0] sm:$0xff] %vm2016_vm5, %v1933_v4  ;;  %2072 = vst.msk [vmem:[#allocation2 + $0x1b8] sm:$0xff] %vm2016_vm5, %v1935_v5 }
 0x2e2   :  { %2306 = vrot.lane.b32.xlu0 %v9669_v0, %s10428_s15  ;;  %2308 = vrot.lane.b32.xlu1 %v9670_v1, %s10428_s15  ;;  %v9701_v0 = vld [vmem:[%s18996_s0 + $0xf1] sm:$0xff]  ;;  %v9702_v1 = vld [vmem:[%s18996_s0 + $0xf9] sm:$0xff] }
 0x2e4   :  { %v1937_v12 = vpop.permute.xlu0 %1936  ;;  %v1939_v14 = vpop.permute.xlu1 %1938 }
 0x2e5   :  { %2073 = vst.msk [vmem:[#allocation2 + $0x1c0] sm:$0xff] %vm2016_vm5, %v1937_v12  ;;  %2074 = vst.msk [vmem:[#allocation2 + $0x1c8] sm:$0xff] %vm2016_vm5, %v1939_v14 }
 0x2e6   :  { %2310 = vrot.lane.b32.xlu0 %v9671_v8, %s10428_s15  ;;  %2312 = vrot.lane.b32.xlu1 %v9672_v9, %s10428_s15  ;;  %v9703_v8 = vld [vmem:[%s18996_s0 + $0x109] sm:$0xff]  ;;  %v9704_v9 = vld [vmem:[%s18996_s0 + $0x111] sm:$0xff] }
 0x2e8   :  { %v1941_v35 = vpop.permute.xlu0 %1940  ;;  %v1943_v37 = vpop.permute.xlu1 %1942 }
 0x2e9   :  { %2075 = vst.msk [vmem:[#allocation2 + $0x1d0] sm:$0xff] %vm2016_vm5, %v1941_v35  ;;  %2076 = vst.msk [vmem:[#allocation2 + $0x1d8] sm:$0xff] %vm2016_vm5, %v1943_v37 }
 0x2ea   :  { %2314 = vrot.lane.b32.xlu0 %v9673_v21, %s10428_s15  ;;  %2316 = vrot.lane.b32.xlu1 %v9674_v22, %s10428_s15  ;;  %v9705_v21 = vld [vmem:[%s18996_s0 + $0x121] sm:$0xff]  ;;  %v9706_v22 = vld [vmem:[%s18996_s0 + $0x129] sm:$0xff] }
 0x2ec   :  { %v1945_v58 = vpop.permute.xlu0 %1944  ;;  %v1947_v59 = vpop.permute.xlu1 %1946 }
 0x2ed   :  { %2077 = vst.msk [vmem:[#allocation2 + $0x1e0] sm:$0xff] %vm2016_vm5, %v1945_v58  ;;  %2078 = vst.msk [vmem:[#allocation2 + $0x1e8] sm:$0xff] %vm2016_vm5, %v1947_v59 }
 0x2ee   :  { %2318 = vrot.lane.b32.xlu0 %v9675_v50, %s10428_s15  ;;  %2320 = vrot.lane.b32.xlu1 %v9676_v51, %s10428_s15  ;;  %v9707_v50 = vld [vmem:[%s18996_s0 + $0x139] sm:$0xff]  ;;  %v9708_v51 = vld [vmem:[%s18996_s0 + $0x141] sm:$0xff] }
 0x2f0   :  { %v1949_v6 = vpop.permute.xlu0 %1948  ;;  %v1951_v7 = vpop.permute.xlu1 %1950 }
 0x2f1   :  { %2079 = vst.msk [vmem:[#allocation2 + $0x1f0] sm:$0xff] %vm2016_vm5, %v1949_v6  ;;  %2080 = vst.msk [vmem:[#allocation2 + $0x1f8] sm:$0xff] %vm2016_vm5, %v1951_v7  ;;  %vm7462_vm5 = vcmask 523712  }
 0x2f2   :  { %2322 = vrot.lane.b32.xlu0 %v9677_v62, %s10428_s15  ;;  %2324 = vrot.lane.b32.xlu1 %v9678_v63, %s10428_s15  ;;  %v9709_v62 = vld [vmem:[%s18996_s0 + $0x151] sm:$0xff]  ;;  %v9710_v63 = vld [vmem:[%s18996_s0 + $0x159] sm:$0xff] }
 0x2f4   :  { %v2211_v44 = vpop.permute.xlu0 %2210  ;;  %v2213_v45 = vpop.permute.xlu1 %2212 }
 0x2f5   :  { %2403 = vst.msk [vmem:[#allocation2] sm:$0xff] %vm2402_vm6, %v2211_v44  ;;  %2404 = vst.msk [vmem:[#allocation2 + $0x8] sm:$0xff] %vm2402_vm6, %v2213_v45 }
 0x2f6   :  { %2326 = vrot.lane.b32.xlu0 %v9679_v15, %s10428_s15  ;;  %2328 = vrot.lane.b32.xlu1 %v9680_v16, %s10428_s15  ;;  %v9711_v15 = vld [vmem:[%s18996_s0 + $0x169] sm:$0xff]  ;;  %v9712_v16 = vld [vmem:[%s18996_s0 + $0x171] sm:$0xff] }
 0x2f8   :  { %v2215_v60 = vpop.permute.xlu0 %2214  ;;  %v2217_v61 = vpop.permute.xlu1 %2216 }
 0x2f9   :  { %2405 = vst.msk [vmem:[#allocation2 + $0x10] sm:$0xff] %vm2402_vm6, %v2215_v60  ;;  %2406 = vst.msk [vmem:[#allocation2 + $0x18] sm:$0xff] %vm2402_vm6, %v2217_v61 }
 0x2fa   :  { %2330 = vrot.lane.b32.xlu0 %v9681_v28, %s10428_s15  ;;  %2332 = vrot.lane.b32.xlu1 %v9682_v29, %s10428_s15  ;;  %v9713_v28 = vld [vmem:[%s18996_s0 + $0x181] sm:$0xff]  ;;  %v9714_v29 = vld [vmem:[%s18996_s0 + $0x189] sm:$0xff] }
 0x2fc   :  { %v2219_v13 = vpop.permute.xlu0 %2218  ;;  %v2221_v17 = vpop.permute.xlu1 %2220 }
 0x2fd   :  { %2407 = vst.msk [vmem:[#allocation2 + $0x20] sm:$0xff] %vm2402_vm6, %v2219_v13  ;;  %2408 = vst.msk [vmem:[#allocation2 + $0x28] sm:$0xff] %vm2402_vm6, %v2221_v17 }
 0x2fe   :  { %2334 = vrot.lane.b32.xlu0 %v9683_v11, %s10428_s15  ;;  %2336 = vrot.lane.b32.xlu1 %v9684_v54, %s10428_s15  ;;  %v9715_v11 = vld [vmem:[%s18996_s0 + $0x199] sm:$0xff]  ;;  %v9716_v54 = vld [vmem:[%s18996_s0 + $0x1a1] sm:$0xff] }
 0x300   :  { %v2223_v20 = vpop.permute.xlu0 %2222  ;;  %v2225_v23 = vpop.permute.xlu1 %2224 }
 0x301   :  { %2409 = vst.msk [vmem:[#allocation2 + $0x30] sm:$0xff] %vm2402_vm6, %v2223_v20  ;;  %2410 = vst.msk [vmem:[#allocation2 + $0x38] sm:$0xff] %vm2402_vm6, %v2225_v23 }
 0x302   :  { %2595 = vrot.lane.b32.xlu0 %v9685_v18, %s10429_s23  ;;  %2597 = vrot.lane.b32.xlu1 %v9686_v19, %s10429_s23  ;;  %v9717_v18 = vld [vmem:[%s18996_s0 + $0x1e1] sm:$0xff]  ;;  %v9718_v19 = vld [vmem:[%s18996_s0 + $0x1e9] sm:$0xff] }
 0x304   :  { %v2227_v26 = vpop.permute.xlu0 %2226  ;;  %v2229_v27 = vpop.permute.xlu1 %2228 }
 0x305   :  { %2411 = vst.msk [vmem:[#allocation2 + $0x40] sm:$0xff] %vm2402_vm6, %v2227_v26  ;;  %2412 = vst.msk [vmem:[#allocation2 + $0x48] sm:$0xff] %vm2402_vm6, %v2229_v27 }
 0x306   :  { %2599 = vrot.lane.b32.xlu0 %v9687_v24, %s10429_s23  ;;  %2601 = vrot.lane.b32.xlu1 %v9688_v25, %s10429_s23  ;;  %v9719_v24 = vld [vmem:[%s18996_s0 + $0x1f9] sm:$0xff]  ;;  %v9720_v25 = vld [vmem:[%s18996_s0 + $0x201] sm:$0xff] }
 0x308   :  { %v2231_v32 = vpop.permute.xlu0 %2230  ;;  %v2233_v33 = vpop.permute.xlu1 %2232 }
 0x309   :  { %2413 = vst.msk [vmem:[#allocation2 + $0x50] sm:$0xff] %vm2402_vm6, %v2231_v32  ;;  %2414 = vst.msk [vmem:[#allocation2 + $0x58] sm:$0xff] %vm2402_vm6, %v2233_v33 }
 0x30a   :  { %2603 = vrot.lane.b32.xlu0 %v9689_v30, %s10429_s23  ;;  %2605 = vrot.lane.b32.xlu1 %v9690_v31, %s10429_s23  ;;  %v9721_v30 = vld [vmem:[%s18996_s0 + $0x211] sm:$0xff]  ;;  %v9722_v31 = vld [vmem:[%s18996_s0 + $0x219] sm:$0xff] }
 0x30c   :  { %v2235_v38 = vpop.permute.xlu0 %2234  ;;  %v2237_v39 = vpop.permute.xlu1 %2236 }
 0x30d   :  { %2415 = vst.msk [vmem:[#allocation2 + $0x60] sm:$0xff] %vm2402_vm6, %v2235_v38  ;;  %2416 = vst.msk [vmem:[#allocation2 + $0x68] sm:$0xff] %vm2402_vm6, %v2237_v39 }
 0x30e   :  { %2607 = vrot.lane.b32.xlu0 %v9691_v34, %s10429_s23  ;;  %2609 = vrot.lane.b32.xlu1 %v9692_v36, %s10429_s23  ;;  %v9723_v34 = vld [vmem:[%s18996_s0 + $0x229] sm:$0xff]  ;;  %v9724_v36 = vld [vmem:[%s18996_s0 + $0x231] sm:$0xff] }
 0x310   :  { %v2239_v42 = vpop.permute.xlu0 %2238  ;;  %v2241_v43 = vpop.permute.xlu1 %2240 }
 0x311   :  { %2417 = vst.msk [vmem:[#allocation2 + $0x70] sm:$0xff] %vm2402_vm6, %v2239_v42  ;;  %2418 = vst.msk [vmem:[#allocation2 + $0x78] sm:$0xff] %vm2402_vm6, %v2241_v43 }
 0x312   :  { %2611 = vrot.lane.b32.xlu0 %v9693_v40, %s10429_s23  ;;  %2613 = vrot.lane.b32.xlu1 %v9694_v41, %s10429_s23  ;;  %v9725_v40 = vld [vmem:[%s18996_s0 + $0x241] sm:$0xff]  ;;  %v9726_v41 = vld [vmem:[%s18996_s0 + $0x249] sm:$0xff] }
 0x314   :  { %v2243_v48 = vpop.permute.xlu0 %2242  ;;  %v2245_v49 = vpop.permute.xlu1 %2244 }
 0x315   :  { %2419 = vst.msk [vmem:[#allocation2 + $0x80] sm:$0xff] %vm2402_vm6, %v2243_v48  ;;  %2420 = vst.msk [vmem:[#allocation2 + $0x88] sm:$0xff] %vm2402_vm6, %v2245_v49 }
 0x316   :  { %2615 = vrot.lane.b32.xlu0 %v9695_v46, %s10429_s23  ;;  %2617 = vrot.lane.b32.xlu1 %v9696_v47, %s10429_s23  ;;  %v9727_v46 = vld [vmem:[%s18996_s0 + $0x259] sm:$0xff]  ;;  %v9728_v47 = vld [vmem:[%s18996_s0 + $0x261] sm:$0xff] }
 0x318   :  { %v2247_v56 = vpop.permute.xlu0 %2246  ;;  %v2249_v57 = vpop.permute.xlu1 %2248 }
 0x319   :  { %2421 = vst.msk [vmem:[#allocation2 + $0x90] sm:$0xff] %vm2402_vm6, %v2247_v56  ;;  %2422 = vst.msk [vmem:[#allocation2 + $0x98] sm:$0xff] %vm2402_vm6, %v2249_v57 }
 0x31a   :  { %2619 = vrot.lane.b32.xlu0 %v9697_v52, %s10429_s23  ;;  %2621 = vrot.lane.b32.xlu1 %v9698_v53, %s10429_s23  ;;  %v9729_v52 = vld [vmem:[%s18996_s0 + $0x271] sm:$0xff]  ;;  %v9730_v53 = vld [vmem:[%s18996_s0 + $0x279] sm:$0xff] }
 0x31c   :  { %v2251_v10 = vpop.permute.xlu0 %2250  ;;  %v2253_v55 = vpop.permute.xlu1 %2252 }
 0x31d   :  { %2423 = vst.msk [vmem:[#allocation2 + $0xa0] sm:$0xff] %vm2402_vm6, %v2251_v10  ;;  %2424 = vst.msk [vmem:[#allocation2 + $0xa8] sm:$0xff] %vm2402_vm6, %v2253_v55 }
 0x31e   :  { %2623 = vrot.lane.b32.xlu0 %v9699_v2, %s10429_s23  ;;  %2625 = vrot.lane.b32.xlu1 %v9700_v3, %s10429_s23  ;;  %v9731_v2 = vld [vmem:[%s18996_s0 + $0x289] sm:$0xff]  ;;  %v9732_v3 = vld [vmem:[%s18996_s0 + $0x291] sm:$0xff] }
 0x320   :  { %v2255_v4 = vpop.permute.xlu0 %2254  ;;  %v2257_v5 = vpop.permute.xlu1 %2256 }
 0x321   :  { %2425 = vst.msk [vmem:[#allocation2 + $0xb0] sm:$0xff] %vm2402_vm6, %v2255_v4  ;;  %2426 = vst.msk [vmem:[#allocation2 + $0xb8] sm:$0xff] %vm2402_vm6, %v2257_v5 }
 0x322   :  { %2627 = vrot.lane.b32.xlu0 %v9701_v0, %s10429_s23  ;;  %2629 = vrot.lane.b32.xlu1 %v9702_v1, %s10429_s23  ;;  %v9733_v0 = vld [vmem:[%s18996_s0 + $0x2a1] sm:$0xff]  ;;  %v9734_v1 = vld [vmem:[%s18996_s0 + $0x2a9] sm:$0xff] }
 0x324   :  { %v2259_v12 = vpop.permute.xlu0 %2258  ;;  %v2261_v14 = vpop.permute.xlu1 %2260 }
 0x325   :  { %2427 = vst.msk [vmem:[#allocation2 + $0xc0] sm:$0xff] %vm2402_vm6, %v2259_v12  ;;  %2428 = vst.msk [vmem:[#allocation2 + $0xc8] sm:$0xff] %vm2402_vm6, %v2261_v14 }
 0x326   :  { %2631 = vrot.lane.b32.xlu0 %v9703_v8, %s10429_s23  ;;  %2633 = vrot.lane.b32.xlu1 %v9704_v9, %s10429_s23  ;;  %v9735_v8 = vld [vmem:[%s18996_s0 + $0x2b9] sm:$0xff]  ;;  %v9736_v9 = vld [vmem:[%s18996_s0 + $0x2c1] sm:$0xff] }
 0x328   :  { %v2263_v35 = vpop.permute.xlu0 %2262  ;;  %v2265_v37 = vpop.permute.xlu1 %2264 }
 0x329   :  { %2429 = vst.msk [vmem:[#allocation2 + $0xd0] sm:$0xff] %vm2402_vm6, %v2263_v35  ;;  %2430 = vst.msk [vmem:[#allocation2 + $0xd8] sm:$0xff] %vm2402_vm6, %v2265_v37 }
 0x32a   :  { %2635 = vrot.lane.b32.xlu0 %v9705_v21, %s10429_s23  ;;  %2637 = vrot.lane.b32.xlu1 %v9706_v22, %s10429_s23  ;;  %v9737_v21 = vld [vmem:[%s18996_s0 + $0x2d1] sm:$0xff]  ;;  %v9738_v22 = vld [vmem:[%s18996_s0 + $0x2d9] sm:$0xff] }
 0x32c   :  { %v2267_v58 = vpop.permute.xlu0 %2266  ;;  %v2269_v59 = vpop.permute.xlu1 %2268 }
 0x32d   :  { %2431 = vst.msk [vmem:[#allocation2 + $0xe0] sm:$0xff] %vm2402_vm6, %v2267_v58  ;;  %2432 = vst.msk [vmem:[#allocation2 + $0xe8] sm:$0xff] %vm2402_vm6, %v2269_v59 }
 0x32e   :  { %2639 = vrot.lane.b32.xlu0 %v9707_v50, %s10429_s23  ;;  %2641 = vrot.lane.b32.xlu1 %v9708_v51, %s10429_s23  ;;  %v9739_v50 = vld [vmem:[%s18996_s0 + $0x2e9] sm:$0xff]  ;;  %v9740_v51 = vld [vmem:[%s18996_s0 + $0x2f1] sm:$0xff] }
 0x330   :  { %v2271_v6 = vpop.permute.xlu0 %2270  ;;  %v2273_v7 = vpop.permute.xlu1 %2272 }
 0x331   :  { %2433 = vst.msk [vmem:[#allocation2 + $0xf0] sm:$0xff] %vm2402_vm6, %v2271_v6  ;;  %2434 = vst.msk [vmem:[#allocation2 + $0xf8] sm:$0xff] %vm2402_vm6, %v2273_v7 }
 0x332   :  { %2643 = vrot.lane.b32.xlu0 %v9709_v62, %s10429_s23  ;;  %2645 = vrot.lane.b32.xlu1 %v9710_v63, %s10429_s23  ;;  %v9741_v62 = vld [vmem:[%s18996_s0 + $0x301] sm:$0xff]  ;;  %v9742_v63 = vld [vmem:[%s18996_s0 + $0x309] sm:$0xff] }
 0x334   :  { %v2275_v44 = vpop.permute.xlu0 %2274  ;;  %v2277_v45 = vpop.permute.xlu1 %2276 }
 0x335   :  { %2435 = vst.msk [vmem:[#allocation2 + $0x100] sm:$0xff] %vm2402_vm6, %v2275_v44  ;;  %2436 = vst.msk [vmem:[#allocation2 + $0x108] sm:$0xff] %vm2402_vm6, %v2277_v45  ;;  %v9743_v45 = vld [vmem:[%s18996_s0 + $0x319] sm:$0xff] }
 0x336   :  { %2647 = vrot.lane.b32.xlu0 %v9711_v15, %s10429_s23  ;;  %2649 = vrot.lane.b32.xlu1 %v9712_v16, %s10429_s23  ;;  %v3301_v15 = vld [vmem:[%s18997_s1] sm:$0xff]  ;;  %v3302_v16 = vld [vmem:[%s18997_s1 + $0x8] sm:$0xff] }
 0x337   :  { %v10372_v44 = vpack.c.bf16 %v3302_v16, %v3301_v15  ;;  %v9772_v15 = vld [vmem:[%s18996_s0 + $0x142] sm:$0xff] }
 0x338   :  { %v2279_v60 = vpop.permute.xlu0 %2278  ;;  %v2281_v61 = vpop.permute.xlu1 %2280 }
 0x339   :  { %2437 = vst.msk [vmem:[#allocation2 + $0x110] sm:$0xff] %vm2402_vm6, %v2279_v60  ;;  %2438 = vst.msk [vmem:[#allocation2 + $0x118] sm:$0xff] %vm2402_vm6, %v2281_v61  ;;  %10373 = vmatprep.subr.bf16.mxu0 %v10372_v44  ;;  %v3303_v61 = vld [vmem:[%s18997_s1 + $0x10] sm:$0xff] }
 0x33a   :  { %2651 = vrot.lane.b32.xlu0 %v9713_v28, %s10429_s23  ;;  %2653 = vrot.lane.b32.xlu1 %v9714_v29, %s10429_s23  ;;  %v9744_v28 = vld [vmem:[%s18996_s0 + $0x321] sm:$0xff] }
 0x33b   :  { %10375 = vmatpush3.bf16.msra.mxu0 %v10372_v44 }
 0x33c   :  { %v2283_v13 = vpop.permute.xlu0 %2282  ;;  %v2285_v17 = vpop.permute.xlu1 %2284 }
 0x33d   :  { %2439 = vst.msk [vmem:[#allocation2 + $0x120] sm:$0xff] %vm2402_vm6, %v2283_v13  ;;  %2440 = vst.msk [vmem:[#allocation2 + $0x128] sm:$0xff] %vm2402_vm6, %v2285_v17  ;;  %v9745_v13 = vld [vmem:[%s18996_s0 + $0x331] sm:$0xff]  ;;  %v9746_v17 = vld [vmem:[%s18996_s0 + $0x339] sm:$0xff] }
 0x33e   :  { %2655 = vrot.lane.b32.xlu0 %v9715_v11, %s10429_s23  ;;  %2657 = vrot.lane.b32.xlu1 %v9716_v54, %s10429_s23  ;;  %v3304_v11 = vld [vmem:[%s18997_s1 + $0x18] sm:$0xff] }
 0x33f   :  { %v10376_v54 = vpack.c.bf16 %v3304_v11, %v3303_v61  ;;  %v9775_v61 = vld [vmem:[%s18996_s0 + $0x16a] sm:$0xff]  ;;  %v9776_v11 = vld [vmem:[%s18996_s0 + $0x172] sm:$0xff] }
 0x340   :  { %v2287_v20 = vpop.permute.xlu0 %2286  ;;  %v2289_v23 = vpop.permute.xlu1 %2288 }
 0x341   :  { %2441 = vst.msk [vmem:[#allocation2 + $0x130] sm:$0xff] %vm2402_vm6, %v2287_v20  ;;  %2442 = vst.msk [vmem:[#allocation2 + $0x138] sm:$0xff] %vm2402_vm6, %v2289_v23  ;;  %10377 = vmatprep.subr.bf16.mxu0 %v10376_v54  ;;  %v3305_v20 = vld [vmem:[%s18997_s1 + $0x20] sm:$0xf]  ;;  %v9747_v23 = vld [vmem:[%s18996_s0 + $0x349] sm:$0xff]  ;;  %s10434_s1 = smov 56  }
 0x342   :  { %2659 = vrot.lane.b32.xlu0 %v9717_v18, %s10429_s23  ;;  %2661 = vrot.lane.b32.xlu1 %v9718_v19, %s10429_s23 }
 0x343   :  { %10379 = vmatpush3.bf16.msra.mxu0 %v10376_v54 }
 0x344   :  { %v2291_v26 = vpop.permute.xlu0 %2290  ;;  %v2293_v27 = vpop.permute.xlu1 %2292  ;;  %10160 = vmatprep.subr.msk.mxu0 %vm3499_vm8, %v3305_v20 }
 0x345   :  { %2443 = vst.msk [vmem:[#allocation2 + $0x140] sm:$0xff] %vm2402_vm6, %v2291_v26  ;;  %2444 = vst.msk [vmem:[#allocation2 + $0x148] sm:$0xff] %vm2402_vm6, %v2293_v27  ;;  %v9749_v27 = vld [vmem:[%s18996_s0 + $0x32] sm:$0xff] }
 0x346   :  { %2663 = vrot.lane.b32.xlu0 %v9719_v24, %s10429_s23  ;;  %2665 = vrot.lane.b32.xlu1 %v9720_v25, %s10429_s23  ;;  %v9748_v24 = vld [vmem:[%s18996_s0 + $0x351] sm:$0xff] }
 0x347   :  { %10161 = vmatpush3.msk.msra.mxu0 %vm3499_vm8, %v3305_v20 }
 0x348   :  { %v2295_v32 = vpop.permute.xlu0 %2294  ;;  %v2297_v33 = vpop.permute.xlu1 %2296 }
 0x349   :  { %2445 = vst.msk [vmem:[#allocation2 + $0x150] sm:$0xff] %vm2402_vm6, %v2295_v32  ;;  %2446 = vst.msk [vmem:[#allocation2 + $0x158] sm:$0xff] %vm2402_vm6, %v2297_v33  ;;  %v9751_v33 = vld [vmem:[%s18996_s0 + $0x4a] sm:$0xff] }
 0x34a   :  { %2667 = vrot.lane.b32.xlu0 %v9721_v30, %s10429_s23  ;;  %2669 = vrot.lane.b32.xlu1 %v9722_v31, %s10429_s23  ;;  %v9750_v30 = vld [vmem:[%s18996_s0 + $0x3a] sm:$0xff] }
 0x34c   :  { %v2299_v38 = vpop.permute.xlu0 %2298  ;;  %v2301_v39 = vpop.permute.xlu1 %2300 }
 0x34d   :  { %2447 = vst.msk [vmem:[#allocation2 + $0x160] sm:$0xff] %vm2402_vm6, %v2299_v38  ;;  %2448 = vst.msk [vmem:[#allocation2 + $0x168] sm:$0xff] %vm2402_vm6, %v2301_v39  ;;  %v9753_v39 = vld [vmem:[%s18996_s0 + $0x62] sm:$0xff] }
 0x34e   :  { %2671 = vrot.lane.b32.xlu0 %v9723_v34, %s10429_s23  ;;  %2673 = vrot.lane.b32.xlu1 %v9724_v36, %s10429_s23  ;;  %v9752_v34 = vld [vmem:[%s18996_s0 + $0x52] sm:$0xff] }
 0x350   :  { %v2303_v42 = vpop.permute.xlu0 %2302  ;;  %v2305_v43 = vpop.permute.xlu1 %2304 }
 0x351   :  { %2449 = vst.msk [vmem:[#allocation2 + $0x170] sm:$0xff] %vm2402_vm6, %v2303_v42  ;;  %2450 = vst.msk [vmem:[#allocation2 + $0x178] sm:$0xff] %vm2402_vm6, %v2305_v43  ;;  %v9755_v43 = vld [vmem:[%s18996_s0 + $0x7a] sm:$0xff] }
 0x352   :  { %2675 = vrot.lane.b32.xlu0 %v9725_v40, %s10429_s23  ;;  %2677 = vrot.lane.b32.xlu1 %v9726_v41, %s10429_s23  ;;  %v9754_v40 = vld [vmem:[%s18996_s0 + $0x6a] sm:$0xff] }
 0x354   :  { %v2307_v48 = vpop.permute.xlu0 %2306  ;;  %v2309_v49 = vpop.permute.xlu1 %2308 }
 0x355   :  { %2451 = vst.msk [vmem:[#allocation2 + $0x180] sm:$0xff] %vm2402_vm6, %v2307_v48  ;;  %2452 = vst.msk [vmem:[#allocation2 + $0x188] sm:$0xff] %vm2402_vm6, %v2309_v49  ;;  %v9757_v49 = vld [vmem:[%s18996_s0 + $0x92] sm:$0xff] }
 0x356   :  { %2679 = vrot.lane.b32.xlu0 %v9727_v46, %s10429_s23  ;;  %2681 = vrot.lane.b32.xlu1 %v9728_v47, %s10429_s23  ;;  %v9756_v46 = vld [vmem:[%s18996_s0 + $0x82] sm:$0xff] }
 0x358   :  { %v2311_v56 = vpop.permute.xlu0 %2310  ;;  %v2313_v57 = vpop.permute.xlu1 %2312 }
 0x359   :  { %2453 = vst.msk [vmem:[#allocation2 + $0x190] sm:$0xff] %vm2402_vm6, %v2311_v56  ;;  %2454 = vst.msk [vmem:[#allocation2 + $0x198] sm:$0xff] %vm2402_vm6, %v2313_v57  ;;  %v9759_v57 = vld [vmem:[%s18996_s0 + $0xaa] sm:$0xff] }
 0x35a   :  { %2683 = vrot.lane.b32.xlu0 %v9729_v52, %s10429_s23  ;;  %2685 = vrot.lane.b32.xlu1 %v9730_v53, %s10429_s23  ;;  %v9758_v52 = vld [vmem:[%s18996_s0 + $0x9a] sm:$0xff] }
 0x35c   :  { %v2315_v10 = vpop.permute.xlu0 %2314  ;;  %v2317_v55 = vpop.permute.xlu1 %2316 }
 0x35d   :  { %2455 = vst.msk [vmem:[#allocation2 + $0x1a0] sm:$0xff] %vm2402_vm6, %v2315_v10  ;;  %2456 = vst.msk [vmem:[#allocation2 + $0x1a8] sm:$0xff] %vm2402_vm6, %v2317_v55  ;;  %v9761_v55 = vld [vmem:[%s18996_s0 + $0xc2] sm:$0xff] }
 0x35e   :  { %2687 = vrot.lane.b32.xlu0 %v9731_v2, %s10429_s23  ;;  %2689 = vrot.lane.b32.xlu1 %v9732_v3, %s10429_s23  ;;  %v9760_v2 = vld [vmem:[%s18996_s0 + $0xb2] sm:$0xff] }
 0x360   :  { %v2319_v4 = vpop.permute.xlu0 %2318  ;;  %v2321_v5 = vpop.permute.xlu1 %2320 }
 0x361   :  { %2457 = vst.msk [vmem:[#allocation2 + $0x1b0] sm:$0xff] %vm2402_vm6, %v2319_v4  ;;  %2458 = vst.msk [vmem:[#allocation2 + $0x1b8] sm:$0xff] %vm2402_vm6, %v2321_v5  ;;  %v9763_v5 = vld [vmem:[%s18996_s0 + $0xda] sm:$0xff] }
 0x362   :  { %2691 = vrot.lane.b32.xlu0 %v9733_v0, %s10429_s23  ;;  %2693 = vrot.lane.b32.xlu1 %v9734_v1, %s10429_s23  ;;  %v9762_v0 = vld [vmem:[%s18996_s0 + $0xca] sm:$0xff] }
 0x364   :  { %v2323_v12 = vpop.permute.xlu0 %2322  ;;  %v2325_v14 = vpop.permute.xlu1 %2324 }
 0x365   :  { %2459 = vst.msk [vmem:[#allocation2 + $0x1c0] sm:$0xff] %vm2402_vm6, %v2323_v12  ;;  %2460 = vst.msk [vmem:[#allocation2 + $0x1c8] sm:$0xff] %vm2402_vm6, %v2325_v14  ;;  %v9765_v14 = vld [vmem:[%s18996_s0 + $0xf2] sm:$0xff] }
 0x366   :  { %2695 = vrot.lane.b32.xlu0 %v9735_v8, %s10429_s23  ;;  %2697 = vrot.lane.b32.xlu1 %v9736_v9, %s10429_s23  ;;  %v9764_v8 = vld [vmem:[%s18996_s0 + $0xe2] sm:$0xff] }
 0x368   :  { %v2327_v35 = vpop.permute.xlu0 %2326  ;;  %v2329_v37 = vpop.permute.xlu1 %2328 }
 0x369   :  { %2461 = vst.msk [vmem:[#allocation2 + $0x1d0] sm:$0xff] %vm2402_vm6, %v2327_v35  ;;  %2462 = vst.msk [vmem:[#allocation2 + $0x1d8] sm:$0xff] %vm2402_vm6, %v2329_v37  ;;  %v9767_v37 = vld [vmem:[%s18996_s0 + $0x10a] sm:$0xff] }
 0x36a   :  { %2699 = vrot.lane.b32.xlu0 %v9737_v21, %s10429_s23  ;;  %2701 = vrot.lane.b32.xlu1 %v9738_v22, %s10429_s23  ;;  %v9766_v21 = vld [vmem:[%s18996_s0 + $0xfa] sm:$0xff] }
 0x36c   :  { %v2331_v58 = vpop.permute.xlu0 %2330  ;;  %v2333_v59 = vpop.permute.xlu1 %2332 }
 0x36d   :  { %2463 = vst.msk [vmem:[#allocation2 + $0x1e0] sm:$0xff] %vm2402_vm6, %v2331_v58  ;;  %2464 = vst.msk [vmem:[#allocation2 + $0x1e8] sm:$0xff] %vm2402_vm6, %v2333_v59  ;;  %v9769_v59 = vld [vmem:[%s18996_s0 + $0x122] sm:$0xff] }
 0x36e   :  { %2703 = vrot.lane.b32.xlu0 %v9739_v50, %s10429_s23  ;;  %2705 = vrot.lane.b32.xlu1 %v9740_v51, %s10429_s23  ;;  %v9768_v50 = vld [vmem:[%s18996_s0 + $0x112] sm:$0xff] }
 0x370   :  { %v2335_v6 = vpop.permute.xlu0 %2334  ;;  %v2337_v7 = vpop.permute.xlu1 %2336 }
 0x371   :  { %2465 = vst.msk [vmem:[#allocation2 + $0x1f0] sm:$0xff] %vm2402_vm6, %v2335_v6  ;;  %2466 = vst.msk [vmem:[#allocation2 + $0x1f8] sm:$0xff] %vm2402_vm6, %v2337_v7  ;;  %v9771_v7 = vld [vmem:[%s18996_s0 + $0x13a] sm:$0xff]  ;;  %vm7847_vm6 = vcmask 589312  }
 0x372   :  { %2707 = vrot.lane.b32.xlu0 %v9741_v62, %s10429_s23  ;;  %2709 = vrot.lane.b32.xlu1 %v9742_v63, %s10429_s23  ;;  %v9770_v62 = vld [vmem:[%s18996_s0 + $0x12a] sm:$0xff] }
 0x374   :  { %v2596_v29 = vpop.permute.xlu0 %2595  ;;  %v2598_v60 = vpop.permute.xlu1 %2597 }
 0x375   :  { %2788 = vst.msk [vmem:[#allocation2] sm:$0xff] %vm2787_vm7, %v2596_v29  ;;  %2789 = vst.msk [vmem:[#allocation2 + $0x8] sm:$0xff] %vm2787_vm7, %v2598_v60 }
 0x376   :  { %2711 = vrot.lane.b32.xlu0 %v9743_v45, %s10429_s23  ;;  %2713 = vrot.lane.b32.xlu1 %v9744_v28, %s10429_s23  ;;  %v9773_v45 = vld [vmem:[%s18996_s0 + $0x152] sm:$0xff]  ;;  %v9774_v28 = vld [vmem:[%s18996_s0 + $0x15a] sm:$0xff] }
 0x378   :  { %v2600_v18 = vpop.permute.xlu0 %2599  ;;  %v2602_v19 = vpop.permute.xlu1 %2601 }
 0x379   :  { %2790 = vst.msk [vmem:[#allocation2 + $0x10] sm:$0xff] %vm2787_vm7, %v2600_v18  ;;  %2791 = vst.msk [vmem:[#allocation2 + $0x18] sm:$0xff] %vm2787_vm7, %v2602_v19  ;;  %v9778_v18 = vld [vmem:[%s18996_s0 + $0x18a] sm:$0xff] }
 0x37a   :  { %2715 = vrot.lane.b32.xlu0 %v9745_v13, %s10429_s23  ;;  %2717 = vrot.lane.b32.xlu1 %v9746_v17, %s10429_s23  ;;  %v9777_v17 = vld [vmem:[%s18996_s0 + $0x182] sm:$0xff] }
 0x37c   :  { %v2604_v25 = vpop.permute.xlu0 %2603  ;;  %v2606_v26 = vpop.permute.xlu1 %2605 }
 0x37d   :  { %2792 = vst.msk [vmem:[#allocation2 + $0x20] sm:$0xff] %vm2787_vm7, %v2604_v25  ;;  %2793 = vst.msk [vmem:[#allocation2 + $0x28] sm:$0xff] %vm2787_vm7, %v2606_v26 }
 0x37e   :  { %2719 = vrot.lane.b32.xlu0 %v9747_v23, %s10429_s23  ;;  %2721 = vrot.lane.b32.xlu1 %v9748_v24, %s10429_s23  ;;  %v9779_v23 = vld [vmem:[%s18996_s0 + $0x19a] sm:$0xff]  ;;  %v9780_v24 = vld [vmem:[%s18996_s0 + $0x1a2] sm:$0xff] }
 0x380   :  { %v2608_v31 = vpop.permute.xlu0 %2607  ;;  %v2610_v32 = vpop.permute.xlu1 %2609 }
 0x381   :  { %2794 = vst.msk [vmem:[#allocation2 + $0x30] sm:$0xff] %vm2787_vm7, %v2608_v31  ;;  %2795 = vst.msk [vmem:[#allocation2 + $0x38] sm:$0xff] %vm2787_vm7, %v2610_v32 }
 0x382   :  { %2980 = vrot.lane.b32.xlu0 %v9749_v27, %s10430_s8  ;;  %2982 = vrot.lane.b32.xlu1 %v9750_v30, %s10430_s8  ;;  %v9781_v27 = vld [vmem:[%s18996_s0 + $0x1e2] sm:$0xff]  ;;  %v9782_v30 = vld [vmem:[%s18996_s0 + $0x1ea] sm:$0xff] }
 0x384   :  { %v2612_v36 = vpop.permute.xlu0 %2611  ;;  %v2614_v38 = vpop.permute.xlu1 %2613 }
 0x385   :  { %2796 = vst.msk [vmem:[#allocation2 + $0x40] sm:$0xff] %vm2787_vm7, %v2612_v36  ;;  %2797 = vst.msk [vmem:[#allocation2 + $0x48] sm:$0xff] %vm2787_vm7, %v2614_v38 }
 0x386   :  { %2984 = vrot.lane.b32.xlu0 %v9751_v33, %s10430_s8  ;;  %2986 = vrot.lane.b32.xlu1 %v9752_v34, %s10430_s8  ;;  %v9783_v33 = vld [vmem:[%s18996_s0 + $0x1fa] sm:$0xff]  ;;  %v9784_v34 = vld [vmem:[%s18996_s0 + $0x202] sm:$0xff] }
 0x388   :  { %v2616_v41 = vpop.permute.xlu0 %2615  ;;  %v2618_v42 = vpop.permute.xlu1 %2617 }
 0x389   :  { %2798 = vst.msk [vmem:[#allocation2 + $0x50] sm:$0xff] %vm2787_vm7, %v2616_v41  ;;  %2799 = vst.msk [vmem:[#allocation2 + $0x58] sm:$0xff] %vm2787_vm7, %v2618_v42 }
 0x38a   :  { %2988 = vrot.lane.b32.xlu0 %v9753_v39, %s10430_s8  ;;  %2990 = vrot.lane.b32.xlu1 %v9754_v40, %s10430_s8  ;;  %v9785_v39 = vld [vmem:[%s18996_s0 + $0x212] sm:$0xff]  ;;  %v9786_v40 = vld [vmem:[%s18996_s0 + $0x21a] sm:$0xff] }
 0x38c   :  { %v2620_v47 = vpop.permute.xlu0 %2619  ;;  %v2622_v48 = vpop.permute.xlu1 %2621 }
 0x38d   :  { %2800 = vst.msk [vmem:[#allocation2 + $0x60] sm:$0xff] %vm2787_vm7, %v2620_v47  ;;  %2801 = vst.msk [vmem:[#allocation2 + $0x68] sm:$0xff] %vm2787_vm7, %v2622_v48 }
 0x38e   :  { %2992 = vrot.lane.b32.xlu0 %v9755_v43, %s10430_s8  ;;  %2994 = vrot.lane.b32.xlu1 %v9756_v46, %s10430_s8  ;;  %v9787_v43 = vld [vmem:[%s18996_s0 + $0x22a] sm:$0xff]  ;;  %v9788_v46 = vld [vmem:[%s18996_s0 + $0x232] sm:$0xff] }
 0x390   :  { %v2624_v53 = vpop.permute.xlu0 %2623  ;;  %v2626_v56 = vpop.permute.xlu1 %2625 }
 0x391   :  { %2802 = vst.msk [vmem:[#allocation2 + $0x70] sm:$0xff] %vm2787_vm7, %v2624_v53  ;;  %2803 = vst.msk [vmem:[#allocation2 + $0x78] sm:$0xff] %vm2787_vm7, %v2626_v56 }
 0x392   :  { %2996 = vrot.lane.b32.xlu0 %v9757_v49, %s10430_s8  ;;  %2998 = vrot.lane.b32.xlu1 %v9758_v52, %s10430_s8  ;;  %v9789_v49 = vld [vmem:[%s18996_s0 + $0x242] sm:$0xff]  ;;  %v9790_v52 = vld [vmem:[%s18996_s0 + $0x24a] sm:$0xff] }
 0x394   :  { %v2628_v3 = vpop.permute.xlu0 %2627  ;;  %v2630_v10 = vpop.permute.xlu1 %2629 }
 0x395   :  { %2804 = vst.msk [vmem:[#allocation2 + $0x80] sm:$0xff] %vm2787_vm7, %v2628_v3  ;;  %2805 = vst.msk [vmem:[#allocation2 + $0x88] sm:$0xff] %vm2787_vm7, %v2630_v10 }
 0x396   :  { %3000 = vrot.lane.b32.xlu0 %v9759_v57, %s10430_s8  ;;  %3002 = vrot.lane.b32.xlu1 %v9760_v2, %s10430_s8  ;;  %v9791_v57 = vld [vmem:[%s18996_s0 + $0x25a] sm:$0xff]  ;;  %v9792_v2 = vld [vmem:[%s18996_s0 + $0x262] sm:$0xff] }
 0x398   :  { %v2632_v1 = vpop.permute.xlu0 %2631  ;;  %v2634_v4 = vpop.permute.xlu1 %2633 }
 0x399   :  { %2806 = vst.msk [vmem:[#allocation2 + $0x90] sm:$0xff] %vm2787_vm7, %v2632_v1  ;;  %2807 = vst.msk [vmem:[#allocation2 + $0x98] sm:$0xff] %vm2787_vm7, %v2634_v4 }
 0x39a   :  { %3004 = vrot.lane.b32.xlu0 %v9761_v55, %s10430_s8  ;;  %3006 = vrot.lane.b32.xlu1 %v9762_v0, %s10430_s8  ;;  %v9793_v55 = vld [vmem:[%s18996_s0 + $0x272] sm:$0xff]  ;;  %v9794_v0 = vld [vmem:[%s18996_s0 + $0x27a] sm:$0xff] }
 0x39c   :  { %v2636_v9 = vpop.permute.xlu0 %2635  ;;  %v2638_v12 = vpop.permute.xlu1 %2637 }
 0x39d   :  { %2808 = vst.msk [vmem:[#allocation2 + $0xa0] sm:$0xff] %vm2787_vm7, %v2636_v9  ;;  %2809 = vst.msk [vmem:[#allocation2 + $0xa8] sm:$0xff] %vm2787_vm7, %v2638_v12 }
 0x39e   :  { %3008 = vrot.lane.b32.xlu0 %v9763_v5, %s10430_s8  ;;  %3010 = vrot.lane.b32.xlu1 %v9764_v8, %s10430_s8  ;;  %v9795_v5 = vld [vmem:[%s18996_s0 + $0x28a] sm:$0xff]  ;;  %v9796_v8 = vld [vmem:[%s18996_s0 + $0x292] sm:$0xff] }
 0x3a0   :  { %v2640_v22 = vpop.permute.xlu0 %2639  ;;  %v2642_v35 = vpop.permute.xlu1 %2641 }
 0x3a1   :  { %2810 = vst.msk [vmem:[#allocation2 + $0xb0] sm:$0xff] %vm2787_vm7, %v2640_v22  ;;  %2811 = vst.msk [vmem:[#allocation2 + $0xb8] sm:$0xff] %vm2787_vm7, %v2642_v35 }
 0x3a2   :  { %3012 = vrot.lane.b32.xlu0 %v9765_v14, %s10430_s8  ;;  %3014 = vrot.lane.b32.xlu1 %v9766_v21, %s10430_s8  ;;  %v9797_v14 = vld [vmem:[%s18996_s0 + $0x2a2] sm:$0xff]  ;;  %v9798_v21 = vld [vmem:[%s18996_s0 + $0x2aa] sm:$0xff] }
 0x3a4   :  { %v2644_v51 = vpop.permute.xlu0 %2643  ;;  %v2646_v58 = vpop.permute.xlu1 %2645 }
 0x3a5   :  { %2812 = vst.msk [vmem:[#allocation2 + $0xc0] sm:$0xff] %vm2787_vm7, %v2644_v51  ;;  %2813 = vst.msk [vmem:[#allocation2 + $0xc8] sm:$0xff] %vm2787_vm7, %v2646_v58 }
 0x3a6   :  { %3016 = vrot.lane.b32.xlu0 %v9767_v37, %s10430_s8  ;;  %3018 = vrot.lane.b32.xlu1 %v9768_v50, %s10430_s8  ;;  %v9799_v37 = vld [vmem:[%s18996_s0 + $0x2ba] sm:$0xff]  ;;  %v9800_v50 = vld [vmem:[%s18996_s0 + $0x2c2] sm:$0xff] }
 0x3a8   :  { %v2648_v63 = vpop.permute.xlu0 %2647  ;;  %v2650_v6 = vpop.permute.xlu1 %2649 }
 0x3a9   :  { %2814 = vst.msk [vmem:[#allocation2 + $0xd0] sm:$0xff] %vm2787_vm7, %v2648_v63  ;;  %2815 = vst.msk [vmem:[#allocation2 + $0xd8] sm:$0xff] %vm2787_vm7, %v2650_v6 }
 0x3aa   :  { %3020 = vrot.lane.b32.xlu0 %v9769_v59, %s10430_s8  ;;  %3022 = vrot.lane.b32.xlu1 %v9770_v62, %s10430_s8  ;;  %v9801_v59 = vld [vmem:[%s18996_s0 + $0x2d2] sm:$0xff]  ;;  %v9802_v62 = vld [vmem:[%s18996_s0 + $0x2da] sm:$0xff] }
 0x3ac   :  { %v2652_v16 = vpop.permute.xlu0 %2651  ;;  %v2654_v44 = vpop.permute.xlu1 %2653 }
 0x3ad   :  { %2816 = vst.msk [vmem:[#allocation2 + $0xe0] sm:$0xff] %vm2787_vm7, %v2652_v16  ;;  %2817 = vst.msk [vmem:[#allocation2 + $0xe8] sm:$0xff] %vm2787_vm7, %v2654_v44 }
 0x3ae   :  { %3024 = vrot.lane.b32.xlu0 %v9771_v7, %s10430_s8  ;;  %3026 = vrot.lane.b32.xlu1 %v9772_v15, %s10430_s8  ;;  %v9803_v7 = vld [vmem:[%s18996_s0 + $0x2ea] sm:$0xff]  ;;  %v9804_v15 = vld [vmem:[%s18996_s0 + $0x2f2] sm:$0xff] }
 0x3b0   :  { %v2656_v29 = vpop.permute.xlu0 %2655  ;;  %v2658_v60 = vpop.permute.xlu1 %2657 }
 0x3b1   :  { %2818 = vst.msk [vmem:[#allocation2 + $0xf0] sm:$0xff] %vm2787_vm7, %v2656_v29  ;;  %2819 = vst.msk [vmem:[#allocation2 + $0xf8] sm:$0xff] %vm2787_vm7, %v2658_v60 }
 0x3b2   :  { %3028 = vrot.lane.b32.xlu0 %v9773_v45, %s10430_s8  ;;  %3030 = vrot.lane.b32.xlu1 %v9774_v28, %s10430_s8  ;;  %v9805_v45 = vld [vmem:[%s18996_s0 + $0x302] sm:$0xff]  ;;  %v9806_v28 = vld [vmem:[%s18996_s0 + $0x30a] sm:$0xff] }
 0x3b4   :  { %v2660_v54 = vpop.permute.xlu0 %2659  ;;  %v2662_v13 = vpop.permute.xlu1 %2661 }
 0x3b5   :  { %2820 = vst.msk [vmem:[#allocation2 + $0x100] sm:$0xff] %vm2787_vm7, %v2660_v54  ;;  %2821 = vst.msk [vmem:[#allocation2 + $0x108] sm:$0xff] %vm2787_vm7, %v2662_v13 }
 0x3b6   :  { %3032 = vrot.lane.b32.xlu0 %v9775_v61, %s10430_s8  ;;  %3034 = vrot.lane.b32.xlu1 %v9776_v11, %s10430_s8  ;;  %v9807_v61 = vld [vmem:[%s18996_s0 + $0x31a] sm:$0xff]  ;;  %v9808_v11 = vld [vmem:[%s18996_s0 + $0x322] sm:$0xff] }
 0x3b8   :  { %v2664_v19 = vpop.permute.xlu0 %2663  ;;  %v2666_v20 = vpop.permute.xlu1 %2665 }
 0x3b9   :  { %2822 = vst.msk [vmem:[#allocation2 + $0x110] sm:$0xff] %vm2787_vm7, %v2664_v19  ;;  %2823 = vst.msk [vmem:[#allocation2 + $0x118] sm:$0xff] %vm2787_vm7, %v2666_v20 }
 0x3ba   :  { %3036 = vrot.lane.b32.xlu0 %v9777_v17, %s10430_s8  ;;  %3038 = vrot.lane.b32.xlu1 %v9778_v18, %s10430_s8  ;;  %v9809_v17 = vld [vmem:[%s18996_s0 + $0x332] sm:$0xff]  ;;  %v9810_v18 = vld [vmem:[%s18996_s0 + $0x33a] sm:$0xff] }
 0x3bc   :  { %v2668_v25 = vpop.permute.xlu0 %2667  ;;  %v2670_v26 = vpop.permute.xlu1 %2669 }
 0x3bd   :  { %2824 = vst.msk [vmem:[#allocation2 + $0x120] sm:$0xff] %vm2787_vm7, %v2668_v25  ;;  %2825 = vst.msk [vmem:[#allocation2 + $0x128] sm:$0xff] %vm2787_vm7, %v2670_v26 }
 0x3be   :  { %3040 = vrot.lane.b32.xlu0 %v9779_v23, %s10430_s8  ;;  %3042 = vrot.lane.b32.xlu1 %v9780_v24, %s10430_s8  ;;  %v9811_v23 = vld [vmem:[%s18996_s0 + $0x34a] sm:$0xff] }
 0x3c0   :  { %v2672_v31 = vpop.permute.xlu0 %2671  ;;  %v2674_v32 = vpop.permute.xlu1 %2673 }
 0x3c1   :  { %2826 = vst.msk [vmem:[#allocation2 + $0x130] sm:$0xff] %vm2787_vm7, %v2672_v31  ;;  %2827 = vst.msk [vmem:[#allocation2 + $0x138] sm:$0xff] %vm2787_vm7, %v2674_v32 }
 0x3c2   :  { %3044 = vrot.lane.b32.xlu0 %v9781_v27, %s10430_s8  ;;  %3046 = vrot.lane.b32.xlu1 %v9782_v30, %s10430_s8  ;;  %v9812_v30 = vld [vmem:[%s18996_s0 + $0x352] sm:$0xff] }
 0x3c4   :  { %v2676_v36 = vpop.permute.xlu0 %2675  ;;  %v2678_v38 = vpop.permute.xlu1 %2677 }
 0x3c5   :  { %2828 = vst.msk [vmem:[#allocation2 + $0x140] sm:$0xff] %vm2787_vm7, %v2676_v36  ;;  %2829 = vst.msk [vmem:[#allocation2 + $0x148] sm:$0xff] %vm2787_vm7, %v2678_v38 }
 0x3c6   :  { %3048 = vrot.lane.b32.xlu0 %v9783_v33, %s10430_s8  ;;  %3050 = vrot.lane.b32.xlu1 %v9784_v34, %s10430_s8 }
 0x3c8   :  { %v2680_v41 = vpop.permute.xlu0 %2679  ;;  %v2682_v42 = vpop.permute.xlu1 %2681 }
 0x3c9   :  { %2830 = vst.msk [vmem:[#allocation2 + $0x150] sm:$0xff] %vm2787_vm7, %v2680_v41  ;;  %2831 = vst.msk [vmem:[#allocation2 + $0x158] sm:$0xff] %vm2787_vm7, %v2682_v42 }
 0x3ca   :  { %3052 = vrot.lane.b32.xlu0 %v9785_v39, %s10430_s8  ;;  %3054 = vrot.lane.b32.xlu1 %v9786_v40, %s10430_s8 }
 0x3cc   :  { %v2684_v47 = vpop.permute.xlu0 %2683  ;;  %v2686_v48 = vpop.permute.xlu1 %2685 }
 0x3cd   :  { %2832 = vst.msk [vmem:[#allocation2 + $0x160] sm:$0xff] %vm2787_vm7, %v2684_v47  ;;  %2833 = vst.msk [vmem:[#allocation2 + $0x168] sm:$0xff] %vm2787_vm7, %v2686_v48 }
 0x3ce   :  { %3056 = vrot.lane.b32.xlu0 %v9787_v43, %s10430_s8  ;;  %3058 = vrot.lane.b32.xlu1 %v9788_v46, %s10430_s8 }
 0x3d0   :  { %v2688_v53 = vpop.permute.xlu0 %2687  ;;  %v2690_v56 = vpop.permute.xlu1 %2689 }
 0x3d1   :  { %2834 = vst.msk [vmem:[#allocation2 + $0x170] sm:$0xff] %vm2787_vm7, %v2688_v53  ;;  %2835 = vst.msk [vmem:[#allocation2 + $0x178] sm:$0xff] %vm2787_vm7, %v2690_v56 }
 0x3d2   :  { %3060 = vrot.lane.b32.xlu0 %v9789_v49, %s10430_s8  ;;  %3062 = vrot.lane.b32.xlu1 %v9790_v52, %s10430_s8 }
 0x3d4   :  { %v2692_v3 = vpop.permute.xlu0 %2691  ;;  %v2694_v10 = vpop.permute.xlu1 %2693 }
 0x3d5   :  { %2836 = vst.msk [vmem:[#allocation2 + $0x180] sm:$0xff] %vm2787_vm7, %v2692_v3  ;;  %2837 = vst.msk [vmem:[#allocation2 + $0x188] sm:$0xff] %vm2787_vm7, %v2694_v10 }
 0x3d6   :  { %3064 = vrot.lane.b32.xlu0 %v9791_v57, %s10430_s8  ;;  %3066 = vrot.lane.b32.xlu1 %v9792_v2, %s10430_s8 }
 0x3d8   :  { %v2696_v1 = vpop.permute.xlu0 %2695  ;;  %v2698_v4 = vpop.permute.xlu1 %2697 }
 0x3d9   :  { %2838 = vst.msk [vmem:[#allocation2 + $0x190] sm:$0xff] %vm2787_vm7, %v2696_v1  ;;  %2839 = vst.msk [vmem:[#allocation2 + $0x198] sm:$0xff] %vm2787_vm7, %v2698_v4 }
 0x3da   :  { %3068 = vrot.lane.b32.xlu0 %v9793_v55, %s10430_s8  ;;  %3070 = vrot.lane.b32.xlu1 %v9794_v0, %s10430_s8 }
 0x3dc   :  { %v2700_v9 = vpop.permute.xlu0 %2699  ;;  %v2702_v12 = vpop.permute.xlu1 %2701 }
 0x3dd   :  { %2840 = vst.msk [vmem:[#allocation2 + $0x1a0] sm:$0xff] %vm2787_vm7, %v2700_v9  ;;  %2841 = vst.msk [vmem:[#allocation2 + $0x1a8] sm:$0xff] %vm2787_vm7, %v2702_v12 }
 0x3de   :  { %3072 = vrot.lane.b32.xlu0 %v9795_v5, %s10430_s8  ;;  %3074 = vrot.lane.b32.xlu1 %v9796_v8, %s10430_s8 }
 0x3e0   :  { %v2704_v22 = vpop.permute.xlu0 %2703  ;;  %v2706_v35 = vpop.permute.xlu1 %2705 }
 0x3e1   :  { %2842 = vst.msk [vmem:[#allocation2 + $0x1b0] sm:$0xff] %vm2787_vm7, %v2704_v22  ;;  %2843 = vst.msk [vmem:[#allocation2 + $0x1b8] sm:$0xff] %vm2787_vm7, %v2706_v35 }
 0x3e2   :  { %3076 = vrot.lane.b32.xlu0 %v9797_v14, %s10430_s8  ;;  %3078 = vrot.lane.b32.xlu1 %v9798_v21, %s10430_s8 }
 0x3e4   :  { %v2708_v51 = vpop.permute.xlu0 %2707  ;;  %v2710_v58 = vpop.permute.xlu1 %2709 }
 0x3e5   :  { %2844 = vst.msk [vmem:[#allocation2 + $0x1c0] sm:$0xff] %vm2787_vm7, %v2708_v51  ;;  %2845 = vst.msk [vmem:[#allocation2 + $0x1c8] sm:$0xff] %vm2787_vm7, %v2710_v58 }
 0x3e6   :  { %3080 = vrot.lane.b32.xlu0 %v9799_v37, %s10430_s8  ;;  %3082 = vrot.lane.b32.xlu1 %v9800_v50, %s10430_s8 }
 0x3e8   :  { %v2712_v63 = vpop.permute.xlu0 %2711  ;;  %v2714_v6 = vpop.permute.xlu1 %2713 }
 0x3e9   :  { %2846 = vst.msk [vmem:[#allocation2 + $0x1d0] sm:$0xff] %vm2787_vm7, %v2712_v63  ;;  %2847 = vst.msk [vmem:[#allocation2 + $0x1d8] sm:$0xff] %vm2787_vm7, %v2714_v6 }
 0x3ea   :  { %3084 = vrot.lane.b32.xlu0 %v9801_v59, %s10430_s8  ;;  %3086 = vrot.lane.b32.xlu1 %v9802_v62, %s10430_s8 }
 0x3ec   :  { %v2716_v16 = vpop.permute.xlu0 %2715  ;;  %v2718_v44 = vpop.permute.xlu1 %2717 }
 0x3ed   :  { %2848 = vst.msk [vmem:[#allocation2 + $0x1e0] sm:$0xff] %vm2787_vm7, %v2716_v16  ;;  %2849 = vst.msk [vmem:[#allocation2 + $0x1e8] sm:$0xff] %vm2787_vm7, %v2718_v44 }
 0x3ee   :  { %3088 = vrot.lane.b32.xlu0 %v9803_v7, %s10430_s8  ;;  %3090 = vrot.lane.b32.xlu1 %v9804_v15, %s10430_s8 }
 0x3f0   :  { %v2720_v29 = vpop.permute.xlu0 %2719  ;;  %v2722_v60 = vpop.permute.xlu1 %2721 }
 0x3f1   :  { %2850 = vst.msk [vmem:[#allocation2 + $0x1f0] sm:$0xff] %vm2787_vm7, %v2720_v29  ;;  %2851 = vst.msk [vmem:[#allocation2 + $0x1f8] sm:$0xff] %vm2787_vm7, %v2722_v60  ;;  %vm7985_vm7 = vcmask 588800  }
 0x3f2   :  { %3092 = vrot.lane.b32.xlu0 %v9805_v45, %s10430_s8  ;;  %3094 = vrot.lane.b32.xlu1 %v9806_v28, %s10430_s8 }
 0x3f4   :  { %v2981_v54 = vpop.permute.xlu0 %2980  ;;  %v2983_v13 = vpop.permute.xlu1 %2982 }
 0x3f5   :  { %3173 = vst.msk [vmem:[#allocation2] sm:$0xff] %vm3172_vm9, %v2981_v54  ;;  %3174 = vst.msk [vmem:[#allocation2 + $0x8] sm:$0xff] %vm3172_vm9, %v2983_v13 }
 0x3f6   :  { %3096 = vrot.lane.b32.xlu0 %v9807_v61, %s10430_s8  ;;  %3098 = vrot.lane.b32.xlu1 %v9808_v11, %s10430_s8 }
 0x3f8   :  { %v2985_v19 = vpop.permute.xlu0 %2984  ;;  %v2987_v20 = vpop.permute.xlu1 %2986 }
 0x3f9   :  { %3175 = vst.msk [vmem:[#allocation2 + $0x10] sm:$0xff] %vm3172_vm9, %v2985_v19  ;;  %3176 = vst.msk [vmem:[#allocation2 + $0x18] sm:$0xff] %vm3172_vm9, %v2987_v20 }
 0x3fa   :  { %3100 = vrot.lane.b32.xlu0 %v9809_v17, %s10430_s8  ;;  %3102 = vrot.lane.b32.xlu1 %v9810_v18, %s10430_s8 }
 0x3fc   :  { %v2989_v24 = vpop.permute.xlu0 %2988  ;;  %v2991_v25 = vpop.permute.xlu1 %2990  ;;  %v3237_v26 = vld [vmem:[#allocation2] sm:$0xff]  ;;  %v3238_v27 = vld [vmem:[#allocation2 + $0x8] sm:$0xff] }
 0x3fd   :  { %3177 = vst.msk [vmem:[#allocation2 + $0x20] sm:$0xff] %vm3172_vm9, %v2989_v24  ;;  %3178 = vst.msk [vmem:[#allocation2 + $0x28] sm:$0xff] %vm3172_vm9, %v2991_v25  ;;  %10162 = vmatprep.mubr.msk.f32.mxu0 %vm3306_vm10, %v3237_v26 }
 0x3fe   :  { %3104 = vrot.lane.b32.xlu0 %v9811_v23, %s10430_s8  ;;  %10163 = vmatmul.mubr.msk.f32.vlgmr.msra.gmra.mrb[0].mxu0 %vm3306_vm10, %v3238_v27 }
 0x3ff   :  { %3106 = vrot.lane.b32.xlu1 %v9812_v30, %s10430_s8 }
 0x400   :  { %v2993_v31 = vpop.permute.xlu0 %2992  ;;  %v2995_v32 = vpop.permute.xlu1 %2994  ;;  %v3239_v33 = vld [vmem:[#allocation2 + $0x10] sm:$0xff]  ;;  %v3240_v34 = vld [vmem:[#allocation2 + $0x18] sm:$0xff] }
 0x401   :  { %3179 = vst.msk [vmem:[#allocation2 + $0x30] sm:$0xff] %vm3172_vm9, %v2993_v31  ;;  %3180 = vst.msk [vmem:[#allocation2 + $0x38] sm:$0xff] %vm3172_vm9, %v2995_v32  ;;  %10165 = vmatprep.mubr.msk.f32.mxu0 %vm3306_vm10, %v3239_v33 }
 0x402   :  { %10166 = vmatmul.mubr.msk.f32.gmra.mrb[2].mxu0 %vm3306_vm10, %v3240_v34 }
 0x404   :  { %v2997_v36 = vpop.permute.xlu0 %2996  ;;  %v2999_v38 = vpop.permute.xlu1 %2998  ;;  %v3241_v39 = vld [vmem:[#allocation2 + $0x20] sm:$0xff]  ;;  %v3242_v40 = vld [vmem:[#allocation2 + $0x28] sm:$0xff] }
 0x405   :  { %3181 = vst.msk [vmem:[#allocation2 + $0x40] sm:$0xff] %vm3172_vm9, %v2997_v36  ;;  %3182 = vst.msk [vmem:[#allocation2 + $0x48] sm:$0xff] %vm3172_vm9, %v2999_v38  ;;  %10168 = vmatprep.mubr.msk.f32.mxu0 %vm3306_vm10, %v3241_v39 }
 0x406   :  { %10169 = vmatmul.mubr.msk.f32.gmra.mrb[4].mxu0 %vm3306_vm10, %v3242_v40 }
 0x408   :  { %v3001_v41 = vpop.permute.xlu0 %3000  ;;  %v3003_v42 = vpop.permute.xlu1 %3002  ;;  %v3243_v43 = vld [vmem:[#allocation2 + $0x30] sm:$0xff]  ;;  %v3244_v46 = vld [vmem:[#allocation2 + $0x38] sm:$0xff] }
 0x409   :  { %3183 = vst.msk [vmem:[#allocation2 + $0x50] sm:$0xff] %vm3172_vm9, %v3001_v41  ;;  %3184 = vst.msk [vmem:[#allocation2 + $0x58] sm:$0xff] %vm3172_vm9, %v3003_v42  ;;  %10171 = vmatprep.mubr.msk.f32.mxu0 %vm3306_vm10, %v3243_v43 }
 0x40a   :  { %10172 = vmatmul.mubr.msk.f32.gmra.mrb[6].mxu0 %vm3306_vm10, %v3244_v46 }
 0x40c   :  { %v3005_v47 = vpop.permute.xlu0 %3004  ;;  %v3007_v48 = vpop.permute.xlu1 %3006  ;;  %v3245_v49 = vld [vmem:[#allocation2 + $0x40] sm:$0xff]  ;;  %v3246_v52 = vld [vmem:[#allocation2 + $0x48] sm:$0xff] }
 0x40d   :  { %3185 = vst.msk [vmem:[#allocation2 + $0x60] sm:$0xff] %vm3172_vm9, %v3005_v47  ;;  %3186 = vst.msk [vmem:[#allocation2 + $0x68] sm:$0xff] %vm3172_vm9, %v3007_v48  ;;  %10174 = vmatprep.mubr.msk.f32.mxu0 %vm3306_vm10, %v3245_v49 }
 0x40e   :  { %10175 = vmatmul.mubr.msk.f32.gmra.mrb[8].mxu0 %vm3306_vm10, %v3246_v52 }
 0x410   :  { %v3009_v53 = vpop.permute.xlu0 %3008  ;;  %v3011_v56 = vpop.permute.xlu1 %3010  ;;  %v3247_v57 = vld [vmem:[#allocation2 + $0x50] sm:$0xff]  ;;  %v3248_v2 = vld [vmem:[#allocation2 + $0x58] sm:$0xff] }
 0x411   :  { %3187 = vst.msk [vmem:[#allocation2 + $0x70] sm:$0xff] %vm3172_vm9, %v3009_v53  ;;  %3188 = vst.msk [vmem:[#allocation2 + $0x78] sm:$0xff] %vm3172_vm9, %v3011_v56  ;;  %10177 = vmatprep.mubr.msk.f32.mxu0 %vm3306_vm10, %v3247_v57 }
 0x412   :  { %10178 = vmatmul.mubr.msk.f32.gmra.mrb[10].mxu0 %vm3306_vm10, %v3248_v2 }
 0x414   :  { %v3013_v3 = vpop.permute.xlu0 %3012  ;;  %v3015_v10 = vpop.permute.xlu1 %3014  ;;  %v3249_v55 = vld [vmem:[#allocation2 + $0x60] sm:$0xff]  ;;  %v3250_v0 = vld [vmem:[#allocation2 + $0x68] sm:$0xff] }
 0x415   :  { %3189 = vst.msk [vmem:[#allocation2 + $0x80] sm:$0xff] %vm3172_vm9, %v3013_v3  ;;  %3190 = vst.msk [vmem:[#allocation2 + $0x88] sm:$0xff] %vm3172_vm9, %v3015_v10  ;;  %10180 = vmatprep.mubr.msk.f32.mxu0 %vm3306_vm10, %v3249_v55 }
 0x416   :  { %10181 = vmatmul.mubr.msk.f32.gmra.mrb[12].mxu0 %vm3306_vm10, %v3250_v0 }
 0x418   :  { %v3017_v1 = vpop.permute.xlu0 %3016  ;;  %v3019_v4 = vpop.permute.xlu1 %3018  ;;  %v3251_v5 = vld [vmem:[#allocation2 + $0x70] sm:$0xff]  ;;  %v3252_v8 = vld [vmem:[#allocation2 + $0x78] sm:$0xff] }
 0x419   :  { %3191 = vst.msk [vmem:[#allocation2 + $0x90] sm:$0xff] %vm3172_vm9, %v3017_v1  ;;  %3192 = vst.msk [vmem:[#allocation2 + $0x98] sm:$0xff] %vm3172_vm9, %v3019_v4  ;;  %10183 = vmatprep.mubr.msk.f32.mxu0 %vm3306_vm10, %v3251_v5 }
 0x41a   :  { %10184 = vmatmul.mubr.msk.f32.gmra.mrb[14].mxu0 %vm3306_vm10, %v3252_v8 }
 0x41c   :  { %v3021_v9 = vpop.permute.xlu0 %3020  ;;  %v3023_v12 = vpop.permute.xlu1 %3022  ;;  %v3253_v14 = vld [vmem:[#allocation2 + $0x80] sm:$0xff]  ;;  %v3254_v21 = vld [vmem:[#allocation2 + $0x88] sm:$0xff] }
 0x41d   :  { %3193 = vst.msk [vmem:[#allocation2 + $0xa0] sm:$0xff] %vm3172_vm9, %v3021_v9  ;;  %3194 = vst.msk [vmem:[#allocation2 + $0xa8] sm:$0xff] %vm3172_vm9, %v3023_v12  ;;  %10186 = vmatprep.mubr.msk.f32.mxu0 %vm3306_vm10, %v3253_v14 }
 0x41e   :  { %10187 = vmatmul.mubr.msk.f32.gmra.mrb[16].mxu0 %vm3306_vm10, %v3254_v21 }
 0x420   :  { %v3025_v22 = vpop.permute.xlu0 %3024  ;;  %v3027_v35 = vpop.permute.xlu1 %3026  ;;  %v3255_v37 = vld [vmem:[#allocation2 + $0x90] sm:$0xff]  ;;  %v3256_v50 = vld [vmem:[#allocation2 + $0x98] sm:$0xff] }
 0x421   :  { %3195 = vst.msk [vmem:[#allocation2 + $0xb0] sm:$0xff] %vm3172_vm9, %v3025_v22  ;;  %3196 = vst.msk [vmem:[#allocation2 + $0xb8] sm:$0xff] %vm3172_vm9, %v3027_v35  ;;  %10189 = vmatprep.mubr.msk.f32.mxu0 %vm3306_vm10, %v3255_v37 }
 0x422   :  { %10190 = vmatmul.mubr.msk.f32.gmra.mrb[18].mxu0 %vm3306_vm10, %v3256_v50 }
 0x424   :  { %v3029_v51 = vpop.permute.xlu0 %3028  ;;  %v3031_v58 = vpop.permute.xlu1 %3030  ;;  %v3257_v59 = vld [vmem:[#allocation2 + $0xa0] sm:$0xff]  ;;  %v3258_v62 = vld [vmem:[#allocation2 + $0xa8] sm:$0xff] }
 0x425   :  { %3197 = vst.msk [vmem:[#allocation2 + $0xc0] sm:$0xff] %vm3172_vm9, %v3029_v51  ;;  %3198 = vst.msk [vmem:[#allocation2 + $0xc8] sm:$0xff] %vm3172_vm9, %v3031_v58  ;;  %10192 = vmatprep.mubr.msk.f32.mxu0 %vm3306_vm10, %v3257_v59 }
 0x426   :  { %10193 = vmatmul.mubr.msk.f32.gmra.mrb[20].mxu0 %vm3306_vm10, %v3258_v62 }
 0x428   :  { %v3033_v63 = vpop.permute.xlu0 %3032  ;;  %v3035_v6 = vpop.permute.xlu1 %3034  ;;  %v3259_v7 = vld [vmem:[#allocation2 + $0xb0] sm:$0xff]  ;;  %v3260_v15 = vld [vmem:[#allocation2 + $0xb8] sm:$0xff] }
 0x429   :  { %3199 = vst.msk [vmem:[#allocation2 + $0xd0] sm:$0xff] %vm3172_vm9, %v3033_v63  ;;  %3200 = vst.msk [vmem:[#allocation2 + $0xd8] sm:$0xff] %vm3172_vm9, %v3035_v6  ;;  %10195 = vmatprep.mubr.msk.f32.mxu0 %vm3306_vm10, %v3259_v7 }
 0x42a   :  { %10196 = vmatmul.mubr.msk.f32.gmra.mrb[22].mxu0 %vm3306_vm10, %v3260_v15 }
 0x42c   :  { %v3037_v16 = vpop.permute.xlu0 %3036  ;;  %v3039_v44 = vpop.permute.xlu1 %3038  ;;  %v3261_v45 = vld [vmem:[#allocation2 + $0xc0] sm:$0xff]  ;;  %v3262_v28 = vld [vmem:[#allocation2 + $0xc8] sm:$0xff] }
 0x42d   :  { %3201 = vst.msk [vmem:[#allocation2 + $0xe0] sm:$0xff] %vm3172_vm9, %v3037_v16  ;;  %3202 = vst.msk [vmem:[#allocation2 + $0xe8] sm:$0xff] %vm3172_vm9, %v3039_v44  ;;  %10198 = vmatprep.mubr.msk.f32.mxu0 %vm3306_vm10, %v3261_v45 }
 0x42e   :  { %10199 = vmatmul.mubr.msk.f32.gmra.mrb[24].mxu0 %vm3306_vm10, %v3262_v28 }
 0x430   :  { %v3041_v29 = vpop.permute.xlu0 %3040  ;;  %v3043_v60 = vpop.permute.xlu1 %3042  ;;  %v3263_v61 = vld [vmem:[#allocation2 + $0xd0] sm:$0xff]  ;;  %v3264_v11 = vld [vmem:[#allocation2 + $0xd8] sm:$0xff] }
 0x431   :  { %3203 = vst.msk [vmem:[#allocation2 + $0xf0] sm:$0xff] %vm3172_vm9, %v3041_v29  ;;  %3204 = vst.msk [vmem:[#allocation2 + $0xf8] sm:$0xff] %vm3172_vm9, %v3043_v60  ;;  %10201 = vmatprep.mubr.msk.f32.mxu0 %vm3306_vm10, %v3263_v61 }
 0x432   :  { %10202 = vmatmul.mubr.msk.f32.gmra.mrb[26].mxu0 %vm3306_vm10, %v3264_v11 }
 0x434   :  { %v3045_v54 = vpop.permute.xlu0 %3044  ;;  %v3047_v13 = vpop.permute.xlu1 %3046  ;;  %v3265_v17 = vld [vmem:[#allocation2 + $0xe0] sm:$0xff]  ;;  %v3266_v18 = vld [vmem:[#allocation2 + $0xe8] sm:$0xff] }
 0x435   :  { %3205 = vst.msk [vmem:[#allocation2 + $0x100] sm:$0xff] %vm3172_vm9, %v3045_v54  ;;  %3206 = vst.msk [vmem:[#allocation2 + $0x108] sm:$0xff] %vm3172_vm9, %v3047_v13  ;;  %10204 = vmatprep.mubr.msk.f32.mxu0 %vm3306_vm10, %v3265_v17 }
 0x436   :  { %10205 = vmatmul.mubr.msk.f32.gmra.mrb[28].mxu0 %vm3306_vm10, %v3266_v18 }
 0x438   :  { %v3049_v19 = vpop.permute.xlu0 %3048  ;;  %v3051_v20 = vpop.permute.xlu1 %3050  ;;  %v3267_v23 = vld [vmem:[#allocation2 + $0xf0] sm:$0xff]  ;;  %v3268_v24 = vld [vmem:[#allocation2 + $0xf8] sm:$0xff] }
 0x439   :  { %3207 = vst.msk [vmem:[#allocation2 + $0x110] sm:$0xff] %vm3172_vm9, %v3049_v19  ;;  %3208 = vst.msk [vmem:[#allocation2 + $0x118] sm:$0xff] %vm3172_vm9, %v3051_v20  ;;  %10207 = vmatprep.mubr.msk.f32.mxu0 %vm3306_vm10, %v3267_v23 }
 0x43a   :  { %10208 = vmatmul.mubr.msk.f32.gmra.mrb[30].mxu0 %vm3306_vm10, %v3268_v24 }
 0x43c   :  { %v3053_v25 = vpop.permute.xlu0 %3052  ;;  %v3055_v26 = vpop.permute.xlu1 %3054  ;;  %v3269_v27 = vld [vmem:[#allocation2 + $0x100] sm:$0xff]  ;;  %v3270_v30 = vld [vmem:[#allocation2 + $0x108] sm:$0xff] }
 0x43d   :  { %3209 = vst.msk [vmem:[#allocation2 + $0x120] sm:$0xff] %vm3172_vm9, %v3053_v25  ;;  %3210 = vst.msk [vmem:[#allocation2 + $0x128] sm:$0xff] %vm3172_vm9, %v3055_v26  ;;  %10210 = vmatprep.mubr.msk.f32.mxu0 %vm3306_vm10, %v3269_v27 }
 0x43e   :  { %10211 = vmatmul.mubr.msk.f32.gmra.mrb[32].mxu0 %vm3306_vm10, %v3270_v30 }
 0x440   :  { %v3057_v31 = vpop.permute.xlu0 %3056  ;;  %v3059_v32 = vpop.permute.xlu1 %3058  ;;  %v3271_v33 = vld [vmem:[#allocation2 + $0x110] sm:$0xff]  ;;  %v3272_v34 = vld [vmem:[#allocation2 + $0x118] sm:$0xff] }
 0x441   :  { %3211 = vst.msk [vmem:[#allocation2 + $0x130] sm:$0xff] %vm3172_vm9, %v3057_v31  ;;  %3212 = vst.msk [vmem:[#allocation2 + $0x138] sm:$0xff] %vm3172_vm9, %v3059_v32  ;;  %10213 = vmatprep.mubr.msk.f32.mxu0 %vm3306_vm10, %v3271_v33 }
 0x442   :  { %10214 = vmatmul.mubr.msk.f32.gmra.mrb[34].mxu0 %vm3306_vm10, %v3272_v34 }
 0x444   :  { %v3061_v36 = vpop.permute.xlu0 %3060  ;;  %v3063_v38 = vpop.permute.xlu1 %3062  ;;  %v3273_v39 = vld [vmem:[#allocation2 + $0x120] sm:$0xff]  ;;  %v3274_v40 = vld [vmem:[#allocation2 + $0x128] sm:$0xff] }
 0x445   :  { %3213 = vst.msk [vmem:[#allocation2 + $0x140] sm:$0xff] %vm3172_vm9, %v3061_v36  ;;  %3214 = vst.msk [vmem:[#allocation2 + $0x148] sm:$0xff] %vm3172_vm9, %v3063_v38  ;;  %10216 = vmatprep.mubr.msk.f32.mxu0 %vm3306_vm10, %v3273_v39 }
 0x446   :  { %10217 = vmatmul.mubr.msk.f32.gmra.mrb[36].mxu0 %vm3306_vm10, %v3274_v40 }
 0x448   :  { %v3065_v41 = vpop.permute.xlu0 %3064  ;;  %v3067_v42 = vpop.permute.xlu1 %3066  ;;  %v3275_v43 = vld [vmem:[#allocation2 + $0x130] sm:$0xff]  ;;  %v3276_v46 = vld [vmem:[#allocation2 + $0x138] sm:$0xff] }
 0x449   :  { %3215 = vst.msk [vmem:[#allocation2 + $0x150] sm:$0xff] %vm3172_vm9, %v3065_v41  ;;  %3216 = vst.msk [vmem:[#allocation2 + $0x158] sm:$0xff] %vm3172_vm9, %v3067_v42  ;;  %10219 = vmatprep.mubr.msk.f32.mxu0 %vm3306_vm10, %v3275_v43 }
 0x44a   :  { %10220 = vmatmul.mubr.msk.f32.gmra.mrb[38].mxu0 %vm3306_vm10, %v3276_v46 }
 0x44c   :  { %v3069_v47 = vpop.permute.xlu0 %3068  ;;  %v3071_v48 = vpop.permute.xlu1 %3070  ;;  %v3277_v49 = vld [vmem:[#allocation2 + $0x140] sm:$0xff]  ;;  %v3278_v52 = vld [vmem:[#allocation2 + $0x148] sm:$0xff] }
 0x44d   :  { %3217 = vst.msk [vmem:[#allocation2 + $0x160] sm:$0xff] %vm3172_vm9, %v3069_v47  ;;  %3218 = vst.msk [vmem:[#allocation2 + $0x168] sm:$0xff] %vm3172_vm9, %v3071_v48  ;;  %10222 = vmatprep.mubr.msk.f32.mxu0 %vm3306_vm10, %v3277_v49 }
 0x44e   :  { %10223 = vmatmul.mubr.msk.f32.gmra.mrb[40].mxu0 %vm3306_vm10, %v3278_v52 }
 0x450   :  { %v3073_v53 = vpop.permute.xlu0 %3072  ;;  %v3075_v56 = vpop.permute.xlu1 %3074  ;;  %v3279_v57 = vld [vmem:[#allocation2 + $0x150] sm:$0xff]  ;;  %v3280_v2 = vld [vmem:[#allocation2 + $0x158] sm:$0xff] }
 0x451   :  { %3219 = vst.msk [vmem:[#allocation2 + $0x170] sm:$0xff] %vm3172_vm9, %v3073_v53  ;;  %3220 = vst.msk [vmem:[#allocation2 + $0x178] sm:$0xff] %vm3172_vm9, %v3075_v56  ;;  %10225 = vmatprep.mubr.msk.f32.mxu0 %vm3306_vm10, %v3279_v57 }
 0x452   :  { %10226 = vmatmul.mubr.msk.f32.gmra.mrb[42].mxu0 %vm3306_vm10, %v3280_v2 }
 0x454   :  { %v3077_v3 = vpop.permute.xlu0 %3076  ;;  %v3079_v10 = vpop.permute.xlu1 %3078  ;;  %v3281_v55 = vld [vmem:[#allocation2 + $0x160] sm:$0xff]  ;;  %v3282_v0 = vld [vmem:[#allocation2 + $0x168] sm:$0xff] }
 0x455   :  { %3221 = vst.msk [vmem:[#allocation2 + $0x180] sm:$0xff] %vm3172_vm9, %v3077_v3  ;;  %3222 = vst.msk [vmem:[#allocation2 + $0x188] sm:$0xff] %vm3172_vm9, %v3079_v10  ;;  %10228 = vmatprep.mubr.msk.f32.mxu0 %vm3306_vm10, %v3281_v55 }
 0x456   :  { %10229 = vmatmul.mubr.msk.f32.gmra.mrb[44].mxu0 %vm3306_vm10, %v3282_v0 }
 0x458   :  { %v3081_v1 = vpop.permute.xlu0 %3080  ;;  %v3083_v4 = vpop.permute.xlu1 %3082  ;;  %v3283_v5 = vld [vmem:[#allocation2 + $0x170] sm:$0xff]  ;;  %v3284_v8 = vld [vmem:[#allocation2 + $0x178] sm:$0xff] }
 0x459   :  { %3223 = vst.msk [vmem:[#allocation2 + $0x190] sm:$0xff] %vm3172_vm9, %v3081_v1  ;;  %3224 = vst.msk [vmem:[#allocation2 + $0x198] sm:$0xff] %vm3172_vm9, %v3083_v4  ;;  %10231 = vmatprep.mubr.msk.f32.mxu0 %vm3306_vm10, %v3283_v5 }
 0x45a   :  { %10232 = vmatmul.mubr.msk.f32.gmra.mrb[46].mxu0 %vm3306_vm10, %v3284_v8 }
 0x45c   :  { %v3085_v9 = vpop.permute.xlu0 %3084  ;;  %v3087_v12 = vpop.permute.xlu1 %3086  ;;  %v3285_v14 = vld [vmem:[#allocation2 + $0x180] sm:$0xff]  ;;  %v3286_v21 = vld [vmem:[#allocation2 + $0x188] sm:$0xff] }
 0x45d   :  { %3225 = vst.msk [vmem:[#allocation2 + $0x1a0] sm:$0xff] %vm3172_vm9, %v3085_v9  ;;  %3226 = vst.msk [vmem:[#allocation2 + $0x1a8] sm:$0xff] %vm3172_vm9, %v3087_v12  ;;  %10234 = vmatprep.mubr.msk.f32.mxu0 %vm3306_vm10, %v3285_v14 }
 0x45e   :  { %10235 = vmatmul.mubr.msk.f32.gmra.mrb[48].mxu0 %vm3306_vm10, %v3286_v21 }
 0x460   :  { %v3089_v22 = vpop.permute.xlu0 %3088  ;;  %v3091_v35 = vpop.permute.xlu1 %3090  ;;  %v3287_v37 = vld [vmem:[#allocation2 + $0x190] sm:$0xff]  ;;  %v3288_v50 = vld [vmem:[#allocation2 + $0x198] sm:$0xff] }
 0x461   :  { %3227 = vst.msk [vmem:[#allocation2 + $0x1b0] sm:$0xff] %vm3172_vm9, %v3089_v22  ;;  %3228 = vst.msk [vmem:[#allocation2 + $0x1b8] sm:$0xff] %vm3172_vm9, %v3091_v35  ;;  %10237 = vmatprep.mubr.msk.f32.mxu0 %vm3306_vm10, %v3287_v37 }
 0x462   :  { %10238 = vmatmul.mubr.msk.f32.gmra.mrb[50].mxu0 %vm3306_vm10, %v3288_v50 }
 0x464   :  { %v3093_v51 = vpop.permute.xlu0 %3092  ;;  %v3095_v58 = vpop.permute.xlu1 %3094  ;;  %v3289_v59 = vld [vmem:[#allocation2 + $0x1a0] sm:$0xff]  ;;  %v3290_v62 = vld [vmem:[#allocation2 + $0x1a8] sm:$0xff] }
 0x465   :  { %3229 = vst.msk [vmem:[#allocation2 + $0x1c0] sm:$0xff] %vm3172_vm9, %v3093_v51  ;;  %3230 = vst.msk [vmem:[#allocation2 + $0x1c8] sm:$0xff] %vm3172_vm9, %v3095_v58  ;;  %10240 = vmatprep.mubr.msk.f32.mxu0 %vm3306_vm10, %v3289_v59 }
 0x466   :  { %10241 = vmatmul.mubr.msk.f32.gmra.mrb[52].mxu0 %vm3306_vm10, %v3290_v62 }
 0x468   :  { %v3097_v63 = vpop.permute.xlu0 %3096  ;;  %v3099_v6 = vpop.permute.xlu1 %3098  ;;  %v3291_v7 = vld [vmem:[#allocation2 + $0x1b0] sm:$0xff]  ;;  %v3292_v15 = vld [vmem:[#allocation2 + $0x1b8] sm:$0xff] }
 0x469   :  { %3231 = vst.msk [vmem:[#allocation2 + $0x1d0] sm:$0xff] %vm3172_vm9, %v3097_v63  ;;  %3232 = vst.msk [vmem:[#allocation2 + $0x1d8] sm:$0xff] %vm3172_vm9, %v3099_v6  ;;  %10243 = vmatprep.mubr.msk.f32.mxu0 %vm3306_vm10, %v3291_v7 }
 0x46a   :  { %10244 = vmatmul.mubr.msk.f32.gmra.mrb[54].mxu0 %vm3306_vm10, %v3292_v15 }
 0x46c   :  { %v3101_v16 = vpop.permute.xlu0 %3100  ;;  %v3103_v44 = vpop.permute.xlu1 %3102  ;;  %v3293_v45 = vld [vmem:[#allocation2 + $0x1c0] sm:$0xff]  ;;  %v3294_v28 = vld [vmem:[#allocation2 + $0x1c8] sm:$0xff] }
 0x46d   :  { %3233 = vst.msk [vmem:[#allocation2 + $0x1e0] sm:$0xff] %vm3172_vm9, %v3101_v16  ;;  %3234 = vst.msk [vmem:[#allocation2 + $0x1e8] sm:$0xff] %vm3172_vm9, %v3103_v44  ;;  %10246 = vmatprep.mubr.msk.f32.mxu0 %vm3306_vm10, %v3293_v45 }
 0x46e   :  { %10247 = vmatmul.mubr.msk.f32.gmra.mrb[56].mxu0 %vm3306_vm10, %v3294_v28 }
 0x470   :  { %v3105_v29 = vpop.permute.xlu0 %3104  ;;  %v3295_v60 = vld [vmem:[#allocation2 + $0x1d0] sm:$0xff]  ;;  %v3296_v61 = vld [vmem:[#allocation2 + $0x1d8] sm:$0xff] }
 0x471   :  { %3235 = vst.msk [vmem:[#allocation2 + $0x1f0] sm:$0xff] %vm3172_vm9, %v3105_v29  ;;  %v3107_v11 = vpop.permute.xlu1 %3106  ;;  %10249 = vmatprep.mubr.msk.f32.mxu0 %vm3306_vm10, %v3295_v60 }
 0x472   :  { %3236 = vst.msk [vmem:[#allocation2 + $0x1f8] sm:$0xff] %vm3172_vm9, %v3107_v11  ;;  %10250 = vmatmul.mubr.msk.f32.gmra.mrb[58].mxu0 %vm3306_vm10, %v3296_v61 }
 0x474   :  { %v3297_v54 = vld [vmem:[#allocation2 + $0x1e0] sm:$0xff]  ;;  %v3298_v13 = vld [vmem:[#allocation2 + $0x1e8] sm:$0xff] }
 0x475   :  { %10252 = vmatprep.mubr.msk.f32.mxu0 %vm3306_vm10, %v3297_v54 }
 0x476   :  { %10253 = vmatmul.mubr.msk.f32.gmra.mrb[60].mxu0 %vm3306_vm10, %v3298_v13 }
 0x478   :  { %v3299_v17 = vld [vmem:[#allocation2 + $0x1f0] sm:$0xff] }
 0x479   :  { %10255 = vmatprep.mubr.msk.f32.mxu0 %vm3306_vm10, %v3299_v17  ;;  %v3300_v18 = vld [vmem:[#allocation2 + $0x1f8] sm:$0xff] }
 0x47a   :  { %10256 = vmatmul.mubr.msk.f32.gmra.mrb[62].mxu0 %vm3306_vm10, %v3300_v18 }
 0x4d1   :  { %v13431_v19 = vpop.f32.mrb[0].mxu0 }
 0x4d2   :  { %v3890_v20 = vsel %vm3888_vm11, %v13431_v19, 0.0  ;;  %v4023_v23 = vmul.f32 %v13431_v19, %v13431_v19  ;;  %v13437_v24 = vpop.f32.mrb[1].mxu0 }
 0x4d3   :  { %v3889_v25 = vsel %vm3888_vm11, %v13437_v24, 0.0  ;;  %v4022_v26 = vmul.f32 %v13437_v24, %v13437_v24 }
 0x4d4   :  { %v4087_v27 = vsel %vm3888_vm11, %v4023_v23, 0.0  ;;  %v3891_v30 = vadd.f32 %v3890_v20, %v3889_v25 }
 0x4d5   :  { %v4086_v31 = vsel %vm3888_vm11, %v4022_v26, 0.0  ;;  %v13445_v32 = vpop.f32.mrb[2].mxu0 }
 0x4d6   :  { %v4088_v33 = vadd.f32 %v4087_v27, %v4086_v31  ;;  %v13447_v34 = vpop.f32.mrb[3].mxu0  ;;  %v4025_v36 = vmul.f32 %v13445_v32, %v13445_v32  ;;  %v3894_v41 = vsel %vm3888_vm11, %v13445_v32, 0.0 }
 0x4d7   :  { %v3892_v38 = vsel %vm3888_vm11, %v13447_v34, 0.0  ;;  %v4024_v39 = vmul.f32 %v13447_v34, %v13447_v34 }
 0x4d8   :  { %v3893_v40 = vadd.f32 %v3892_v38, %v3891_v30  ;;  %v4091_v49 = vsel %vm3888_vm11, %v4025_v36, 0.0 }
 0x4d9   :  { %v4089_v42 = vsel %vm3888_vm11, %v4024_v39, 0.0  ;;  %v13458_v43 = vpop.f32.mrb[4].mxu0 }
 0x4da   :  { %v3895_v46 = vadd.f32 %v3894_v41, %v3893_v40  ;;  %v4090_v47 = vadd.f32 %v4089_v42, %v4088_v33  ;;  %v13460_v48 = vpop.f32.mrb[5].mxu0  ;;  %v4027_v52 = vmul.f32 %v13458_v43, %v13458_v43  ;;  %v3898_v3 = vsel %vm3888_vm11, %v13458_v43, 0.0 }
 0x4db   :  { %v3896_v53 = vsel %vm3888_vm11, %v13460_v48, 0.0  ;;  %v4026_v56 = vmul.f32 %v13460_v48, %v13460_v48 }
 0x4dc   :  { %v4092_v57 = vadd.f32 %v4091_v49, %v4090_v47  ;;  %v3897_v2 = vadd.f32 %v3896_v53, %v3895_v46  ;;  %v4095_v5 = vsel %vm3888_vm11, %v4027_v52, 0.0 }
 0x4dd   :  { %v4093_v10 = vsel %vm3888_vm11, %v4026_v56, 0.0  ;;  %v13472_v55 = vpop.f32.mrb[6].mxu0 }
 0x4de   :  { %v4094_v0 = vadd.f32 %v4093_v10, %v4092_v57  ;;  %v13474_v1 = vpop.f32.mrb[7].mxu0  ;;  %v3899_v4 = vadd.f32 %v3898_v3, %v3897_v2  ;;  %v4029_v8 = vmul.f32 %v13472_v55, %v13472_v55  ;;  %v3902_v22 = vsel %vm3888_vm11, %v13472_v55, 0.0 }
 0x4df   :  { %v3900_v9 = vsel %vm3888_vm11, %v13474_v1, 0.0  ;;  %v4028_v12 = vmul.f32 %v13474_v1, %v13474_v1 }
 0x4e0   :  { %v3901_v14 = vadd.f32 %v3900_v9, %v3899_v4  ;;  %v4096_v21 = vadd.f32 %v4095_v5, %v4094_v0  ;;  %v4099_v59 = vsel %vm3888_vm11, %v4029_v8, 0.0 }
 0x4e1   :  { %v4097_v35 = vsel %vm3888_vm11, %v4028_v12, 0.0  ;;  %v13486_v37 = vpop.f32.mrb[8].mxu0 }
 0x4e2   :  { %v4098_v50 = vadd.f32 %v4097_v35, %v4096_v21  ;;  %v13488_v51 = vpop.f32.mrb[9].mxu0  ;;  %v3903_v58 = vadd.f32 %v3902_v22, %v3901_v14  ;;  %v4031_v62 = vmul.f32 %v13486_v37, %v13486_v37  ;;  %v3906_v16 = vsel %vm3888_vm11, %v13486_v37, 0.0 }
 0x4e3   :  { %v3904_v63 = vsel %vm3888_vm11, %v13488_v51, 0.0  ;;  %v4030_v6 = vmul.f32 %v13488_v51, %v13488_v51 }
 0x4e4   :  { %v3905_v7 = vadd.f32 %v3904_v63, %v3903_v58  ;;  %v4100_v15 = vadd.f32 %v4099_v59, %v4098_v50  ;;  %v4103_v61 = vsel %vm3888_vm11, %v4031_v62, 0.0 }
 0x4e5   :  { %v4101_v44 = vsel %vm3888_vm11, %v4030_v6, 0.0  ;;  %v13500_v45 = vpop.f32.mrb[10].mxu0 }
 0x4e6   :  { %v4102_v28 = vadd.f32 %v4101_v44, %v4100_v15  ;;  %v13502_v29 = vpop.f32.mrb[11].mxu0  ;;  %v3907_v60 = vadd.f32 %v3906_v16, %v3905_v7  ;;  %v4033_v11 = vmul.f32 %v13500_v45, %v13500_v45  ;;  %v3910_v20 = vsel %vm3888_vm11, %v13500_v45, 0.0 }
 0x4e7   :  { %v3908_v54 = vsel %vm3888_vm11, %v13502_v29, 0.0  ;;  %v4032_v13 = vmul.f32 %v13502_v29, %v13502_v29 }
 0x4e8   :  { %v3909_v17 = vadd.f32 %v3908_v54, %v3907_v60  ;;  %v4104_v18 = vadd.f32 %v4103_v61, %v4102_v28  ;;  %v4107_v31 = vsel %vm3888_vm11, %v4033_v11, 0.0 }
 0x4e9   :  { %v4105_v23 = vsel %vm3888_vm11, %v4032_v13, 0.0  ;;  %v13514_v25 = vpop.f32.mrb[12].mxu0 }
 0x4ea   :  { %v4106_v26 = vadd.f32 %v4105_v23, %v4104_v18  ;;  %v13516_v27 = vpop.f32.mrb[13].mxu0  ;;  %v3911_v30 = vadd.f32 %v3910_v20, %v3909_v17  ;;  %v4035_v33 = vmul.f32 %v13514_v25, %v13514_v25  ;;  %v3914_v41 = vsel %vm3888_vm11, %v13514_v25, 0.0 }
 0x4eb   :  { %v3912_v36 = vsel %vm3888_vm11, %v13516_v27, 0.0  ;;  %v4034_v38 = vmul.f32 %v13516_v27, %v13516_v27 }
 0x4ec   :  { %v3913_v39 = vadd.f32 %v3912_v36, %v3911_v30  ;;  %v4108_v40 = vadd.f32 %v4107_v31, %v4106_v26  ;;  %v4111_v53 = vsel %vm3888_vm11, %v4035_v33, 0.0 }
 0x4ed   :  { %v4109_v42 = vsel %vm3888_vm11, %v4034_v38, 0.0  ;;  %v13528_v46 = vpop.f32.mrb[14].mxu0 }
 0x4ee   :  { %v4110_v47 = vadd.f32 %v4109_v42, %v4108_v40  ;;  %v13530_v49 = vpop.f32.mrb[15].mxu0  ;;  %v3915_v52 = vadd.f32 %v3914_v41, %v3913_v39  ;;  %v4037_v56 = vmul.f32 %v13528_v46, %v13528_v46  ;;  %v3918_v0 = vsel %vm3888_vm11, %v13528_v46, 0.0 }
 0x4ef   :  { %v3916_v57 = vsel %vm3888_vm11, %v13530_v49, 0.0  ;;  %v4036_v2 = vmul.f32 %v13530_v49, %v13530_v49  ;;  %v19008_v39 = vmov 0.0  }
 0x4f0   :  { %v3917_v3 = vadd.f32 %v3916_v57, %v3915_v52  ;;  %v4112_v10 = vadd.f32 %v4111_v53, %v4110_v47  ;;  %v4115_v14 = vsel %vm3888_vm11, %v4037_v56, 0.0  ;;  %4560 = vst.msk [vmem:[#allocation3 + $0x8] sm:$0xff] %vm3888_vm11, %v19008_v39  ;;  %4559 = vst.msk [vmem:[#allocation3] sm:$0xff] %vm3888_vm11, %v19008_v39 }
 0x4f1   :  { %v4113_v4 = vsel %vm3888_vm11, %v4036_v2, 0.0  ;;  %v13542_v5 = vpop.f32.mrb[16].mxu0  ;;  %4562 = vst.msk [vmem:[#allocation3 + $0x10] sm:$0x3] %vm4561_vm12, %v19008_v39  ;;  %4565 = vst.msk [vmem:[#allocation3 + $0x1c0] sm:$0x3] %vm4561_vm12, %v19008_v39 }
 0x4f2   :  { %v4114_v8 = vadd.f32 %v4113_v4, %v4112_v10  ;;  %v13544_v9 = vpop.f32.mrb[17].mxu0  ;;  %v3919_v12 = vadd.f32 %v3918_v0, %v3917_v3  ;;  %v4039_v21 = vmul.f32 %v13542_v5, %v13542_v5  ;;  %v3922_v59 = vsel %vm3888_vm11, %v13542_v5, 0.0  ;;  %4563 = vst.msk [vmem:[#allocation3 + $0x1b0] sm:$0xff] %vm3888_vm11, %v19008_v39  ;;  %4564 = vst.msk [vmem:[#allocation3 + $0x1b8] sm:$0xff] %vm3888_vm11, %v19008_v39 }
 0x4f3   :  { %v3920_v22 = vsel %vm3888_vm11, %v13544_v9, 0.0  ;;  %v4038_v35 = vmul.f32 %v13544_v9, %v13544_v9  ;;  %4567 = vst.msk [vmem:[#allocation3 + $0x198] sm:$0xff] %vm3888_vm11, %v19008_v39  ;;  %4568 = vst.msk [vmem:[#allocation3 + $0x1a0] sm:$0xff] %vm3888_vm11, %v19008_v39 }
 0x4f4   :  { %v3921_v50 = vadd.f32 %v3920_v22, %v3919_v12  ;;  %v4116_v58 = vadd.f32 %v4115_v14, %v4114_v8  ;;  %v4119_v44 = vsel %vm3888_vm11, %v4039_v21, 0.0  ;;  %4569 = vst.msk [vmem:[#allocation3 + $0x1a8] sm:$0x3] %vm4561_vm12, %v19008_v39  ;;  %4572 = vst.msk [vmem:[#allocation3 + $0x358] sm:$0x3] %vm4561_vm12, %v19008_v39 }
 0x4f5   :  { %v4117_v62 = vsel %vm3888_vm11, %v4038_v35, 0.0  ;;  %v13556_v63 = vpop.f32.mrb[18].mxu0  ;;  %4570 = vst.msk [vmem:[#allocation3 + $0x348] sm:$0xff] %vm3888_vm11, %v19008_v39  ;;  %4571 = vst.msk [vmem:[#allocation3 + $0x350] sm:$0xff] %vm3888_vm11, %v19008_v39 }
 0x4f6   :  { %v4118_v6 = vadd.f32 %v4117_v62, %v4116_v58  ;;  %v4041_v7 = vmul.f32 %v13556_v63, %v13556_v63  ;;  %v13560_v15 = vpop.f32.mrb[19].mxu0  ;;  %v3923_v16 = vadd.f32 %v3922_v59, %v3921_v50  ;;  %v3926_v54 = vsel %vm3888_vm11, %v13556_v63, 0.0 }
 0x4f7   :  { %v3924_v28 = vsel %vm3888_vm11, %v13560_v15, 0.0  ;;  %v4040_v60 = vmul.f32 %v13560_v15, %v13560_v15 }
 0x4f8   :  { %v3925_v61 = vadd.f32 %v3924_v28, %v3923_v16  ;;  %v4120_v11 = vadd.f32 %v4119_v44, %v4118_v6  ;;  %v4123_v18 = vsel %vm3888_vm11, %v4041_v7, 0.0  ;;  %v4832_v62 = vld [vmem:[#allocation3 + $0x9] sm:$0xff]  ;;  %v4831_v6 = vld [vmem:[#allocation3 + $0x1] sm:$0xff] }
 0x4f9   :  { %v4121_v13 = vsel %vm3888_vm11, %v4040_v60, 0.0  ;;  %v13570_v17 = vpop.f32.mrb[20].mxu0  ;;  %4961 = vrot.lane.b32.xlu1 %v4832_v62, %s10424_s20  ;;  %4959 = vrot.lane.b32.xlu0 %v4831_v6, %s10424_s20 }
 0x4fa   :  { %v4122_v20 = vadd.f32 %v4121_v13, %v4120_v11  ;;  %v4043_v23 = vmul.f32 %v13570_v17, %v13570_v17  ;;  %v13575_v26 = vpop.f32.mrb[21].mxu0  ;;  %v3927_v30 = vadd.f32 %v3926_v54, %v3925_v61  ;;  %v3930_v40 = vsel %vm3888_vm11, %v13570_v17, 0.0 }
 0x4fb   :  { %v3928_v31 = vsel %vm3888_vm11, %v13575_v26, 0.0  ;;  %v4042_v33 = vmul.f32 %v13575_v26, %v13575_v26 }
 0x4fc   :  { %v3929_v36 = vadd.f32 %v3928_v31, %v3927_v30  ;;  %v4124_v38 = vadd.f32 %v4123_v18, %v4122_v20  ;;  %v4127_v56 = vsel %vm3888_vm11, %v4043_v23, 0.0 }
 0x4fd   :  { %v4125_v41 = vsel %vm3888_vm11, %v4042_v33, 0.0  ;;  %v13604_v42 = vpop.f32.mrb[22].mxu0 }
 0x4fe   :  { %v4126_v47 = vadd.f32 %v4125_v41, %v4124_v38  ;;  %v13606_v52 = vpop.f32.mrb[23].mxu0  ;;  %v3931_v53 = vadd.f32 %v3930_v40, %v3929_v36  ;;  %v4045_v57 = vmul.f32 %v13604_v42, %v13604_v42  ;;  %v3934_v4 = vsel %vm3888_vm11, %v13604_v42, 0.0 }
 0x4ff   :  { %v3932_v2 = vsel %vm3888_vm11, %v13606_v52, 0.0  ;;  %v4044_v3 = vmul.f32 %v13606_v52, %v13606_v52 }
 0x500   :  { %v3933_v10 = vadd.f32 %v3932_v2, %v3931_v53  ;;  %v4128_v0 = vadd.f32 %v4127_v56, %v4126_v47  ;;  %v4131_v35 = vsel %vm3888_vm11, %v4045_v57, 0.0 }
 0x501   :  { %v4129_v8 = vsel %vm3888_vm11, %v4044_v3, 0.0  ;;  %v13618_v12 = vpop.f32.mrb[24].mxu0 }
 0x502   :  { %v4130_v14 = vadd.f32 %v4129_v8, %v4128_v0  ;;  %v13620_v21 = vpop.f32.mrb[25].mxu0  ;;  %v3935_v22 = vadd.f32 %v3934_v4, %v3933_v10  ;;  %v4047_v50 = vmul.f32 %v13618_v12, %v13618_v12  ;;  %v3938_v44 = vsel %vm3888_vm11, %v13618_v12, 0.0 }
 0x503   :  { %v3936_v58 = vsel %vm3888_vm11, %v13620_v21, 0.0  ;;  %v4046_v59 = vmul.f32 %v13620_v21, %v13620_v21 }
 0x504   :  { %v3937_v7 = vadd.f32 %v3936_v58, %v3935_v22  ;;  %v4132_v16 = vadd.f32 %v4131_v35, %v4130_v14  ;;  %v4135_v13 = vsel %vm3888_vm11, %v4047_v50, 0.0 }
 0x505   :  { %v4133_v28 = vsel %vm3888_vm11, %v4046_v59, 0.0  ;;  %v13634_v60 = vpop.f32.mrb[26].mxu0 }
 0x506   :  { %v4134_v61 = vadd.f32 %v4133_v28, %v4132_v16  ;;  %v13636_v11 = vpop.f32.mrb[27].mxu0  ;;  %v3939_v54 = vadd.f32 %v3938_v44, %v3937_v7  ;;  %v4049_v18 = vmul.f32 %v13634_v60, %v13634_v60  ;;  %v3942_v33 = vsel %vm3888_vm11, %v13634_v60, 0.0 }
 0x507   :  { %v3940_v20 = vsel %vm3888_vm11, %v13636_v11, 0.0  ;;  %v4048_v23 = vmul.f32 %v13636_v11, %v13636_v11 }
 0x508   :  { %v3941_v30 = vadd.f32 %v3940_v20, %v3939_v54  ;;  %v4136_v31 = vadd.f32 %v4135_v13, %v4134_v61  ;;  %v4139_v53 = vsel %vm3888_vm11, %v4049_v18, 0.0 }
 0x509   :  { %v4137_v36 = vsel %vm3888_vm11, %v4048_v23, 0.0  ;;  %v13648_v38 = vpop.f32.mrb[28].mxu0 }
 0x50a   :  { %v4138_v40 = vadd.f32 %v4137_v36, %v4136_v31  ;;  %v13650_v41 = vpop.f32.mrb[29].mxu0  ;;  %v3943_v47 = vadd.f32 %v3942_v33, %v3941_v30  ;;  %v4051_v56 = vmul.f32 %v13648_v38, %v13648_v38  ;;  %v3946_v0 = vsel %vm3888_vm11, %v13648_v38, 0.0 }
 0x50b   :  { %v3944_v57 = vsel %vm3888_vm11, %v13650_v41, 0.0  ;;  %v4050_v2 = vmul.f32 %v13650_v41, %v13650_v41 }
 0x50c   :  { %v3945_v3 = vadd.f32 %v3944_v57, %v3943_v47  ;;  %v4140_v10 = vadd.f32 %v4139_v53, %v4138_v40  ;;  %v4143_v50 = vsel %vm3888_vm11, %v4051_v56, 0.0 }
 0x50d   :  { %v4141_v4 = vsel %vm3888_vm11, %v4050_v2, 0.0  ;;  %v13662_v8 = vpop.f32.mrb[30].mxu0 }
 0x50e   :  { %v4142_v14 = vadd.f32 %v4141_v4, %v4140_v10  ;;  %v13664_v22 = vpop.f32.mrb[31].mxu0  ;;  %v3947_v35 = vadd.f32 %v3946_v0, %v3945_v3  ;;  %v4053_v58 = vmul.f32 %v13662_v8, %v13662_v8  ;;  %v3950_v16 = vsel %vm3888_vm11, %v13662_v8, 0.0 }
 0x50f   :  { %v3948_v59 = vsel %vm3888_vm11, %v13664_v22, 0.0  ;;  %v4052_v62 = vmul.f32 %v13664_v22, %v13664_v22 }
 0x510   :  { %v3949_v6 = vadd.f32 %v3948_v59, %v3947_v35  ;;  %v4144_v7 = vadd.f32 %v4143_v50, %v4142_v14  ;;  %v4147_v18 = vsel %vm3888_vm11, %v4053_v58, 0.0 }
 0x511   :  { %v4145_v44 = vsel %vm3888_vm11, %v4052_v62, 0.0  ;;  %v13676_v28 = vpop.f32.mrb[32].mxu0 }
 0x512   :  { %v4146_v61 = vadd.f32 %v4145_v44, %v4144_v7  ;;  %v13678_v54 = vpop.f32.mrb[33].mxu0  ;;  %v3951_v13 = vadd.f32 %v3950_v16, %v3949_v6  ;;  %v4055_v20 = vmul.f32 %v13676_v28, %v13676_v28  ;;  %v3954_v36 = vsel %vm3888_vm11, %v13676_v28, 0.0 }
 0x513   :  { %v3952_v23 = vsel %vm3888_vm11, %v13678_v54, 0.0  ;;  %v4054_v30 = vmul.f32 %v13678_v54, %v13678_v54 }
 0x514   :  { %v3953_v31 = vadd.f32 %v3952_v23, %v3951_v13  ;;  %v4148_v33 = vadd.f32 %v4147_v18, %v4146_v61  ;;  %v4151_v2 = vsel %vm3888_vm11, %v4055_v20, 0.0 }
 0x515   :  { %v4149_v40 = vsel %vm3888_vm11, %v4054_v30, 0.0  ;;  %v13690_v47 = vpop.f32.mrb[34].mxu0 }
 0x516   :  { %v4150_v53 = vadd.f32 %v4149_v40, %v4148_v33  ;;  %v13692_v56 = vpop.f32.mrb[35].mxu0  ;;  %v3955_v57 = vadd.f32 %v3954_v36, %v3953_v31  ;;  %v4057_v3 = vmul.f32 %v13690_v47, %v13690_v47  ;;  %v3958_v35 = vsel %vm3888_vm11, %v13690_v47, 0.0 }
 0x517   :  { %v3956_v10 = vsel %vm3888_vm11, %v13692_v56, 0.0  ;;  %v4056_v0 = vmul.f32 %v13692_v56, %v13692_v56 }
 0x518   :  { %v3957_v4 = vadd.f32 %v3956_v10, %v3955_v57  ;;  %v4152_v14 = vadd.f32 %v4151_v2, %v4150_v53  ;;  %v4155_v7 = vsel %vm3888_vm11, %v4057_v3, 0.0 }
 0x519   :  { %v4153_v50 = vsel %vm3888_vm11, %v4056_v0, 0.0  ;;  %v13704_v58 = vpop.f32.mrb[36].mxu0 }
 0x51a   :  { %v4154_v59 = vadd.f32 %v4153_v50, %v4152_v14  ;;  %v13706_v62 = vpop.f32.mrb[37].mxu0  ;;  %v3959_v6 = vadd.f32 %v3958_v35, %v3957_v4  ;;  %v4059_v16 = vmul.f32 %v13704_v58, %v13704_v58  ;;  %v3962_v20 = vsel %vm3888_vm11, %v13704_v58, 0.0 }
 0x51b   :  { %v3960_v44 = vsel %vm3888_vm11, %v13706_v62, 0.0  ;;  %v4058_v61 = vmul.f32 %v13706_v62, %v13706_v62 }
 0x51c   :  { %v3961_v13 = vadd.f32 %v3960_v44, %v3959_v6  ;;  %v4156_v18 = vadd.f32 %v4155_v7, %v4154_v59  ;;  %v4159_v40 = vsel %vm3888_vm11, %v4059_v16, 0.0 }
 0x51d   :  { %v4157_v23 = vsel %vm3888_vm11, %v4058_v61, 0.0  ;;  %v13718_v30 = vpop.f32.mrb[38].mxu0 }
 0x51e   :  { %v4158_v31 = vadd.f32 %v4157_v23, %v4156_v18  ;;  %v13720_v33 = vpop.f32.mrb[39].mxu0  ;;  %v3963_v36 = vadd.f32 %v3962_v20, %v3961_v13  ;;  %v4061_v53 = vmul.f32 %v13718_v30, %v13718_v30  ;;  %v3966_v0 = vsel %vm3888_vm11, %v13718_v30, 0.0 }
 0x51f   :  { %v3964_v57 = vsel %vm3888_vm11, %v13720_v33, 0.0  ;;  %v4060_v2 = vmul.f32 %v13720_v33, %v13720_v33 }
 0x520   :  { %v3965_v3 = vadd.f32 %v3964_v57, %v3963_v36  ;;  %v4160_v10 = vadd.f32 %v4159_v40, %v4158_v31  ;;  %v4163_v6 = vsel %vm3888_vm11, %v4061_v53, 0.0 }
 0x521   :  { %v4161_v4 = vsel %vm3888_vm11, %v4060_v2, 0.0  ;;  %v13732_v14 = vpop.f32.mrb[40].mxu0 }
 0x522   :  { %19117 = vst [vmem:[#allocation5_spill] sm:$0xff] %v13732_v14  ;;  %v4162_v35 = vadd.f32 %v4161_v4, %v4160_v10  ;;  %v13734_v50 = vpop.f32.mrb[41].mxu0  ;;  %v3967_v59 = vadd.f32 %v3966_v0, %v3965_v3  ;;  %v4063_v7 = vmul.f32 %v13732_v14, %v13732_v14  ;;  %v3970_v18 = vsel %vm3888_vm11, %v13732_v14, 0.0 }
 0x523   :  { %19118 = vst [vmem:[#allocation6_spill] sm:$0xff] %v13734_v50  ;;  %v3968_v16 = vsel %vm3888_vm11, %v13734_v50, 0.0  ;;  %v4062_v44 = vmul.f32 %v13734_v50, %v13734_v50 }
 0x524   :  { %v3969_v61 = vadd.f32 %v3968_v16, %v3967_v59  ;;  %v4164_v13 = vadd.f32 %v4163_v6, %v4162_v35  ;;  %v4167_v53 = vsel %vm3888_vm11, %v4063_v7, 0.0 }
 0x525   :  { %v4165_v20 = vsel %vm3888_vm11, %v4062_v44, 0.0  ;;  %v13746_v23 = vpop.f32.mrb[42].mxu0 }
 0x526   :  { %19119 = vst [vmem:[#allocation7_spill] sm:$0xff] %v13746_v23  ;;  %v4166_v31 = vadd.f32 %v4165_v20, %v4164_v13  ;;  %v13748_v36 = vpop.f32.mrb[43].mxu0  ;;  %v3971_v40 = vadd.f32 %v3970_v18, %v3969_v61  ;;  %v4065_v57 = vmul.f32 %v13746_v23, %v13746_v23  ;;  %v3974_v4 = vsel %vm3888_vm11, %v13746_v23, 0.0 }
 0x527   :  { %19120 = vst [vmem:[#allocation8_spill] sm:$0xff] %v13748_v36  ;;  %v3972_v2 = vsel %vm3888_vm11, %v13748_v36, 0.0  ;;  %v4064_v3 = vmul.f32 %v13748_v36, %v13748_v36 }
 0x528   :  { %v3973_v10 = vadd.f32 %v3972_v2, %v3971_v40  ;;  %v4168_v0 = vadd.f32 %v4167_v53, %v4166_v31  ;;  %v4171_v44 = vsel %vm3888_vm11, %v4065_v57, 0.0 }
 0x529   :  { %v4169_v35 = vsel %vm3888_vm11, %v4064_v3, 0.0  ;;  %v13760_v59 = vpop.f32.mrb[44].mxu0 }
 0x52a   :  { %19121 = vst [vmem:[#allocation9_spill] sm:$0xff] %v13760_v59  ;;  %v4170_v6 = vadd.f32 %v4169_v35, %v4168_v0  ;;  %v13762_v7 = vpop.f32.mrb[45].mxu0  ;;  %v3975_v16 = vadd.f32 %v3974_v4, %v3973_v10  ;;  %v4067_v61 = vmul.f32 %v13760_v59, %v13760_v59  ;;  %v3978_v40 = vsel %vm3888_vm11, %v13760_v59, 0.0 }
 0x52b   :  { %19122 = vst [vmem:[#allocation10_spill] sm:$0xff] %v13762_v7  ;;  %v3976_v13 = vsel %vm3888_vm11, %v13762_v7, 0.0  ;;  %v4066_v18 = vmul.f32 %v13762_v7, %v13762_v7 }
 0x52c   :  { %v3977_v20 = vadd.f32 %v3976_v13, %v3975_v16  ;;  %v4172_v31 = vadd.f32 %v4171_v44, %v4170_v6  ;;  %v4175_v0 = vsel %vm3888_vm11, %v4067_v61, 0.0 }
 0x52d   :  { %v4173_v53 = vsel %vm3888_vm11, %v4066_v18, 0.0  ;;  %v13774_v2 = vpop.f32.mrb[46].mxu0 }
 0x52e   :  { %19123 = vst [vmem:[#allocation11_spill] sm:$0xff] %v13774_v2  ;;  %v4174_v3 = vadd.f32 %v4173_v53, %v4172_v31  ;;  %v13776_v57 = vpop.f32.mrb[47].mxu0  ;;  %v3979_v10 = vadd.f32 %v3978_v40, %v3977_v20  ;;  %v4069_v4 = vmul.f32 %v13774_v2, %v13774_v2  ;;  %v3982_v13 = vsel %vm3888_vm11, %v13774_v2, 0.0 }
 0x52f   :  { %19124 = vst [vmem:[#allocation12_spill] sm:$0xff] %v13776_v57  ;;  %v3980_v35 = vsel %vm3888_vm11, %v13776_v57, 0.0  ;;  %v4068_v6 = vmul.f32 %v13776_v57, %v13776_v57 }
 0x530   :  { %v3981_v16 = vadd.f32 %v3980_v35, %v3979_v10  ;;  %v4176_v44 = vadd.f32 %v4175_v0, %v4174_v3  ;;  %v4179_v53 = vsel %vm3888_vm11, %v4069_v4, 0.0 }
 0x531   :  { %v4177_v18 = vsel %vm3888_vm11, %v4068_v6, 0.0  ;;  %v13788_v31 = vpop.f32.mrb[48].mxu0 }
 0x532   :  { %19125 = vst [vmem:[#allocation13_spill] sm:$0xff] %v13788_v31  ;;  %v4178_v20 = vadd.f32 %v4177_v18, %v4176_v44  ;;  %v13790_v61 = vpop.f32.mrb[49].mxu0  ;;  %v3983_v40 = vadd.f32 %v3982_v13, %v3981_v16  ;;  %v4071_v39 = vmul.f32 %v13788_v31, %v13788_v31  ;;  %v3986_v6 = vsel %vm3888_vm11, %v13788_v31, 0.0 }
 0x533   :  { %19126 = vst [vmem:[#allocation14_spill] sm:$0xff] %v13790_v61  ;;  %v3984_v10 = vsel %vm3888_vm11, %v13790_v61, 0.0  ;;  %v4070_v3 = vmul.f32 %v13790_v61, %v13790_v61 }
 0x534   :  { %v3985_v0 = vadd.f32 %v3984_v10, %v3983_v40  ;;  %v4180_v35 = vadd.f32 %v4179_v53, %v4178_v20  ;;  %v4183_v2 = vsel %vm3888_vm11, %v4071_v39, 0.0 }
 0x535   :  { %v4181_v44 = vsel %vm3888_vm11, %v4070_v3, 0.0  ;;  %v13802_v18 = vpop.f32.mrb[50].mxu0 }
 0x536   :  { %19127 = vst [vmem:[#allocation15_spill] sm:$0xff] %v13802_v18  ;;  %v4182_v16 = vadd.f32 %v4181_v44, %v4180_v35  ;;  %v13804_v4 = vpop.f32.mrb[51].mxu0  ;;  %v3987_v13 = vadd.f32 %v3986_v6, %v3985_v0  ;;  %v13809_v57 = vmul.f32 %v13802_v18, %v13802_v18  ;;  %v13821_v3 = vsel %vm3888_vm11, %v13802_v18, 0.0 }
 0x537   :  { %19128 = vst [vmem:[#allocation16_spill] sm:$0xff] %v13804_v4  ;;  %v3988_v20 = vsel %vm3888_vm11, %v13804_v4, 0.0  ;;  %v4072_v40 = vmul.f32 %v13804_v4, %v13804_v4  ;;  %v19130_v35 = vmov 0.0  }
 0x538   :  { %v13815_v53 = vadd.f32 %v3988_v20, %v3987_v13  ;;  %v13817_v10 = vadd.f32 %v4183_v2, %v4182_v16  ;;  %4575 = vst.msk [vmem:[#allocation3 + $0x18] sm:$0x1] %vm4574_vm13, %v19130_v35  ;;  %4576 = vst.msk [vmem:[#allocation3 + $0x30] sm:$0x1] %vm4574_vm13, %v19130_v35  ;;  %v4187_v16 = vsel %vm3888_vm11, %v13809_v57, 0.0 }
 0x539   :  { %v13824_v39 = vsel %vm3888_vm11, %v4072_v40, 0.0  ;;  %v13826_v0 = vpop.f32.mrb[52].mxu0  ;;  %4577 = vst.msk [vmem:[#allocation3 + $0x48] sm:$0x1] %vm4574_vm13, %v19130_v35  ;;  %4578 = vst.msk [vmem:[#allocation3 + $0x60] sm:$0x1] %vm4574_vm13, %v19130_v35 }
 0x53a   :  { %19129 = vst [vmem:[#allocation17_spill] sm:$0xff] %v13826_v0  ;;  %4579 = vst.msk [vmem:[#allocation3 + $0x78] sm:$0x1] %vm4574_vm13, %v19130_v35  ;;  %v4186_v2 = vadd.f32 %v13824_v39, %v13817_v10  ;;  %v13958_v6 = vpop.f32.mrb[53].mxu0  ;;  %v3991_v44 = vadd.f32 %v13821_v3, %v13815_v53  ;;  %v4075_v13 = vmul.f32 %v13826_v0, %v13826_v0  ;;  %v3994_v10 = vsel %vm3888_vm11, %v13826_v0, 0.0 }
 0x53b   :  { %4580 = vst.msk [vmem:[#allocation3 + $0x90] sm:$0x1] %vm4574_vm13, %v19130_v35  ;;  %4581 = vst.msk [vmem:[#allocation3 + $0xa8] sm:$0x1] %vm4574_vm13, %v19130_v35  ;;  %v3992_v20 = vsel %vm3888_vm11, %v13958_v6, 0.0  ;;  %v4074_v40 = vmul.f32 %v13958_v6, %v13958_v6 }
 0x53c   :  { %4582 = vst.msk [vmem:[#allocation3 + $0xc0] sm:$0x1] %vm4574_vm13, %v19130_v35  ;;  %4583 = vst.msk [vmem:[#allocation3 + $0xd8] sm:$0x1] %vm4574_vm13, %v19130_v35  ;;  %v4188_v18 = vadd.f32 %v4187_v16, %v4186_v2  ;;  %v4191_v31 = vsel %vm3888_vm11, %v4075_v13, 0.0 }
 0x53d   :  { %4584 = vst.msk [vmem:[#allocation3 + $0xf0] sm:$0x1] %vm4574_vm13, %v19130_v35  ;;  %4585 = vst.msk [vmem:[#allocation3 + $0x108] sm:$0x1] %vm4574_vm13, %v19130_v35  ;;  %v4189_v39 = vsel %vm3888_vm11, %v4074_v40, 0.0  ;;  %v13973_v53 = vpop.f32.mrb[54].mxu0 }
 0x53e   :  { %4586 = vst.msk [vmem:[#allocation3 + $0x120] sm:$0x1] %vm4574_vm13, %v19130_v35  ;;  %4587 = vst.msk [vmem:[#allocation3 + $0x138] sm:$0x1] %vm4574_vm13, %v19130_v35  ;;  %v4190_v3 = vadd.f32 %v4189_v39, %v4188_v18  ;;  %v13975_v57 = vpop.f32.mrb[55].mxu0  ;;  %v4077_v61 = vmul.f32 %v13973_v53, %v13973_v53  ;;  %v3998_v40 = vsel %vm3888_vm11, %v13973_v53, 0.0 }
 0x53f   :  { %4588 = vst.msk [vmem:[#allocation3 + $0x150] sm:$0x1] %vm4574_vm13, %v19130_v35  ;;  %4589 = vst.msk [vmem:[#allocation3 + $0x168] sm:$0x1] %vm4574_vm13, %v19130_v35  ;;  %v4076_v2 = vmul.f32 %v13975_v57, %v13975_v57 }
 0x540   :  { %4590 = vst.msk [vmem:[#allocation3 + $0x180] sm:$0x1] %vm4574_vm13, %v19130_v35  ;;  %4591 = vst.msk [vmem:[#allocation3 + $0x1c8] sm:$0x1] %vm4574_vm13, %v19130_v35  ;;  %v4195_v0 = vsel %vm3888_vm11, %v4077_v61, 0.0 }
 0x541   :  { %4592 = vst.msk [vmem:[#allocation3 + $0x1e0] sm:$0x1] %vm4574_vm13, %v19130_v35  ;;  %4593 = vst.msk [vmem:[#allocation3 + $0x1f8] sm:$0x1] %vm4574_vm13, %v19130_v35  ;;  %v4193_v18 = vsel %vm3888_vm11, %v4076_v2, 0.0  ;;  %v13987_v39 = vpop.f32.mrb[56].mxu0 }
 0x542   :  { %4594 = vst.msk [vmem:[#allocation3 + $0x210] sm:$0x1] %vm4574_vm13, %v19130_v35  ;;  %4595 = vst.msk [vmem:[#allocation3 + $0x228] sm:$0x1] %vm4574_vm13, %v19130_v35  ;;  %v13989_v13 = vpop.f32.mrb[57].mxu0  ;;  %v4002_v2 = vsel %vm3888_vm11, %v13987_v39, 0.0 }
 0x543   :  { %4596 = vst.msk [vmem:[#allocation3 + $0x240] sm:$0x1] %vm4574_vm13, %v19130_v35  ;;  %4597 = vst.msk [vmem:[#allocation3 + $0x258] sm:$0x1] %vm4574_vm13, %v19130_v35 }
 0x544   :  { %4598 = vst.msk [vmem:[#allocation3 + $0x270] sm:$0x1] %vm4574_vm13, %v19130_v35  ;;  %4599 = vst.msk [vmem:[#allocation3 + $0x288] sm:$0x1] %vm4574_vm13, %v19130_v35 }
 0x545   :  { %4600 = vst.msk [vmem:[#allocation3 + $0x2a0] sm:$0x1] %vm4574_vm13, %v19130_v35  ;;  %4601 = vst.msk [vmem:[#allocation3 + $0x2b8] sm:$0x1] %vm4574_vm13, %v19130_v35 }
 0x546   :  { %4602 = vst.msk [vmem:[#allocation3 + $0x2d0] sm:$0x1] %vm4574_vm13, %v19130_v35  ;;  %4603 = vst.msk [vmem:[#allocation3 + $0x2e8] sm:$0x1] %vm4574_vm13, %v19130_v35 }
 0x547   :  { %4604 = vst.msk [vmem:[#allocation3 + $0x300] sm:$0x1] %vm4574_vm13, %v19130_v35  ;;  %4605 = vst.msk [vmem:[#allocation3 + $0x318] sm:$0x1] %vm4574_vm13, %v19130_v35 }
 0x548   :  { %4606 = vst.msk [vmem:[#allocation3 + $0x330] sm:$0x1] %vm4574_vm13, %v19130_v35  ;;  %4607 = vst.msk [vmem:[#allocation3 + $0x29] sm:$0x1] %vm4574_vm13, %v19130_v35 }
 0x549   :  { %4608 = vst.msk [vmem:[#allocation3 + $0x41] sm:$0x1] %vm4574_vm13, %v19130_v35  ;;  %4609 = vst.msk [vmem:[#allocation3 + $0x59] sm:$0x1] %vm4574_vm13, %v19130_v35 }
 0x54a   :  { %4610 = vst.msk [vmem:[#allocation3 + $0x71] sm:$0x1] %vm4574_vm13, %v19130_v35  ;;  %4611 = vst.msk [vmem:[#allocation3 + $0x89] sm:$0x1] %vm4574_vm13, %v19130_v35 }
 0x54b   :  { %4612 = vst.msk [vmem:[#allocation3 + $0xa1] sm:$0x1] %vm4574_vm13, %v19130_v35  ;;  %4613 = vst.msk [vmem:[#allocation3 + $0xb9] sm:$0x1] %vm4574_vm13, %v19130_v35 }
 0x54c   :  { %4614 = vst.msk [vmem:[#allocation3 + $0xd1] sm:$0x1] %vm4574_vm13, %v19130_v35  ;;  %4615 = vst.msk [vmem:[#allocation3 + $0xe9] sm:$0x1] %vm4574_vm13, %v19130_v35 }
 0x54d   :  { %4616 = vst.msk [vmem:[#allocation3 + $0x101] sm:$0x1] %vm4574_vm13, %v19130_v35  ;;  %4617 = vst.msk [vmem:[#allocation3 + $0x119] sm:$0x1] %vm4574_vm13, %v19130_v35 }
 0x54e   :  { %4618 = vst.msk [vmem:[#allocation3 + $0x131] sm:$0x1] %vm4574_vm13, %v19130_v35  ;;  %4619 = vst.msk [vmem:[#allocation3 + $0x149] sm:$0x1] %vm4574_vm13, %v19130_v35 }
 0x54f   :  { %4620 = vst.msk [vmem:[#allocation3 + $0x161] sm:$0x1] %vm4574_vm13, %v19130_v35  ;;  %4621 = vst.msk [vmem:[#allocation3 + $0x179] sm:$0x1] %vm4574_vm13, %v19130_v35 }
 0x550   :  { %4622 = vst.msk [vmem:[#allocation3 + $0x191] sm:$0x1] %vm4574_vm13, %v19130_v35  ;;  %4623 = vst.msk [vmem:[#allocation3 + $0x1d9] sm:$0x1] %vm4574_vm13, %v19130_v35 }
 0x551   :  { %4624 = vst.msk [vmem:[#allocation3 + $0x1f1] sm:$0x1] %vm4574_vm13, %v19130_v35  ;;  %4625 = vst.msk [vmem:[#allocation3 + $0x209] sm:$0x1] %vm4574_vm13, %v19130_v35 }
 0x552   :  { %4626 = vst.msk [vmem:[#allocation3 + $0x221] sm:$0x1] %vm4574_vm13, %v19130_v35  ;;  %4627 = vst.msk [vmem:[#allocation3 + $0x239] sm:$0x1] %vm4574_vm13, %v19130_v35 }
 0x553   :  { %4628 = vst.msk [vmem:[#allocation3 + $0x251] sm:$0x1] %vm4574_vm13, %v19130_v35  ;;  %4629 = vst.msk [vmem:[#allocation3 + $0x269] sm:$0x1] %vm4574_vm13, %v19130_v35 }
 0x554   :  { %4630 = vst.msk [vmem:[#allocation3 + $0x281] sm:$0x1] %vm4574_vm13, %v19130_v35  ;;  %4631 = vst.msk [vmem:[#allocation3 + $0x299] sm:$0x1] %vm4574_vm13, %v19130_v35 }
 0x555   :  { %4632 = vst.msk [vmem:[#allocation3 + $0x2b1] sm:$0x1] %vm4574_vm13, %v19130_v35  ;;  %4633 = vst.msk [vmem:[#allocation3 + $0x2c9] sm:$0x1] %vm4574_vm13, %v19130_v35 }
 0x556   :  { %4634 = vst.msk [vmem:[#allocation3 + $0x2e1] sm:$0x1] %vm4574_vm13, %v19130_v35  ;;  %4635 = vst.msk [vmem:[#allocation3 + $0x2f9] sm:$0x1] %vm4574_vm13, %v19130_v35 }
 0x557   :  { %4636 = vst.msk [vmem:[#allocation3 + $0x311] sm:$0x1] %vm4574_vm13, %v19130_v35  ;;  %4637 = vst.msk [vmem:[#allocation3 + $0x329] sm:$0x1] %vm4574_vm13, %v19130_v35 }
 0x558   :  { %4638 = vst.msk [vmem:[#allocation3 + $0x341] sm:$0x1] %vm4574_vm13, %v19130_v35  ;;  %19131 = vst [vmem:[#allocation18_spill] sm:$0xff] %v13958_v6  ;;  %v3993_v35 = vadd.f32 %v3992_v20, %v3991_v44  ;;  %v3996_v44 = vsel %vm3888_vm11, %v13975_v57, 0.0  ;;  %v4192_v20 = vadd.f32 %v4191_v31, %v4190_v3  ;;  %v4079_v6 = vmul.f32 %v13987_v39, %v13987_v39 }
 0x559   :  { %19132 = vst [vmem:[#allocation19_spill] sm:$0xff] %v13973_v53  ;;  %19133 = vst [vmem:[#allocation20_spill] sm:$0xff] %v13975_v57  ;;  %v4078_v31 = vmul.f32 %v13989_v13, %v13989_v13 }
 0x55a   :  { %v3995_v4 = vadd.f32 %v3994_v10, %v3993_v35  ;;  %19134 = vst [vmem:[#allocation21_spill] sm:$0xff] %v13987_v39  ;;  %v4194_v35 = vadd.f32 %v4193_v18, %v4192_v20  ;;  %19135 = vst [vmem:[#allocation22_spill] sm:$0xff] %v13989_v13  ;;  %v14001_v18 = vpop.f32.mrb[58].mxu0  ;;  %v4199_v53 = vsel %vm3888_vm11, %v4079_v6, 0.0 }
 0x55b   :  { %v4197_v20 = vsel %vm3888_vm11, %v4078_v31, 0.0  ;;  %19136 = vst [vmem:[#allocation23_spill] sm:$0xff] %v14001_v18  ;;  %v14003_v61 = vpop.f32.mrb[59].mxu0  ;;  %v4081_v57 = vmul.f32 %v14001_v18, %v14001_v18  ;;  %v4006_v31 = vsel %vm3888_vm11, %v14001_v18, 0.0 }
 0x55c   :  { %v3997_v16 = vadd.f32 %v3996_v44, %v3995_v4  ;;  %v4000_v4 = vsel %vm3888_vm11, %v13989_v13, 0.0  ;;  %v4196_v44 = vadd.f32 %v4195_v0, %v4194_v35  ;;  %19137 = vst [vmem:[#allocation24_spill] sm:$0xff] %v14003_v61  ;;  %v4080_v0 = vmul.f32 %v14003_v61, %v14003_v61 }
 0x55d   :  { %v4203_v39 = vsel %vm3888_vm11, %v4081_v57, 0.0 }
 0x55e   :  { %v3999_v10 = vadd.f32 %v3998_v40, %v3997_v16  ;;  %v4198_v16 = vadd.f32 %v4197_v20, %v4196_v44  ;;  %v4201_v44 = vsel %vm3888_vm11, %v4080_v0, 0.0  ;;  %v14015_v20 = vpop.f32.mrb[60].mxu0 }
 0x55f   :  { %19138 = vst [vmem:[#allocation25_spill] sm:$0xff] %v14015_v20  ;;  %v14017_v6 = vpop.f32.mrb[61].mxu0  ;;  %v4083_v13 = vmul.f32 %v14015_v20, %v14015_v20  ;;  %v4010_v0 = vsel %vm3888_vm11, %v14015_v20, 0.0 }
 0x560   :  { %v4001_v3 = vadd.f32 %v4000_v4, %v3999_v10  ;;  %v4004_v10 = vsel %vm3888_vm11, %v14003_v61, 0.0  ;;  %v4200_v4 = vadd.f32 %v4199_v53, %v4198_v16  ;;  %19139 = vst [vmem:[#allocation26_spill] sm:$0xff] %v14017_v6  ;;  %v4082_v53 = vmul.f32 %v14017_v6, %v14017_v6 }
 0x561   :  { %v4207_v18 = vsel %vm3888_vm11, %v4083_v13, 0.0 }
 0x562   :  { %v4003_v40 = vadd.f32 %v4002_v2, %v4001_v3  ;;  %v4202_v3 = vadd.f32 %v4201_v44, %v4200_v4  ;;  %v4205_v4 = vsel %vm3888_vm11, %v4082_v53, 0.0  ;;  %v14029_v44 = vpop.f32.mrb[62].mxu0 }
 0x563   :  { %19140 = vst [vmem:[#allocation27_spill] sm:$0xff] %v14029_v44  ;;  %v14031_v57 = vpop.f32.mrb[63].mxu0  ;;  %v4085_v61 = vmul.f32 %v14029_v44, %v14029_v44  ;;  %v4014_v53 = vsel %vm3888_vm11, %v14029_v44, 0.0 }
 0x564   :  { %v4005_v35 = vadd.f32 %v4004_v10, %v4003_v40  ;;  %v4008_v40 = vsel %vm3888_vm11, %v14017_v6, 0.0  ;;  %v4204_v10 = vadd.f32 %v4203_v39, %v4202_v3  ;;  %v4084_v39 = vmul.f32 %v14031_v57, %v14031_v57 }
 0x565   :  { %v4211_v13 = vsel %vm3888_vm11, %v4085_v61, 0.0  ;;  %v19160_v61 = vld [vmem:[#allocation23_spill] sm:$0xff] }
 0x566   :  { %v4007_v2 = vadd.f32 %v4006_v31, %v4005_v35  ;;  %v4206_v35 = vadd.f32 %v4205_v4, %v4204_v10  ;;  %v4209_v10 = vsel %vm3888_vm11, %v4084_v39, 0.0 }
 0x568   :  { %v4009_v16 = vadd.f32 %v4008_v40, %v4007_v2  ;;  %v4012_v2 = vsel %vm3888_vm11, %v14031_v57, 0.0  ;;  %v4208_v40 = vadd.f32 %v4207_v18, %v4206_v35 }
 0x56a   :  { %v4011_v31 = vadd.f32 %v4010_v0, %v4009_v16  ;;  %v4210_v16 = vadd.f32 %v4209_v10, %v4208_v40  ;;  %v19152_v10 = vld [vmem:[#allocation15_spill] sm:$0xff] }
 0x56c   :  { %v4013_v3 = vadd.f32 %v4012_v2, %v4011_v31  ;;  %v4212_v20 = vadd.f32 %v4211_v13, %v4210_v16  ;;  %v19162_v16 = vld [vmem:[#allocation25_spill] sm:$0xff] }
 0x56e   :  { %v4015_v4 = vadd.f32 %v4014_v53, %v4013_v3  ;;  %v4213_v59 = vrot.slane %v4212_v20, 4 }
 0x570   :  { %v4016_v0 = vrot.slane %v4015_v4, 4  ;;  %v4214_v23 = vadd.f32 %v4213_v59, %v4212_v20  ;;  %v14171_v59 = vld [vmem:[%s18998_s2] ss:$0 sm:$0xff] }
 0x572   :  { %v4017_v6 = vadd.f32 %v4016_v0, %v4015_v4  ;;  %v4215_v14 = vrot.slane %v4214_v23, 2  ;;  %v19161_v0 = vld [vmem:[#allocation26_spill] sm:$0xff] }
 0x574   :  { %v4018_v7 = vrot.slane %v4017_v6, 2  ;;  %v4216_v31 = vadd.f32 %v4215_v14, %v4214_v23 }
 0x576   :  { %v4019_v36 = vadd.f32 %v4018_v7, %v4017_v6  ;;  %v4217_v35 = vrot.slane %v4216_v31, 1  ;;  %v19164_v6 = vld [vmem:[#allocation27_spill] sm:$0xff] }
 0x578   :  { %v4020_v50 = vrot.slane %v4019_v36, 1  ;;  %v4218_v2 = vadd.f32 %v4217_v35, %v4216_v31  ;;  %v19142_v31 = vld [vmem:[#allocation5_spill] sm:$0xff]  ;;  %v19144_v35 = vld [vmem:[#allocation7_spill] sm:$0xff] }
 0x57a   :  { %v4021_v18 = vadd.f32 %v4020_v50, %v4019_v36  ;;  %v4220_v39 = vmul.f32 0.001953125, %v4218_v2  ;;  %v19145_v2 = vld [vmem:[#allocation10_spill] sm:$0xff] }
 0x57c   :  { %v14044_v44 = vmul.f32 0.001953125, %v4021_v18  ;;  %v19143_v18 = vld [vmem:[#allocation8_spill] sm:$0xff] }
 0x57e   :  { %v4221_v3 = vmul.f32 %v14044_v44, %v14044_v44  ;;  %v19163_v4 = vsub.f32 %v14031_v57, %v14044_v44  ;;  %v19165_v14 = vsub.f32 %v13437_v24, %v14044_v44  ;;  %v19166_v7 = vsub.f32 %v13431_v19, %v14044_v44  ;;  %v14202_v57 = vld [vmem:[%s18999_s3] ss:$0 sm:$0xff]  ;;  %s10432_s3 = smov 40  }
 0x57f   :  { %v19169_v24 = vsub.f32 %v13445_v32, %v14044_v44  ;;  %v19170_v19 = vsub.f32 %v13460_v48, %v14044_v44  ;;  %v19171_v23 = vsub.f32 %v13458_v43, %v14044_v44  ;;  %v19172_v32 = vsub.f32 %v13474_v1, %v14044_v44 }
 0x580   :  { %v4222_v36 = vsub.f32 %v4220_v39, %v4221_v3  ;;  %v19146_v39 = vld [vmem:[#allocation9_spill] sm:$0xff]  ;;  %v19173_v48 = vsub.f32 %v13472_v55, %v14044_v44  ;;  %v19174_v43 = vsub.f32 %v13488_v51, %v14044_v44 }
 0x582   :  { %v4287_v13 = vadd.f32 1e-05, %v4222_v36  ;;  %v19141_v36 = vld [vmem:[#allocation6_spill] sm:$0xff] }
 0x583   :  { %19167 = vst [vmem:[#allocation6_spill] sm:$0xff] %v14202_v57 }
 0x584   :  { %10419 = vrsqrt.f32 %v4287_v13  ;;  %v19147_v13 = vld [vmem:[#allocation12_spill] sm:$0xff] }
 0x58e   :  { %v14166_v3 = vpop.eup %10419 }
 0x58f   :  { %v4351_v50 = vmul.f32 %v14166_v3, %v19163_v4  ;;  %v14191_v40 = vmul.f32 %v14166_v3, %v19165_v14  ;;  %v14197_v20 = vmul.f32 %v14166_v3, %v19166_v7  ;;  %v19168_v4 = vsub.f32 %v13447_v34, %v14044_v44 }
 0x590   :  { %v14214_v14 = vmul.f32 %v14166_v3, %v19169_v24  ;;  %v14220_v7 = vmul.f32 %v14166_v3, %v19170_v19  ;;  %v14226_v34 = vmul.f32 %v14166_v3, %v19171_v23  ;;  %v14233_v24 = vmul.f32 %v14166_v3, %v19172_v32 }
 0x591   :  { %v14208_v53 = vmul.f32 %v14166_v3, %v19168_v4  ;;  %v4422_v4 = vmul.f32 %v14171_v59, %v4351_v50  ;;  %v14239_v19 = vmul.f32 %v14166_v3, %v19173_v48  ;;  %v14245_v23 = vmul.f32 %v14166_v3, %v19174_v43 }
 0x592   :  { %v19175_v50 = vsub.f32 %v13486_v37, %v14044_v44  ;;  %v19176_v32 = vsub.f32 %v13502_v29, %v14044_v44  ;;  %v19177_v48 = vsub.f32 %v13500_v45, %v14044_v44  ;;  %v19178_v43 = vsub.f32 %v13516_v27, %v14044_v44 }
 0x593   :  { %v19179_v29 = vsub.f32 %v13514_v25, %v14044_v44  ;;  %v19180_v45 = vsub.f32 %v13530_v49, %v14044_v44  ;;  %v19181_v27 = vsub.f32 %v13528_v46, %v14044_v44 }
 0x594   :  { %v14251_v1 = vmul.f32 %v14166_v3, %v19175_v50  ;;  %v14257_v55 = vmul.f32 %v14166_v3, %v19176_v32  ;;  %v14263_v51 = vmul.f32 %v14166_v3, %v19177_v48  ;;  %v14269_v37 = vmul.f32 %v14166_v3, %v19178_v43 }
 0x595   :  { %v4493_v50 = vadd.f32 %v14202_v57, %v4422_v4  ;;  %v14276_v32 = vmul.f32 %v14166_v3, %v19179_v29  ;;  %v14282_v48 = vmul.f32 %v14166_v3, %v19180_v45  ;;  %v14288_v43 = vmul.f32 %v14166_v3, %v19181_v27 }
 0x596   :  { %v19182_v4 = vsub.f32 %v13544_v9, %v14044_v44  ;;  %v19183_v29 = vsub.f32 %v13542_v5, %v14044_v44  ;;  %v19184_v45 = vsub.f32 %v13560_v15, %v14044_v44  ;;  %v19185_v27 = vsub.f32 %v13556_v63, %v14044_v44 }
 0x597   :  { %v19186_v57 = vsub.f32 %v13575_v26, %v14044_v44 }
 0x598   :  { %v14294_v25 = vmul.f32 %v14166_v3, %v19182_v4  ;;  %v14300_v49 = vmul.f32 %v14166_v3, %v19183_v29  ;;  %v14306_v46 = vmul.f32 %v14166_v3, %v19184_v45  ;;  %v14312_v9 = vmul.f32 %v14166_v3, %v19185_v27 }
 0x599   :  { %v4557_v4 = vmax.f32 %v4493_v50, 0.0  ;;  %v14318_v5 = vmul.f32 %v14166_v3, %v19186_v57  ;;  %v19187_v29 = vsub.f32 %v13570_v17, %v14044_v44  ;;  %v19188_v45 = vsub.f32 %v13606_v52, %v14044_v44 }
 0x59a   :  { %v19189_v50 = vsub.f32 %v13604_v42, %v14044_v44  ;;  %v19190_v57 = vsub.f32 %v13620_v21, %v14044_v44  ;;  %v19191_v27 = vsub.f32 %v13618_v12, %v14044_v44  ;;  %v19193_v21 = vsub.f32 %v13634_v60, %v14044_v44 }
 0x59b   :  { %v14324_v15 = vmul.f32 %v14166_v3, %v19187_v29  ;;  %v14330_v63 = vmul.f32 %v14166_v3, %v19188_v45  ;;  %v19192_v29 = vsub.f32 %v13636_v11, %v14044_v44  ;;  %4701 = vst.msk [vmem:[#allocation3 + $0x331] sm:$0xff] %vm3888_vm11, %v4557_v4  ;;  %v19194_v12 = vsub.f32 %v13650_v41, %v14044_v44 }
 0x59c   :  { %v14336_v26 = vmul.f32 %v14166_v3, %v19189_v50  ;;  %v14342_v17 = vmul.f32 %v14166_v3, %v19190_v57  ;;  %v14348_v52 = vmul.f32 %v14166_v3, %v19191_v27  ;;  %v14361_v45 = vmul.f32 %v14166_v3, %v19193_v21 }
 0x59d   :  { %v14354_v42 = vmul.f32 %v14166_v3, %v19192_v29  ;;  %v14367_v50 = vmul.f32 %v14166_v3, %v19194_v12  ;;  %v19195_v11 = vsub.f32 %v13648_v38, %v14044_v44  ;;  %v19196_v4 = vsub.f32 %v13664_v22, %v14044_v44 }
 0x59e   :  { %v19197_v27 = vsub.f32 %v13662_v8, %v14044_v44  ;;  %v19198_v29 = vsub.f32 %v13678_v54, %v14044_v44  ;;  %v19199_v21 = vsub.f32 %v13676_v28, %v14044_v44  ;;  %v19200_v12 = vsub.f32 %v13692_v56, %v14044_v44 }
 0x59f   :  { %v14373_v57 = vmul.f32 %v14166_v3, %v19195_v11  ;;  %v14379_v60 = vmul.f32 %v14166_v3, %v19196_v4  ;;  %v19201_v11 = vsub.f32 %v13690_v47, %v14044_v44  ;;  %v19202_v4 = vsub.f32 %v13706_v62, %v14044_v44 }
 0x5a0   :  { %v14385_v41 = vmul.f32 %v14166_v3, %v19197_v27  ;;  %v14391_v38 = vmul.f32 %v14166_v3, %v19198_v29  ;;  %v14397_v22 = vmul.f32 %v14166_v3, %v19199_v21  ;;  %v14403_v8 = vmul.f32 %v14166_v3, %v19200_v12 }
 0x5a1   :  { %v14409_v54 = vmul.f32 %v14166_v3, %v19201_v11  ;;  %v14415_v28 = vmul.f32 %v14166_v3, %v19202_v4  ;;  %v19203_v27 = vsub.f32 %v13704_v58, %v14044_v44  ;;  %v19204_v29 = vsub.f32 %v13720_v33, %v14044_v44 }
 0x5a2   :  { %v19205_v21 = vsub.f32 %v13718_v30, %v14044_v44  ;;  %v19206_v12 = vsub.f32 %v19141_v36, %v14044_v44  ;;  %v19207_v11 = vsub.f32 %v19142_v31, %v14044_v44  ;;  %v19208_v4 = vsub.f32 %v19143_v18, %v14044_v44 }
 0x5a3   :  { %v14421_v56 = vmul.f32 %v14166_v3, %v19203_v27  ;;  %v14427_v47 = vmul.f32 %v14166_v3, %v19204_v29  ;;  %v19209_v27 = vsub.f32 %v19144_v35, %v14044_v44  ;;  %v19210_v29 = vsub.f32 %v19145_v2, %v14044_v44 }
 0x5a4   :  { %v14433_v62 = vmul.f32 %v14166_v3, %v19205_v21  ;;  %v14439_v58 = vmul.f32 %v14166_v3, %v19206_v12  ;;  %v14445_v33 = vmul.f32 %v14166_v3, %v19207_v11  ;;  %v14451_v30 = vmul.f32 %v14166_v3, %v19208_v4  ;;  %v19215_v11 = vld [vmem:[#allocation11_spill] sm:$0xff] }
 0x5a5   :  { %v14457_v36 = vmul.f32 %v14166_v3, %v19209_v27  ;;  %v14463_v31 = vmul.f32 %v14166_v3, %v19210_v29  ;;  %v19211_v21 = vsub.f32 %v19146_v39, %v14044_v44  ;;  %v19213_v12 = vsub.f32 %v19147_v13, %v14044_v44  ;;  %v19217_v27 = vld [vmem:[#allocation14_spill] sm:$0xff] }
 0x5a6   :  { %v19216_v4 = vsub.f32 %v19215_v11, %v14044_v44  ;;  %v19218_v29 = vsub.f32 %v19217_v27, %v14044_v44 }
 0x5a7   :  { %v14469_v18 = vmul.f32 %v14166_v3, %v19211_v21  ;;  %v14475_v35 = vmul.f32 %v14166_v3, %v19213_v12  ;;  %v19220_v21 = vld [vmem:[#allocation13_spill] sm:$0xff]  ;;  %v19223_v12 = vld [vmem:[#allocation16_spill] sm:$0xff] }
 0x5a8   :  { %v14481_v2 = vmul.f32 %v14166_v3, %v19216_v4  ;;  %v14487_v39 = vmul.f32 %v14166_v3, %v19218_v29  ;;  %v19226_v4 = vsub.f32 %v19152_v10, %v14044_v44  ;;  %v19228_v29 = vld [vmem:[#allocation18_spill] sm:$0xff] }
 0x5a9   :  { %19212 = vst [vmem:[#allocation5_spill] sm:$0xff] %v14469_v18  ;;  %19214 = vst [vmem:[#allocation8_spill] sm:$0xff] %v14475_v35  ;;  %v19221_v18 = vsub.f32 %v19220_v21, %v14044_v44  ;;  %v19224_v35 = vsub.f32 %v19223_v12, %v14044_v44 }
 0x5aa   :  { %19219 = vst [vmem:[#allocation7_spill] sm:$0xff] %v14487_v39  ;;  %v14505_v27 = vmul.f32 %v14166_v3, %v19226_v4  ;;  %v19229_v39 = vsub.f32 %v19228_v29, %v14044_v44  ;;  %v19237_v4 = vld [vmem:[#allocation19_spill] sm:$0xff] }
 0x5ab   :  { %v14493_v13 = vmul.f32 %v14166_v3, %v19221_v18  ;;  %v14499_v11 = vmul.f32 %v14166_v3, %v19224_v35  ;;  %v19231_v18 = vld [vmem:[#allocation17_spill] sm:$0xff]  ;;  %v19234_v35 = vld [vmem:[#allocation20_spill] sm:$0xff] }
 0x5ac   :  { %19227 = vst [vmem:[#allocation12_spill] sm:$0xff] %v14505_v27  ;;  %v14511_v21 = vmul.f32 %v14166_v3, %v19229_v39  ;;  %v19238_v27 = vsub.f32 %v19237_v4, %v14044_v44  ;;  %v19239_v39 = vld [vmem:[#allocation22_spill] sm:$0xff] }
 0x5ad   :  { %19222 = vst [vmem:[#allocation10_spill] sm:$0xff] %v14493_v13  ;;  %19225 = vst [vmem:[#allocation9_spill] sm:$0xff] %v14499_v11  ;;  %v19232_v13 = vsub.f32 %v19231_v18, %v14044_v44  ;;  %v19235_v11 = vsub.f32 %v19234_v35, %v14044_v44 }
 0x5ae   :  { %19230 = vst [vmem:[#allocation15_spill] sm:$0xff] %v14511_v21  ;;  %v14529_v29 = vmul.f32 %v14166_v3, %v19238_v27  ;;  %v19240_v21 = vsub.f32 %v19239_v39, %v14044_v44  ;;  %v19245_v27 = vsub.f32 %v19160_v61, %v14044_v44 }
 0x5af   :  { %v14517_v12 = vmul.f32 %v14166_v3, %v19232_v13  ;;  %v14523_v10 = vmul.f32 %v14166_v3, %v19235_v11  ;;  %v19241_v13 = vld [vmem:[#allocation21_spill] sm:$0xff]  ;;  %v19243_v11 = vld [vmem:[#allocation24_spill] sm:$0xff] }
 0x5b0   :  { %v14535_v18 = vmul.f32 %v14166_v3, %v19240_v21  ;;  %v14553_v39 = vmul.f32 %v14166_v3, %v19245_v27  ;;  %v19246_v21 = vsub.f32 %v19161_v0, %v14044_v44  ;;  %v14575_v27 = vmul.f32 %v14171_v59, %v14191_v40 }
 0x5b1   :  { %19233 = vst [vmem:[#allocation23_spill] sm:$0xff] %v14517_v12  ;;  %19236 = vst [vmem:[#allocation26_spill] sm:$0xff] %v14523_v10  ;;  %v19242_v12 = vsub.f32 %v19241_v13, %v14044_v44  ;;  %v19244_v10 = vsub.f32 %v19243_v11, %v14044_v44  ;;  %v4361_v0 = vmul.f32 %v14171_v59, %v14197_v20 }
 0x5b2   :  { %v14559_v13 = vmul.f32 %v14166_v3, %v19246_v21  ;;  %v14581_v21 = vmul.f32 %v14171_v59, %v14208_v53  ;;  %v14597_v40 = vmul.f32 %v14171_v59, %v14233_v24  ;;  %v14601_v20 = vmul.f32 %v14171_v59, %v14239_v19 }
 0x5b3   :  { %v14541_v35 = vmul.f32 %v14166_v3, %v19242_v12  ;;  %v14547_v4 = vmul.f32 %v14166_v3, %v19244_v10  ;;  %v19247_v12 = vsub.f32 %v19162_v16, %v14044_v44  ;;  %v19248_v10 = vsub.f32 %v19164_v6, %v14044_v44 }
 0x5b4   :  { %v14585_v16 = vmul.f32 %v14171_v59, %v14214_v14  ;;  %v14589_v44 = vmul.f32 %v14171_v59, %v14220_v7  ;;  %v14593_v6 = vmul.f32 %v14171_v59, %v14226_v34  ;;  %v14605_v53 = vmul.f32 %v14171_v59, %v14245_v23 }
 0x5b5   :  { %v14565_v11 = vmul.f32 %v14166_v3, %v19247_v12  ;;  %v14571_v61 = vmul.f32 %v14166_v3, %v19248_v10  ;;  %v14609_v3 = vmul.f32 %v14171_v59, %v14251_v1  ;;  %v14613_v14 = vmul.f32 %v14171_v59, %v14257_v55  ;;  %v19255_v12 = vld [vmem:[#allocation7_spill] sm:$0xff]  ;;  %v19257_v10 = vld [vmem:[#allocation10_spill] sm:$0xff] }
 0x5b6   :  { %v14617_v7 = vmul.f32 %v14171_v59, %v14263_v51  ;;  %v14621_v34 = vmul.f32 %v14171_v59, %v14269_v37  ;;  %v14625_v24 = vmul.f32 %v14171_v59, %v14276_v32  ;;  %v14629_v19 = vmul.f32 %v14171_v59, %v14282_v48 }
 0x5b7   :  { %v14633_v23 = vmul.f32 %v14171_v59, %v14288_v43  ;;  %v14637_v1 = vmul.f32 %v14171_v59, %v14294_v25  ;;  %v14641_v55 = vmul.f32 %v14171_v59, %v14300_v49  ;;  %v14645_v51 = vmul.f32 %v14171_v59, %v14306_v46 }
 0x5b8   :  { %v14649_v37 = vmul.f32 %v14171_v59, %v14312_v9  ;;  %v14653_v32 = vmul.f32 %v14171_v59, %v14318_v5  ;;  %v14657_v48 = vmul.f32 %v14171_v59, %v14324_v15  ;;  %v14661_v43 = vmul.f32 %v14171_v59, %v14330_v63 }
 0x5b9   :  { %v14665_v25 = vmul.f32 %v14171_v59, %v14336_v26  ;;  %v14669_v49 = vmul.f32 %v14171_v59, %v14342_v17  ;;  %v14673_v46 = vmul.f32 %v14171_v59, %v14348_v52  ;;  %v14677_v9 = vmul.f32 %v14171_v59, %v14354_v42 }
 0x5ba   :  { %v14681_v5 = vmul.f32 %v14171_v59, %v14361_v45  ;;  %v14685_v15 = vmul.f32 %v14171_v59, %v14367_v50  ;;  %v14689_v63 = vmul.f32 %v14171_v59, %v14373_v57  ;;  %v14693_v26 = vmul.f32 %v14171_v59, %v14379_v60 }
 0x5bb   :  { %v14697_v17 = vmul.f32 %v14171_v59, %v14385_v41  ;;  %v14701_v52 = vmul.f32 %v14171_v59, %v14391_v38  ;;  %v14705_v42 = vmul.f32 %v14171_v59, %v14397_v22  ;;  %v14709_v45 = vmul.f32 %v14171_v59, %v14403_v8 }
 0x5bc   :  { %v14713_v50 = vmul.f32 %v14171_v59, %v14409_v54  ;;  %v14717_v57 = vmul.f32 %v14171_v59, %v14415_v28  ;;  %v14721_v60 = vmul.f32 %v14171_v59, %v14421_v56  ;;  %v14725_v41 = vmul.f32 %v14171_v59, %v14427_v47  ;;  %v19250_v47 = vld [vmem:[#allocation5_spill] sm:$0xff] }
 0x5bd   :  { %v14729_v38 = vmul.f32 %v14171_v59, %v14433_v62  ;;  %v14733_v22 = vmul.f32 %v14171_v59, %v14439_v58  ;;  %v14737_v8 = vmul.f32 %v14171_v59, %v14445_v33  ;;  %v14741_v54 = vmul.f32 %v14171_v59, %v14451_v30  ;;  %v19252_v58 = vld [vmem:[#allocation8_spill] sm:$0xff] }
 0x5be   :  { %v14745_v28 = vmul.f32 %v14171_v59, %v14457_v36  ;;  %v14749_v56 = vmul.f32 %v14171_v59, %v14463_v31  ;;  %v14753_v62 = vmul.f32 %v14171_v59, %v19250_v47  ;;  %v14757_v33 = vmul.f32 %v14171_v59, %v19252_v58 }
 0x5bf   :  { %v14761_v30 = vmul.f32 %v14171_v59, %v14481_v2  ;;  %v14765_v36 = vmul.f32 %v14171_v59, %v19255_v12  ;;  %v14769_v31 = vmul.f32 %v14171_v59, %v19257_v10 }
 0x5c0   :  { %19249 = vst [vmem:[#allocation25_spill] sm:$0xff] %v14749_v56  ;;  %19251 = vst [vmem:[#allocation27_spill] sm:$0xff] %v14753_v62  ;;  %v19258_v56 = vld [vmem:[#allocation9_spill] sm:$0xff]  ;;  %v19259_v62 = vld [vmem:[#allocation12_spill] sm:$0xff] }
 0x5c1   :  { %19253 = vst [vmem:[#allocation11_spill] sm:$0xff] %v14757_v33  ;;  %19254 = vst [vmem:[#allocation14_spill] sm:$0xff] %v14761_v30  ;;  %v14773_v47 = vmul.f32 %v14171_v59, %v19258_v56  ;;  %v14777_v58 = vmul.f32 %v14171_v59, %v19259_v62  ;;  %v19260_v33 = vld [vmem:[#allocation15_spill] sm:$0xff]  ;;  %v14793_v56 = vmul.f32 %v14171_v59, %v14529_v29 }
 0x5c2   :  { %19256 = vst [vmem:[#allocation13_spill] sm:$0xff] %v14765_v36  ;;  %v14781_v2 = vmul.f32 %v14171_v59, %v19260_v33  ;;  %v19261_v30 = vld [vmem:[#allocation23_spill] sm:$0xff]  ;;  %v19262_v36 = vld [vmem:[#allocation26_spill] sm:$0xff]  ;;  %v14797_v62 = vmul.f32 %v14171_v59, %v14535_v18  ;;  %v14801_v33 = vmul.f32 %v14171_v59, %v14541_v35  ;;  %v14813_v29 = vmul.f32 %v14171_v59, %v14559_v13 }
 0x5c3   :  { %v14785_v12 = vmul.f32 %v14171_v59, %v19261_v30  ;;  %v14789_v10 = vmul.f32 %v14171_v59, %v19262_v36  ;;  %v14805_v30 = vmul.f32 %v14171_v59, %v14547_v4  ;;  %v14809_v36 = vmul.f32 %v14171_v59, %v14553_v39 }
 0x5c4   :  { %19263 = vst [vmem:[#allocation16_spill] sm:$0xff] %v14797_v62  ;;  %19264 = vst [vmem:[#allocation18_spill] sm:$0xff] %v14801_v33  ;;  %v14817_v18 = vmul.f32 %v14171_v59, %v14565_v11  ;;  %v14821_v35 = vmul.f32 %v14171_v59, %v14571_v61  ;;  %v19265_v33 = vld [vmem:[#allocation6_spill] sm:$0xff] }
 0x5c5   :  { %v4432_v62 = vadd.f32 %v19265_v33, %v4361_v0  ;;  %v14826_v4 = vadd.f32 %v19265_v33, %v14575_v27  ;;  %v14830_v39 = vadd.f32 %v19265_v33, %v14581_v21  ;;  %v14834_v13 = vadd.f32 %v19265_v33, %v14585_v16 }
 0x5c6   :  { %v14838_v11 = vadd.f32 %v19265_v33, %v14589_v44  ;;  %v14842_v61 = vadd.f32 %v19265_v33, %v14593_v6  ;;  %v14846_v27 = vadd.f32 %v19265_v33, %v14597_v40  ;;  %v14850_v0 = vadd.f32 %v19265_v33, %v14601_v20 }
 0x5c7   :  { %v4496_v59 = vmax.f32 %v4432_v62, 0.0  ;;  %v14854_v21 = vadd.f32 %v19265_v33, %v14605_v53  ;;  %v14858_v16 = vadd.f32 %v19265_v33, %v14609_v3  ;;  %v14862_v44 = vadd.f32 %v19265_v33, %v14613_v14  ;;  %v4703_v62 = vld [vmem:[#allocation3] sm:$0xff] }
 0x5c8   :  { %v14866_v6 = vadd.f32 %v19265_v33, %v14617_v7  ;;  %v14871_v40 = vadd.f32 %v19265_v33, %v14621_v34  ;;  %v14875_v20 = vadd.f32 %v19265_v33, %v14625_v24  ;;  %v14879_v53 = vadd.f32 %v19265_v33, %v14629_v19  ;;  %4767 = vst.msk [vmem:[#allocation4] sm:$0xff] %vm3888_vm11, %v4703_v62 }
 0x5c9   :  { %4640 = vst.msk [vmem:[#allocation3 + $0x21] sm:$0xff] %vm3888_vm11, %v4496_v59  ;;  %v14883_v3 = vadd.f32 %v19265_v33, %v14633_v23  ;;  %v14887_v14 = vadd.f32 %v19265_v33, %v14637_v1  ;;  %v14891_v7 = vadd.f32 %v19265_v33, %v14641_v55  ;;  %v14895_v34 = vadd.f32 %v19265_v33, %v14645_v51  ;;  %v4704_v51 = vld [vmem:[#allocation3 + $0x8] sm:$0xff] }
 0x5ca   :  { %v14899_v24 = vadd.f32 %v19265_v33, %v14649_v37  ;;  %v14903_v19 = vadd.f32 %v19265_v33, %v14653_v32  ;;  %v14907_v23 = vadd.f32 %v19265_v33, %v14657_v48  ;;  %v14911_v1 = vadd.f32 %v19265_v33, %v14661_v43  ;;  %4768 = vst.msk [vmem:[#allocation4 + $0x8] sm:$0xff] %vm3888_vm11, %v4704_v51 }
 0x5cb   :  { %v14915_v55 = vadd.f32 %v19265_v33, %v14665_v25  ;;  %v14919_v37 = vadd.f32 %v19265_v33, %v14669_v49  ;;  %v14923_v32 = vadd.f32 %v19265_v33, %v14673_v46  ;;  %v14927_v48 = vadd.f32 %v19265_v33, %v14677_v9 }
 0x5cc   :  { %v14931_v43 = vadd.f32 %v19265_v33, %v14681_v5  ;;  %v14937_v25 = vadd.f32 %v19265_v33, %v14685_v15  ;;  %v14941_v49 = vadd.f32 %v19265_v33, %v14689_v63  ;;  %v14945_v46 = vadd.f32 %v19265_v33, %v14693_v26 }
 0x5cd   :  { %v14949_v9 = vadd.f32 %v19265_v33, %v14697_v17  ;;  %v14953_v5 = vadd.f32 %v19265_v33, %v14701_v52  ;;  %v14957_v15 = vadd.f32 %v19265_v33, %v14705_v42  ;;  %v14961_v63 = vadd.f32 %v19265_v33, %v14709_v45 }
 0x5ce   :  { %v14965_v26 = vadd.f32 %v19265_v33, %v14713_v50  ;;  %v14969_v17 = vadd.f32 %v19265_v33, %v14717_v57  ;;  %v14973_v52 = vadd.f32 %v19265_v33, %v14721_v60  ;;  %v14977_v42 = vadd.f32 %v19265_v33, %v14725_v41 }
 0x5cf   :  { %v14981_v45 = vadd.f32 %v19265_v33, %v14729_v38  ;;  %v14985_v50 = vadd.f32 %v19265_v33, %v14733_v22  ;;  %v14989_v57 = vadd.f32 %v19265_v33, %v14737_v8  ;;  %v14993_v60 = vadd.f32 %v19265_v33, %v14741_v54  ;;  %v19269_v38 = vld [vmem:[#allocation25_spill] sm:$0xff]  ;;  %v19270_v22 = vld [vmem:[#allocation27_spill] sm:$0xff]  ;;  %v19272_v54 = vld [vmem:[#allocation14_spill] sm:$0xff] }
 0x5d0   :  { %v4834_v59 = vld [vmem:[#allocation3 + $0x21] sm:$0xff]  ;;  %v14997_v41 = vadd.f32 %v19265_v33, %v14745_v28  ;;  %v15002_v51 = vadd.f32 %v19265_v33, %v19269_v38  ;;  %v15006_v62 = vadd.f32 %v19265_v33, %v19270_v22  ;;  %v19271_v8 = vld [vmem:[#allocation11_spill] sm:$0xff]  ;;  %v15026_v38 = vadd.f32 %v19265_v33, %v14773_v47 }
 0x5d1   :  { %19266 = vst [vmem:[#allocation17_spill] sm:$0xff] %v14989_v57  ;;  %19267 = vst [vmem:[#allocation20_spill] sm:$0xff] %v14993_v60  ;;  %4965 = vrot.lane.b32.xlu1 %v4834_v59, %s10424_s20  ;;  %v15010_v57 = vadd.f32 %v19265_v33, %v19271_v8  ;;  %v15014_v60 = vadd.f32 %v19265_v33, %v19272_v54  ;;  %v19273_v28 = vld [vmem:[#allocation13_spill] sm:$0xff]  ;;  %v15022_v59 = vadd.f32 %v19265_v33, %v14769_v31 }
 0x5d2   :  { %19268 = vst [vmem:[#allocation19_spill] sm:$0xff] %v14997_v41  ;;  %v15018_v41 = vadd.f32 %v19265_v33, %v19273_v28  ;;  %v15030_v22 = vadd.f32 %v19265_v33, %v14777_v58  ;;  %v15034_v8 = vadd.f32 %v19265_v33, %v14781_v2  ;;  %v15038_v54 = vadd.f32 %v19265_v33, %v14785_v12  ;;  %v19275_v28 = vld [vmem:[#allocation16_spill] sm:$0xff] }
 0x5d3   :  { %v15042_v31 = vadd.f32 %v19265_v33, %v14789_v10  ;;  %v15046_v47 = vadd.f32 %v19265_v33, %v14793_v56  ;;  %v15050_v58 = vadd.f32 %v19265_v33, %v19275_v28  ;;  %v15058_v12 = vadd.f32 %v19265_v33, %v14805_v30 }
 0x5d4   :  { %19274 = vst [vmem:[#allocation22_spill] sm:$0xff] %v15030_v22  ;;  %v19276_v22 = vld [vmem:[#allocation18_spill] sm:$0xff]  ;;  %v15062_v10 = vadd.f32 %v19265_v33, %v14809_v36  ;;  %v15066_v56 = vadd.f32 %v19265_v33, %v14813_v29  ;;  %v15070_v28 = vadd.f32 %v19265_v33, %v14817_v18  ;;  %v4497_v30 = vmax.f32 %v14830_v39, 0.0 }
 0x5d5   :  { %v15054_v2 = vadd.f32 %v19265_v33, %v19276_v22  ;;  %19278 = vst [vmem:[#allocation24_spill] sm:$0xff] %v15058_v12  ;;  %v15074_v22 = vadd.f32 %v19265_v33, %v14821_v35  ;;  %v4498_v12 = vmax.f32 %v14834_v13, 0.0  ;;  %v4499_v36 = vmax.f32 %v14838_v11, 0.0 }
 0x5d6   :  { %19279 = vst [vmem:[#allocation5_spill] sm:$0xff] %v15062_v10  ;;  %19280 = vst [vmem:[#allocation8_spill] sm:$0xff] %v15070_v28  ;;  %v4500_v10 = vmax.f32 %v14842_v61, 0.0  ;;  %v4501_v29 = vmax.f32 %v14846_v27, 0.0  ;;  %v4502_v18 = vmax.f32 %v14850_v0, 0.0  ;;  %v4503_v28 = vmax.f32 %v14854_v21, 0.0 }
 0x5d7   :  { %19277 = vst [vmem:[#allocation21_spill] sm:$0xff] %v15054_v2  ;;  %v4495_v2 = vmax.f32 %v14826_v4, 0.0  ;;  %v4504_v33 = vmax.f32 %v14858_v16, 0.0  ;;  %v4505_v35 = vmax.f32 %v14862_v44, 0.0  ;;  %v4506_v4 = vmax.f32 %v14866_v6, 0.0  ;;  %4642 = vst.msk [vmem:[#allocation3 + $0x39] sm:$0xff] %vm3888_vm11, %v4498_v12 }
 0x5d8   :  { %v4507_v39 = vmax.f32 %v14871_v40, 0.0  ;;  %v4508_v13 = vmax.f32 %v14875_v20, 0.0  ;;  %4641 = vst.msk [vmem:[#allocation3 + $0x31] sm:$0xff] %vm3888_vm11, %v4497_v30  ;;  %4643 = vst.msk [vmem:[#allocation3 + $0x49] sm:$0xff] %vm3888_vm11, %v4499_v36  ;;  %v4509_v11 = vmax.f32 %v14879_v53, 0.0  ;;  %v4510_v61 = vmax.f32 %v14883_v3, 0.0 }
 0x5d9   :  { %4639 = vst.msk [vmem:[#allocation3 + $0x19] sm:$0xff] %vm3888_vm11, %v4495_v2  ;;  %4644 = vst.msk [vmem:[#allocation3 + $0x51] sm:$0xff] %vm3888_vm11, %v4500_v10  ;;  %v4511_v27 = vmax.f32 %v14887_v14, 0.0  ;;  %v4512_v0 = vmax.f32 %v14891_v7, 0.0  ;;  %v4513_v21 = vmax.f32 %v14895_v34, 0.0  ;;  %v4514_v16 = vmax.f32 %v14899_v24, 0.0 }
 0x5da   :  { %4645 = vst.msk [vmem:[#allocation3 + $0x61] sm:$0xff] %vm3888_vm11, %v4501_v29  ;;  %4646 = vst.msk [vmem:[#allocation3 + $0x69] sm:$0xff] %vm3888_vm11, %v4502_v18  ;;  %v4515_v44 = vmax.f32 %v14903_v19, 0.0  ;;  %v4516_v6 = vmax.f32 %v14907_v23, 0.0  ;;  %v4517_v40 = vmax.f32 %v14911_v1, 0.0  ;;  %v4518_v20 = vmax.f32 %v14915_v55, 0.0 }
 0x5db   :  { %4647 = vst.msk [vmem:[#allocation3 + $0x79] sm:$0xff] %vm3888_vm11, %v4503_v28  ;;  %4648 = vst.msk [vmem:[#allocation3 + $0x81] sm:$0xff] %vm3888_vm11, %v4504_v33  ;;  %v4519_v53 = vmax.f32 %v14919_v37, 0.0  ;;  %v4520_v3 = vmax.f32 %v14923_v32, 0.0  ;;  %v4521_v14 = vmax.f32 %v14927_v48, 0.0  ;;  %v4522_v7 = vmax.f32 %v14931_v43, 0.0 }
 0x5dc   :  { %4649 = vst.msk [vmem:[#allocation3 + $0x91] sm:$0xff] %vm3888_vm11, %v4505_v35  ;;  %4650 = vst.msk [vmem:[#allocation3 + $0x99] sm:$0xff] %vm3888_vm11, %v4506_v4  ;;  %v4523_v34 = vmax.f32 %v14937_v25, 0.0  ;;  %v4524_v24 = vmax.f32 %v14941_v49, 0.0  ;;  %v4525_v19 = vmax.f32 %v14945_v46, 0.0  ;;  %v4526_v23 = vmax.f32 %v14949_v9, 0.0  ;;  %v4960_v35 = vpop.permute.xlu0 %4959 }
 0x5dd   :  { %4651 = vst.msk [vmem:[#allocation3 + $0xa9] sm:$0xff] %vm3888_vm11, %v4507_v39  ;;  %4652 = vst.msk [vmem:[#allocation3 + $0xb1] sm:$0xff] %vm3888_vm11, %v4508_v13  ;;  %v4527_v1 = vmax.f32 %v14953_v5, 0.0  ;;  %v4528_v55 = vmax.f32 %v14957_v15, 0.0  ;;  %v4529_v32 = vmax.f32 %v14961_v63, 0.0  ;;  %v4530_v48 = vmax.f32 %v14965_v26, 0.0 }
 0x5de   :  { %4653 = vst.msk [vmem:[#allocation3 + $0xc1] sm:$0xff] %vm3888_vm11, %v4509_v11  ;;  %4654 = vst.msk [vmem:[#allocation3 + $0xc9] sm:$0xff] %vm3888_vm11, %v4510_v61  ;;  %v4531_v43 = vmax.f32 %v14969_v17, 0.0  ;;  %v4532_v25 = vmax.f32 %v14973_v52, 0.0  ;;  %v4533_v46 = vmax.f32 %v14977_v42, 0.0  ;;  %v4534_v9 = vmax.f32 %v14981_v45, 0.0 }
 0x5df   :  { %4655 = vst.msk [vmem:[#allocation3 + $0xd9] sm:$0xff] %vm3888_vm11, %v4511_v27  ;;  %4656 = vst.msk [vmem:[#allocation3 + $0xe1] sm:$0xff] %vm3888_vm11, %v4512_v0  ;;  %v4535_v5 = vmax.f32 %v14985_v50, 0.0  ;;  %v19281_v15 = vld [vmem:[#allocation17_spill] sm:$0xff]  ;;  %v19282_v17 = vld [vmem:[#allocation20_spill] sm:$0xff]  ;;  %v4539_v50 = vmax.f32 %v15002_v51, 0.0 }
 0x5e0   :  { %4657 = vst.msk [vmem:[#allocation3 + $0xf1] sm:$0xff] %vm3888_vm11, %v4513_v21  ;;  %4658 = vst.msk [vmem:[#allocation3 + $0xf9] sm:$0xff] %vm3888_vm11, %v4514_v16  ;;  %v4833_v37 = vld [vmem:[#allocation3 + $0x19] sm:$0xff]  ;;  %v4536_v63 = vmax.f32 %v19281_v15, 0.0  ;;  %v4537_v52 = vmax.f32 %v19282_v17, 0.0  ;;  %v19283_v42 = vld [vmem:[#allocation19_spill] sm:$0xff] }
 0x5e1   :  { %4659 = vst.msk [vmem:[#allocation3 + $0x109] sm:$0xff] %vm3888_vm11, %v4515_v44  ;;  %4660 = vst.msk [vmem:[#allocation3 + $0x111] sm:$0xff] %vm3888_vm11, %v4516_v6  ;;  %v15142_v49 = vld [vmem:[#allocation3 + $0x20] sm:$0xff]  ;;  %4963 = vrot.lane.b32.xlu0 %v4833_v37, %s10424_s20  ;;  %v4538_v45 = vmax.f32 %v19283_v42, 0.0  ;;  %v4540_v2 = vmax.f32 %v15006_v62, 0.0  ;;  %v4541_v12 = vmax.f32 %v15010_v57, 0.0 }
 0x5e2   :  { %4661 = vst.msk [vmem:[#allocation3 + $0x121] sm:$0xff] %vm3888_vm11, %v4517_v40  ;;  %4662 = vst.msk [vmem:[#allocation3 + $0x129] sm:$0xff] %vm3888_vm11, %v4518_v20  ;;  %v4836_v26 = vld [vmem:[#allocation3 + $0x39] sm:$0xff]  ;;  %v4542_v10 = vmax.f32 %v15014_v60, 0.0  ;;  %v4543_v28 = vmax.f32 %v15018_v41, 0.0  ;;  %v4544_v51 = vmax.f32 %v15022_v59, 0.0 }
 0x5e3   :  { %4663 = vst.msk [vmem:[#allocation3 + $0x139] sm:$0xff] %vm3888_vm11, %v4519_v53  ;;  %4664 = vst.msk [vmem:[#allocation3 + $0x141] sm:$0xff] %vm3888_vm11, %v4520_v3  ;;  %4969 = vrot.lane.b32.xlu1 %v4836_v26, %s10424_s20  ;;  %v4545_v62 = vmax.f32 %v15026_v38, 0.0  ;;  %v19284_v30 = vld [vmem:[#allocation22_spill] sm:$0xff]  ;;  %v4547_v57 = vmax.f32 %v15034_v8, 0.0  ;;  %v4548_v60 = vmax.f32 %v15038_v54, 0.0  ;;  %v4962_v54 = vpop.permute.xlu1 %4961 }
 0x5e4   :  { %4665 = vst.msk [vmem:[#allocation3 + $0x151] sm:$0xff] %vm3888_vm11, %v4521_v14  ;;  %4666 = vst.msk [vmem:[#allocation3 + $0x159] sm:$0xff] %vm3888_vm11, %v4522_v7  ;;  %v4546_v36 = vmax.f32 %v19284_v30, 0.0  ;;  %v4835_v41 = vld [vmem:[#allocation3 + $0x31] sm:$0xff]  ;;  %v4549_v59 = vmax.f32 %v15042_v31, 0.0  ;;  %v4550_v29 = vmax.f32 %v15046_v47, 0.0 }
 0x5e5   :  { %4667 = vst.msk [vmem:[#allocation3 + $0x169] sm:$0xff] %vm3888_vm11, %v4523_v34  ;;  %4668 = vst.msk [vmem:[#allocation3 + $0x171] sm:$0xff] %vm3888_vm11, %v4524_v24  ;;  %v4551_v38 = vmax.f32 %v15050_v58, 0.0  ;;  %v19285_v18 = vld [vmem:[#allocation21_spill] sm:$0xff]  ;;  %4967 = vrot.lane.b32.xlu0 %v4835_v41, %s10424_s20  ;;  %v4838_v8 = vld [vmem:[#allocation3 + $0x51] sm:$0xff]  ;;  %v4555_v58 = vmax.f32 %v15066_v56, 0.0 }
 0x5e6   :  { %4669 = vst.msk [vmem:[#allocation3 + $0x181] sm:$0xff] %vm3888_vm11, %v4525_v19  ;;  %4670 = vst.msk [vmem:[#allocation3 + $0x189] sm:$0xff] %vm3888_vm11, %v4526_v23  ;;  %v4552_v33 = vmax.f32 %v19285_v18, 0.0  ;;  %v19286_v31 = vld [vmem:[#allocation24_spill] sm:$0xff]  ;;  %v19287_v47 = vld [vmem:[#allocation5_spill] sm:$0xff]  ;;  %v4558_v61 = vmax.f32 %v15074_v22, 0.0 }
 0x5e7   :  { %4671 = vst.msk [vmem:[#allocation3 + $0x1c9] sm:$0xff] %vm3888_vm11, %v4527_v1  ;;  %4672 = vst.msk [vmem:[#allocation3 + $0x1d1] sm:$0xff] %vm3888_vm11, %v4528_v55  ;;  %v4553_v4 = vmax.f32 %v19286_v31, 0.0  ;;  %v4554_v39 = vmax.f32 %v19287_v47, 0.0  ;;  %v19288_v13 = vld [vmem:[#allocation8_spill] sm:$0xff]  ;;  %4973 = vrot.lane.b32.xlu1 %v4838_v8, %s10424_s20  ;;  %v4837_v56 = vld [vmem:[#allocation3 + $0x49] sm:$0xff] }
 0x5e8   :  { %4770 = vst.msk [vmem:[#allocation4 + $0x18] sm:$0xff] %vm3888_vm11, %v15142_v49  ;;  %4673 = vst.msk [vmem:[#allocation3 + $0x1e1] sm:$0xff] %vm3888_vm11, %v4529_v32  ;;  %v4556_v11 = vmax.f32 %v19288_v13, 0.0  ;;  %v4840_v22 = vld [vmem:[#allocation3 + $0x69] sm:$0xff]  ;;  %v4839_v27 = vld [vmem:[#allocation3 + $0x61] sm:$0xff] }
 0x5e9   :  { %4674 = vst.msk [vmem:[#allocation3 + $0x1e9] sm:$0xff] %vm3888_vm11, %v4530_v48  ;;  %4675 = vst.msk [vmem:[#allocation3 + $0x1f9] sm:$0xff] %vm3888_vm11, %v4531_v43  ;;  %4971 = vrot.lane.b32.xlu0 %v4837_v56, %s10424_s20  ;;  %v4842_v0 = vld [vmem:[#allocation3 + $0x81] sm:$0xff]  ;;  %v4841_v21 = vld [vmem:[#allocation3 + $0x79] sm:$0xff] }
 0x5ea   :  { %4676 = vst.msk [vmem:[#allocation3 + $0x201] sm:$0xff] %vm3888_vm11, %v4532_v25  ;;  %4677 = vst.msk [vmem:[#allocation3 + $0x211] sm:$0xff] %vm3888_vm11, %v4533_v46  ;;  %v4844_v16 = vld [vmem:[#allocation3 + $0x99] sm:$0xff]  ;;  %v4843_v44 = vld [vmem:[#allocation3 + $0x91] sm:$0xff] }
 0x5eb   :  { %4678 = vst.msk [vmem:[#allocation3 + $0x219] sm:$0xff] %vm3888_vm11, %v4534_v9  ;;  %4679 = vst.msk [vmem:[#allocation3 + $0x229] sm:$0xff] %vm3888_vm11, %v4535_v5  ;;  %4977 = vrot.lane.b32.xlu1 %v4840_v22, %s10424_s20  ;;  %v4846_v6 = vld [vmem:[#allocation3 + $0xb1] sm:$0xff]  ;;  %v15232_v14 = vld [vmem:[#allocation3 + $0x48] sm:$0xff] }
 0x5ec   :  { %4680 = vst.msk [vmem:[#allocation3 + $0x231] sm:$0xff] %vm3888_vm11, %v4536_v63  ;;  %4681 = vst.msk [vmem:[#allocation3 + $0x241] sm:$0xff] %vm3888_vm11, %v4537_v52  ;;  %v15217_v40 = vld [vmem:[#allocation3 + $0x18] sm:$0xff]  ;;  %v15224_v53 = vld [vmem:[#allocation3 + $0x30] sm:$0xff] }
 0x5ed   :  { %4682 = vst.msk [vmem:[#allocation3 + $0x249] sm:$0xff] %vm3888_vm11, %v4538_v45  ;;  %4683 = vst.msk [vmem:[#allocation3 + $0x259] sm:$0xff] %vm3888_vm11, %v4539_v50  ;;  %4975 = vrot.lane.b32.xlu0 %v4839_v27, %s10424_s20  ;;  %v15222_v20 = vld [vmem:[#allocation3 + $0x38] sm:$0xff]  ;;  %v15230_v3 = vld [vmem:[#allocation3 + $0x50] sm:$0xff] }
 0x5ee   :  { %4684 = vst.msk [vmem:[#allocation3 + $0x261] sm:$0xff] %vm3888_vm11, %v4540_v2  ;;  %4685 = vst.msk [vmem:[#allocation3 + $0x271] sm:$0xff] %vm3888_vm11, %v4541_v12  ;;  %v4845_v7 = vld [vmem:[#allocation3 + $0xa9] sm:$0xff]  ;;  %v15240_v24 = vld [vmem:[#allocation3 + $0x60] sm:$0xff] }
 0x5ef   :  { %4686 = vst.msk [vmem:[#allocation3 + $0x279] sm:$0xff] %vm3888_vm11, %v4542_v10  ;;  %4687 = vst.msk [vmem:[#allocation3 + $0x289] sm:$0xff] %vm3888_vm11, %v4543_v28  ;;  %4981 = vrot.lane.b32.xlu1 %v4842_v0, %s10424_s20  ;;  %v15238_v34 = vld [vmem:[#allocation3 + $0x68] sm:$0xff]  ;;  %v15247_v23 = vld [vmem:[#allocation3 + $0x80] sm:$0xff] }
 0x5f0   :  { %4688 = vst.msk [vmem:[#allocation3 + $0x291] sm:$0xff] %vm3888_vm11, %v4544_v51  ;;  %4689 = vst.msk [vmem:[#allocation3 + $0x2a1] sm:$0xff] %vm3888_vm11, %v4545_v62  ;;  %v4848_v19 = vld [vmem:[#allocation3 + $0xc9] sm:$0xff]  ;;  %v15249_v1 = vld [vmem:[#allocation3 + $0x78] sm:$0xff] }
 0x5f1   :  { %4690 = vst.msk [vmem:[#allocation3 + $0x2a9] sm:$0xff] %vm3888_vm11, %v4546_v36  ;;  %4691 = vst.msk [vmem:[#allocation3 + $0x2b9] sm:$0xff] %vm3888_vm11, %v4547_v57  ;;  %4979 = vrot.lane.b32.xlu0 %v4841_v21, %s10424_s20  ;;  %v15256_v55 = vld [vmem:[#allocation3 + $0x98] sm:$0xff]  ;;  %v15258_v37 = vld [vmem:[#allocation3 + $0x90] sm:$0xff] }
 0x5f2   :  { %4692 = vst.msk [vmem:[#allocation3 + $0x2c1] sm:$0xff] %vm3888_vm11, %v4548_v60  ;;  %4693 = vst.msk [vmem:[#allocation3 + $0x2d1] sm:$0xff] %vm3888_vm11, %v4549_v59  ;;  %v15264_v32 = vld [vmem:[#allocation3 + $0xb0] sm:$0xff]  ;;  %v4847_v48 = vld [vmem:[#allocation3 + $0xc1] sm:$0xff] }
 0x5f3   :  { %4694 = vst.msk [vmem:[#allocation3 + $0x2d9] sm:$0xff] %vm3888_vm11, %v4550_v29  ;;  %4695 = vst.msk [vmem:[#allocation3 + $0x2e9] sm:$0xff] %vm3888_vm11, %v4551_v38  ;;  %4985 = vrot.lane.b32.xlu1 %v4844_v16, %s10424_s20  ;;  %v15268_v43 = vld [vmem:[#allocation3 + $0xa8] sm:$0xff]  ;;  %v15275_v9 = vld [vmem:[#allocation3 + $0xc0] sm:$0xff] }
 0x5f4   :  { %4696 = vst.msk [vmem:[#allocation3 + $0x2f1] sm:$0xff] %vm3888_vm11, %v4552_v33  ;;  %4697 = vst.msk [vmem:[#allocation3 + $0x301] sm:$0xff] %vm3888_vm11, %v4553_v4  ;;  %v4850_v25 = vld [vmem:[#allocation3 + $0xe1] sm:$0xff]  ;;  %v15284_v15 = vld [vmem:[#allocation3 + $0xd8] sm:$0xff] }
 0x5f5   :  { %4698 = vst.msk [vmem:[#allocation3 + $0x309] sm:$0xff] %vm3888_vm11, %v4554_v39  ;;  %4699 = vst.msk [vmem:[#allocation3 + $0x319] sm:$0xff] %vm3888_vm11, %v4555_v58  ;;  %4983 = vrot.lane.b32.xlu0 %v4843_v44, %s10424_s20  ;;  %v15273_v46 = vld [vmem:[#allocation3 + $0xc8] sm:$0xff]  ;;  %v15282_v5 = vld [vmem:[#allocation3 + $0xe0] sm:$0xff] }
 0x5f6   :  { %4700 = vst.msk [vmem:[#allocation3 + $0x321] sm:$0xff] %vm3888_vm11, %v4556_v11  ;;  %4702 = vst.msk [vmem:[#allocation3 + $0x339] sm:$0xff] %vm3888_vm11, %v4558_v61  ;;  %v15290_v63 = vld [vmem:[#allocation3 + $0xf8] sm:$0xff]  ;;  %v15294_v17 = vld [vmem:[#allocation3 + $0xf0] sm:$0xff] }
 0x5f7   :  { %5153 = vst.msk [vmem:[#allocation4 + $0x8] sm:$0xff] %vm5151_vm14, %v4962_v54  ;;  %5152 = vst.msk [vmem:[#allocation4] sm:$0xff] %vm5151_vm14, %v4960_v35  ;;  %4989 = vrot.lane.b32.xlu1 %v4846_v6, %s10424_s20  ;;  %v4849_v26 = vld [vmem:[#allocation3 + $0xd9] sm:$0xff]  ;;  %v15299_v42 = vld [vmem:[#allocation3 + $0x110] sm:$0xff] }
 0x5f8   :  { %4769 = vst.msk [vmem:[#allocation4 + $0x10] sm:$0xff] %vm3888_vm11, %v15217_v40  ;;  %4772 = vst.msk [vmem:[#allocation4 + $0x28] sm:$0xff] %vm3888_vm11, %v15222_v20  ;;  %v4852_v52 = vld [vmem:[#allocation3 + $0xf9] sm:$0xff]  ;;  %v15301_v45 = vld [vmem:[#allocation3 + $0x108] sm:$0xff] }
 0x5f9   :  { %4771 = vst.msk [vmem:[#allocation4 + $0x20] sm:$0xff] %vm3888_vm11, %v15224_v53  ;;  %4774 = vst.msk [vmem:[#allocation4 + $0x38] sm:$0xff] %vm3888_vm11, %v15230_v3  ;;  %4987 = vrot.lane.b32.xlu0 %v4845_v7, %s10424_s20  ;;  %v15308_v50 = vld [vmem:[#allocation3 + $0x128] sm:$0xff]  ;;  %v15310_v2 = vld [vmem:[#allocation3 + $0x120] sm:$0xff] }
 0x5fa   :  { %4773 = vst.msk [vmem:[#allocation4 + $0x30] sm:$0xff] %vm3888_vm11, %v15232_v14  ;;  %4776 = vst.msk [vmem:[#allocation4 + $0x48] sm:$0xff] %vm3888_vm11, %v15238_v34  ;;  %v15316_v12 = vld [vmem:[#allocation3 + $0x140] sm:$0xff]  ;;  %v4851_v10 = vld [vmem:[#allocation3 + $0xf1] sm:$0xff] }
 0x5fb   :  { %4775 = vst.msk [vmem:[#allocation4 + $0x40] sm:$0xff] %vm3888_vm11, %v15240_v24  ;;  %4993 = vrot.lane.b32.xlu1 %v4848_v19, %s10424_s20  ;;  %4778 = vst.msk [vmem:[#allocation4 + $0x58] sm:$0xff] %vm3888_vm11, %v15247_v23  ;;  %v15320_v28 = vld [vmem:[#allocation3 + $0x138] sm:$0xff]  ;;  %v15327_v30 = vld [vmem:[#allocation3 + $0x150] sm:$0xff] }
 0x5fc   :  { %4777 = vst.msk [vmem:[#allocation4 + $0x50] sm:$0xff] %vm3888_vm11, %v15249_v1  ;;  %4780 = vst.msk [vmem:[#allocation4 + $0x68] sm:$0xff] %vm3888_vm11, %v15256_v55  ;;  %v4854_v51 = vld [vmem:[#allocation3 + $0x111] sm:$0xff]  ;;  %v15336_v57 = vld [vmem:[#allocation3 + $0x168] sm:$0xff] }
 0x5fd   :  { %4779 = vst.msk [vmem:[#allocation4 + $0x60] sm:$0xff] %vm3888_vm11, %v15258_v37  ;;  %4782 = vst.msk [vmem:[#allocation4 + $0x78] sm:$0xff] %vm3888_vm11, %v15264_v32  ;;  %4991 = vrot.lane.b32.xlu0 %v4847_v48, %s10424_s20  ;;  %v15325_v62 = vld [vmem:[#allocation3 + $0x158] sm:$0xff]  ;;  %v15334_v36 = vld [vmem:[#allocation3 + $0x170] sm:$0xff] }
 0x5fe   :  { %4781 = vst.msk [vmem:[#allocation4 + $0x70] sm:$0xff] %vm3888_vm11, %v15268_v43  ;;  %4784 = vst.msk [vmem:[#allocation4 + $0x88] sm:$0xff] %vm3888_vm11, %v15273_v46  ;;  %v4853_v60 = vld [vmem:[#allocation3 + $0x109] sm:$0xff]  ;;  %v15356_v18 = vld [vmem:[#allocation3 + $0x1e0] sm:$0xff] }
 0x5ff   :  { %4997 = vrot.lane.b32.xlu1 %v4850_v25, %s10424_s20  ;;  %4783 = vst.msk [vmem:[#allocation4 + $0x80] sm:$0xff] %vm3888_vm11, %v15275_v9  ;;  %4786 = vst.msk [vmem:[#allocation4 + $0x98] sm:$0xff] %vm3888_vm11, %v15282_v5  ;;  %v15342_v41 = vld [vmem:[#allocation3 + $0x1d0] sm:$0xff]  ;;  %v15344_v59 = vld [vmem:[#allocation3 + $0x1c8] sm:$0xff] }
 0x600   :  { %4785 = vst.msk [vmem:[#allocation4 + $0x90] sm:$0xff] %vm3888_vm11, %v15284_v15  ;;  %4788 = vst.msk [vmem:[#allocation4 + $0xa8] sm:$0xff] %vm3888_vm11, %v15290_v63  ;;  %v4856_v29 = vld [vmem:[#allocation3 + $0x129] sm:$0xff]  ;;  %v15360_v33 = vld [vmem:[#allocation3 + $0x200] sm:$0xff] }
 0x601   :  { %4995 = vrot.lane.b32.xlu0 %v4849_v26, %s10424_s20  ;;  %4787 = vst.msk [vmem:[#allocation4 + $0xa0] sm:$0xff] %vm3888_vm11, %v15294_v17  ;;  %4790 = vst.msk [vmem:[#allocation4 + $0xb8] sm:$0xff] %vm3888_vm11, %v15299_v42  ;;  %v15351_v38 = vld [vmem:[#allocation3 + $0x1e8] sm:$0xff]  ;;  %v15362_v8 = vld [vmem:[#allocation3 + $0x1f8] sm:$0xff] }
 0x602   :  { %4789 = vst.msk [vmem:[#allocation4 + $0xb0] sm:$0xff] %vm3888_vm11, %v15301_v45  ;;  %4792 = vst.msk [vmem:[#allocation4 + $0xc8] sm:$0xff] %vm3888_vm11, %v15308_v50  ;;  %v15364_v54 = vld [vmem:[#allocation3 + $0x218] sm:$0xff]  ;;  %v4855_v35 = vld [vmem:[#allocation3 + $0x121] sm:$0xff] }
 0x603   :  { %5001 = vrot.lane.b32.xlu1 %v4852_v52, %s10424_s20  ;;  %4791 = vst.msk [vmem:[#allocation4 + $0xc0] sm:$0xff] %vm3888_vm11, %v15310_v2  ;;  %4794 = vst.msk [vmem:[#allocation4 + $0xd8] sm:$0xff] %vm3888_vm11, %v15316_v12  ;;  %v4858_v31 = vld [vmem:[#allocation3 + $0x141] sm:$0xff]  ;;  %v15372_v4 = vld [vmem:[#allocation3 + $0x210] sm:$0xff] }
 0x604   :  { %4793 = vst.msk [vmem:[#allocation4 + $0xd0] sm:$0xff] %vm3888_vm11, %v15320_v28  ;;  %4796 = vst.msk [vmem:[#allocation4 + $0xe8] sm:$0xff] %vm3888_vm11, %v15325_v62  ;;  %v4736_v47 = vld [vmem:[#allocation3 + $0x1b8] sm:$0xff]  ;;  %v4735_v39 = vld [vmem:[#allocation3 + $0x1b0] sm:$0xff] }
 0x605   :  { %4999 = vrot.lane.b32.xlu0 %v4851_v10, %s10424_s20  ;;  %4795 = vst.msk [vmem:[#allocation4 + $0xe0] sm:$0xff] %vm3888_vm11, %v15327_v30  ;;  %4798 = vst.msk [vmem:[#allocation4 + $0xf8] sm:$0xff] %vm3888_vm11, %v15334_v36  ;;  %v15377_v58 = vld [vmem:[#allocation3 + $0x230] sm:$0xff]  ;;  %v15384_v13 = vld [vmem:[#allocation3 + $0x228] sm:$0xff] }
 0x606   :  { %4797 = vst.msk [vmem:[#allocation4 + $0xf0] sm:$0xff] %vm3888_vm11, %v15336_v57  ;;  %4802 = vst.msk [vmem:[#allocation4 + $0x118] sm:$0xff] %vm3888_vm11, %v15342_v41  ;;  %v15388_v11 = vld [vmem:[#allocation3 + $0x248] sm:$0xff]  ;;  %v15390_v61 = vld [vmem:[#allocation3 + $0x240] sm:$0xff] }
 0x607   :  { %5005 = vrot.lane.b32.xlu1 %v4854_v51, %s10424_s20  ;;  %4801 = vst.msk [vmem:[#allocation4 + $0x110] sm:$0xff] %vm3888_vm11, %v15344_v59  ;;  %4804 = vst.msk [vmem:[#allocation4 + $0x128] sm:$0xff] %vm3888_vm11, %v15351_v38  ;;  %v4857_v56 = vld [vmem:[#allocation3 + $0x139] sm:$0xff]  ;;  %v15410_v16 = vld [vmem:[#allocation3 + $0x270] sm:$0xff] }
 0x608   :  { %4803 = vst.msk [vmem:[#allocation4 + $0x120] sm:$0xff] %vm3888_vm11, %v15356_v18  ;;  %4806 = vst.msk [vmem:[#allocation4 + $0x138] sm:$0xff] %vm3888_vm11, %v15360_v33  ;;  %v15396_v22 = vld [vmem:[#allocation3 + $0x260] sm:$0xff]  ;;  %v15398_v27 = vld [vmem:[#allocation3 + $0x258] sm:$0xff] }
 0x609   :  { %5003 = vrot.lane.b32.xlu0 %v4853_v60, %s10424_s20  ;;  %4805 = vst.msk [vmem:[#allocation4 + $0x130] sm:$0xff] %vm3888_vm11, %v15362_v8  ;;  %4808 = vst.msk [vmem:[#allocation4 + $0x148] sm:$0xff] %vm3888_vm11, %v15364_v54  ;;  %v4860_v0 = vld [vmem:[#allocation3 + $0x159] sm:$0xff]  ;;  %v15414_v44 = vld [vmem:[#allocation3 + $0x290] sm:$0xff] }
 0x60a   :  { %4807 = vst.msk [vmem:[#allocation4 + $0x140] sm:$0xff] %vm3888_vm11, %v15372_v4  ;;  %4800 = vst.msk [vmem:[#allocation4 + $0x108] sm:$0xff] %vm3888_vm11, %v4736_v47  ;;  %v15405_v21 = vld [vmem:[#allocation3 + $0x278] sm:$0xff]  ;;  %v15416_v6 = vld [vmem:[#allocation3 + $0x288] sm:$0xff] }
 0x60b   :  { %5009 = vrot.lane.b32.xlu1 %v4856_v29, %s10424_s20  ;;  %4799 = vst.msk [vmem:[#allocation4 + $0x100] sm:$0xff] %vm3888_vm11, %v4735_v39  ;;  %4810 = vst.msk [vmem:[#allocation4 + $0x158] sm:$0xff] %vm3888_vm11, %v15377_v58  ;;  %v4859_v7 = vld [vmem:[#allocation3 + $0x151] sm:$0xff]  ;;  %v15422_v19 = vld [vmem:[#allocation3 + $0x2a8] sm:$0xff] }
 0x60c   :  { %4809 = vst.msk [vmem:[#allocation4 + $0x150] sm:$0xff] %vm3888_vm11, %v15384_v13  ;;  %4812 = vst.msk [vmem:[#allocation4 + $0x168] sm:$0xff] %vm3888_vm11, %v15388_v11  ;;  %v15424_v48 = vld [vmem:[#allocation3 + $0x2a0] sm:$0xff]  ;;  %v4862_v25 = vld [vmem:[#allocation3 + $0x171] sm:$0xff] }
 0x60d   :  { %5007 = vrot.lane.b32.xlu0 %v4855_v35, %s10424_s20  ;;  %4811 = vst.msk [vmem:[#allocation4 + $0x160] sm:$0xff] %vm3888_vm11, %v15390_v61  ;;  %4814 = vst.msk [vmem:[#allocation4 + $0x178] sm:$0xff] %vm3888_vm11, %v15396_v22  ;;  %v15431_v26 = vld [vmem:[#allocation3 + $0x2c0] sm:$0xff]  ;;  %v15436_v52 = vld [vmem:[#allocation3 + $0x2b8] sm:$0xff] }
 0x60e   :  { %4813 = vst.msk [vmem:[#allocation4 + $0x170] sm:$0xff] %vm3888_vm11, %v15398_v27  ;;  %4816 = vst.msk [vmem:[#allocation4 + $0x188] sm:$0xff] %vm3888_vm11, %v15405_v21  ;;  %v4864_v10 = vld [vmem:[#allocation3 + $0x1b9] sm:$0xff]  ;;  %v15442_v60 = vld [vmem:[#allocation3 + $0x2d0] sm:$0xff] }
 0x60f   :  { %5013 = vrot.lane.b32.xlu1 %v4858_v31, %s10424_s20  ;;  %4815 = vst.msk [vmem:[#allocation4 + $0x180] sm:$0xff] %vm3888_vm11, %v15410_v16  ;;  %4818 = vst.msk [vmem:[#allocation4 + $0x198] sm:$0xff] %vm3888_vm11, %v15414_v44  ;;  %v15440_v51 = vld [vmem:[#allocation3 + $0x2d8] sm:$0xff]  ;;  %v4861_v29 = vld [vmem:[#allocation3 + $0x169] sm:$0xff] }
 0x610   :  { %4817 = vst.msk [vmem:[#allocation4 + $0x190] sm:$0xff] %vm3888_vm11, %v15416_v6  ;;  %4820 = vst.msk [vmem:[#allocation4 + $0x1a8] sm:$0xff] %vm3888_vm11, %v15422_v19  ;;  %v15448_v35 = vld [vmem:[#allocation3 + $0x2f0] sm:$0xff]  ;;  %v15450_v31 = vld [vmem:[#allocation3 + $0x2e8] sm:$0xff] }
 0x611   :  { %5011 = vrot.lane.b32.xlu0 %v4857_v56, %s10424_s20  ;;  %4819 = vst.msk [vmem:[#allocation4 + $0x1a0] sm:$0xff] %vm3888_vm11, %v15424_v48  ;;  %4822 = vst.msk [vmem:[#allocation4 + $0x1b8] sm:$0xff] %vm3888_vm11, %v15431_v26  ;;  %v15457_v47 = vld [vmem:[#allocation3 + $0x308] sm:$0xff]  ;;  %v4863_v39 = vld [vmem:[#allocation3 + $0x1b1] sm:$0xff] }
 0x612   :  { %4821 = vst.msk [vmem:[#allocation4 + $0x1b0] sm:$0xff] %vm3888_vm11, %v15436_v52  ;;  %4824 = vst.msk [vmem:[#allocation4 + $0x1c8] sm:$0xff] %vm3888_vm11, %v15440_v51  ;;  %v15462_v56 = vld [vmem:[#allocation3 + $0x300] sm:$0xff] }
 0x613   :  { %5017 = vrot.lane.b32.xlu1 %v4860_v0, %s10424_s20  ;;  %4823 = vst.msk [vmem:[#allocation4 + $0x1c0] sm:$0xff] %vm3888_vm11, %v15442_v60  ;;  %19289 = vst [vmem:[#allocation7_spill] sm:$0xff] %v15450_v31  ;;  %v15466_v0 = vld [vmem:[#allocation3 + $0x320] sm:$0xff] }
 0x614   :  { %4826 = vst.msk [vmem:[#allocation4 + $0x1d8] sm:$0xff] %vm3888_vm11, %v15448_v35  ;;  %4825 = vst.msk [vmem:[#allocation4 + $0x1d0] sm:$0xff] %vm3888_vm11, %v15450_v31 }
 0x615   :  { %5015 = vrot.lane.b32.xlu0 %v4859_v7, %s10424_s20  ;;  %19290 = vst [vmem:[#allocation10_spill] sm:$0xff] %v15457_v47  ;;  %4828 = vst.msk [vmem:[#allocation4 + $0x1e8] sm:$0xff] %vm3888_vm11, %v15457_v47  ;;  %v15468_v7 = vld [vmem:[#allocation3 + $0x318] sm:$0xff]  ;;  %v4870_v47 = vld [vmem:[#allocation3 + $0x201] sm:$0xff] }
 0x616   :  { %19291 = vst [vmem:[#allocation9_spill] sm:$0xff] %v15462_v56  ;;  %4827 = vst.msk [vmem:[#allocation4 + $0x1e0] sm:$0xff] %vm3888_vm11, %v15462_v56  ;;  %v4867_v56 = vld [vmem:[#allocation3 + $0x1e1] sm:$0xff] }
 0x617   :  { %5021 = vrot.lane.b32.xlu1 %v4862_v25, %s10424_s20  ;;  %19292 = vst [vmem:[#allocation12_spill] sm:$0xff] %v15466_v0  ;;  %19293 = vst [vmem:[#allocation15_spill] sm:$0xff] %v15468_v7  ;;  %v4866_v25 = vld [vmem:[#allocation3 + $0x1d1] sm:$0xff] }
 0x618   :  { %4830 = vst.msk [vmem:[#allocation4 + $0x1f8] sm:$0xff] %vm3888_vm11, %v15466_v0  ;;  %4829 = vst.msk [vmem:[#allocation4 + $0x1f0] sm:$0xff] %vm3888_vm11, %v15468_v7  ;;  %v4869_v0 = vld [vmem:[#allocation3 + $0x1f9] sm:$0xff] }
 0x619   :  { %5019 = vrot.lane.b32.xlu0 %v4861_v29, %s10424_s20  ;;  %v4868_v29 = vld [vmem:[#allocation3 + $0x1e9] sm:$0xff]  ;;  %v4872_v7 = vld [vmem:[#allocation3 + $0x219] sm:$0xff] }
 0x61b   :  { %5025 = vrot.lane.b32.xlu1 %v4864_v10, %s10424_s20  ;;  %v4865_v10 = vld [vmem:[#allocation3 + $0x1c9] sm:$0xff] }
 0x61d   :  { %5023 = vrot.lane.b32.xlu0 %v4863_v39, %s10424_s20  ;;  %v4871_v39 = vld [vmem:[#allocation3 + $0x211] sm:$0xff] }
 0x61f   :  { %5029 = vrot.lane.b32.xlu1 %v4866_v25, %s10424_s20  ;;  %v4874_v25 = vld [vmem:[#allocation3 + $0x231] sm:$0xff] }
 0x621   :  { %5027 = vrot.lane.b32.xlu0 %v4865_v10, %s10424_s20  ;;  %v4873_v10 = vld [vmem:[#allocation3 + $0x229] sm:$0xff] }
 0x623   :  { %5033 = vrot.lane.b32.xlu1 %v4868_v29, %s10424_s20  ;;  %v4876_v29 = vld [vmem:[#allocation3 + $0x249] sm:$0xff] }
 0x625   :  { %5031 = vrot.lane.b32.xlu0 %v4867_v56, %s10424_s20  ;;  %v4875_v56 = vld [vmem:[#allocation3 + $0x241] sm:$0xff] }
 0x627   :  { %5037 = vrot.lane.b32.xlu1 %v4870_v47, %s10424_s20  ;;  %v4878_v47 = vld [vmem:[#allocation3 + $0x261] sm:$0xff] }
 0x629   :  { %5035 = vrot.lane.b32.xlu0 %v4869_v0, %s10424_s20  ;;  %v4877_v0 = vld [vmem:[#allocation3 + $0x259] sm:$0xff] }
 0x62b   :  { %5041 = vrot.lane.b32.xlu1 %v4872_v7, %s10424_s20  ;;  %v4880_v7 = vld [vmem:[#allocation3 + $0x279] sm:$0xff] }
 0x62d   :  { %5039 = vrot.lane.b32.xlu0 %v4871_v39, %s10424_s20  ;;  %v4879_v39 = vld [vmem:[#allocation3 + $0x271] sm:$0xff] }
 0x62f   :  { %5045 = vrot.lane.b32.xlu1 %v4874_v25, %s10424_s20  ;;  %v4882_v25 = vld [vmem:[#allocation3 + $0x291] sm:$0xff] }
 0x631   :  { %5043 = vrot.lane.b32.xlu0 %v4873_v10, %s10424_s20  ;;  %v4881_v10 = vld [vmem:[#allocation3 + $0x289] sm:$0xff] }
 0x633   :  { %5049 = vrot.lane.b32.xlu1 %v4876_v29, %s10424_s20  ;;  %v4884_v29 = vld [vmem:[#allocation3 + $0x2a9] sm:$0xff] }
 0x635   :  { %5047 = vrot.lane.b32.xlu0 %v4875_v56, %s10424_s20  ;;  %v4883_v56 = vld [vmem:[#allocation3 + $0x2a1] sm:$0xff] }
 0x637   :  { %5053 = vrot.lane.b32.xlu1 %v4878_v47, %s10424_s20  ;;  %v4886_v47 = vld [vmem:[#allocation3 + $0x2c1] sm:$0xff] }
 0x639   :  { %5051 = vrot.lane.b32.xlu0 %v4877_v0, %s10424_s20 }
 0x63b   :  { %5057 = vrot.lane.b32.xlu1 %v4880_v7, %s10424_s20  ;;  %v4885_v7 = vld [vmem:[#allocation3 + $0x2b9] sm:$0xff] }
 0x63d   :  { %5055 = vrot.lane.b32.xlu0 %v4879_v39, %s10424_s20  ;;  %v4888_v39 = vld [vmem:[#allocation3 + $0x2d9] sm:$0xff] }
 0x63f   :  { %5061 = vrot.lane.b32.xlu1 %v4882_v25, %s10424_s20  ;;  %v4887_v25 = vld [vmem:[#allocation3 + $0x2d1] sm:$0xff] }
 0x641   :  { %5059 = vrot.lane.b32.xlu0 %v4881_v10, %s10424_s20  ;;  %v4890_v10 = vld [vmem:[#allocation3 + $0x2f1] sm:$0xff] }
 0x643   :  { %5065 = vrot.lane.b32.xlu1 %v4884_v29, %s10424_s20  ;;  %v4966_v0 = vpop.permute.xlu1 %4965  ;;  %v4889_v29 = vld [vmem:[#allocation3 + $0x2e9] sm:$0xff] }
 0x644   :  { %5155 = vst.msk [vmem:[#allocation4 + $0x18] sm:$0xff] %vm5151_vm14, %v4966_v0  ;;  %v4891_v0 = vld [vmem:[#allocation3 + $0x301] sm:$0xff] }
 0x645   :  { %5063 = vrot.lane.b32.xlu0 %v4883_v56, %s10424_s20  ;;  %v4892_v56 = vld [vmem:[#allocation3 + $0x309] sm:$0xff] }
 0x647   :  { %5069 = vrot.lane.b32.xlu1 %v4886_v47, %s10424_s20 }
 0x649   :  { %5067 = vrot.lane.b32.xlu0 %v4885_v7, %s10424_s20 }
 0x64b   :  { %5073 = vrot.lane.b32.xlu1 %v4888_v39, %s10424_s20  ;;  %v4894_v39 = vld [vmem:[#allocation3 + $0x321] sm:$0xff] }
 0x64d   :  { %5071 = vrot.lane.b32.xlu0 %v4887_v25, %s10424_s20 }
 0x64f   :  { %5077 = vrot.lane.b32.xlu1 %v4890_v10, %s10424_s20  ;;  %v5217_v10 = vld [vmem:[#allocation3 + $0xa] sm:$0xff] }
 0x651   :  { %5075 = vrot.lane.b32.xlu0 %v4889_v29, %s10424_s20  ;;  %v4893_v29 = vld [vmem:[#allocation3 + $0x319] sm:$0xff] }
 0x653   :  { %5081 = vrot.lane.b32.xlu1 %v4892_v56, %s10424_s20  ;;  %v4964_v47 = vpop.permute.xlu0 %4963  ;;  %v5216_v56 = vld [vmem:[#allocation3 + $0x2] sm:$0xff] }
 0x654   :  { %5154 = vst.msk [vmem:[#allocation4 + $0x10] sm:$0xff] %vm5151_vm14, %v4964_v47 }
 0x655   :  { %v4970_v7 = vpop.permute.xlu1 %4969  ;;  %5079 = vrot.lane.b32.xlu0 %v4891_v0, %s10424_s20 }
 0x656   :  { %5157 = vst.msk [vmem:[#allocation4 + $0x28] sm:$0xff] %vm5151_vm14, %v4970_v7  ;;  %v5219_v7 = vld [vmem:[#allocation3 + $0x22] sm:$0xff] }
 0x657   :  { %5085 = vrot.lane.b32.xlu1 %v4894_v39, %s10424_s20  ;;  %v4968_v25 = vpop.permute.xlu0 %4967 }
 0x658   :  { %5156 = vst.msk [vmem:[#allocation4 + $0x20] sm:$0xff] %vm5151_vm14, %v4968_v25  ;;  %v5218_v25 = vld [vmem:[#allocation3 + $0x1a] sm:$0xff] }
 0x659   :  { %v4974_v31 = vpop.permute.xlu1 %4973  ;;  %5083 = vrot.lane.b32.xlu0 %v4893_v29, %s10424_s20 }
 0x65a   :  { %5159 = vst.msk [vmem:[#allocation4 + $0x38] sm:$0xff] %vm5151_vm14, %v4974_v31  ;;  %v5221_v31 = vld [vmem:[#allocation3 + $0x3a] sm:$0xff] }
 0x65b   :  { %5346 = vrot.lane.b32.xlu1 %v5217_v10, %s10426_s25  ;;  %v4972_v47 = vpop.permute.xlu0 %4971 }
 0x65c   :  { %5158 = vst.msk [vmem:[#allocation4 + $0x30] sm:$0xff] %vm5151_vm14, %v4972_v47 }
 0x65d   :  { %v4978_v0 = vpop.permute.xlu1 %4977  ;;  %5344 = vrot.lane.b32.xlu0 %v5216_v56, %s10426_s25  ;;  %v5220_v56 = vld [vmem:[#allocation3 + $0x32] sm:$0xff] }
 0x65e   :  { %5161 = vst.msk [vmem:[#allocation4 + $0x48] sm:$0xff] %vm5151_vm14, %v4978_v0  ;;  %v5223_v0 = vld [vmem:[#allocation3 + $0x52] sm:$0xff] }
 0x65f   :  { %5350 = vrot.lane.b32.xlu1 %v5219_v7, %s10426_s25  ;;  %v4976_v39 = vpop.permute.xlu0 %4975 }
 0x660   :  { %5160 = vst.msk [vmem:[#allocation4 + $0x40] sm:$0xff] %vm5151_vm14, %v4976_v39  ;;  %v5222_v39 = vld [vmem:[#allocation3 + $0x4a] sm:$0xff] }
 0x661   :  { %v4982_v29 = vpop.permute.xlu1 %4981  ;;  %5348 = vrot.lane.b32.xlu0 %v5218_v25, %s10426_s25 }
 0x662   :  { %5163 = vst.msk [vmem:[#allocation4 + $0x58] sm:$0xff] %vm5151_vm14, %v4982_v29  ;;  %v5225_v29 = vld [vmem:[#allocation3 + $0x6a] sm:$0xff] }
 0x663   :  { %5354 = vrot.lane.b32.xlu1 %v5221_v31, %s10426_s25  ;;  %v4980_v10 = vpop.permute.xlu0 %4979 }
 0x664   :  { %5162 = vst.msk [vmem:[#allocation4 + $0x50] sm:$0xff] %vm5151_vm14, %v4980_v10  ;;  %v5224_v10 = vld [vmem:[#allocation3 + $0x62] sm:$0xff] }
 0x665   :  { %v4986_v47 = vpop.permute.xlu1 %4985  ;;  %5352 = vrot.lane.b32.xlu0 %v5220_v56, %s10426_s25 }
 0x666   :  { %5165 = vst.msk [vmem:[#allocation4 + $0x68] sm:$0xff] %vm5151_vm14, %v4986_v47  ;;  %v5227_v47 = vld [vmem:[#allocation3 + $0x82] sm:$0xff] }
 0x667   :  { %5358 = vrot.lane.b32.xlu1 %v5223_v0, %s10426_s25  ;;  %v4984_v7 = vpop.permute.xlu0 %4983 }
 0x668   :  { %5164 = vst.msk [vmem:[#allocation4 + $0x60] sm:$0xff] %vm5151_vm14, %v4984_v7  ;;  %v5226_v7 = vld [vmem:[#allocation3 + $0x7a] sm:$0xff] }
 0x669   :  { %v4990_v25 = vpop.permute.xlu1 %4989  ;;  %5356 = vrot.lane.b32.xlu0 %v5222_v39, %s10426_s25 }
 0x66a   :  { %5167 = vst.msk [vmem:[#allocation4 + $0x78] sm:$0xff] %vm5151_vm14, %v4990_v25  ;;  %v5229_v25 = vld [vmem:[#allocation3 + $0x9a] sm:$0xff] }
 0x66b   :  { %5362 = vrot.lane.b32.xlu1 %v5225_v29, %s10426_s25  ;;  %v4988_v31 = vpop.permute.xlu0 %4987 }
 0x66c   :  { %5166 = vst.msk [vmem:[#allocation4 + $0x70] sm:$0xff] %vm5151_vm14, %v4988_v31  ;;  %v5228_v31 = vld [vmem:[#allocation3 + $0x92] sm:$0xff] }
 0x66d   :  { %v4994_v56 = vpop.permute.xlu1 %4993  ;;  %5360 = vrot.lane.b32.xlu0 %v5224_v10, %s10426_s25 }
 0x66e   :  { %5169 = vst.msk [vmem:[#allocation4 + $0x88] sm:$0xff] %vm5151_vm14, %v4994_v56  ;;  %v5231_v56 = vld [vmem:[#allocation3 + $0xb2] sm:$0xff] }
 0x66f   :  { %5366 = vrot.lane.b32.xlu1 %v5227_v47, %s10426_s25  ;;  %v4992_v0 = vpop.permute.xlu0 %4991 }
 0x670   :  { %5168 = vst.msk [vmem:[#allocation4 + $0x80] sm:$0xff] %vm5151_vm14, %v4992_v0  ;;  %v5230_v0 = vld [vmem:[#allocation3 + $0xaa] sm:$0xff] }
 0x671   :  { %v4998_v39 = vpop.permute.xlu1 %4997  ;;  %5364 = vrot.lane.b32.xlu0 %v5226_v7, %s10426_s25 }
 0x672   :  { %5171 = vst.msk [vmem:[#allocation4 + $0x98] sm:$0xff] %vm5151_vm14, %v4998_v39  ;;  %v5233_v39 = vld [vmem:[#allocation3 + $0xca] sm:$0xff] }
 0x673   :  { %5370 = vrot.lane.b32.xlu1 %v5229_v25, %s10426_s25  ;;  %v4996_v29 = vpop.permute.xlu0 %4995 }
 0x674   :  { %5170 = vst.msk [vmem:[#allocation4 + $0x90] sm:$0xff] %vm5151_vm14, %v4996_v29  ;;  %v5232_v29 = vld [vmem:[#allocation3 + $0xc2] sm:$0xff] }
 0x675   :  { %v5002_v10 = vpop.permute.xlu1 %5001  ;;  %5368 = vrot.lane.b32.xlu0 %v5228_v31, %s10426_s25 }
 0x676   :  { %5173 = vst.msk [vmem:[#allocation4 + $0xa8] sm:$0xff] %vm5151_vm14, %v5002_v10  ;;  %v5235_v10 = vld [vmem:[#allocation3 + $0xe2] sm:$0xff] }
 0x677   :  { %5374 = vrot.lane.b32.xlu1 %v5231_v56, %s10426_s25  ;;  %v5000_v47 = vpop.permute.xlu0 %4999 }
 0x678   :  { %5172 = vst.msk [vmem:[#allocation4 + $0xa0] sm:$0xff] %vm5151_vm14, %v5000_v47  ;;  %v5234_v47 = vld [vmem:[#allocation3 + $0xda] sm:$0xff] }
 0x679   :  { %v5006_v7 = vpop.permute.xlu1 %5005  ;;  %5372 = vrot.lane.b32.xlu0 %v5230_v0, %s10426_s25 }
 0x67a   :  { %5175 = vst.msk [vmem:[#allocation4 + $0xb8] sm:$0xff] %vm5151_vm14, %v5006_v7  ;;  %v5237_v7 = vld [vmem:[#allocation3 + $0xfa] sm:$0xff] }
 0x67b   :  { %5378 = vrot.lane.b32.xlu1 %v5233_v39, %s10426_s25  ;;  %v5004_v25 = vpop.permute.xlu0 %5003 }
 0x67c   :  { %5174 = vst.msk [vmem:[#allocation4 + $0xb0] sm:$0xff] %vm5151_vm14, %v5004_v25  ;;  %v5236_v25 = vld [vmem:[#allocation3 + $0xf2] sm:$0xff] }
 0x67d   :  { %v5010_v31 = vpop.permute.xlu1 %5009  ;;  %5376 = vrot.lane.b32.xlu0 %v5232_v29, %s10426_s25 }
 0x67e   :  { %5177 = vst.msk [vmem:[#allocation4 + $0xc8] sm:$0xff] %vm5151_vm14, %v5010_v31  ;;  %v5239_v31 = vld [vmem:[#allocation3 + $0x112] sm:$0xff] }
 0x67f   :  { %5382 = vrot.lane.b32.xlu1 %v5235_v10, %s10426_s25  ;;  %v5008_v56 = vpop.permute.xlu0 %5007 }
 0x680   :  { %5176 = vst.msk [vmem:[#allocation4 + $0xc0] sm:$0xff] %vm5151_vm14, %v5008_v56  ;;  %v5238_v56 = vld [vmem:[#allocation3 + $0x10a] sm:$0xff] }
 0x681   :  { %v5014_v0 = vpop.permute.xlu1 %5013  ;;  %5380 = vrot.lane.b32.xlu0 %v5234_v47, %s10426_s25 }
 0x682   :  { %5179 = vst.msk [vmem:[#allocation4 + $0xd8] sm:$0xff] %vm5151_vm14, %v5014_v0  ;;  %v5241_v0 = vld [vmem:[#allocation3 + $0x12a] sm:$0xff] }
 0x683   :  { %5386 = vrot.lane.b32.xlu1 %v5237_v7, %s10426_s25  ;;  %v5012_v39 = vpop.permute.xlu0 %5011 }
 0x684   :  { %5178 = vst.msk [vmem:[#allocation4 + $0xd0] sm:$0xff] %vm5151_vm14, %v5012_v39  ;;  %v5240_v39 = vld [vmem:[#allocation3 + $0x122] sm:$0xff] }
 0x685   :  { %v5018_v29 = vpop.permute.xlu1 %5017  ;;  %5384 = vrot.lane.b32.xlu0 %v5236_v25, %s10426_s25 }
 0x686   :  { %5181 = vst.msk [vmem:[#allocation4 + $0xe8] sm:$0xff] %vm5151_vm14, %v5018_v29  ;;  %v5243_v29 = vld [vmem:[#allocation3 + $0x142] sm:$0xff] }
 0x687   :  { %5390 = vrot.lane.b32.xlu1 %v5239_v31, %s10426_s25  ;;  %v5016_v10 = vpop.permute.xlu0 %5015 }
 0x688   :  { %5180 = vst.msk [vmem:[#allocation4 + $0xe0] sm:$0xff] %vm5151_vm14, %v5016_v10  ;;  %v5242_v10 = vld [vmem:[#allocation3 + $0x13a] sm:$0xff] }
 0x689   :  { %v5022_v47 = vpop.permute.xlu1 %5021  ;;  %5388 = vrot.lane.b32.xlu0 %v5238_v56, %s10426_s25 }
 0x68a   :  { %5183 = vst.msk [vmem:[#allocation4 + $0xf8] sm:$0xff] %vm5151_vm14, %v5022_v47  ;;  %v5245_v47 = vld [vmem:[#allocation3 + $0x15a] sm:$0xff] }
 0x68b   :  { %5394 = vrot.lane.b32.xlu1 %v5241_v0, %s10426_s25  ;;  %v5020_v7 = vpop.permute.xlu0 %5019 }
 0x68c   :  { %5182 = vst.msk [vmem:[#allocation4 + $0xf0] sm:$0xff] %vm5151_vm14, %v5020_v7  ;;  %v5244_v7 = vld [vmem:[#allocation3 + $0x152] sm:$0xff] }
 0x68d   :  { %v5026_v25 = vpop.permute.xlu1 %5025  ;;  %5392 = vrot.lane.b32.xlu0 %v5240_v39, %s10426_s25 }
 0x68e   :  { %5185 = vst.msk [vmem:[#allocation4 + $0x108] sm:$0xff] %vm5151_vm14, %v5026_v25  ;;  %v5247_v25 = vld [vmem:[#allocation3 + $0x172] sm:$0xff] }
 0x68f   :  { %5398 = vrot.lane.b32.xlu1 %v5243_v29, %s10426_s25  ;;  %v5024_v31 = vpop.permute.xlu0 %5023 }
 0x690   :  { %5184 = vst.msk [vmem:[#allocation4 + $0x100] sm:$0xff] %vm5151_vm14, %v5024_v31  ;;  %v5249_v31 = vld [vmem:[#allocation3 + $0x1ba] sm:$0xff] }
 0x691   :  { %v5030_v56 = vpop.permute.xlu1 %5029  ;;  %5396 = vrot.lane.b32.xlu0 %v5242_v10, %s10426_s25  ;;  %v5246_v10 = vld [vmem:[#allocation3 + $0x16a] sm:$0xff] }
 0x692   :  { %5187 = vst.msk [vmem:[#allocation4 + $0x118] sm:$0xff] %vm5151_vm14, %v5030_v56 }
 0x693   :  { %5402 = vrot.lane.b32.xlu1 %v5245_v47, %s10426_s25  ;;  %v5028_v0 = vpop.permute.xlu0 %5027  ;;  %v5248_v47 = vld [vmem:[#allocation3 + $0x1b2] sm:$0xff] }
 0x694   :  { %5186 = vst.msk [vmem:[#allocation4 + $0x110] sm:$0xff] %vm5151_vm14, %v5028_v0 }
 0x695   :  { %v5034_v39 = vpop.permute.xlu1 %5033  ;;  %5400 = vrot.lane.b32.xlu0 %v5244_v7, %s10426_s25 }
 0x696   :  { %5189 = vst.msk [vmem:[#allocation4 + $0x128] sm:$0xff] %vm5151_vm14, %v5034_v39  ;;  %v5251_v39 = vld [vmem:[#allocation3 + $0x1d2] sm:$0xff] }
 0x697   :  { %5406 = vrot.lane.b32.xlu1 %v5247_v25, %s10426_s25  ;;  %v5032_v29 = vpop.permute.xlu0 %5031 }
 0x698   :  { %5188 = vst.msk [vmem:[#allocation4 + $0x120] sm:$0xff] %vm5151_vm14, %v5032_v29  ;;  %v5250_v29 = vld [vmem:[#allocation3 + $0x1ca] sm:$0xff] }
 0x699   :  { %v5038_v56 = vpop.permute.xlu1 %5037  ;;  %5404 = vrot.lane.b32.xlu0 %v5246_v10, %s10426_s25 }
 0x69a   :  { %5191 = vst.msk [vmem:[#allocation4 + $0x138] sm:$0xff] %vm5151_vm14, %v5038_v56 }
 0x69b   :  { %5410 = vrot.lane.b32.xlu1 %v5249_v31, %s10426_s25  ;;  %v5036_v0 = vpop.permute.xlu0 %5035  ;;  %v5253_v31 = vld [vmem:[#allocation3 + $0x1ea] sm:$0xff] }
 0x69c   :  { %5190 = vst.msk [vmem:[#allocation4 + $0x130] sm:$0xff] %vm5151_vm14, %v5036_v0 }
 0x69d   :  { %v5042_v7 = vpop.permute.xlu1 %5041  ;;  %5408 = vrot.lane.b32.xlu0 %v5248_v47, %s10426_s25  ;;  %v5252_v47 = vld [vmem:[#allocation3 + $0x1e2] sm:$0xff] }
 0x69e   :  { %5193 = vst.msk [vmem:[#allocation4 + $0x148] sm:$0xff] %vm5151_vm14, %v5042_v7  ;;  %v5255_v7 = vld [vmem:[#allocation3 + $0x202] sm:$0xff] }
 0x69f   :  { %5414 = vrot.lane.b32.xlu1 %v5251_v39, %s10426_s25  ;;  %v5040_v25 = vpop.permute.xlu0 %5039 }
 0x6a0   :  { %5192 = vst.msk [vmem:[#allocation4 + $0x140] sm:$0xff] %vm5151_vm14, %v5040_v25  ;;  %v5254_v25 = vld [vmem:[#allocation3 + $0x1fa] sm:$0xff] }
 0x6a1   :  { %v5046_v10 = vpop.permute.xlu1 %5045  ;;  %5412 = vrot.lane.b32.xlu0 %v5250_v29, %s10426_s25 }
 0x6a2   :  { %5195 = vst.msk [vmem:[#allocation4 + $0x158] sm:$0xff] %vm5151_vm14, %v5046_v10  ;;  %v5257_v10 = vld [vmem:[#allocation3 + $0x21a] sm:$0xff] }
 0x6a3   :  { %5418 = vrot.lane.b32.xlu1 %v5253_v31, %s10426_s25  ;;  %v5044_v56 = vpop.permute.xlu0 %5043 }
 0x6a4   :  { %5194 = vst.msk [vmem:[#allocation4 + $0x150] sm:$0xff] %vm5151_vm14, %v5044_v56  ;;  %v5256_v56 = vld [vmem:[#allocation3 + $0x212] sm:$0xff] }
 0x6a5   :  { %v5050_v0 = vpop.permute.xlu1 %5049  ;;  %5416 = vrot.lane.b32.xlu0 %v5252_v47, %s10426_s25 }
 0x6a6   :  { %5197 = vst.msk [vmem:[#allocation4 + $0x168] sm:$0xff] %vm5151_vm14, %v5050_v0  ;;  %v5259_v0 = vld [vmem:[#allocation3 + $0x232] sm:$0xff] }
 0x6a7   :  { %5422 = vrot.lane.b32.xlu1 %v5255_v7, %s10426_s25  ;;  %v5048_v39 = vpop.permute.xlu0 %5047 }
 0x6a8   :  { %5196 = vst.msk [vmem:[#allocation4 + $0x160] sm:$0xff] %vm5151_vm14, %v5048_v39  ;;  %v5258_v39 = vld [vmem:[#allocation3 + $0x22a] sm:$0xff] }
 0x6a9   :  { %v5054_v29 = vpop.permute.xlu1 %5053  ;;  %5420 = vrot.lane.b32.xlu0 %v5254_v25, %s10426_s25 }
 0x6aa   :  { %5199 = vst.msk [vmem:[#allocation4 + $0x178] sm:$0xff] %vm5151_vm14, %v5054_v29  ;;  %v5261_v29 = vld [vmem:[#allocation3 + $0x24a] sm:$0xff] }
 0x6ab   :  { %5426 = vrot.lane.b32.xlu1 %v5257_v10, %s10426_s25  ;;  %v5052_v31 = vpop.permute.xlu0 %5051 }
 0x6ac   :  { %5198 = vst.msk [vmem:[#allocation4 + $0x170] sm:$0xff] %vm5151_vm14, %v5052_v31  ;;  %v5260_v31 = vld [vmem:[#allocation3 + $0x242] sm:$0xff] }
 0x6ad   :  { %v5058_v47 = vpop.permute.xlu1 %5057  ;;  %5424 = vrot.lane.b32.xlu0 %v5256_v56, %s10426_s25 }
 0x6ae   :  { %5201 = vst.msk [vmem:[#allocation4 + $0x188] sm:$0xff] %vm5151_vm14, %v5058_v47  ;;  %v5263_v47 = vld [vmem:[#allocation3 + $0x262] sm:$0xff] }
 0x6af   :  { %5430 = vrot.lane.b32.xlu1 %v5259_v0, %s10426_s25  ;;  %v5056_v7 = vpop.permute.xlu0 %5055 }
 0x6b0   :  { %5200 = vst.msk [vmem:[#allocation4 + $0x180] sm:$0xff] %vm5151_vm14, %v5056_v7  ;;  %v5262_v7 = vld [vmem:[#allocation3 + $0x25a] sm:$0xff] }
 0x6b1   :  { %v5062_v25 = vpop.permute.xlu1 %5061  ;;  %5428 = vrot.lane.b32.xlu0 %v5258_v39, %s10426_s25 }
 0x6b2   :  { %5203 = vst.msk [vmem:[#allocation4 + $0x198] sm:$0xff] %vm5151_vm14, %v5062_v25  ;;  %v5265_v25 = vld [vmem:[#allocation3 + $0x27a] sm:$0xff] }
 0x6b3   :  { %5434 = vrot.lane.b32.xlu1 %v5261_v29, %s10426_s25  ;;  %v5060_v10 = vpop.permute.xlu0 %5059 }
 0x6b4   :  { %5202 = vst.msk [vmem:[#allocation4 + $0x190] sm:$0xff] %vm5151_vm14, %v5060_v10  ;;  %v5264_v10 = vld [vmem:[#allocation3 + $0x272] sm:$0xff] }
 0x6b5   :  { %v5066_v56 = vpop.permute.xlu1 %5065  ;;  %5432 = vrot.lane.b32.xlu0 %v5260_v31, %s10426_s25 }
 0x6b6   :  { %5205 = vst.msk [vmem:[#allocation4 + $0x1a8] sm:$0xff] %vm5151_vm14, %v5066_v56  ;;  %v5267_v56 = vld [vmem:[#allocation3 + $0x292] sm:$0xff] }
 0x6b7   :  { %5438 = vrot.lane.b32.xlu1 %v5263_v47, %s10426_s25  ;;  %v5064_v0 = vpop.permute.xlu0 %5063 }
 0x6b8   :  { %5204 = vst.msk [vmem:[#allocation4 + $0x1a0] sm:$0xff] %vm5151_vm14, %v5064_v0  ;;  %v5266_v0 = vld [vmem:[#allocation3 + $0x28a] sm:$0xff] }
 0x6b9   :  { %v5070_v39 = vpop.permute.xlu1 %5069  ;;  %5436 = vrot.lane.b32.xlu0 %v5262_v7, %s10426_s25 }
 0x6ba   :  { %5207 = vst.msk [vmem:[#allocation4 + $0x1b8] sm:$0xff] %vm5151_vm14, %v5070_v39  ;;  %v5269_v39 = vld [vmem:[#allocation3 + $0x2aa] sm:$0xff] }
 0x6bb   :  { %5442 = vrot.lane.b32.xlu1 %v5265_v25, %s10426_s25  ;;  %v5068_v29 = vpop.permute.xlu0 %5067 }
 0x6bc   :  { %5206 = vst.msk [vmem:[#allocation4 + $0x1b0] sm:$0xff] %vm5151_vm14, %v5068_v29  ;;  %v5268_v29 = vld [vmem:[#allocation3 + $0x2a2] sm:$0xff] }
 0x6bd   :  { %v5074_v31 = vpop.permute.xlu1 %5073  ;;  %5440 = vrot.lane.b32.xlu0 %v5264_v10, %s10426_s25 }
 0x6be   :  { %5209 = vst.msk [vmem:[#allocation4 + $0x1c8] sm:$0xff] %vm5151_vm14, %v5074_v31  ;;  %v5271_v31 = vld [vmem:[#allocation3 + $0x2c2] sm:$0xff] }
 0x6bf   :  { %5446 = vrot.lane.b32.xlu1 %v5267_v56, %s10426_s25  ;;  %v5072_v47 = vpop.permute.xlu0 %5071 }
 0x6c0   :  { %5208 = vst.msk [vmem:[#allocation4 + $0x1c0] sm:$0xff] %vm5151_vm14, %v5072_v47  ;;  %v5270_v47 = vld [vmem:[#allocation3 + $0x2ba] sm:$0xff] }
 0x6c1   :  { %v5078_v7 = vpop.permute.xlu1 %5077  ;;  %5444 = vrot.lane.b32.xlu0 %v5266_v0, %s10426_s25 }
 0x6c2   :  { %5211 = vst.msk [vmem:[#allocation4 + $0x1d8] sm:$0xff] %vm5151_vm14, %v5078_v7  ;;  %v5273_v7 = vld [vmem:[#allocation3 + $0x2da] sm:$0xff] }
 0x6c3   :  { %5450 = vrot.lane.b32.xlu1 %v5269_v39, %s10426_s25  ;;  %v5076_v25 = vpop.permute.xlu0 %5075 }
 0x6c4   :  { %5210 = vst.msk [vmem:[#allocation4 + $0x1d0] sm:$0xff] %vm5151_vm14, %v5076_v25  ;;  %v5272_v25 = vld [vmem:[#allocation3 + $0x2d2] sm:$0xff] }
 0x6c5   :  { %v5082_v10 = vpop.permute.xlu1 %5081  ;;  %5448 = vrot.lane.b32.xlu0 %v5268_v29, %s10426_s25 }
 0x6c6   :  { %5213 = vst.msk [vmem:[#allocation4 + $0x1e8] sm:$0xff] %vm5151_vm14, %v5082_v10  ;;  %v5275_v10 = vld [vmem:[#allocation3 + $0x2f2] sm:$0xff] }
 0x6c7   :  { %5454 = vrot.lane.b32.xlu1 %v5271_v31, %s10426_s25  ;;  %v5080_v56 = vpop.permute.xlu0 %5079 }
 0x6c8   :  { %5212 = vst.msk [vmem:[#allocation4 + $0x1e0] sm:$0xff] %vm5151_vm14, %v5080_v56  ;;  %v5274_v56 = vld [vmem:[#allocation3 + $0x2ea] sm:$0xff] }
 0x6c9   :  { %v5086_v0 = vpop.permute.xlu1 %5085  ;;  %5452 = vrot.lane.b32.xlu0 %v5270_v47, %s10426_s25 }
 0x6ca   :  { %5215 = vst.msk [vmem:[#allocation4 + $0x1f8] sm:$0xff] %vm5151_vm14, %v5086_v0  ;;  %v5277_v0 = vld [vmem:[#allocation3 + $0x30a] sm:$0xff] }
 0x6cb   :  { %5458 = vrot.lane.b32.xlu1 %v5273_v7, %s10426_s25  ;;  %v5084_v39 = vpop.permute.xlu0 %5083 }
 0x6cc   :  { %5214 = vst.msk [vmem:[#allocation4 + $0x1f0] sm:$0xff] %vm5151_vm14, %v5084_v39  ;;  %v5276_v39 = vld [vmem:[#allocation3 + $0x302] sm:$0xff] }
 0x6cd   :  { %v5347_v29 = vpop.permute.xlu1 %5346  ;;  %5456 = vrot.lane.b32.xlu0 %v5272_v25, %s10426_s25 }
 0x6ce   :  { %5538 = vst.msk [vmem:[#allocation4 + $0x8] sm:$0xff] %vm5536_vm15, %v5347_v29  ;;  %v5279_v29 = vld [vmem:[#allocation3 + $0x322] sm:$0xff] }
 0x6cf   :  { %5462 = vrot.lane.b32.xlu1 %v5275_v10, %s10426_s25  ;;  %v5345_v31 = vpop.permute.xlu0 %5344 }
 0x6d0   :  { %5537 = vst.msk [vmem:[#allocation4] sm:$0xff] %vm5536_vm15, %v5345_v31  ;;  %v5278_v31 = vld [vmem:[#allocation3 + $0x31a] sm:$0xff] }
 0x6d1   :  { %v5351_v47 = vpop.permute.xlu1 %5350  ;;  %5460 = vrot.lane.b32.xlu0 %v5274_v56, %s10426_s25 }
 0x6d2   :  { %5540 = vst.msk [vmem:[#allocation4 + $0x18] sm:$0xff] %vm5536_vm15, %v5351_v47 }
 0x6d3   :  { %5466 = vrot.lane.b32.xlu1 %v5277_v0, %s10426_s25  ;;  %v5349_v7 = vpop.permute.xlu0 %5348 }
 0x6d4   :  { %5539 = vst.msk [vmem:[#allocation4 + $0x10] sm:$0xff] %vm5536_vm15, %v5349_v7 }
 0x6d5   :  { %v5355_v25 = vpop.permute.xlu1 %5354  ;;  %5464 = vrot.lane.b32.xlu0 %v5276_v39, %s10426_s25 }
 0x6d6   :  { %5542 = vst.msk [vmem:[#allocation4 + $0x28] sm:$0xff] %vm5536_vm15, %v5355_v25 }
 0x6d7   :  { %5470 = vrot.lane.b32.xlu1 %v5279_v29, %s10426_s25  ;;  %v5353_v10 = vpop.permute.xlu0 %5352 }
 0x6d8   :  { %5541 = vst.msk [vmem:[#allocation4 + $0x20] sm:$0xff] %vm5536_vm15, %v5353_v10 }
 0x6d9   :  { %v5359_v56 = vpop.permute.xlu1 %5358  ;;  %5468 = vrot.lane.b32.xlu0 %v5278_v31, %s10426_s25 }
 0x6da   :  { %5544 = vst.msk [vmem:[#allocation4 + $0x38] sm:$0xff] %vm5536_vm15, %v5359_v56  ;;  %v19294_v56 = vld [vmem:[#allocation7_spill] sm:$0xff] }
 0x6db   :  { %5731 = vrot.lane.b32.xlu1 %v15142_v49, %s10428_s15  ;;  %v5357_v47 = vpop.permute.xlu0 %5356 }
 0x6dc   :  { %5543 = vst.msk [vmem:[#allocation4 + $0x30] sm:$0xff] %vm5536_vm15, %v5357_v47 }
 0x6dd   :  { %v5363_v0 = vpop.permute.xlu1 %5362  ;;  %5729 = vrot.lane.b32.xlu0 %v15217_v40, %s10428_s15 }
 0x6de   :  { %5546 = vst.msk [vmem:[#allocation4 + $0x48] sm:$0xff] %vm5536_vm15, %v5363_v0  ;;  %v19296_v0 = vld [vmem:[#allocation9_spill] sm:$0xff] }
 0x6df   :  { %5735 = vrot.lane.b32.xlu1 %v15222_v20, %s10428_s15  ;;  %v5361_v7 = vpop.permute.xlu0 %5360 }
 0x6e0   :  { %5545 = vst.msk [vmem:[#allocation4 + $0x40] sm:$0xff] %vm5536_vm15, %v5361_v7 }
 0x6e1   :  { %v5367_v39 = vpop.permute.xlu1 %5366  ;;  %5733 = vrot.lane.b32.xlu0 %v15224_v53, %s10428_s15 }
 0x6e2   :  { %5548 = vst.msk [vmem:[#allocation4 + $0x58] sm:$0xff] %vm5536_vm15, %v5367_v39 }
 0x6e3   :  { %5739 = vrot.lane.b32.xlu1 %v15230_v3, %s10428_s15  ;;  %v5365_v49 = vpop.permute.xlu0 %5364 }
 0x6e4   :  { %5547 = vst.msk [vmem:[#allocation4 + $0x50] sm:$0xff] %vm5536_vm15, %v5365_v49  ;;  %v19298_v49 = vld [vmem:[#allocation15_spill] sm:$0xff] }
 0x6e5   :  { %v5371_v40 = vpop.permute.xlu1 %5370  ;;  %5737 = vrot.lane.b32.xlu0 %v15232_v14, %s10428_s15 }
 0x6e6   :  { %5550 = vst.msk [vmem:[#allocation4 + $0x68] sm:$0xff] %vm5536_vm15, %v5371_v40  ;;  %v5664_v40 = vld [vmem:[#allocation3 + $0x338] sm:$0xff] }
 0x6e7   :  { %5743 = vrot.lane.b32.xlu1 %v15238_v34, %s10428_s15  ;;  %v5369_v20 = vpop.permute.xlu0 %5368 }
 0x6e8   :  { %5549 = vst.msk [vmem:[#allocation4 + $0x60] sm:$0xff] %vm5536_vm15, %v5369_v20 }
 0x6e9   :  { %v5375_v53 = vpop.permute.xlu1 %5374  ;;  %5741 = vrot.lane.b32.xlu0 %v15240_v24, %s10428_s15 }
 0x6ea   :  { %5552 = vst.msk [vmem:[#allocation4 + $0x78] sm:$0xff] %vm5536_vm15, %v5375_v53  ;;  %v5663_v53 = vld [vmem:[#allocation3 + $0x330] sm:$0xff] }
 0x6eb   :  { %5747 = vrot.lane.b32.xlu1 %v15247_v23, %s10428_s15  ;;  %v5373_v3 = vpop.permute.xlu0 %5372 }
 0x6ec   :  { %5551 = vst.msk [vmem:[#allocation4 + $0x70] sm:$0xff] %vm5536_vm15, %v5373_v3 }
 0x6ed   :  { %v5379_v14 = vpop.permute.xlu1 %5378  ;;  %5745 = vrot.lane.b32.xlu0 %v15249_v1, %s10428_s15 }
 0x6ee   :  { %5554 = vst.msk [vmem:[#allocation4 + $0x88] sm:$0xff] %vm5536_vm15, %v5379_v14  ;;  %v5987_v14 = vld [vmem:[#allocation3 + $0x21] sm:$0xff] }
 0x6ef   :  { %5751 = vrot.lane.b32.xlu1 %v15256_v55, %s10428_s15  ;;  %v5377_v34 = vpop.permute.xlu0 %5376 }
 0x6f0   :  { %5553 = vst.msk [vmem:[#allocation4 + $0x80] sm:$0xff] %vm5536_vm15, %v5377_v34 }
 0x6f1   :  { %v5383_v24 = vpop.permute.xlu1 %5382  ;;  %5749 = vrot.lane.b32.xlu0 %v15258_v37, %s10428_s15 }
 0x6f2   :  { %5556 = vst.msk [vmem:[#allocation4 + $0x98] sm:$0xff] %vm5536_vm15, %v5383_v24  ;;  %v5986_v24 = vld [vmem:[#allocation3 + $0x19] sm:$0xff] }
 0x6f3   :  { %5755 = vrot.lane.b32.xlu1 %v15264_v32, %s10428_s15  ;;  %v5381_v23 = vpop.permute.xlu0 %5380 }
 0x6f4   :  { %5555 = vst.msk [vmem:[#allocation4 + $0x90] sm:$0xff] %vm5536_vm15, %v5381_v23 }
 0x6f5   :  { %v5387_v1 = vpop.permute.xlu1 %5386  ;;  %5753 = vrot.lane.b32.xlu0 %v15268_v43, %s10428_s15 }
 0x6f6   :  { %5558 = vst.msk [vmem:[#allocation4 + $0xa8] sm:$0xff] %vm5536_vm15, %v5387_v1  ;;  %v15830_v1 = vld [vmem:[#allocation3 + $0x39] sm:$0xff] }
 0x6f7   :  { %5759 = vrot.lane.b32.xlu1 %v15273_v46, %s10428_s15  ;;  %v5385_v55 = vpop.permute.xlu0 %5384 }
 0x6f8   :  { %5557 = vst.msk [vmem:[#allocation4 + $0xa0] sm:$0xff] %vm5536_vm15, %v5385_v55 }
 0x6f9   :  { %v5391_v37 = vpop.permute.xlu1 %5390  ;;  %5757 = vrot.lane.b32.xlu0 %v15275_v9, %s10428_s15 }
 0x6fa   :  { %5560 = vst.msk [vmem:[#allocation4 + $0xb8] sm:$0xff] %vm5536_vm15, %v5391_v37  ;;  %v15835_v37 = vld [vmem:[#allocation3 + $0x31] sm:$0xff] }
 0x6fb   :  { %5763 = vrot.lane.b32.xlu1 %v15282_v5, %s10428_s15  ;;  %v5389_v32 = vpop.permute.xlu0 %5388 }
 0x6fc   :  { %5559 = vst.msk [vmem:[#allocation4 + $0xb0] sm:$0xff] %vm5536_vm15, %v5389_v32 }
 0x6fd   :  { %v5395_v43 = vpop.permute.xlu1 %5394  ;;  %5761 = vrot.lane.b32.xlu0 %v15284_v15, %s10428_s15 }
 0x6fe   :  { %5562 = vst.msk [vmem:[#allocation4 + $0xc8] sm:$0xff] %vm5536_vm15, %v5395_v43  ;;  %v15840_v43 = vld [vmem:[#allocation3 + $0x51] sm:$0xff] }
 0x6ff   :  { %5767 = vrot.lane.b32.xlu1 %v15290_v63, %s10428_s15  ;;  %v5393_v46 = vpop.permute.xlu0 %5392 }
 0x700   :  { %5561 = vst.msk [vmem:[#allocation4 + $0xc0] sm:$0xff] %vm5536_vm15, %v5393_v46 }
 0x701   :  { %v5399_v9 = vpop.permute.xlu1 %5398  ;;  %5765 = vrot.lane.b32.xlu0 %v15294_v17, %s10428_s15 }
 0x702   :  { %5564 = vst.msk [vmem:[#allocation4 + $0xd8] sm:$0xff] %vm5536_vm15, %v5399_v9  ;;  %v15845_v9 = vld [vmem:[#allocation3 + $0x49] sm:$0xff] }
 0x703   :  { %5771 = vrot.lane.b32.xlu1 %v15299_v42, %s10428_s15  ;;  %v5397_v5 = vpop.permute.xlu0 %5396 }
 0x704   :  { %5563 = vst.msk [vmem:[#allocation4 + $0xd0] sm:$0xff] %vm5536_vm15, %v5397_v5 }
 0x705   :  { %v5403_v15 = vpop.permute.xlu1 %5402  ;;  %5769 = vrot.lane.b32.xlu0 %v15301_v45, %s10428_s15 }
 0x706   :  { %5566 = vst.msk [vmem:[#allocation4 + $0xe8] sm:$0xff] %vm5536_vm15, %v5403_v15  ;;  %v15850_v15 = vld [vmem:[#allocation3 + $0x69] sm:$0xff] }
 0x707   :  { %5775 = vrot.lane.b32.xlu1 %v15308_v50, %s10428_s15  ;;  %v5401_v63 = vpop.permute.xlu0 %5400 }
 0x708   :  { %5565 = vst.msk [vmem:[#allocation4 + $0xe0] sm:$0xff] %vm5536_vm15, %v5401_v63 }
 0x709   :  { %v5407_v17 = vpop.permute.xlu1 %5406  ;;  %5773 = vrot.lane.b32.xlu0 %v15310_v2, %s10428_s15 }
 0x70a   :  { %5568 = vst.msk [vmem:[#allocation4 + $0xf8] sm:$0xff] %vm5536_vm15, %v5407_v17  ;;  %v15855_v17 = vld [vmem:[#allocation3 + $0x61] sm:$0xff] }
 0x70b   :  { %5779 = vrot.lane.b32.xlu1 %v15316_v12, %s10428_s15  ;;  %v5405_v42 = vpop.permute.xlu0 %5404 }
 0x70c   :  { %5567 = vst.msk [vmem:[#allocation4 + $0xf0] sm:$0xff] %vm5536_vm15, %v5405_v42 }
 0x70d   :  { %v5411_v45 = vpop.permute.xlu1 %5410  ;;  %5777 = vrot.lane.b32.xlu0 %v15320_v28, %s10428_s15 }
 0x70e   :  { %5570 = vst.msk [vmem:[#allocation4 + $0x108] sm:$0xff] %vm5536_vm15, %v5411_v45  ;;  %v15860_v45 = vld [vmem:[#allocation3 + $0x81] sm:$0xff] }
 0x70f   :  { %5783 = vrot.lane.b32.xlu1 %v15325_v62, %s10428_s15  ;;  %v5409_v50 = vpop.permute.xlu0 %5408  ;;  %v5632_v62 = vld [vmem:[#allocation3 + $0x188] sm:$0xff] }
 0x710   :  { %5569 = vst.msk [vmem:[#allocation4 + $0x100] sm:$0xff] %vm5536_vm15, %v5409_v50 }
 0x711   :  { %v5415_v2 = vpop.permute.xlu1 %5414  ;;  %5781 = vrot.lane.b32.xlu0 %v15327_v30, %s10428_s15  ;;  %v5631_v30 = vld [vmem:[#allocation3 + $0x180] sm:$0xff] }
 0x712   :  { %5572 = vst.msk [vmem:[#allocation4 + $0x118] sm:$0xff] %vm5536_vm15, %v5415_v2  ;;  %v15865_v2 = vld [vmem:[#allocation3 + $0x79] sm:$0xff] }
 0x713   :  { %5787 = vrot.lane.b32.xlu1 %v15334_v36, %s10428_s15  ;;  %v5413_v12 = vpop.permute.xlu0 %5412 }
 0x714   :  { %5571 = vst.msk [vmem:[#allocation4 + $0x110] sm:$0xff] %vm5536_vm15, %v5413_v12 }
 0x715   :  { %v5419_v28 = vpop.permute.xlu1 %5418  ;;  %5785 = vrot.lane.b32.xlu0 %v15336_v57, %s10428_s15 }
 0x716   :  { %5574 = vst.msk [vmem:[#allocation4 + $0x128] sm:$0xff] %vm5536_vm15, %v5419_v28  ;;  %v15870_v28 = vld [vmem:[#allocation3 + $0x99] sm:$0xff] }
 0x717   :  { %5791 = vrot.lane.b32.xlu1 %v5632_v62, %s10428_s15  ;;  %v5417_v25 = vpop.permute.xlu0 %5416 }
 0x718   :  { %5573 = vst.msk [vmem:[#allocation4 + $0x120] sm:$0xff] %vm5536_vm15, %v5417_v25  ;;  %v15875_v25 = vld [vmem:[#allocation3 + $0x91] sm:$0xff] }
 0x719   :  { %v5423_v29 = vpop.permute.xlu1 %5422  ;;  %5789 = vrot.lane.b32.xlu0 %v5631_v30, %s10428_s15 }
 0x71a   :  { %5576 = vst.msk [vmem:[#allocation4 + $0x138] sm:$0xff] %vm5536_vm15, %v5423_v29  ;;  %v15880_v29 = vld [vmem:[#allocation3 + $0xb1] sm:$0xff] }
 0x71b   :  { %5795 = vrot.lane.b32.xlu1 %v15342_v41, %s10428_s15  ;;  %v5421_v36 = vpop.permute.xlu0 %5420 }
 0x71c   :  { %5575 = vst.msk [vmem:[#allocation4 + $0x130] sm:$0xff] %vm5536_vm15, %v5421_v36 }
 0x71d   :  { %v5427_v57 = vpop.permute.xlu1 %5426  ;;  %5793 = vrot.lane.b32.xlu0 %v15344_v59, %s10428_s15 }
 0x71e   :  { %5578 = vst.msk [vmem:[#allocation4 + $0x148] sm:$0xff] %vm5536_vm15, %v5427_v57  ;;  %v15885_v57 = vld [vmem:[#allocation3 + $0xa9] sm:$0xff] }
 0x71f   :  { %5799 = vrot.lane.b32.xlu1 %v15351_v38, %s10428_s15  ;;  %v5425_v10 = vpop.permute.xlu0 %5424 }
 0x720   :  { %5577 = vst.msk [vmem:[#allocation4 + $0x140] sm:$0xff] %vm5536_vm15, %v5425_v10 }
 0x721   :  { %v5431_v31 = vpop.permute.xlu1 %5430  ;;  %5797 = vrot.lane.b32.xlu0 %v15356_v18, %s10428_s15 }
 0x722   :  { %5580 = vst.msk [vmem:[#allocation4 + $0x158] sm:$0xff] %vm5536_vm15, %v5431_v31  ;;  %v15890_v31 = vld [vmem:[#allocation3 + $0xc9] sm:$0xff] }
 0x723   :  { %5803 = vrot.lane.b32.xlu1 %v15360_v33, %s10428_s15  ;;  %v5429_v41 = vpop.permute.xlu0 %5428 }
 0x724   :  { %5579 = vst.msk [vmem:[#allocation4 + $0x150] sm:$0xff] %vm5536_vm15, %v5429_v41 }
 0x725   :  { %v5435_v59 = vpop.permute.xlu1 %5434  ;;  %5801 = vrot.lane.b32.xlu0 %v15362_v8, %s10428_s15 }
 0x726   :  { %5582 = vst.msk [vmem:[#allocation4 + $0x168] sm:$0xff] %vm5536_vm15, %v5435_v59  ;;  %v15895_v59 = vld [vmem:[#allocation3 + $0xc1] sm:$0xff] }
 0x727   :  { %5807 = vrot.lane.b32.xlu1 %v15364_v54, %s10428_s15  ;;  %v5433_v38 = vpop.permute.xlu0 %5432 }
 0x728   :  { %5581 = vst.msk [vmem:[#allocation4 + $0x160] sm:$0xff] %vm5536_vm15, %v5433_v38 }
 0x729   :  { %v5439_v18 = vpop.permute.xlu1 %5438  ;;  %5805 = vrot.lane.b32.xlu0 %v15372_v4, %s10428_s15 }
 0x72a   :  { %5584 = vst.msk [vmem:[#allocation4 + $0x178] sm:$0xff] %vm5536_vm15, %v5439_v18  ;;  %v15900_v18 = vld [vmem:[#allocation3 + $0xe1] sm:$0xff] }
 0x72b   :  { %5811 = vrot.lane.b32.xlu1 %v15377_v58, %s10428_s15  ;;  %v5437_v33 = vpop.permute.xlu0 %5436 }
 0x72c   :  { %5583 = vst.msk [vmem:[#allocation4 + $0x170] sm:$0xff] %vm5536_vm15, %v5437_v33 }
 0x72d   :  { %v5443_v8 = vpop.permute.xlu1 %5442  ;;  %5809 = vrot.lane.b32.xlu0 %v15384_v13, %s10428_s15 }
 0x72e   :  { %5586 = vst.msk [vmem:[#allocation4 + $0x188] sm:$0xff] %vm5536_vm15, %v5443_v8  ;;  %v15905_v8 = vld [vmem:[#allocation3 + $0xd9] sm:$0xff] }
 0x72f   :  { %5815 = vrot.lane.b32.xlu1 %v15388_v11, %s10428_s15  ;;  %v5441_v54 = vpop.permute.xlu0 %5440 }
 0x730   :  { %5585 = vst.msk [vmem:[#allocation4 + $0x180] sm:$0xff] %vm5536_vm15, %v5441_v54 }
 0x731   :  { %v5447_v4 = vpop.permute.xlu1 %5446  ;;  %5813 = vrot.lane.b32.xlu0 %v15390_v61, %s10428_s15 }
 0x732   :  { %5588 = vst.msk [vmem:[#allocation4 + $0x198] sm:$0xff] %vm5536_vm15, %v5447_v4  ;;  %v6005_v4 = vld [vmem:[#allocation3 + $0xf9] sm:$0xff] }
 0x733   :  { %5819 = vrot.lane.b32.xlu1 %v15396_v22, %s10428_s15  ;;  %v5445_v58 = vpop.permute.xlu0 %5444 }
 0x734   :  { %5587 = vst.msk [vmem:[#allocation4 + $0x190] sm:$0xff] %vm5536_vm15, %v5445_v58 }
 0x735   :  { %v5451_v13 = vpop.permute.xlu1 %5450  ;;  %5817 = vrot.lane.b32.xlu0 %v15398_v27, %s10428_s15 }
 0x736   :  { %5590 = vst.msk [vmem:[#allocation4 + $0x1a8] sm:$0xff] %vm5536_vm15, %v5451_v13  ;;  %v15912_v13 = vld [vmem:[#allocation3 + $0xf1] sm:$0xff] }
 0x737   :  { %5823 = vrot.lane.b32.xlu1 %v15405_v21, %s10428_s15  ;;  %v5449_v11 = vpop.permute.xlu0 %5448 }
 0x738   :  { %5589 = vst.msk [vmem:[#allocation4 + $0x1a0] sm:$0xff] %vm5536_vm15, %v5449_v11 }
 0x739   :  { %v5455_v61 = vpop.permute.xlu1 %5454  ;;  %5821 = vrot.lane.b32.xlu0 %v15410_v16, %s10428_s15 }
 0x73a   :  { %5592 = vst.msk [vmem:[#allocation4 + $0x1b8] sm:$0xff] %vm5536_vm15, %v5455_v61  ;;  %v6007_v61 = vld [vmem:[#allocation3 + $0x111] sm:$0xff] }
 0x73b   :  { %5827 = vrot.lane.b32.xlu1 %v15414_v44, %s10428_s15  ;;  %v5453_v22 = vpop.permute.xlu0 %5452 }
 0x73c   :  { %5591 = vst.msk [vmem:[#allocation4 + $0x1b0] sm:$0xff] %vm5536_vm15, %v5453_v22 }
 0x73d   :  { %v5459_v27 = vpop.permute.xlu1 %5458  ;;  %5825 = vrot.lane.b32.xlu0 %v15416_v6, %s10428_s15 }
 0x73e   :  { %5594 = vst.msk [vmem:[#allocation4 + $0x1c8] sm:$0xff] %vm5536_vm15, %v5459_v27  ;;  %v6006_v27 = vld [vmem:[#allocation3 + $0x109] sm:$0xff] }
 0x73f   :  { %5831 = vrot.lane.b32.xlu1 %v15422_v19, %s10428_s15  ;;  %v5457_v21 = vpop.permute.xlu0 %5456 }
 0x740   :  { %5593 = vst.msk [vmem:[#allocation4 + $0x1c0] sm:$0xff] %vm5536_vm15, %v5457_v21 }
 0x741   :  { %v5463_v16 = vpop.permute.xlu1 %5462  ;;  %5829 = vrot.lane.b32.xlu0 %v15424_v48, %s10428_s15 }
 0x742   :  { %5596 = vst.msk [vmem:[#allocation4 + $0x1d8] sm:$0xff] %vm5536_vm15, %v5463_v16  ;;  %v6009_v16 = vld [vmem:[#allocation3 + $0x129] sm:$0xff] }
 0x743   :  { %5835 = vrot.lane.b32.xlu1 %v15431_v26, %s10428_s15  ;;  %v5461_v44 = vpop.permute.xlu0 %5460 }
 0x744   :  { %5595 = vst.msk [vmem:[#allocation4 + $0x1d0] sm:$0xff] %vm5536_vm15, %v5461_v44 }
 0x745   :  { %v5467_v6 = vpop.permute.xlu1 %5466  ;;  %5833 = vrot.lane.b32.xlu0 %v15436_v52, %s10428_s15 }
 0x746   :  { %5598 = vst.msk [vmem:[#allocation4 + $0x1e8] sm:$0xff] %vm5536_vm15, %v5467_v6  ;;  %v6008_v6 = vld [vmem:[#allocation3 + $0x121] sm:$0xff] }
 0x747   :  { %5839 = vrot.lane.b32.xlu1 %v15440_v51, %s10428_s15  ;;  %v5465_v19 = vpop.permute.xlu0 %5464  ;;  %v19295_v51 = vld [vmem:[#allocation10_spill] sm:$0xff] }
 0x748   :  { %5597 = vst.msk [vmem:[#allocation4 + $0x1e0] sm:$0xff] %vm5536_vm15, %v5465_v19 }
 0x749   :  { %v5471_v48 = vpop.permute.xlu1 %5470  ;;  %5837 = vrot.lane.b32.xlu0 %v15442_v60, %s10428_s15 }
 0x74a   :  { %5600 = vst.msk [vmem:[#allocation4 + $0x1f8] sm:$0xff] %vm5536_vm15, %v5471_v48  ;;  %v6011_v48 = vld [vmem:[#allocation3 + $0x141] sm:$0xff] }
 0x74b   :  { %5843 = vrot.lane.b32.xlu1 %v15448_v35, %s10428_s15  ;;  %v5469_v26 = vpop.permute.xlu0 %5468  ;;  %v19297_v35 = vld [vmem:[#allocation12_spill] sm:$0xff] }
 0x74c   :  { %5599 = vst.msk [vmem:[#allocation4 + $0x1f0] sm:$0xff] %vm5536_vm15, %v5469_v26 }
 0x74d   :  { %v5732_v52 = vpop.permute.xlu1 %5731  ;;  %5841 = vrot.lane.b32.xlu0 %v19294_v56, %s10428_s15 }
 0x74e   :  { %5923 = vst.msk [vmem:[#allocation4 + $0x8] sm:$0xff] %vm5921_vm1, %v5732_v52  ;;  %v6010_v52 = vld [vmem:[#allocation3 + $0x139] sm:$0xff] }
 0x74f   :  { %5847 = vrot.lane.b32.xlu1 %v19295_v51, %s10428_s15  ;;  %v5730_v47 = vpop.permute.xlu0 %5729  ;;  %v6013_v51 = vld [vmem:[#allocation3 + $0x159] sm:$0xff] }
 0x750   :  { %5922 = vst.msk [vmem:[#allocation4] sm:$0xff] %vm5921_vm1, %v5730_v47 }
 0x751   :  { %v5736_v60 = vpop.permute.xlu1 %5735  ;;  %5845 = vrot.lane.b32.xlu0 %v19296_v0, %s10428_s15 }
 0x752   :  { %5925 = vst.msk [vmem:[#allocation4 + $0x18] sm:$0xff] %vm5921_vm1, %v5736_v60  ;;  %v6012_v60 = vld [vmem:[#allocation3 + $0x151] sm:$0xff] }
 0x753   :  { %5851 = vrot.lane.b32.xlu1 %v19297_v35, %s10428_s15  ;;  %v5734_v7 = vpop.permute.xlu0 %5733  ;;  %v6015_v35 = vld [vmem:[#allocation3 + $0x171] sm:$0xff] }
 0x754   :  { %5924 = vst.msk [vmem:[#allocation4 + $0x10] sm:$0xff] %vm5921_vm1, %v5734_v7 }
 0x755   :  { %v5740_v39 = vpop.permute.xlu1 %5739  ;;  %5849 = vrot.lane.b32.xlu0 %v19298_v49, %s10428_s15 }
 0x756   :  { %5927 = vst.msk [vmem:[#allocation4 + $0x28] sm:$0xff] %vm5921_vm1, %v5740_v39  ;;  %v6014_v39 = vld [vmem:[#allocation3 + $0x169] sm:$0xff] }
 0x757   :  { %5855 = vrot.lane.b32.xlu1 %v5664_v40, %s10428_s15  ;;  %v5738_v20 = vpop.permute.xlu0 %5737  ;;  %v6017_v40 = vld [vmem:[#allocation3 + $0x189] sm:$0xff] }
 0x758   :  { %5926 = vst.msk [vmem:[#allocation4 + $0x20] sm:$0xff] %vm5921_vm1, %v5738_v20 }
 0x759   :  { %v5744_v3 = vpop.permute.xlu1 %5743  ;;  %5853 = vrot.lane.b32.xlu0 %v5663_v53, %s10428_s15  ;;  %v6016_v53 = vld [vmem:[#allocation3 + $0x181] sm:$0xff] }
 0x75a   :  { %5929 = vst.msk [vmem:[#allocation4 + $0x38] sm:$0xff] %vm5921_vm1, %v5744_v3 }
 0x75b   :  { %6116 = vrot.lane.b32.xlu1 %v5987_v14, %s10430_s8  ;;  %v5742_v34 = vpop.permute.xlu0 %5741  ;;  %v6019_v14 = vld [vmem:[#allocation3 + $0x1d1] sm:$0xff] }
 0x75c   :  { %5928 = vst.msk [vmem:[#allocation4 + $0x30] sm:$0xff] %vm5921_vm1, %v5742_v34 }
 0x75d   :  { %v5748_v23 = vpop.permute.xlu1 %5747  ;;  %6114 = vrot.lane.b32.xlu0 %v5986_v24, %s10430_s8  ;;  %v6018_v24 = vld [vmem:[#allocation3 + $0x1c9] sm:$0xff] }
 0x75e   :  { %5931 = vst.msk [vmem:[#allocation4 + $0x48] sm:$0xff] %vm5921_vm1, %v5748_v23 }
 0x75f   :  { %6120 = vrot.lane.b32.xlu1 %v15830_v1, %s10430_s8  ;;  %v5746_v55 = vpop.permute.xlu0 %5745 }
 0x760   :  { %5930 = vst.msk [vmem:[#allocation4 + $0x40] sm:$0xff] %vm5921_vm1, %v5746_v55  ;;  %v6021_v55 = vld [vmem:[#allocation3 + $0x1e9] sm:$0xff] }
 0x761   :  { %v5752_v32 = vpop.permute.xlu1 %5751  ;;  %6118 = vrot.lane.b32.xlu0 %v15835_v37, %s10430_s8 }
 0x762   :  { %5933 = vst.msk [vmem:[#allocation4 + $0x58] sm:$0xff] %vm5921_vm1, %v5752_v32 }
 0x763   :  { %6124 = vrot.lane.b32.xlu1 %v15840_v43, %s10430_s8  ;;  %v5750_v46 = vpop.permute.xlu0 %5749 }
 0x764   :  { %5932 = vst.msk [vmem:[#allocation4 + $0x50] sm:$0xff] %vm5921_vm1, %v5750_v46  ;;  %v6020_v46 = vld [vmem:[#allocation3 + $0x1e1] sm:$0xff] }
 0x765   :  { %v5756_v5 = vpop.permute.xlu1 %5755  ;;  %6122 = vrot.lane.b32.xlu0 %v15845_v9, %s10430_s8 }
 0x766   :  { %5935 = vst.msk [vmem:[#allocation4 + $0x68] sm:$0xff] %vm5921_vm1, %v5756_v5 }
 0x767   :  { %6128 = vrot.lane.b32.xlu1 %v15850_v15, %s10430_s8  ;;  %v5754_v63 = vpop.permute.xlu0 %5753 }
 0x768   :  { %5934 = vst.msk [vmem:[#allocation4 + $0x60] sm:$0xff] %vm5921_vm1, %v5754_v63  ;;  %v6023_v63 = vld [vmem:[#allocation3 + $0x201] sm:$0xff] }
 0x769   :  { %v5760_v42 = vpop.permute.xlu1 %5759  ;;  %6126 = vrot.lane.b32.xlu0 %v15855_v17, %s10430_s8 }
 0x76a   :  { %5937 = vst.msk [vmem:[#allocation4 + $0x78] sm:$0xff] %vm5921_vm1, %v5760_v42 }
 0x76b   :  { %6132 = vrot.lane.b32.xlu1 %v15860_v45, %s10430_s8  ;;  %v5758_v50 = vpop.permute.xlu0 %5757 }
 0x76c   :  { %5936 = vst.msk [vmem:[#allocation4 + $0x70] sm:$0xff] %vm5921_vm1, %v5758_v50  ;;  %v6022_v50 = vld [vmem:[#allocation3 + $0x1f9] sm:$0xff] }
 0x76d   :  { %v5764_v12 = vpop.permute.xlu1 %5763  ;;  %6130 = vrot.lane.b32.xlu0 %v15865_v2, %s10430_s8 }
 0x76e   :  { %5939 = vst.msk [vmem:[#allocation4 + $0x88] sm:$0xff] %vm5921_vm1, %v5764_v12 }
 0x76f   :  { %6136 = vrot.lane.b32.xlu1 %v15870_v28, %s10430_s8  ;;  %v5762_v62 = vpop.permute.xlu0 %5761 }
 0x770   :  { %5938 = vst.msk [vmem:[#allocation4 + $0x80] sm:$0xff] %vm5921_vm1, %v5762_v62  ;;  %v6025_v62 = vld [vmem:[#allocation3 + $0x219] sm:$0xff] }
 0x771   :  { %v5768_v30 = vpop.permute.xlu1 %5767  ;;  %6134 = vrot.lane.b32.xlu0 %v15875_v25, %s10430_s8 }
 0x772   :  { %5941 = vst.msk [vmem:[#allocation4 + $0x98] sm:$0xff] %vm5921_vm1, %v5768_v30 }
 0x773   :  { %6140 = vrot.lane.b32.xlu1 %v15880_v29, %s10430_s8  ;;  %v5766_v36 = vpop.permute.xlu0 %5765 }
 0x774   :  { %5940 = vst.msk [vmem:[#allocation4 + $0x90] sm:$0xff] %vm5921_vm1, %v5766_v36  ;;  %v6024_v36 = vld [vmem:[#allocation3 + $0x211] sm:$0xff] }
 0x775   :  { %v5772_v10 = vpop.permute.xlu1 %5771  ;;  %6138 = vrot.lane.b32.xlu0 %v15885_v57, %s10430_s8 }
 0x776   :  { %5943 = vst.msk [vmem:[#allocation4 + $0xa8] sm:$0xff] %vm5921_vm1, %v5772_v10 }
 0x777   :  { %6144 = vrot.lane.b32.xlu1 %v15890_v31, %s10430_s8  ;;  %v5770_v41 = vpop.permute.xlu0 %5769 }
 0x778   :  { %5942 = vst.msk [vmem:[#allocation4 + $0xa0] sm:$0xff] %vm5921_vm1, %v5770_v41  ;;  %v6027_v41 = vld [vmem:[#allocation3 + $0x231] sm:$0xff] }
 0x779   :  { %v5776_v38 = vpop.permute.xlu1 %5775  ;;  %6142 = vrot.lane.b32.xlu0 %v15895_v59, %s10430_s8 }
 0x77a   :  { %5945 = vst.msk [vmem:[#allocation4 + $0xb8] sm:$0xff] %vm5921_vm1, %v5776_v38 }
 0x77b   :  { %6148 = vrot.lane.b32.xlu1 %v15900_v18, %s10430_s8  ;;  %v5774_v33 = vpop.permute.xlu0 %5773 }
 0x77c   :  { %5944 = vst.msk [vmem:[#allocation4 + $0xb0] sm:$0xff] %vm5921_vm1, %v5774_v33  ;;  %v6026_v33 = vld [vmem:[#allocation3 + $0x229] sm:$0xff] }
 0x77d   :  { %v5780_v54 = vpop.permute.xlu1 %5779  ;;  %6146 = vrot.lane.b32.xlu0 %v15905_v8, %s10430_s8 }
 0x77e   :  { %5947 = vst.msk [vmem:[#allocation4 + $0xc8] sm:$0xff] %vm5921_vm1, %v5780_v54 }
 0x77f   :  { %6152 = vrot.lane.b32.xlu1 %v6005_v4, %s10430_s8  ;;  %v5778_v58 = vpop.permute.xlu0 %5777  ;;  %v6029_v4 = vld [vmem:[#allocation3 + $0x249] sm:$0xff] }
 0x780   :  { %5946 = vst.msk [vmem:[#allocation4 + $0xc0] sm:$0xff] %vm5921_vm1, %v5778_v58 }
 0x781   :  { %v5784_v11 = vpop.permute.xlu1 %5783  ;;  %6150 = vrot.lane.b32.xlu0 %v15912_v13, %s10430_s8 }
 0x782   :  { %5949 = vst.msk [vmem:[#allocation4 + $0xd8] sm:$0xff] %vm5921_vm1, %v5784_v11  ;;  %v6028_v11 = vld [vmem:[#allocation3 + $0x241] sm:$0xff] }
 0x783   :  { %6156 = vrot.lane.b32.xlu1 %v6007_v61, %s10430_s8  ;;  %v5782_v22 = vpop.permute.xlu0 %5781 }
 0x784   :  { %5948 = vst.msk [vmem:[#allocation4 + $0xd0] sm:$0xff] %vm5921_vm1, %v5782_v22  ;;  %v6031_v22 = vld [vmem:[#allocation3 + $0x261] sm:$0xff] }
 0x785   :  { %v5788_v21 = vpop.permute.xlu1 %5787  ;;  %6154 = vrot.lane.b32.xlu0 %v6006_v27, %s10430_s8 }
 0x786   :  { %5951 = vst.msk [vmem:[#allocation4 + $0xe8] sm:$0xff] %vm5921_vm1, %v5788_v21  ;;  %v6030_v21 = vld [vmem:[#allocation3 + $0x259] sm:$0xff] }
 0x787   :  { %6160 = vrot.lane.b32.xlu1 %v6009_v16, %s10430_s8  ;;  %v5786_v44 = vpop.permute.xlu0 %5785 }
 0x788   :  { %5950 = vst.msk [vmem:[#allocation4 + $0xe0] sm:$0xff] %vm5921_vm1, %v5786_v44  ;;  %v6033_v44 = vld [vmem:[#allocation3 + $0x279] sm:$0xff] }
 0x789   :  { %v5792_v19 = vpop.permute.xlu1 %5791  ;;  %6158 = vrot.lane.b32.xlu0 %v6008_v6, %s10430_s8 }
 0x78a   :  { %5953 = vst.msk [vmem:[#allocation4 + $0xf8] sm:$0xff] %vm5921_vm1, %v5792_v19  ;;  %v6032_v19 = vld [vmem:[#allocation3 + $0x271] sm:$0xff] }
 0x78b   :  { %6164 = vrot.lane.b32.xlu1 %v6011_v48, %s10430_s8  ;;  %v5790_v26 = vpop.permute.xlu0 %5789 }
 0x78c   :  { %5952 = vst.msk [vmem:[#allocation4 + $0xf0] sm:$0xff] %vm5921_vm1, %v5790_v26  ;;  %v6035_v26 = vld [vmem:[#allocation3 + $0x291] sm:$0xff] }
 0x78d   :  { %v5796_v56 = vpop.permute.xlu1 %5795  ;;  %6162 = vrot.lane.b32.xlu0 %v6010_v52, %s10430_s8 }
 0x78e   :  { %5955 = vst.msk [vmem:[#allocation4 + $0x108] sm:$0xff] %vm5921_vm1, %v5796_v56  ;;  %v6034_v56 = vld [vmem:[#allocation3 + $0x289] sm:$0xff] }
 0x78f   :  { %6168 = vrot.lane.b32.xlu1 %v6013_v51, %s10430_s8  ;;  %v5794_v47 = vpop.permute.xlu0 %5793 }
 0x790   :  { %5954 = vst.msk [vmem:[#allocation4 + $0x100] sm:$0xff] %vm5921_vm1, %v5794_v47  ;;  %v6037_v47 = vld [vmem:[#allocation3 + $0x2a9] sm:$0xff] }
 0x791   :  { %v5800_v0 = vpop.permute.xlu1 %5799  ;;  %6166 = vrot.lane.b32.xlu0 %v6012_v60, %s10430_s8 }
 0x792   :  { %5957 = vst.msk [vmem:[#allocation4 + $0x118] sm:$0xff] %vm5921_vm1, %v5800_v0  ;;  %v6036_v0 = vld [vmem:[#allocation3 + $0x2a1] sm:$0xff] }
 0x793   :  { %6172 = vrot.lane.b32.xlu1 %v6015_v35, %s10430_s8  ;;  %v5798_v7 = vpop.permute.xlu0 %5797 }
 0x794   :  { %5956 = vst.msk [vmem:[#allocation4 + $0x110] sm:$0xff] %vm5921_vm1, %v5798_v7  ;;  %v6039_v7 = vld [vmem:[#allocation3 + $0x2c1] sm:$0xff] }
 0x795   :  { %v5804_v49 = vpop.permute.xlu1 %5803  ;;  %6170 = vrot.lane.b32.xlu0 %v6014_v39, %s10430_s8 }
 0x796   :  { %5959 = vst.msk [vmem:[#allocation4 + $0x128] sm:$0xff] %vm5921_vm1, %v5804_v49  ;;  %v6038_v49 = vld [vmem:[#allocation3 + $0x2b9] sm:$0xff] }
 0x797   :  { %6176 = vrot.lane.b32.xlu1 %v6017_v40, %s10430_s8  ;;  %v5802_v20 = vpop.permute.xlu0 %5801 }
 0x798   :  { %5958 = vst.msk [vmem:[#allocation4 + $0x120] sm:$0xff] %vm5921_vm1, %v5802_v20  ;;  %v6041_v20 = vld [vmem:[#allocation3 + $0x2d9] sm:$0xff] }
 0x799   :  { %v5808_v3 = vpop.permute.xlu1 %5807  ;;  %6174 = vrot.lane.b32.xlu0 %v6016_v53, %s10430_s8 }
 0x79a   :  { %5961 = vst.msk [vmem:[#allocation4 + $0x138] sm:$0xff] %vm5921_vm1, %v5808_v3  ;;  %v6040_v3 = vld [vmem:[#allocation3 + $0x2d1] sm:$0xff] }
 0x79b   :  { %6180 = vrot.lane.b32.xlu1 %v6019_v14, %s10430_s8  ;;  %v5806_v34 = vpop.permute.xlu0 %5805 }
 0x79c   :  { %5960 = vst.msk [vmem:[#allocation4 + $0x130] sm:$0xff] %vm5921_vm1, %v5806_v34  ;;  %v6043_v34 = vld [vmem:[#allocation3 + $0x2f1] sm:$0xff] }
 0x79d   :  { %v5812_v23 = vpop.permute.xlu1 %5811  ;;  %6178 = vrot.lane.b32.xlu0 %v6018_v24, %s10430_s8 }
 0x79e   :  { %5963 = vst.msk [vmem:[#allocation4 + $0x148] sm:$0xff] %vm5921_vm1, %v5812_v23  ;;  %v6042_v23 = vld [vmem:[#allocation3 + $0x2e9] sm:$0xff] }
 0x79f   :  { %6184 = vrot.lane.b32.xlu1 %v6021_v55, %s10430_s8  ;;  %v5810_v32 = vpop.permute.xlu0 %5809 }
 0x7a0   :  { %5962 = vst.msk [vmem:[#allocation4 + $0x140] sm:$0xff] %vm5921_vm1, %v5810_v32  ;;  %v6045_v32 = vld [vmem:[#allocation3 + $0x309] sm:$0xff] }
 0x7a1   :  { %v5816_v5 = vpop.permute.xlu1 %5815  ;;  %6182 = vrot.lane.b32.xlu0 %v6020_v46, %s10430_s8 }
 0x7a2   :  { %5965 = vst.msk [vmem:[#allocation4 + $0x158] sm:$0xff] %vm5921_vm1, %v5816_v5  ;;  %v6044_v5 = vld [vmem:[#allocation3 + $0x301] sm:$0xff] }
 0x7a3   :  { %6188 = vrot.lane.b32.xlu1 %v6023_v63, %s10430_s8  ;;  %v5814_v42 = vpop.permute.xlu0 %5813 }
 0x7a4   :  { %5964 = vst.msk [vmem:[#allocation4 + $0x150] sm:$0xff] %vm5921_vm1, %v5814_v42  ;;  %v6047_v42 = vld [vmem:[#allocation3 + $0x321] sm:$0xff] }
 0x7a5   :  { %v5820_v12 = vpop.permute.xlu1 %5819  ;;  %6186 = vrot.lane.b32.xlu0 %v6022_v50, %s10430_s8 }
 0x7a6   :  { %5967 = vst.msk [vmem:[#allocation4 + $0x168] sm:$0xff] %vm5921_vm1, %v5820_v12  ;;  %v6046_v12 = vld [vmem:[#allocation3 + $0x319] sm:$0xff] }
 0x7a7   :  { %6192 = vrot.lane.b32.xlu1 %v6025_v62, %s10430_s8  ;;  %v5818_v30 = vpop.permute.xlu0 %5817 }
 0x7a8   :  { %5966 = vst.msk [vmem:[#allocation4 + $0x160] sm:$0xff] %vm5921_vm1, %v5818_v30  ;;  %v6049_v30 = vld [vmem:[#allocation3 + $0x339] sm:$0xff] }
 0x7a9   :  { %v5824_v10 = vpop.permute.xlu1 %5823  ;;  %6190 = vrot.lane.b32.xlu0 %v6024_v36, %s10430_s8 }
 0x7aa   :  { %5969 = vst.msk [vmem:[#allocation4 + $0x178] sm:$0xff] %vm5921_vm1, %v5824_v10  ;;  %v6048_v10 = vld [vmem:[#allocation3 + $0x331] sm:$0xff] }
 0x7ab   :  { %6196 = vrot.lane.b32.xlu1 %v6027_v41, %s10430_s8  ;;  %v5822_v38 = vpop.permute.xlu0 %5821 }
 0x7ac   :  { %5968 = vst.msk [vmem:[#allocation4 + $0x170] sm:$0xff] %vm5921_vm1, %v5822_v38  ;;  %v6372_v38 = vld [vmem:[#allocation3 + $0x22] sm:$0xff] }
 0x7ad   :  { %v5828_v54 = vpop.permute.xlu1 %5827  ;;  %6194 = vrot.lane.b32.xlu0 %v6026_v33, %s10430_s8 }
 0x7ae   :  { %5971 = vst.msk [vmem:[#allocation4 + $0x188] sm:$0xff] %vm5921_vm1, %v5828_v54  ;;  %v6371_v54 = vld [vmem:[#allocation3 + $0x1a] sm:$0xff] }
 0x7af   :  { %6200 = vrot.lane.b32.xlu1 %v6029_v4, %s10430_s8  ;;  %v5826_v58 = vpop.permute.xlu0 %5825 }
 0x7b0   :  { %5970 = vst.msk [vmem:[#allocation4 + $0x180] sm:$0xff] %vm5921_vm1, %v5826_v58  ;;  %v16009_v58 = vld [vmem:[#allocation3 + $0x3a] sm:$0xff] }
 0x7b1   :  { %v5832_v61 = vpop.permute.xlu1 %5831  ;;  %6198 = vrot.lane.b32.xlu0 %v6028_v11, %s10430_s8 }
 0x7b2   :  { %5973 = vst.msk [vmem:[#allocation4 + $0x198] sm:$0xff] %vm5921_vm1, %v5832_v61  ;;  %v16014_v61 = vld [vmem:[#allocation3 + $0x32] sm:$0xff] }
 0x7b3   :  { %6204 = vrot.lane.b32.xlu1 %v6031_v22, %s10430_s8  ;;  %v5830_v27 = vpop.permute.xlu0 %5829 }
 0x7b4   :  { %5972 = vst.msk [vmem:[#allocation4 + $0x190] sm:$0xff] %vm5921_vm1, %v5830_v27  ;;  %v16019_v27 = vld [vmem:[#allocation3 + $0x52] sm:$0xff] }
 0x7b5   :  { %v5836_v16 = vpop.permute.xlu1 %5835  ;;  %6202 = vrot.lane.b32.xlu0 %v6030_v21, %s10430_s8 }
 0x7b6   :  { %5975 = vst.msk [vmem:[#allocation4 + $0x1a8] sm:$0xff] %vm5921_vm1, %v5836_v16  ;;  %v16024_v16 = vld [vmem:[#allocation3 + $0x4a] sm:$0xff] }
 0x7b7   :  { %6208 = vrot.lane.b32.xlu1 %v6033_v44, %s10430_s8  ;;  %v5834_v6 = vpop.permute.xlu0 %5833 }
 0x7b8   :  { %5974 = vst.msk [vmem:[#allocation4 + $0x1a0] sm:$0xff] %vm5921_vm1, %v5834_v6  ;;  %v16029_v6 = vld [vmem:[#allocation3 + $0x6a] sm:$0xff] }
 0x7b9   :  { %v5840_v48 = vpop.permute.xlu1 %5839  ;;  %6206 = vrot.lane.b32.xlu0 %v6032_v19, %s10430_s8 }
 0x7ba   :  { %5977 = vst.msk [vmem:[#allocation4 + $0x1b8] sm:$0xff] %vm5921_vm1, %v5840_v48  ;;  %v16034_v48 = vld [vmem:[#allocation3 + $0x62] sm:$0xff] }
 0x7bb   :  { %6212 = vrot.lane.b32.xlu1 %v6035_v26, %s10430_s8  ;;  %v5838_v52 = vpop.permute.xlu0 %5837 }
 0x7bc   :  { %5976 = vst.msk [vmem:[#allocation4 + $0x1b0] sm:$0xff] %vm5921_vm1, %v5838_v52  ;;  %v16039_v52 = vld [vmem:[#allocation3 + $0x82] sm:$0xff] }
 0x7bd   :  { %v5844_v51 = vpop.permute.xlu1 %5843  ;;  %6210 = vrot.lane.b32.xlu0 %v6034_v56, %s10430_s8 }
 0x7be   :  { %5979 = vst.msk [vmem:[#allocation4 + $0x1c8] sm:$0xff] %vm5921_vm1, %v5844_v51  ;;  %v16044_v51 = vld [vmem:[#allocation3 + $0x7a] sm:$0xff] }
 0x7bf   :  { %6216 = vrot.lane.b32.xlu1 %v6037_v47, %s10430_s8  ;;  %v5842_v60 = vpop.permute.xlu0 %5841 }
 0x7c0   :  { %5978 = vst.msk [vmem:[#allocation4 + $0x1c0] sm:$0xff] %vm5921_vm1, %v5842_v60  ;;  %v16049_v60 = vld [vmem:[#allocation3 + $0x9a] sm:$0xff] }
 0x7c1   :  { %v5848_v35 = vpop.permute.xlu1 %5847  ;;  %6214 = vrot.lane.b32.xlu0 %v6036_v0, %s10430_s8 }
 0x7c2   :  { %5981 = vst.msk [vmem:[#allocation4 + $0x1d8] sm:$0xff] %vm5921_vm1, %v5848_v35  ;;  %v16054_v35 = vld [vmem:[#allocation3 + $0x92] sm:$0xff] }
 0x7c3   :  { %6220 = vrot.lane.b32.xlu1 %v6039_v7, %s10430_s8  ;;  %v5846_v39 = vpop.permute.xlu0 %5845 }
 0x7c4   :  { %5980 = vst.msk [vmem:[#allocation4 + $0x1d0] sm:$0xff] %vm5921_vm1, %v5846_v39  ;;  %v16059_v39 = vld [vmem:[#allocation3 + $0xb2] sm:$0xff] }
 0x7c5   :  { %v5852_v40 = vpop.permute.xlu1 %5851  ;;  %6218 = vrot.lane.b32.xlu0 %v6038_v49, %s10430_s8 }
 0x7c6   :  { %5983 = vst.msk [vmem:[#allocation4 + $0x1e8] sm:$0xff] %vm5921_vm1, %v5852_v40  ;;  %v16064_v40 = vld [vmem:[#allocation3 + $0xaa] sm:$0xff] }
 0x7c7   :  { %6224 = vrot.lane.b32.xlu1 %v6041_v20, %s10430_s8  ;;  %v5850_v53 = vpop.permute.xlu0 %5849 }
 0x7c8   :  { %5982 = vst.msk [vmem:[#allocation4 + $0x1e0] sm:$0xff] %vm5921_vm1, %v5850_v53  ;;  %v16069_v53 = vld [vmem:[#allocation3 + $0xca] sm:$0xff] }
 0x7c9   :  { %v5856_v14 = vpop.permute.xlu1 %5855  ;;  %6222 = vrot.lane.b32.xlu0 %v6040_v3, %s10430_s8 }
 0x7ca   :  { %5985 = vst.msk [vmem:[#allocation4 + $0x1f8] sm:$0xff] %vm5921_vm1, %v5856_v14  ;;  %v16074_v14 = vld [vmem:[#allocation3 + $0xc2] sm:$0xff] }
 0x7cb   :  { %6228 = vrot.lane.b32.xlu1 %v6043_v34, %s10430_s8  ;;  %v5854_v24 = vpop.permute.xlu0 %5853 }
 0x7cc   :  { %5984 = vst.msk [vmem:[#allocation4 + $0x1f0] sm:$0xff] %vm5921_vm1, %v5854_v24  ;;  %v16079_v24 = vld [vmem:[#allocation3 + $0xe2] sm:$0xff] }
 0x7cd   :  { %v6117_v55 = vpop.permute.xlu1 %6116  ;;  %6226 = vrot.lane.b32.xlu0 %v6042_v23, %s10430_s8 }
 0x7ce   :  { %6308 = vst.msk [vmem:[#allocation4 + $0x8] sm:$0xff] %vm6306_vm2, %v6117_v55  ;;  %v16084_v55 = vld [vmem:[#allocation3 + $0xda] sm:$0xff] }
 0x7cf   :  { %6232 = vrot.lane.b32.xlu1 %v6045_v32, %s10430_s8  ;;  %v6115_v46 = vpop.permute.xlu0 %6114 }
 0x7d0   :  { %6307 = vst.msk [vmem:[#allocation4] sm:$0xff] %vm6306_vm2, %v6115_v46  ;;  %v16089_v46 = vld [vmem:[#allocation3 + $0xfa] sm:$0xff] }
 0x7d1   :  { %v6121_v63 = vpop.permute.xlu1 %6120  ;;  %6230 = vrot.lane.b32.xlu0 %v6044_v5, %s10430_s8 }
 0x7d2   :  { %6310 = vst.msk [vmem:[#allocation4 + $0x18] sm:$0xff] %vm6306_vm2, %v6121_v63  ;;  %v16094_v63 = vld [vmem:[#allocation3 + $0xf2] sm:$0xff] }
 0x7d3   :  { %6236 = vrot.lane.b32.xlu1 %v6047_v42, %s10430_s8  ;;  %v6119_v50 = vpop.permute.xlu0 %6118 }
 0x7d4   :  { %6309 = vst.msk [vmem:[#allocation4 + $0x10] sm:$0xff] %vm6306_vm2, %v6119_v50  ;;  %v16099_v50 = vld [vmem:[#allocation3 + $0x112] sm:$0xff] }
 0x7d5   :  { %v6125_v62 = vpop.permute.xlu1 %6124  ;;  %6234 = vrot.lane.b32.xlu0 %v6046_v12, %s10430_s8 }
 0x7d6   :  { %6312 = vst.msk [vmem:[#allocation4 + $0x28] sm:$0xff] %vm6306_vm2, %v6125_v62  ;;  %v16104_v62 = vld [vmem:[#allocation3 + $0x10a] sm:$0xff] }
 0x7d7   :  { %6240 = vrot.lane.b32.xlu1 %v6049_v30, %s10430_s8  ;;  %v6123_v36 = vpop.permute.xlu0 %6122 }
 0x7d8   :  { %6311 = vst.msk [vmem:[#allocation4 + $0x20] sm:$0xff] %vm6306_vm2, %v6123_v36  ;;  %v16109_v36 = vld [vmem:[#allocation3 + $0x12a] sm:$0xff] }
 0x7d9   :  { %v6129_v41 = vpop.permute.xlu1 %6128  ;;  %6238 = vrot.lane.b32.xlu0 %v6048_v10, %s10430_s8 }
 0x7da   :  { %6314 = vst.msk [vmem:[#allocation4 + $0x38] sm:$0xff] %vm6306_vm2, %v6129_v41  ;;  %v16114_v41 = vld [vmem:[#allocation3 + $0x122] sm:$0xff] }
 0x7db   :  { %6501 = vrot.lane.b32.xlu1 %v6372_v38, %s10432_s3  ;;  %v6127_v33 = vpop.permute.xlu0 %6126 }
 0x7dc   :  { %6313 = vst.msk [vmem:[#allocation4 + $0x30] sm:$0xff] %vm6306_vm2, %v6127_v33  ;;  %v16119_v33 = vld [vmem:[#allocation3 + $0x142] sm:$0xff] }
 0x7dd   :  { %v6133_v4 = vpop.permute.xlu1 %6132  ;;  %6499 = vrot.lane.b32.xlu0 %v6371_v54, %s10432_s3 }
 0x7de   :  { %6316 = vst.msk [vmem:[#allocation4 + $0x48] sm:$0xff] %vm6306_vm2, %v6133_v4  ;;  %v16124_v4 = vld [vmem:[#allocation3 + $0x13a] sm:$0xff] }
 0x7df   :  { %6505 = vrot.lane.b32.xlu1 %v16009_v58, %s10432_s3  ;;  %v6131_v11 = vpop.permute.xlu0 %6130 }
 0x7e0   :  { %6315 = vst.msk [vmem:[#allocation4 + $0x40] sm:$0xff] %vm6306_vm2, %v6131_v11 }
 0x7e1   :  { %v6137_v22 = vpop.permute.xlu1 %6136  ;;  %6503 = vrot.lane.b32.xlu0 %v16014_v61, %s10432_s3 }
 0x7e2   :  { %6318 = vst.msk [vmem:[#allocation4 + $0x58] sm:$0xff] %vm6306_vm2, %v6137_v22  ;;  %v16129_v22 = vld [vmem:[#allocation3 + $0x15a] sm:$0xff] }
 0x7e3   :  { %6509 = vrot.lane.b32.xlu1 %v16019_v27, %s10432_s3  ;;  %v6135_v21 = vpop.permute.xlu0 %6134 }
 0x7e4   :  { %6317 = vst.msk [vmem:[#allocation4 + $0x50] sm:$0xff] %vm6306_vm2, %v6135_v21 }
 0x7e5   :  { %v6141_v44 = vpop.permute.xlu1 %6140  ;;  %6507 = vrot.lane.b32.xlu0 %v16024_v16, %s10432_s3 }
 0x7e6   :  { %6320 = vst.msk [vmem:[#allocation4 + $0x68] sm:$0xff] %vm6306_vm2, %v6141_v44  ;;  %v16134_v44 = vld [vmem:[#allocation3 + $0x152] sm:$0xff] }
 0x7e7   :  { %6513 = vrot.lane.b32.xlu1 %v16029_v6, %s10432_s3  ;;  %v6139_v19 = vpop.permute.xlu0 %6138 }
 0x7e8   :  { %6319 = vst.msk [vmem:[#allocation4 + $0x60] sm:$0xff] %vm6306_vm2, %v6139_v19 }
 0x7e9   :  { %v6145_v26 = vpop.permute.xlu1 %6144  ;;  %6511 = vrot.lane.b32.xlu0 %v16034_v48, %s10432_s3 }
 0x7ea   :  { %6322 = vst.msk [vmem:[#allocation4 + $0x78] sm:$0xff] %vm6306_vm2, %v6145_v26  ;;  %v16139_v26 = vld [vmem:[#allocation3 + $0x172] sm:$0xff] }
 0x7eb   :  { %6517 = vrot.lane.b32.xlu1 %v16039_v52, %s10432_s3  ;;  %v6143_v56 = vpop.permute.xlu0 %6142 }
 0x7ec   :  { %6321 = vst.msk [vmem:[#allocation4 + $0x70] sm:$0xff] %vm6306_vm2, %v6143_v56  ;;  %v7976_v56 = vld [vmem:[%s19000_s4] sm:$0xff] }
 0x7ed   :  { %v6149_v47 = vpop.permute.xlu1 %6148  ;;  %6515 = vrot.lane.b32.xlu0 %v16044_v51, %s10432_s3 }
 0x7ee   :  { %6324 = vst.msk [vmem:[#allocation4 + $0x88] sm:$0xff] %vm6306_vm2, %v6149_v47  ;;  %v7977_v47 = vld [vmem:[%s19000_s4 + $0x8] sm:$0xff] }
 0x7ef   :  { %6521 = vrot.lane.b32.xlu1 %v16049_v60, %s10432_s3  ;;  %v6147_v0 = vpop.permute.xlu0 %6146 }
 0x7f0   :  { %6323 = vst.msk [vmem:[#allocation4 + $0x80] sm:$0xff] %vm6306_vm2, %v6147_v0 }
 0x7f1   :  { %v6153_v7 = vpop.permute.xlu1 %6152  ;;  %6519 = vrot.lane.b32.xlu0 %v16054_v35, %s10432_s3 }
 0x7f2   :  { %6326 = vst.msk [vmem:[#allocation4 + $0x98] sm:$0xff] %vm6306_vm2, %v6153_v7  ;;  %v10380_v7 = vpack.c.bf16 %v7977_v47, %v7976_v56 }
 0x7f3   :  { %6525 = vrot.lane.b32.xlu1 %v16059_v39, %s10432_s3  ;;  %v6151_v49 = vpop.permute.xlu0 %6150 }
 0x7f4   :  { %6325 = vst.msk [vmem:[#allocation4 + $0x90] sm:$0xff] %vm6306_vm2, %v6151_v49  ;;  %v16150_v49 = vld [vmem:[#allocation3 + $0x16a] sm:$0xff]  ;;  %10381 = vmatprep.subr.bf16.mxu0 %v10380_v7  ;;  %10396 = vmatprep.subr.bf16.mxu1 %v10380_v7 }
 0x7f5   :  { %v6157_v20 = vpop.permute.xlu1 %6156  ;;  %6523 = vrot.lane.b32.xlu0 %v16064_v40, %s10432_s3  ;;  %10383 = vmatpush3.bf16.msra.mxu0 %v10380_v7 }
 0x7f6   :  { %6328 = vst.msk [vmem:[#allocation4 + $0xa8] sm:$0xff] %vm6306_vm2, %v6157_v20  ;;  %10401 = vmatpush3.bf16.msra.mxu1 %v10380_v7 }
 0x7f7   :  { %6529 = vrot.lane.b32.xlu1 %v16069_v53, %s10432_s3  ;;  %v6155_v3 = vpop.permute.xlu0 %6154 }
 0x7f8   :  { %6327 = vst.msk [vmem:[#allocation4 + $0xa0] sm:$0xff] %vm6306_vm2, %v6155_v3  ;;  %v6757_v3 = vld [vmem:[#allocation3 + $0x30] sm:$0xff] }
 0x7f9   :  { %v6161_v34 = vpop.permute.xlu1 %6160  ;;  %6527 = vrot.lane.b32.xlu0 %v16074_v14, %s10432_s3 }
 0x7fa   :  { %6330 = vst.msk [vmem:[#allocation4 + $0xb8] sm:$0xff] %vm6306_vm2, %v6161_v34  ;;  %v7978_v34 = vld [vmem:[%s19000_s4 + $0x10] sm:$0xff] }
 0x7fb   :  { %6533 = vrot.lane.b32.xlu1 %v16079_v24, %s10432_s3  ;;  %v6159_v23 = vpop.permute.xlu0 %6158 }
 0x7fc   :  { %6329 = vst.msk [vmem:[#allocation4 + $0xb0] sm:$0xff] %vm6306_vm2, %v6159_v23  ;;  %v7979_v23 = vld [vmem:[%s19000_s4 + $0x18] sm:$0xff] }
 0x7fd   :  { %v6165_v32 = vpop.permute.xlu1 %6164  ;;  %6531 = vrot.lane.b32.xlu0 %v16084_v55, %s10432_s3 }
 0x7fe   :  { %6332 = vst.msk [vmem:[#allocation4 + $0xc8] sm:$0xff] %vm6306_vm2, %v6165_v32  ;;  %v10384_v32 = vpack.c.bf16 %v7979_v23, %v7978_v34 }
 0x7ff   :  { %6537 = vrot.lane.b32.xlu1 %v16089_v46, %s10432_s3  ;;  %v6163_v5 = vpop.permute.xlu0 %6162 }
 0x800   :  { %6331 = vst.msk [vmem:[#allocation4 + $0xc0] sm:$0xff] %vm6306_vm2, %v6163_v5  ;;  %10385 = vmatprep.subr.bf16.mxu0 %v10384_v32  ;;  %10397 = vmatprep.subr.bf16.mxu1 %v10384_v32 }
 0x801   :  { %v6169_v42 = vpop.permute.xlu1 %6168  ;;  %6535 = vrot.lane.b32.xlu0 %v16094_v63, %s10432_s3  ;;  %10387 = vmatpush3.bf16.msra.mxu0 %v10384_v32 }
 0x802   :  { %6334 = vst.msk [vmem:[#allocation4 + $0xd8] sm:$0xff] %vm6306_vm2, %v6169_v42  ;;  %v16163_v42 = vld [vmem:[#allocation3 + $0x182] sm:$0xff]  ;;  %10402 = vmatpush3.bf16.msra.mxu1 %v10384_v32 }
 0x803   :  { %6541 = vrot.lane.b32.xlu1 %v16099_v50, %s10432_s3  ;;  %v6167_v12 = vpop.permute.xlu0 %6166 }
 0x804   :  { %6333 = vst.msk [vmem:[#allocation4 + $0xd0] sm:$0xff] %vm6306_vm2, %v6167_v12 }
 0x805   :  { %v6173_v30 = vpop.permute.xlu1 %6172  ;;  %6539 = vrot.lane.b32.xlu0 %v16104_v62, %s10432_s3 }
 0x806   :  { %6336 = vst.msk [vmem:[#allocation4 + $0xe8] sm:$0xff] %vm6306_vm2, %v6173_v30  ;;  %v7980_v30 = vld [vmem:[%s19000_s4 + $0x20] sm:$0xff] }
 0x807   :  { %6545 = vrot.lane.b32.xlu1 %v16109_v36, %s10432_s3  ;;  %v6171_v10 = vpop.permute.xlu0 %6170 }
 0x808   :  { %6335 = vst.msk [vmem:[#allocation4 + $0xe0] sm:$0xff] %vm6306_vm2, %v6171_v10  ;;  %v7981_v10 = vld [vmem:[%s19000_s4 + $0x28] sm:$0xff] }
 0x809   :  { %v6177_v38 = vpop.permute.xlu1 %6176  ;;  %6543 = vrot.lane.b32.xlu0 %v16114_v41, %s10432_s3 }
 0x80a   :  { %6338 = vst.msk [vmem:[#allocation4 + $0xf8] sm:$0xff] %vm6306_vm2, %v6177_v38  ;;  %v10388_v38 = vpack.c.bf16 %v7981_v10, %v7980_v30 }
 0x80b   :  { %6549 = vrot.lane.b32.xlu1 %v16119_v33, %s10432_s3  ;;  %v6175_v54 = vpop.permute.xlu0 %6174 }
 0x80c   :  { %6337 = vst.msk [vmem:[#allocation4 + $0xf0] sm:$0xff] %vm6306_vm2, %v6175_v54  ;;  %10389 = vmatprep.subr.bf16.mxu0 %v10388_v38  ;;  %10398 = vmatprep.subr.bf16.mxu1 %v10388_v38 }
 0x80d   :  { %v6181_v11 = vpop.permute.xlu1 %6180  ;;  %6547 = vrot.lane.b32.xlu0 %v16124_v4, %s10432_s3  ;;  %10391 = vmatpush3.bf16.msra.mxu0 %v10388_v38 }
 0x80e   :  { %6340 = vst.msk [vmem:[#allocation4 + $0x108] sm:$0xff] %vm6306_vm2, %v6181_v11  ;;  %v6758_v11 = vld [vmem:[#allocation3 + $0x38] sm:$0xff]  ;;  %10403 = vmatpush3.bf16.msra.mxu1 %v10388_v38 }
 0x80f   :  { %6553 = vrot.lane.b32.xlu1 %v16129_v22, %s10432_s3  ;;  %v6179_v21 = vpop.permute.xlu0 %6178 }
 0x810   :  { %6339 = vst.msk [vmem:[#allocation4 + $0x100] sm:$0xff] %vm6306_vm2, %v6179_v21 }
 0x811   :  { %v6185_v19 = vpop.permute.xlu1 %6184  ;;  %6551 = vrot.lane.b32.xlu0 %v16134_v44, %s10432_s3 }
 0x812   :  { %6342 = vst.msk [vmem:[#allocation4 + $0x118] sm:$0xff] %vm6306_vm2, %v6185_v19  ;;  %v7982_v19 = vld [vmem:[%s19000_s4 + $0x30] sm:$0xff] }
 0x813   :  { %6557 = vrot.lane.b32.xlu1 %v16139_v26, %s10432_s3  ;;  %v6183_v0 = vpop.permute.xlu0 %6182 }
 0x814   :  { %6341 = vst.msk [vmem:[#allocation4 + $0x110] sm:$0xff] %vm6306_vm2, %v6183_v0  ;;  %v6759_v0 = vld [vmem:[#allocation3 + $0x48] sm:$0xff] }
 0x815   :  { %v6189_v20 = vpop.permute.xlu1 %6188  ;;  %6555 = vrot.lane.b32.xlu0 %v16150_v49, %s10432_s3 }
 0x816   :  { %6344 = vst.msk [vmem:[#allocation4 + $0x128] sm:$0xff] %vm6306_vm2, %v6189_v20  ;;  %v6760_v20 = vld [vmem:[#allocation3 + $0x50] sm:$0xff] }
 0x817   :  { %6885 = vrot.lane.b32.xlu1 %v6757_v3, %s10433_s19  ;;  %v6187_v5 = vpop.permute.xlu0 %6186  ;;  %v7984_v3 = vld [vmem:[%s19000_s4 + $0x40] sm:$0xff] }
 0x818   :  { %6343 = vst.msk [vmem:[#allocation4 + $0x120] sm:$0xff] %vm6306_vm2, %v6187_v5 }
 0x819   :  { %v6193_v12 = vpop.permute.xlu1 %6192  ;;  %6559 = vrot.lane.b32.xlu0 %v16163_v42, %s10432_s3 }
 0x81a   :  { %6346 = vst.msk [vmem:[#allocation4 + $0x138] sm:$0xff] %vm6306_vm2, %v6193_v12 }
 0x81b   :  { %7270 = vrot.lane.b32.xlu1 %v15835_v37, %s10434_s1  ;;  %v6191_v54 = vpop.permute.xlu0 %6190  ;;  %v7983_v37 = vld [vmem:[%s19000_s4 + $0x38] sm:$0xff] }
 0x81c   :  { %6345 = vst.msk [vmem:[#allocation4 + $0x130] sm:$0xff] %vm6306_vm2, %v6191_v54  ;;  %v10392_v56 = vpack.c.bf16 %v7983_v37, %v7982_v19 }
 0x81d   :  { %v6197_v21 = vpop.permute.xlu1 %6196  ;;  %6887 = vrot.lane.b32.xlu0 %v6758_v11, %s10433_s19 }
 0x81e   :  { %6348 = vst.msk [vmem:[#allocation4 + $0x148] sm:$0xff] %vm6306_vm2, %v6197_v21  ;;  %10393 = vmatprep.subr.bf16.mxu0 %v10392_v56  ;;  %10399 = vmatprep.subr.bf16.mxu1 %v10392_v56 }
 0x81f   :  { %7272 = vrot.lane.b32.xlu1 %v15830_v1, %s10434_s1  ;;  %v6195_v47 = vpop.permute.xlu0 %6194  ;;  %10395 = vmatpush3.bf16.msra.mxu0 %v10392_v56 }
 0x820   :  { %6347 = vst.msk [vmem:[#allocation4 + $0x140] sm:$0xff] %vm6306_vm2, %v6195_v47  ;;  %10274 = vmatprep.subr.mxu0 %v7984_v3  ;;  %10404 = vmatpush3.bf16.msra.mxu1 %v10392_v56 }
 0x821   :  { %v6201_v7 = vpop.permute.xlu1 %6200  ;;  %6889 = vrot.lane.b32.xlu0 %v6759_v0, %s10433_s19  ;;  %10400 = vmatprep.subr.mxu1 %v7984_v3 }
 0x822   :  { %6350 = vst.msk [vmem:[#allocation4 + $0x158] sm:$0xff] %vm6306_vm2, %v6201_v7 }
 0x823   :  { %6891 = vrot.lane.b32.xlu1 %v6760_v20, %s10433_s19  ;;  %v6199_v1 = vpop.permute.xlu0 %6198  ;;  %10275 = vmatpush3.msra.mxu0 %v7984_v3 }
 0x824   :  { %6349 = vst.msk [vmem:[#allocation4 + $0x150] sm:$0xff] %vm6306_vm2, %v6199_v1  ;;  %10405 = vmatpush3.msra.mxu1 %v7984_v3 }
 0x825   :  { %v6205_v34 = vpop.permute.xlu1 %6204  ;;  %7655 = vrot.lane.b32.xlu0 %v16014_v61, %s10435_s11 }
 0x826   :  { %6352 = vst.msk [vmem:[#allocation4 + $0x168] sm:$0xff] %vm6306_vm2, %v6205_v34 }
 0x827   :  { %7657 = vrot.lane.b32.xlu1 %v16009_v58, %s10435_s11  ;;  %v6203_v23 = vpop.permute.xlu0 %6202  ;;  %v6761_v58 = vld [vmem:[#allocation3 + $0x60] sm:$0xff] }
 0x828   :  { %6351 = vst.msk [vmem:[#allocation4 + $0x160] sm:$0xff] %vm6306_vm2, %v6203_v23 }
 0x829   :  { %v6209_v32 = vpop.permute.xlu1 %6208  ;;  %7274 = vrot.lane.b32.xlu0 %v15845_v9, %s10434_s1 }
 0x82a   :  { %6354 = vst.msk [vmem:[#allocation4 + $0x178] sm:$0xff] %vm6306_vm2, %v6209_v32 }
 0x82b   :  { %7659 = vrot.lane.b32.xlu1 %v16024_v16, %s10435_s11  ;;  %v6207_v61 = vpop.permute.xlu0 %6206 }
 0x82c   :  { %6353 = vst.msk [vmem:[#allocation4 + $0x170] sm:$0xff] %vm6306_vm2, %v6207_v61 }
 0x82d   :  { %v6213_v5 = vpop.permute.xlu1 %6212  ;;  %7276 = vrot.lane.b32.xlu0 %v15840_v43, %s10434_s1  ;;  %v6762_v43 = vld [vmem:[#allocation3 + $0x68] sm:$0xff] }
 0x82e   :  { %6356 = vst.msk [vmem:[#allocation4 + $0x188] sm:$0xff] %vm6306_vm2, %v6213_v5 }
 0x82f   :  { %6893 = vrot.lane.b32.xlu1 %v6761_v58, %s10433_s19  ;;  %v6211_v12 = vpop.permute.xlu0 %6210 }
 0x830   :  { %6355 = vst.msk [vmem:[#allocation4 + $0x180] sm:$0xff] %vm6306_vm2, %v6211_v12 }
 0x831   :  { %v6217_v9 = vpop.permute.xlu1 %6216  ;;  %7661 = vrot.lane.b32.xlu0 %v16019_v27, %s10435_s11 }
 0x832   :  { %6358 = vst.msk [vmem:[#allocation4 + $0x198] sm:$0xff] %vm6306_vm2, %v6217_v9 }
 0x833   :  { %7278 = vrot.lane.b32.xlu1 %v15855_v17, %s10434_s1  ;;  %v6215_v16 = vpop.permute.xlu0 %6214  ;;  %v6763_v17 = vld [vmem:[#allocation3 + $0x78] sm:$0xff] }
 0x834   :  { %6357 = vst.msk [vmem:[#allocation4 + $0x190] sm:$0xff] %vm6306_vm2, %v6215_v16 }
 0x835   :  { %v6221_v30 = vpop.permute.xlu1 %6220  ;;  %6895 = vrot.lane.b32.xlu0 %v6762_v43, %s10433_s19 }
 0x836   :  { %6360 = vst.msk [vmem:[#allocation4 + $0x1a8] sm:$0xff] %vm6306_vm2, %v6221_v30 }
 0x837   :  { %7663 = vrot.lane.b32.xlu1 %v16034_v48, %s10435_s11  ;;  %v6219_v10 = vpop.permute.xlu0 %6218 }
 0x838   :  { %6359 = vst.msk [vmem:[#allocation4 + $0x1a0] sm:$0xff] %vm6306_vm2, %v6219_v10 }
 0x839   :  { %v6225_v27 = vpop.permute.xlu1 %6224  ;;  %7280 = vrot.lane.b32.xlu0 %v15850_v15, %s10434_s1  ;;  %v6764_v15 = vld [vmem:[#allocation3 + $0x80] sm:$0xff] }
 0x83a   :  { %6362 = vst.msk [vmem:[#allocation4 + $0x1b8] sm:$0xff] %vm6306_vm2, %v6225_v27 }
 0x83b   :  { %6897 = vrot.lane.b32.xlu1 %v6763_v17, %s10433_s19  ;;  %v6223_v38 = vpop.permute.xlu0 %6222 }
 0x83c   :  { %6361 = vst.msk [vmem:[#allocation4 + $0x1b0] sm:$0xff] %vm6306_vm2, %v6223_v38 }
 0x83d   :  { %v6229_v54 = vpop.permute.xlu1 %6228  ;;  %7665 = vrot.lane.b32.xlu0 %v16029_v6, %s10435_s11 }
 0x83e   :  { %6364 = vst.msk [vmem:[#allocation4 + $0x1c8] sm:$0xff] %vm6306_vm2, %v6229_v54  ;;  %v6776_v54 = vld [vmem:[#allocation3 + $0x110] sm:$0xff] }
 0x83f   :  { %7282 = vrot.lane.b32.xlu1 %v15865_v2, %s10434_s1  ;;  %v6227_v48 = vpop.permute.xlu0 %6226  ;;  %v6765_v2 = vld [vmem:[#allocation3 + $0x90] sm:$0xff] }
 0x840   :  { %6363 = vst.msk [vmem:[#allocation4 + $0x1c0] sm:$0xff] %vm6306_vm2, %v6227_v48 }
 0x841   :  { %v6233_v11 = vpop.permute.xlu1 %6232  ;;  %6899 = vrot.lane.b32.xlu0 %v6764_v15, %s10433_s19  ;;  %v7161_v15 = vld [vmem:[#allocation3 + $0x111] sm:$0xff] }
 0x842   :  { %6366 = vst.msk [vmem:[#allocation4 + $0x1d8] sm:$0xff] %vm6306_vm2, %v6233_v11 }
 0x843   :  { %7667 = vrot.lane.b32.xlu1 %v16044_v51, %s10435_s11  ;;  %v6231_v21 = vpop.permute.xlu0 %6230 }
 0x844   :  { %6365 = vst.msk [vmem:[#allocation4 + $0x1d0] sm:$0xff] %vm6306_vm2, %v6231_v21  ;;  %v6777_v21 = vld [vmem:[#allocation3 + $0x120] sm:$0xff] }
 0x845   :  { %v6237_v6 = vpop.permute.xlu1 %6236  ;;  %7284 = vrot.lane.b32.xlu0 %v15860_v45, %s10434_s1  ;;  %v6766_v45 = vld [vmem:[#allocation3 + $0x98] sm:$0xff] }
 0x846   :  { %6368 = vst.msk [vmem:[#allocation4 + $0x1e8] sm:$0xff] %vm6306_vm2, %v6237_v6 }
 0x847   :  { %6901 = vrot.lane.b32.xlu1 %v6765_v2, %s10433_s19  ;;  %v6235_v19 = vpop.permute.xlu0 %6234 }
 0x848   :  { %6367 = vst.msk [vmem:[#allocation4 + $0x1e0] sm:$0xff] %vm6306_vm2, %v6235_v19 }
 0x849   :  { %v6241_v37 = vpop.permute.xlu1 %6240  ;;  %7669 = vrot.lane.b32.xlu0 %v16039_v52, %s10435_s11 }
 0x84a   :  { %6370 = vst.msk [vmem:[#allocation4 + $0x1f8] sm:$0xff] %vm6306_vm2, %v6241_v37  ;;  %v6778_v37 = vld [vmem:[#allocation3 + $0x128] sm:$0xff] }
 0x84b   :  { %7286 = vrot.lane.b32.xlu1 %v15875_v25, %s10434_s1  ;;  %v6239_v51 = vpop.permute.xlu0 %6238  ;;  %v6767_v25 = vld [vmem:[#allocation3 + $0xa8] sm:$0xff] }
 0x84c   :  { %6369 = vst.msk [vmem:[#allocation4 + $0x1f0] sm:$0xff] %vm6306_vm2, %v6239_v51 }
 0x84d   :  { %v6502_v56 = vpop.permute.xlu1 %6501  ;;  %6903 = vrot.lane.b32.xlu0 %v6766_v45, %s10433_s19 }
 0x84e   :  { %6693 = vst.msk [vmem:[#allocation4 + $0x8] sm:$0xff] %vm6691_vm3, %v6502_v56 }
 0x84f   :  { %7671 = vrot.lane.b32.xlu1 %v16054_v35, %s10435_s11  ;;  %v6500_v47 = vpop.permute.xlu0 %6499 }
 0x850   :  { %6692 = vst.msk [vmem:[#allocation4] sm:$0xff] %vm6691_vm3, %v6500_v47  ;;  %v6779_v47 = vld [vmem:[#allocation3 + $0x138] sm:$0xff] }
 0x851   :  { %v6506_v52 = vpop.permute.xlu1 %6505  ;;  %7288 = vrot.lane.b32.xlu0 %v15870_v28, %s10434_s1  ;;  %v6768_v28 = vld [vmem:[#allocation3 + $0xb0] sm:$0xff] }
 0x852   :  { %6695 = vst.msk [vmem:[#allocation4 + $0x18] sm:$0xff] %vm6691_vm3, %v6506_v52 }
 0x853   :  { %6905 = vrot.lane.b32.xlu1 %v6767_v25, %s10433_s19  ;;  %v6504_v0 = vpop.permute.xlu0 %6503 }
 0x854   :  { %6694 = vst.msk [vmem:[#allocation4 + $0x10] sm:$0xff] %vm6691_vm3, %v6504_v0 }
 0x855   :  { %v6510_v7 = vpop.permute.xlu1 %6509  ;;  %7673 = vrot.lane.b32.xlu0 %v16049_v60, %s10435_s11 }
 0x856   :  { %6697 = vst.msk [vmem:[#allocation4 + $0x28] sm:$0xff] %vm6691_vm3, %v6510_v7 }
 0x857   :  { %7290 = vrot.lane.b32.xlu1 %v15885_v57, %s10434_s1  ;;  %v6508_v35 = vpop.permute.xlu0 %6507  ;;  %v6769_v57 = vld [vmem:[#allocation3 + $0xc0] sm:$0xff] }
 0x858   :  { %6696 = vst.msk [vmem:[#allocation4 + $0x20] sm:$0xff] %vm6691_vm3, %v6508_v35  ;;  %v6780_v35 = vld [vmem:[#allocation3 + $0x140] sm:$0xff] }
 0x859   :  { %v6514_v20 = vpop.permute.xlu1 %6513  ;;  %6907 = vrot.lane.b32.xlu0 %v6768_v28, %s10433_s19 }
 0x85a   :  { %6699 = vst.msk [vmem:[#allocation4 + $0x38] sm:$0xff] %vm6691_vm3, %v6514_v20 }
 0x85b   :  { %7675 = vrot.lane.b32.xlu1 %v16064_v40, %s10435_s11  ;;  %v6512_v3 = vpop.permute.xlu0 %6511 }
 0x85c   :  { %6698 = vst.msk [vmem:[#allocation4 + $0x30] sm:$0xff] %vm6691_vm3, %v6512_v3  ;;  %v7165_v3 = vld [vmem:[#allocation3 + $0x141] sm:$0xff] }
 0x85d   :  { %v6518_v60 = vpop.permute.xlu1 %6517  ;;  %7292 = vrot.lane.b32.xlu0 %v15880_v29, %s10434_s1  ;;  %v6770_v29 = vld [vmem:[#allocation3 + $0xc8] sm:$0xff] }
 0x85e   :  { %6701 = vst.msk [vmem:[#allocation4 + $0x48] sm:$0xff] %vm6691_vm3, %v6518_v60 }
 0x85f   :  { %6909 = vrot.lane.b32.xlu1 %v6769_v57, %s10433_s19  ;;  %v6516_v1 = vpop.permute.xlu0 %6515 }
 0x860   :  { %6700 = vst.msk [vmem:[#allocation4 + $0x40] sm:$0xff] %vm6691_vm3, %v6516_v1  ;;  %v6781_v1 = vld [vmem:[#allocation3 + $0x150] sm:$0xff] }
 0x861   :  { %v6522_v34 = vpop.permute.xlu1 %6521  ;;  %7677 = vrot.lane.b32.xlu0 %v16059_v39, %s10435_s11 }
 0x862   :  { %6703 = vst.msk [vmem:[#allocation4 + $0x58] sm:$0xff] %vm6691_vm3, %v6522_v34 }
 0x863   :  { %7294 = vrot.lane.b32.xlu1 %v15895_v59, %s10434_s1  ;;  %v6520_v40 = vpop.permute.xlu0 %6519  ;;  %v6771_v59 = vld [vmem:[#allocation3 + $0xd8] sm:$0xff] }
 0x864   :  { %6702 = vst.msk [vmem:[#allocation4 + $0x50] sm:$0xff] %vm6691_vm3, %v6520_v40 }
 0x865   :  { %v6526_v23 = vpop.permute.xlu1 %6525  ;;  %6911 = vrot.lane.b32.xlu0 %v6770_v29, %s10433_s19 }
 0x866   :  { %6705 = vst.msk [vmem:[#allocation4 + $0x68] sm:$0xff] %vm6691_vm3, %v6526_v23 }
 0x867   :  { %7679 = vrot.lane.b32.xlu1 %v16074_v14, %s10435_s11  ;;  %v6524_v32 = vpop.permute.xlu0 %6523 }
 0x868   :  { %6704 = vst.msk [vmem:[#allocation4 + $0x60] sm:$0xff] %vm6691_vm3, %v6524_v32  ;;  %v6782_v32 = vld [vmem:[#allocation3 + $0x158] sm:$0xff] }
 0x869   :  { %v6530_v39 = vpop.permute.xlu1 %6529  ;;  %7296 = vrot.lane.b32.xlu0 %v15890_v31, %s10434_s1  ;;  %v6772_v31 = vld [vmem:[#allocation3 + $0xe0] sm:$0xff] }
 0x86a   :  { %6707 = vst.msk [vmem:[#allocation4 + $0x78] sm:$0xff] %vm6691_vm3, %v6530_v39 }
 0x86b   :  { %6913 = vrot.lane.b32.xlu1 %v6771_v59, %s10433_s19  ;;  %v6528_v61 = vpop.permute.xlu0 %6527  ;;  %v7167_v59 = vld [vmem:[#allocation3 + $0x159] sm:$0xff] }
 0x86c   :  { %6706 = vst.msk [vmem:[#allocation4 + $0x70] sm:$0xff] %vm6691_vm3, %v6528_v61 }
 0x86d   :  { %v6534_v5 = vpop.permute.xlu1 %6533  ;;  %7681 = vrot.lane.b32.xlu0 %v16069_v53, %s10435_s11 }
 0x86e   :  { %6709 = vst.msk [vmem:[#allocation4 + $0x88] sm:$0xff] %vm6691_vm3, %v6534_v5 }
 0x86f   :  { %7298 = vrot.lane.b32.xlu1 %v15905_v8, %s10434_s1  ;;  %v6532_v14 = vpop.permute.xlu0 %6531  ;;  %v6773_v8 = vld [vmem:[#allocation3 + $0xf0] sm:$0xff] }
 0x870   :  { %6708 = vst.msk [vmem:[#allocation4 + $0x80] sm:$0xff] %vm6691_vm3, %v6532_v14  ;;  %v6783_v14 = vld [vmem:[#allocation3 + $0x168] sm:$0xff] }
 0x871   :  { %v6538_v58 = vpop.permute.xlu1 %6537  ;;  %6915 = vrot.lane.b32.xlu0 %v6772_v31, %s10433_s19 }
 0x872   :  { %6711 = vst.msk [vmem:[#allocation4 + $0x98] sm:$0xff] %vm6691_vm3, %v6538_v58 }
 0x873   :  { %7683 = vrot.lane.b32.xlu1 %v16084_v55, %s10435_s11  ;;  %v6536_v12 = vpop.permute.xlu0 %6535 }
 0x874   :  { %6710 = vst.msk [vmem:[#allocation4 + $0x90] sm:$0xff] %vm6691_vm3, %v6536_v12 }
 0x875   :  { %v6542_v53 = vpop.permute.xlu1 %6541  ;;  %7300 = vrot.lane.b32.xlu0 %v15900_v18, %s10434_s1  ;;  %v6774_v18 = vld [vmem:[#allocation3 + $0xf8] sm:$0xff] }
 0x876   :  { %6713 = vst.msk [vmem:[#allocation4 + $0xa8] sm:$0xff] %vm6691_vm3, %v6542_v53 }
 0x877   :  { %6917 = vrot.lane.b32.xlu1 %v6773_v8, %s10433_s19  ;;  %v6540_v9 = vpop.permute.xlu0 %6539  ;;  %v6784_v8 = vld [vmem:[#allocation3 + $0x170] sm:$0xff] }
 0x878   :  { %6712 = vst.msk [vmem:[#allocation4 + $0xa0] sm:$0xff] %vm6691_vm3, %v6540_v9 }
 0x879   :  { %v6546_v16 = vpop.permute.xlu1 %6545  ;;  %7685 = vrot.lane.b32.xlu0 %v16079_v24, %s10435_s11  ;;  %v7159_v24 = vld [vmem:[#allocation3 + $0xf9] sm:$0xff] }
 0x87a   :  { %6715 = vst.msk [vmem:[#allocation4 + $0xb8] sm:$0xff] %vm6691_vm3, %v6546_v16  ;;  %v7169_v16 = vld [vmem:[#allocation3 + $0x171] sm:$0xff] }
 0x87b   :  { %7302 = vrot.lane.b32.xlu1 %v15912_v13, %s10434_s1  ;;  %v6544_v55 = vpop.permute.xlu0 %6543  ;;  %v6775_v13 = vld [vmem:[#allocation3 + $0x108] sm:$0xff] }
 0x87c   :  { %6714 = vst.msk [vmem:[#allocation4 + $0xb0] sm:$0xff] %vm6691_vm3, %v6544_v55 }
 0x87d   :  { %v6550_v43 = vpop.permute.xlu1 %6549  ;;  %6919 = vrot.lane.b32.xlu0 %v6774_v18, %s10433_s19 }
 0x87e   :  { %6717 = vst.msk [vmem:[#allocation4 + $0xc8] sm:$0xff] %vm6691_vm3, %v6550_v43  ;;  %v6785_v43 = vld [vmem:[#allocation3 + $0x180] sm:$0xff] }
 0x87f   :  { %7687 = vrot.lane.b32.xlu1 %v16094_v63, %s10435_s11  ;;  %v6548_v30 = vpop.permute.xlu0 %6547  ;;  %v7160_v63 = vld [vmem:[#allocation3 + $0x109] sm:$0xff] }
 0x880   :  { %6716 = vst.msk [vmem:[#allocation4 + $0xc0] sm:$0xff] %vm6691_vm3, %v6548_v30 }
 0x881   :  { %v6554_v10 = vpop.permute.xlu1 %6553  ;;  %7304 = vrot.lane.b32.xlu0 %v7159_v24, %s10434_s1 }
 0x882   :  { %6719 = vst.msk [vmem:[#allocation4 + $0xd8] sm:$0xff] %vm6691_vm3, %v6554_v10 }
 0x883   :  { %6921 = vrot.lane.b32.xlu1 %v6775_v13, %s10433_s19  ;;  %v6552_v27 = vpop.permute.xlu0 %6551 }
 0x884   :  { %6718 = vst.msk [vmem:[#allocation4 + $0xd0] sm:$0xff] %vm6691_vm3, %v6552_v27  ;;  %v6786_v27 = vld [vmem:[#allocation3 + $0x188] sm:$0xff] }
 0x885   :  { %v6558_v17 = vpop.permute.xlu1 %6557  ;;  %7689 = vrot.lane.b32.xlu0 %v16089_v46, %s10435_s11 }
 0x886   :  { %6721 = vst.msk [vmem:[#allocation4 + $0xe8] sm:$0xff] %vm6691_vm3, %v6558_v17 }
 0x887   :  { %7306 = vrot.lane.b32.xlu1 %v7160_v63, %s10434_s1  ;;  %v6556_v38 = vpop.permute.xlu0 %6555  ;;  %v7171_v63 = vld [vmem:[#allocation3 + $0x189] sm:$0xff] }
 0x888   :  { %6720 = vst.msk [vmem:[#allocation4 + $0xe0] sm:$0xff] %vm6691_vm3, %v6556_v38 }
 0x889   :  { %v6886_v48 = vpop.permute.xlu1 %6885  ;;  %6923 = vrot.lane.b32.xlu0 %v6776_v54, %s10433_s19 }
 0x88a   :  { %7078 = vst.msk [vmem:[#allocation4] sm:$0xff] %vm7077_vm4, %v6886_v48  ;;  %v6402_v48 = vld [vmem:[#allocation3 + $0x18a] sm:$0xff] }
 0x88b   :  { %7691 = vrot.lane.b32.xlu1 %v16104_v62, %s10435_s11  ;;  %v6560_v46 = vpop.permute.xlu0 %6559  ;;  %v7162_v62 = vld [vmem:[#allocation3 + $0x121] sm:$0xff] }
 0x88c   :  { %6722 = vst.msk [vmem:[#allocation4 + $0xf0] sm:$0xff] %vm6691_vm3, %v6560_v46 }
 0x88d   :  { %v7271_v11 = vpop.permute.xlu1 %7270  ;;  %7308 = vrot.lane.b32.xlu0 %v7161_v15, %s10434_s1  ;;  %v6788_v15 = vld [vmem:[#allocation3 + $0x1a0] sm:$0xff] }
 0x88e   :  { %7463 = vst.msk [vmem:[#allocation4] sm:$0xff] %vm7462_vm5, %v7271_v11  ;;  %v6787_v11 = vld [vmem:[#allocation3 + $0x198] sm:$0xff] }
 0x88f   :  { %6925 = vrot.lane.b32.xlu1 %v6777_v21, %s10433_s19  ;;  %v6888_v6 = vpop.permute.xlu0 %6887 }
 0x890   :  { %7079 = vst.msk [vmem:[#allocation4 + $0x8] sm:$0xff] %vm7077_vm4, %v6888_v6 }
 0x891   :  { %v7273_v2 = vpop.permute.xlu1 %7272  ;;  %7693 = vrot.lane.b32.xlu0 %v16099_v50, %s10435_s11  ;;  %v7163_v50 = vld [vmem:[#allocation3 + $0x129] sm:$0xff] }
 0x892   :  { %7464 = vst.msk [vmem:[#allocation4 + $0x8] sm:$0xff] %vm7462_vm5, %v7273_v2  ;;  %v7173_v2 = vld [vmem:[#allocation3 + $0x1a1] sm:$0xff] }
 0x893   :  { %7310 = vrot.lane.b32.xlu1 %v7162_v62, %s10434_s1  ;;  %v6890_v19 = vpop.permute.xlu0 %6889 }
 0x894   :  { %7080 = vst.msk [vmem:[#allocation4 + $0x10] sm:$0xff] %vm7077_vm4, %v6890_v19  ;;  %v7172_v19 = vld [vmem:[#allocation3 + $0x199] sm:$0xff] }
 0x895   :  { %v6892_v51 = vpop.permute.xlu1 %6891  ;;  %6927 = vrot.lane.b32.xlu0 %v6778_v37, %s10433_s19 }
 0x896   :  { %7081 = vst.msk [vmem:[#allocation4 + $0x18] sm:$0xff] %vm7077_vm4, %v6892_v51 }
 0x897   :  { %7695 = vrot.lane.b32.xlu1 %v16114_v41, %s10435_s11  ;;  %v7656_v45 = vpop.permute.xlu0 %7655  ;;  %v7164_v41 = vld [vmem:[#allocation3 + $0x139] sm:$0xff] }
 0x898   :  { %7848 = vst.msk [vmem:[#allocation4] sm:$0xff] %vm7847_vm6, %v7656_v45 }
 0x899   :  { %v7658_v56 = vpop.permute.xlu1 %7657  ;;  %7312 = vrot.lane.b32.xlu0 %v7163_v50, %s10434_s1  ;;  %v6403_v50 = vld [vmem:[#allocation3 + $0x1ca] sm:$0xff] }
 0x89a   :  { %7849 = vst.msk [vmem:[#allocation4 + $0x8] sm:$0xff] %vm7847_vm6, %v7658_v56  ;;  %v7557_v56 = vld [vmem:[#allocation3 + $0x19a] sm:$0xff] }
 0x89b   :  { %6929 = vrot.lane.b32.xlu1 %v6779_v47, %s10433_s19  ;;  %v7275_v52 = vpop.permute.xlu0 %7274 }
 0x89c   :  { %7465 = vst.msk [vmem:[#allocation4 + $0x10] sm:$0xff] %vm7462_vm5, %v7275_v52 }
 0x89d   :  { %v7660_v25 = vpop.permute.xlu1 %7659  ;;  %7697 = vrot.lane.b32.xlu0 %v16109_v36, %s10435_s11 }
 0x89e   :  { %7850 = vst.msk [vmem:[#allocation4 + $0x10] sm:$0xff] %vm7847_vm6, %v7660_v25  ;;  %v6404_v25 = vld [vmem:[#allocation3 + $0x1d2] sm:$0xff] }
 0x89f   :  { %7314 = vrot.lane.b32.xlu1 %v7164_v41, %s10434_s1  ;;  %v7277_v0 = vpop.permute.xlu0 %7276  ;;  %v7912_v7 = vld [vmem:[#allocation4] sm:$0xff] }
 0x8a0   :  { %7466 = vst.msk [vmem:[#allocation4 + $0x18] sm:$0xff] %vm7462_vm5, %v7277_v0  ;;  %10276 = vmatprep.mubr.msk.f32.mxu0 %vm7985_vm7, %v7912_v7  ;;  %v7558_v41 = vld [vmem:[#allocation3 + $0x1a2] sm:$0xff] }
 0x8a1   :  { %v6894_v28 = vpop.permute.xlu1 %6893  ;;  %v7913_v20 = vld [vmem:[#allocation4 + $0x8] sm:$0xff]  ;;  %6931 = vrot.lane.b32.xlu0 %v6780_v35, %s10433_s19 }
 0x8a2   :  { %7082 = vst.msk [vmem:[#allocation4 + $0x20] sm:$0xff] %vm7077_vm4, %v6894_v28  ;;  %10277 = vmatmul.mubr.msk.f32.vlgmr.msra.gmra.mrb[64].mxu0 %vm7985_vm7, %v7913_v20  ;;  %v6790_v28 = vld [vmem:[#allocation3 + $0x1e8] sm:$0xff] }
 0x8a3   :  { %7699 = vrot.lane.b32.xlu1 %v16124_v4, %s10435_s11  ;;  %v7662_v36 = vpop.permute.xlu0 %7661  ;;  %v7166_v4 = vld [vmem:[#allocation3 + $0x151] sm:$0xff] }
 0x8a4   :  { %7851 = vst.msk [vmem:[#allocation4 + $0x18] sm:$0xff] %vm7847_vm6, %v7662_v36  ;;  %v6789_v36 = vld [vmem:[#allocation3 + $0x1e0] sm:$0xff] }
 0x8a5   :  { %v7279_v60 = vpop.permute.xlu1 %7278  ;;  %v7914_v57 = vld [vmem:[#allocation4 + $0x10] sm:$0xff]  ;;  %7316 = vrot.lane.b32.xlu0 %v7165_v3, %s10434_s1 }
 0x8a6   :  { %7467 = vst.msk [vmem:[#allocation4 + $0x20] sm:$0xff] %vm7462_vm5, %v7279_v60  ;;  %10279 = vmatprep.mubr.msk.f32.mxu1 %vm7985_vm7, %v7914_v57  ;;  %v7175_v57 = vld [vmem:[#allocation3 + $0x1e9] sm:$0xff] }
 0x8a7   :  { %6933 = vrot.lane.b32.xlu1 %v6781_v1, %s10433_s19  ;;  %v6896_v34 = vpop.permute.xlu0 %6895 }
 0x8a8   :  { %7083 = vst.msk [vmem:[#allocation4 + $0x28] sm:$0xff] %vm7077_vm4, %v6896_v34  ;;  %v7174_v34 = vld [vmem:[#allocation3 + $0x1e1] sm:$0xff] }
 0x8a9   :  { %v7664_v40 = vpop.permute.xlu1 %7663  ;;  %7701 = vrot.lane.b32.xlu0 %v16119_v33, %s10435_s11 }
 0x8aa   :  { %7852 = vst.msk [vmem:[#allocation4 + $0x20] sm:$0xff] %vm7847_vm6, %v7664_v40 }
 0x8ab   :  { %7318 = vrot.lane.b32.xlu1 %v7166_v4, %s10434_s1  ;;  %v7281_v29 = vpop.permute.xlu0 %7280  ;;  %v7915_v23 = vld [vmem:[#allocation4 + $0x18] sm:$0xff]  ;;  %v6405_v4 = vld [vmem:[#allocation3 + $0x1e2] sm:$0xff] }
 0x8ac   :  { %7468 = vst.msk [vmem:[#allocation4 + $0x28] sm:$0xff] %vm7462_vm5, %v7281_v29  ;;  %10280 = vmatmul.mubr.msk.f32.vlgmr.msra.gmra.mrb[0].mxu1 %vm7985_vm7, %v7915_v23 }
 0x8ad   :  { %v6898_v39 = vpop.permute.xlu1 %6897  ;;  %6935 = vrot.lane.b32.xlu0 %v6782_v32, %s10433_s19 }
 0x8ae   :  { %7084 = vst.msk [vmem:[#allocation4 + $0x30] sm:$0xff] %vm7077_vm4, %v6898_v39  ;;  %v6406_v39 = vld [vmem:[#allocation3 + $0x1ea] sm:$0xff] }
 0x8af   :  { %7703 = vrot.lane.b32.xlu1 %v16134_v44, %s10435_s11  ;;  %v7666_v33 = vpop.permute.xlu0 %7665  ;;  %v7168_v44 = vld [vmem:[#allocation3 + $0x169] sm:$0xff] }
 0x8b0   :  { %7853 = vst.msk [vmem:[#allocation4 + $0x28] sm:$0xff] %vm7847_vm6, %v7666_v33 }
 0x8b1   :  { %v7283_v61 = vpop.permute.xlu1 %7282  ;;  %v7916_v5 = vld [vmem:[#allocation4 + $0x20] sm:$0xff]  ;;  %7320 = vrot.lane.b32.xlu0 %v7167_v59, %s10434_s1 }
 0x8b2   :  { %7469 = vst.msk [vmem:[#allocation4 + $0x30] sm:$0xff] %vm7462_vm5, %v7283_v61  ;;  %10282 = vmatprep.mubr.msk.f32.mxu1 %vm7985_vm7, %v7916_v5  ;;  %v6792_v5 = vld [vmem:[#allocation3 + $0x200] sm:$0xff] }
 0x8b3   :  { %6937 = vrot.lane.b32.xlu1 %v6783_v14, %s10433_s19  ;;  %v6900_v31 = vpop.permute.xlu0 %6899 }
 0x8b4   :  { %7085 = vst.msk [vmem:[#allocation4 + $0x38] sm:$0xff] %vm7077_vm4, %v6900_v31  ;;  %v6791_v31 = vld [vmem:[#allocation3 + $0x1f8] sm:$0xff] }
 0x8b5   :  { %v7668_v58 = vpop.permute.xlu1 %7667  ;;  %7705 = vrot.lane.b32.xlu0 %v16129_v22, %s10435_s11 }
 0x8b6   :  { %7854 = vst.msk [vmem:[#allocation4 + $0x30] sm:$0xff] %vm7847_vm6, %v7668_v58 }
 0x8b7   :  { %7322 = vrot.lane.b32.xlu1 %v7168_v44, %s10434_s1  ;;  %v7285_v12 = vpop.permute.xlu0 %7284  ;;  %v7917_v53 = vld [vmem:[#allocation4 + $0x28] sm:$0xff] }
 0x8b8   :  { %7470 = vst.msk [vmem:[#allocation4 + $0x38] sm:$0xff] %vm7462_vm5, %v7285_v12  ;;  %10283 = vmatmul.mubr.msk.f32.gmra.mrb[2].mxu1 %vm7985_vm7, %v7917_v53  ;;  %v7177_v44 = vld [vmem:[#allocation3 + $0x201] sm:$0xff] }
 0x8b9   :  { %v6902_v9 = vpop.permute.xlu1 %6901  ;;  %6939 = vrot.lane.b32.xlu0 %v6784_v8, %s10433_s19  ;;  %v7176_v8 = vld [vmem:[#allocation3 + $0x1f9] sm:$0xff] }
 0x8ba   :  { %7086 = vst.msk [vmem:[#allocation4 + $0x40] sm:$0xff] %vm7077_vm4, %v6902_v9 }
 0x8bb   :  { %7707 = vrot.lane.b32.xlu1 %v16150_v49, %s10435_s11  ;;  %v7670_v22 = vpop.permute.xlu0 %7669  ;;  %v7170_v49 = vld [vmem:[#allocation3 + $0x181] sm:$0xff] }
 0x8bc   :  { %7855 = vst.msk [vmem:[#allocation4 + $0x38] sm:$0xff] %vm7847_vm6, %v7670_v22  ;;  %v6407_v22 = vld [vmem:[#allocation3 + $0x1fa] sm:$0xff] }
 0x8bd   :  { %v7287_v55 = vpop.permute.xlu1 %7286  ;;  %v7918_v18 = vld [vmem:[#allocation4 + $0x30] sm:$0xff]  ;;  %7324 = vrot.lane.b32.xlu0 %v7169_v16, %s10434_s1 }
 0x8be   :  { %7471 = vst.msk [vmem:[#allocation4 + $0x40] sm:$0xff] %vm7462_vm5, %v7287_v55  ;;  %10285 = vmatprep.mubr.msk.f32.mxu1 %vm7985_vm7, %v7918_v18 }
 0x8bf   :  { %6941 = vrot.lane.b32.xlu1 %v6785_v43, %s10433_s19  ;;  %v6904_v30 = vpop.permute.xlu0 %6903  ;;  %v6408_v43 = vld [vmem:[#allocation3 + $0x202] sm:$0xff] }
 0x8c0   :  { %7087 = vst.msk [vmem:[#allocation4 + $0x48] sm:$0xff] %vm7077_vm4, %v6904_v30 }
 0x8c1   :  { %v7672_v24 = vpop.permute.xlu1 %7671  ;;  %7709 = vrot.lane.b32.xlu0 %v16139_v26, %s10435_s11 }
 0x8c2   :  { %7856 = vst.msk [vmem:[#allocation4 + $0x40] sm:$0xff] %vm7847_vm6, %v7672_v24 }
 0x8c3   :  { %7326 = vrot.lane.b32.xlu1 %v7170_v49, %s10434_s1  ;;  %v7289_v10 = vpop.permute.xlu0 %7288  ;;  %v7919_v13 = vld [vmem:[#allocation4 + $0x38] sm:$0xff] }
 0x8c4   :  { %7472 = vst.msk [vmem:[#allocation4 + $0x48] sm:$0xff] %vm7462_vm5, %v7289_v10  ;;  %10286 = vmatmul.mubr.msk.f32.gmra.mrb[4].mxu1 %vm7985_vm7, %v7919_v13  ;;  %v6794_v49 = vld [vmem:[#allocation3 + $0x218] sm:$0xff] }
 0x8c5   :  { %v6906_v17 = vpop.permute.xlu1 %6905  ;;  %6943 = vrot.lane.b32.xlu0 %v6786_v27, %s10433_s19  ;;  %v6793_v27 = vld [vmem:[#allocation3 + $0x210] sm:$0xff] }
 0x8c6   :  { %7088 = vst.msk [vmem:[#allocation4 + $0x50] sm:$0xff] %vm7077_vm4, %v6906_v17 }
 0x8c7   :  { %7711 = vrot.lane.b32.xlu1 %v16163_v42, %s10435_s11  ;;  %v7674_v26 = vpop.permute.xlu0 %7673 }
 0x8c8   :  { %7857 = vst.msk [vmem:[#allocation4 + $0x48] sm:$0xff] %vm7847_vm6, %v7674_v26  ;;  %v7179_v26 = vld [vmem:[#allocation3 + $0x219] sm:$0xff] }
 0x8c9   :  { %v7291_v38 = vpop.permute.xlu1 %7290  ;;  %v7920_v54 = vld [vmem:[#allocation4 + $0x40] sm:$0xff]  ;;  %7328 = vrot.lane.b32.xlu0 %v7171_v63, %s10434_s1 }
 0x8ca   :  { %7473 = vst.msk [vmem:[#allocation4 + $0x50] sm:$0xff] %vm7462_vm5, %v7291_v38  ;;  %10288 = vmatprep.mubr.msk.f32.mxu1 %vm7985_vm7, %v7920_v54  ;;  %v7178_v38 = vld [vmem:[#allocation3 + $0x211] sm:$0xff] }
 0x8cb   :  { %6561 = vrot.lane.b32.xlu1 %v6402_v48, %s10432_s3  ;;  %v6908_v46 = vpop.permute.xlu0 %6907 }
 0x8cc   :  { %7089 = vst.msk [vmem:[#allocation4 + $0x58] sm:$0xff] %vm7077_vm4, %v6908_v46  ;;  %v6409_v46 = vld [vmem:[#allocation3 + $0x212] sm:$0xff] }
 0x8cd   :  { %v7676_v42 = vpop.permute.xlu1 %7675  ;;  %7713 = vrot.lane.b32.xlu0 %v6402_v48, %s10435_s11 }
 0x8ce   :  { %7858 = vst.msk [vmem:[#allocation4 + $0x50] sm:$0xff] %vm7847_vm6, %v7676_v42 }
 0x8cf   :  { %6947 = vrot.lane.b32.xlu1 %v6788_v15, %s10433_s19  ;;  %v7293_v21 = vpop.permute.xlu0 %7292  ;;  %v7921_v6 = vld [vmem:[#allocation4 + $0x48] sm:$0xff] }
 0x8d0   :  { %7474 = vst.msk [vmem:[#allocation4 + $0x58] sm:$0xff] %vm7462_vm5, %v7293_v21  ;;  %10289 = vmatmul.mubr.msk.f32.gmra.mrb[6].mxu1 %vm7985_vm7, %v7921_v6 }
 0x8d1   :  { %v6910_v62 = vpop.permute.xlu1 %6909  ;;  %6945 = vrot.lane.b32.xlu0 %v6787_v11, %s10433_s19  ;;  %v6410_v11 = vld [vmem:[#allocation3 + $0x21a] sm:$0xff] }
 0x8d2   :  { %7090 = vst.msk [vmem:[#allocation4 + $0x60] sm:$0xff] %vm7077_vm4, %v6910_v62  ;;  %v6796_v62 = vld [vmem:[#allocation3 + $0x230] sm:$0xff] }
 0x8d3   :  { %7332 = vrot.lane.b32.xlu1 %v7173_v2, %s10434_s1  ;;  %v7678_v37 = vpop.permute.xlu0 %7677 }
 0x8d4   :  { %7859 = vst.msk [vmem:[#allocation4 + $0x58] sm:$0xff] %vm7847_vm6, %v7678_v37  ;;  %v6795_v37 = vld [vmem:[#allocation3 + $0x228] sm:$0xff] }
 0x8d5   :  { %v7295_v51 = vpop.permute.xlu1 %7294  ;;  %v7922_v45 = vld [vmem:[#allocation4 + $0x50] sm:$0xff]  ;;  %7330 = vrot.lane.b32.xlu0 %v7172_v19, %s10434_s1 }
 0x8d6   :  { %7475 = vst.msk [vmem:[#allocation4 + $0x60] sm:$0xff] %vm7462_vm5, %v7295_v51  ;;  %10291 = vmatprep.mubr.msk.f32.mxu1 %vm7985_vm7, %v7922_v45 }
 0x8d7   :  { %6563 = vrot.lane.b32.xlu1 %v6403_v50, %s10432_s3  ;;  %v6912_v47 = vpop.permute.xlu0 %6911  ;;  %v7181_v50 = vld [vmem:[#allocation3 + $0x231] sm:$0xff] }
 0x8d8   :  { %7091 = vst.msk [vmem:[#allocation4 + $0x68] sm:$0xff] %vm7077_vm4, %v6912_v47  ;;  %v7180_v47 = vld [vmem:[#allocation3 + $0x229] sm:$0xff] }
 0x8d9   :  { %v7680_v52 = vpop.permute.xlu1 %7679  ;;  %7715 = vrot.lane.b32.xlu0 %v7557_v56, %s10435_s11 }
 0x8da   :  { %7860 = vst.msk [vmem:[#allocation4 + $0x60] sm:$0xff] %vm7847_vm6, %v7680_v52 }
 0x8db   :  { %6565 = vrot.lane.b32.xlu1 %v6404_v25, %s10432_s3  ;;  %v7297_v0 = vpop.permute.xlu0 %7296  ;;  %v7923_v7 = vld [vmem:[#allocation4 + $0x58] sm:$0xff]  ;;  %v6411_v25 = vld [vmem:[#allocation3 + $0x22a] sm:$0xff] }
 0x8dc   :  { %7476 = vst.msk [vmem:[#allocation4 + $0x68] sm:$0xff] %vm7462_vm5, %v7297_v0  ;;  %10292 = vmatmul.mubr.msk.f32.gmra.mrb[8].mxu1 %vm7985_vm7, %v7923_v7 }
 0x8dd   :  { %v6914_v35 = vpop.permute.xlu1 %6913  ;;  %7717 = vrot.lane.b32.xlu0 %v7558_v41, %s10435_s11 }
 0x8de   :  { %7092 = vst.msk [vmem:[#allocation4 + $0x70] sm:$0xff] %vm7077_vm4, %v6914_v35  ;;  %v6412_v35 = vld [vmem:[#allocation3 + $0x232] sm:$0xff] }
 0x8df   :  { %6951 = vrot.lane.b32.xlu1 %v6790_v28, %s10433_s19  ;;  %v7682_v20 = vpop.permute.xlu0 %7681 }
 0x8e0   :  { %7861 = vst.msk [vmem:[#allocation4 + $0x68] sm:$0xff] %vm7847_vm6, %v7682_v20 }
 0x8e1   :  { %v7299_v3 = vpop.permute.xlu1 %7298  ;;  %v7924_v60 = vld [vmem:[#allocation4 + $0x60] sm:$0xff]  ;;  %6949 = vrot.lane.b32.xlu0 %v6789_v36, %s10433_s19 }
 0x8e2   :  { %7477 = vst.msk [vmem:[#allocation4 + $0x70] sm:$0xff] %vm7462_vm5, %v7299_v3  ;;  %10294 = vmatprep.mubr.msk.f32.mxu1 %vm7985_vm7, %v7924_v60  ;;  %v6798_v3 = vld [vmem:[#allocation3 + $0x248] sm:$0xff] }
 0x8e3   :  { %7336 = vrot.lane.b32.xlu1 %v7175_v57, %s10434_s1  ;;  %v6916_v1 = vpop.permute.xlu0 %6915  ;;  %v6797_v57 = vld [vmem:[#allocation3 + $0x240] sm:$0xff] }
 0x8e4   :  { %7093 = vst.msk [vmem:[#allocation4 + $0x78] sm:$0xff] %vm7077_vm4, %v6916_v1 }
 0x8e5   :  { %v7684_v40 = vpop.permute.xlu1 %7683  ;;  %7334 = vrot.lane.b32.xlu0 %v7174_v34, %s10434_s1  ;;  %v7183_v34 = vld [vmem:[#allocation3 + $0x249] sm:$0xff] }
 0x8e6   :  { %7862 = vst.msk [vmem:[#allocation4 + $0x70] sm:$0xff] %vm7847_vm6, %v7684_v40 }
 0x8e7   :  { %6567 = vrot.lane.b32.xlu1 %v6405_v4, %s10432_s3  ;;  %v7301_v29 = vpop.permute.xlu0 %7300  ;;  %v7925_v23 = vld [vmem:[#allocation4 + $0x68] sm:$0xff] }
 0x8e8   :  { %7478 = vst.msk [vmem:[#allocation4 + $0x78] sm:$0xff] %vm7462_vm5, %v7301_v29  ;;  %10295 = vmatmul.mubr.msk.f32.gmra.mrb[10].mxu1 %vm7985_vm7, %v7925_v23  ;;  %v7182_v29 = vld [vmem:[#allocation3 + $0x241] sm:$0xff] }
 0x8e9   :  { %v6918_v32 = vpop.permute.xlu1 %6917  ;;  %7719 = vrot.lane.b32.xlu0 %v6405_v4, %s10435_s11 }
 0x8ea   :  { %7094 = vst.msk [vmem:[#allocation4 + $0x80] sm:$0xff] %vm7077_vm4, %v6918_v32  ;;  %v6413_v32 = vld [vmem:[#allocation3 + $0x242] sm:$0xff] }
 0x8eb   :  { %6569 = vrot.lane.b32.xlu1 %v6406_v39, %s10432_s3  ;;  %v7686_v33 = vpop.permute.xlu0 %7685 }
 0x8ec   :  { %7863 = vst.msk [vmem:[#allocation4 + $0x78] sm:$0xff] %vm7847_vm6, %v7686_v33 }
 0x8ed   :  { %v7303_v59 = vpop.permute.xlu1 %7302  ;;  %v7926_v61 = vld [vmem:[#allocation4 + $0x70] sm:$0xff]  ;;  %7721 = vrot.lane.b32.xlu0 %v6406_v39, %s10435_s11 }
 0x8ee   :  { %7479 = vst.msk [vmem:[#allocation4 + $0x80] sm:$0xff] %vm7462_vm5, %v7303_v59  ;;  %10297 = vmatprep.mubr.msk.f32.mxu1 %vm7985_vm7, %v7926_v61  ;;  %v6414_v61 = vld [vmem:[#allocation3 + $0x24a] sm:$0xff] }
 0x8ef   :  { %6955 = vrot.lane.b32.xlu1 %v6792_v5, %s10433_s19  ;;  %v6920_v14 = vpop.permute.xlu0 %6919 }
 0x8f0   :  { %7095 = vst.msk [vmem:[#allocation4 + $0x88] sm:$0xff] %vm7077_vm4, %v6920_v14 }
 0x8f1   :  { %v7688_v58 = vpop.permute.xlu1 %7687  ;;  %6953 = vrot.lane.b32.xlu0 %v6791_v31, %s10433_s19  ;;  %v6800_v31 = vld [vmem:[#allocation3 + $0x260] sm:$0xff] }
 0x8f2   :  { %7864 = vst.msk [vmem:[#allocation4 + $0x80] sm:$0xff] %vm7847_vm6, %v7688_v58 }
 0x8f3   :  { %7340 = vrot.lane.b32.xlu1 %v7177_v44, %s10434_s1  ;;  %v7305_v12 = vpop.permute.xlu0 %7304  ;;  %v7927_v53 = vld [vmem:[#allocation4 + $0x78] sm:$0xff] }
 0x8f4   :  { %7480 = vst.msk [vmem:[#allocation4 + $0x88] sm:$0xff] %vm7462_vm5, %v7305_v12  ;;  %10298 = vmatmul.mubr.msk.f32.gmra.mrb[12].mxu1 %vm7985_vm7, %v7927_v53  ;;  %v6799_v12 = vld [vmem:[#allocation3 + $0x258] sm:$0xff] }
 0x8f5   :  { %v6922_v9 = vpop.permute.xlu1 %6921  ;;  %7338 = vrot.lane.b32.xlu0 %v7176_v8, %s10434_s1  ;;  %v7185_v8 = vld [vmem:[#allocation3 + $0x261] sm:$0xff] }
 0x8f6   :  { %7096 = vst.msk [vmem:[#allocation4 + $0x90] sm:$0xff] %vm7077_vm4, %v6922_v9 }
 0x8f7   :  { %6571 = vrot.lane.b32.xlu1 %v6407_v22, %s10432_s3  ;;  %v7690_v16 = vpop.permute.xlu0 %7689 }
 0x8f8   :  { %7865 = vst.msk [vmem:[#allocation4 + $0x88] sm:$0xff] %vm7847_vm6, %v7690_v16 }
 0x8f9   :  { %v7307_v55 = vpop.permute.xlu1 %7306  ;;  %v7928_v18 = vld [vmem:[#allocation4 + $0x80] sm:$0xff]  ;;  %7723 = vrot.lane.b32.xlu0 %v6407_v22, %s10435_s11 }
 0x8fa   :  { %7481 = vst.msk [vmem:[#allocation4 + $0x90] sm:$0xff] %vm7462_vm5, %v7307_v55  ;;  %10300 = vmatprep.mubr.msk.f32.mxu1 %vm7985_vm7, %v7928_v18  ;;  %v7184_v22 = vld [vmem:[#allocation3 + $0x259] sm:$0xff] }
 0x8fb   :  { %6573 = vrot.lane.b32.xlu1 %v6408_v43, %s10432_s3  ;;  %v6924_v30 = vpop.permute.xlu0 %6923  ;;  %v6415_v18 = vld [vmem:[#allocation3 + $0x25a] sm:$0xff] }
 0x8fc   :  { %7097 = vst.msk [vmem:[#allocation4 + $0x98] sm:$0xff] %vm7077_vm4, %v6924_v30 }
 0x8fd   :  { %v7692_v24 = vpop.permute.xlu1 %7691  ;;  %7725 = vrot.lane.b32.xlu0 %v6408_v43, %s10435_s11 }
 0x8fe   :  { %7866 = vst.msk [vmem:[#allocation4 + $0x90] sm:$0xff] %vm7847_vm6, %v7692_v24  ;;  %v6416_v24 = vld [vmem:[#allocation3 + $0x262] sm:$0xff] }
 0x8ff   :  { %6959 = vrot.lane.b32.xlu1 %v6794_v49, %s10433_s19  ;;  %v7309_v10 = vpop.permute.xlu0 %7308  ;;  %v7929_v13 = vld [vmem:[#allocation4 + $0x88] sm:$0xff] }
 0x900   :  { %7482 = vst.msk [vmem:[#allocation4 + $0x98] sm:$0xff] %vm7462_vm5, %v7309_v10  ;;  %10301 = vmatmul.mubr.msk.f32.gmra.mrb[14].mxu1 %vm7985_vm7, %v7929_v13 }
 0x901   :  { %v6926_v17 = vpop.permute.xlu1 %6925  ;;  %6957 = vrot.lane.b32.xlu0 %v6793_v27, %s10433_s19  ;;  %v6802_v27 = vld [vmem:[#allocation3 + $0x278] sm:$0xff] }
 0x902   :  { %7098 = vst.msk [vmem:[#allocation4 + $0xa0] sm:$0xff] %vm7077_vm4, %v6926_v17 }
 0x903   :  { %7344 = vrot.lane.b32.xlu1 %v7179_v26, %s10434_s1  ;;  %v7694_v63 = vpop.permute.xlu0 %7693  ;;  %v6801_v26 = vld [vmem:[#allocation3 + $0x270] sm:$0xff] }
 0x904   :  { %7867 = vst.msk [vmem:[#allocation4 + $0x98] sm:$0xff] %vm7847_vm6, %v7694_v63 }
 0x905   :  { %v7311_v54 = vpop.permute.xlu1 %7310  ;;  %v7930_v48 = vld [vmem:[#allocation4 + $0x90] sm:$0xff]  ;;  %7342 = vrot.lane.b32.xlu0 %v7178_v38, %s10434_s1 }
 0x906   :  { %7483 = vst.msk [vmem:[#allocation4 + $0xa0] sm:$0xff] %vm7462_vm5, %v7311_v54  ;;  %10303 = vmatprep.mubr.msk.f32.mxu1 %vm7985_vm7, %v7930_v48  ;;  %v7187_v54 = vld [vmem:[#allocation3 + $0x279] sm:$0xff] }
 0x907   :  { %6575 = vrot.lane.b32.xlu1 %v6409_v46, %s10432_s3  ;;  %v6928_v15 = vpop.permute.xlu0 %6927 }
 0x908   :  { %7099 = vst.msk [vmem:[#allocation4 + $0xa8] sm:$0xff] %vm7077_vm4, %v6928_v15 }
 0x909   :  { %v7696_v42 = vpop.permute.xlu1 %7695  ;;  %7727 = vrot.lane.b32.xlu0 %v6409_v46, %s10435_s11  ;;  %v7186_v46 = vld [vmem:[#allocation3 + $0x271] sm:$0xff] }
 0x90a   :  { %7868 = vst.msk [vmem:[#allocation4 + $0xa0] sm:$0xff] %vm7847_vm6, %v7696_v42  ;;  %v6417_v42 = vld [vmem:[#allocation3 + $0x272] sm:$0xff] }
 0x90b   :  { %6577 = vrot.lane.b32.xlu1 %v6410_v11, %s10432_s3  ;;  %v7313_v21 = vpop.permute.xlu0 %7312  ;;  %v7931_v6 = vld [vmem:[#allocation4 + $0x98] sm:$0xff] }
 0x90c   :  { %7484 = vst.msk [vmem:[#allocation4 + $0xa8] sm:$0xff] %vm7462_vm5, %v7313_v21  ;;  %10304 = vmatmul.mubr.msk.f32.gmra.mrb[16].mxu1 %vm7985_vm7, %v7931_v6 }
 0x90d   :  { %v6930_v2 = vpop.permute.xlu1 %6929  ;;  %7729 = vrot.lane.b32.xlu0 %v6410_v11, %s10435_s11 }
 0x90e   :  { %7100 = vst.msk [vmem:[#allocation4 + $0xb0] sm:$0xff] %vm7077_vm4, %v6930_v2  ;;  %v6418_v2 = vld [vmem:[#allocation3 + $0x27a] sm:$0xff] }
 0x90f   :  { %6963 = vrot.lane.b32.xlu1 %v6796_v62, %s10433_s19  ;;  %v7698_v19 = vpop.permute.xlu0 %7697 }
 0x910   :  { %7869 = vst.msk [vmem:[#allocation4 + $0xa8] sm:$0xff] %vm7847_vm6, %v7698_v19 }
 0x911   :  { %v7315_v51 = vpop.permute.xlu1 %7314  ;;  %v7932_v45 = vld [vmem:[#allocation4 + $0xa0] sm:$0xff]  ;;  %6961 = vrot.lane.b32.xlu0 %v6795_v37, %s10433_s19  ;;  %v6804_v37 = vld [vmem:[#allocation3 + $0x290] sm:$0xff] }
 0x912   :  { %7485 = vst.msk [vmem:[#allocation4 + $0xb0] sm:$0xff] %vm7462_vm5, %v7315_v51  ;;  %10306 = vmatprep.mubr.msk.f32.mxu1 %vm7985_vm7, %v7932_v45  ;;  %v6803_v45 = vld [vmem:[#allocation3 + $0x288] sm:$0xff] }
 0x913   :  { %7348 = vrot.lane.b32.xlu1 %v7181_v50, %s10434_s1  ;;  %v6932_v56 = vpop.permute.xlu0 %6931 }
 0x914   :  { %7101 = vst.msk [vmem:[#allocation4 + $0xb8] sm:$0xff] %vm7077_vm4, %v6932_v56  ;;  %v7189_v56 = vld [vmem:[#allocation3 + $0x291] sm:$0xff] }
 0x915   :  { %v7700_v52 = vpop.permute.xlu1 %7699  ;;  %7346 = vrot.lane.b32.xlu0 %v7180_v47, %s10434_s1 }
 0x916   :  { %7870 = vst.msk [vmem:[#allocation4 + $0xb0] sm:$0xff] %vm7847_vm6, %v7700_v52 }
 0x917   :  { %6579 = vrot.lane.b32.xlu1 %v6411_v25, %s10432_s3  ;;  %v7317_v41 = vpop.permute.xlu0 %7316  ;;  %v7933_v0 = vld [vmem:[#allocation4 + $0xa8] sm:$0xff] }
 0x918   :  { %7486 = vst.msk [vmem:[#allocation4 + $0xb8] sm:$0xff] %vm7462_vm5, %v7317_v41  ;;  %10307 = vmatmul.mubr.msk.f32.gmra.mrb[18].mxu1 %vm7985_vm7, %v7933_v0  ;;  %v6419_v0 = vld [vmem:[#allocation3 + $0x28a] sm:$0xff] }
 0x919   :  { %v6934_v7 = vpop.permute.xlu1 %6933  ;;  %7731 = vrot.lane.b32.xlu0 %v6411_v25, %s10435_s11  ;;  %v7188_v25 = vld [vmem:[#allocation3 + $0x289] sm:$0xff] }
 0x91a   :  { %7102 = vst.msk [vmem:[#allocation4 + $0xc0] sm:$0xff] %vm7077_vm4, %v6934_v7 }
 0x91b   :  { %6581 = vrot.lane.b32.xlu1 %v6412_v35, %s10432_s3  ;;  %v7702_v28 = vpop.permute.xlu0 %7701 }
 0x91c   :  { %7871 = vst.msk [vmem:[#allocation4 + $0xb8] sm:$0xff] %vm7847_vm6, %v7702_v28 }
 0x91d   :  { %v7319_v20 = vpop.permute.xlu1 %7318  ;;  %v7934_v36 = vld [vmem:[#allocation4 + $0xb0] sm:$0xff]  ;;  %7733 = vrot.lane.b32.xlu0 %v6412_v35, %s10435_s11 }
 0x91e   :  { %7487 = vst.msk [vmem:[#allocation4 + $0xc0] sm:$0xff] %vm7462_vm5, %v7319_v20  ;;  %10309 = vmatprep.mubr.msk.f32.mxu1 %vm7985_vm7, %v7934_v36  ;;  %v6420_v20 = vld [vmem:[#allocation3 + $0x292] sm:$0xff] }
 0x91f   :  { %6967 = vrot.lane.b32.xlu1 %v6798_v3, %s10433_s19  ;;  %v6936_v60 = vpop.permute.xlu0 %6935 }
 0x920   :  { %7103 = vst.msk [vmem:[#allocation4 + $0xc8] sm:$0xff] %vm7077_vm4, %v6936_v60  ;;  %v6806_v60 = vld [vmem:[#allocation3 + $0x2a8] sm:$0xff] }
 0x921   :  { %v7704_v1 = vpop.permute.xlu1 %7703  ;;  %6965 = vrot.lane.b32.xlu0 %v6797_v57, %s10433_s19 }
 0x922   :  { %7872 = vst.msk [vmem:[#allocation4 + $0xc0] sm:$0xff] %vm7847_vm6, %v7704_v1  ;;  %v6805_v1 = vld [vmem:[#allocation3 + $0x2a0] sm:$0xff] }
 0x923   :  { %7352 = vrot.lane.b32.xlu1 %v7183_v34, %s10434_s1  ;;  %v7321_v40 = vpop.permute.xlu0 %7320  ;;  %v7935_v4 = vld [vmem:[#allocation4 + $0xb8] sm:$0xff] }
 0x924   :  { %7488 = vst.msk [vmem:[#allocation4 + $0xc8] sm:$0xff] %vm7462_vm5, %v7321_v40  ;;  %10310 = vmatmul.mubr.msk.f32.gmra.mrb[20].mxu1 %vm7985_vm7, %v7935_v4  ;;  %v7191_v40 = vld [vmem:[#allocation3 + $0x2a9] sm:$0xff] }
 0x925   :  { %v6938_v23 = vpop.permute.xlu1 %6937  ;;  %7350 = vrot.lane.b32.xlu0 %v7182_v29, %s10434_s1 }
 0x926   :  { %7104 = vst.msk [vmem:[#allocation4 + $0xd0] sm:$0xff] %vm7077_vm4, %v6938_v23  ;;  %v7190_v23 = vld [vmem:[#allocation3 + $0x2a1] sm:$0xff] }
 0x927   :  { %6583 = vrot.lane.b32.xlu1 %v6413_v32, %s10432_s3  ;;  %v7706_v39 = vpop.permute.xlu0 %7705 }
 0x928   :  { %7873 = vst.msk [vmem:[#allocation4 + $0xc8] sm:$0xff] %vm7847_vm6, %v7706_v39  ;;  %v6421_v39 = vld [vmem:[#allocation3 + $0x2a2] sm:$0xff] }
 0x929   :  { %v7323_v33 = vpop.permute.xlu1 %7322  ;;  %v7936_v59 = vld [vmem:[#allocation4 + $0xc0] sm:$0xff]  ;;  %7735 = vrot.lane.b32.xlu0 %v6413_v32, %s10435_s11 }
 0x92a   :  { %7489 = vst.msk [vmem:[#allocation4 + $0xd0] sm:$0xff] %vm7462_vm5, %v7323_v33  ;;  %10312 = vmatprep.mubr.msk.f32.mxu1 %vm7985_vm7, %v7936_v59 }
 0x92b   :  { %6585 = vrot.lane.b32.xlu1 %v6414_v61, %s10432_s3  ;;  %v6940_v5 = vpop.permute.xlu0 %6939 }
 0x92c   :  { %7105 = vst.msk [vmem:[#allocation4 + $0xd8] sm:$0xff] %vm7077_vm4, %v6940_v5  ;;  %v6422_v5 = vld [vmem:[#allocation3 + $0x2aa] sm:$0xff] }
 0x92d   :  { %v7708_v14 = vpop.permute.xlu1 %7707  ;;  %7737 = vrot.lane.b32.xlu0 %v6414_v61, %s10435_s11 }
 0x92e   :  { %7874 = vst.msk [vmem:[#allocation4 + $0xd0] sm:$0xff] %vm7847_vm6, %v7708_v14 }
 0x92f   :  { %6971 = vrot.lane.b32.xlu1 %v6800_v31, %s10433_s19  ;;  %v7325_v58 = vpop.permute.xlu0 %7324  ;;  %v7937_v44 = vld [vmem:[#allocation4 + $0xc8] sm:$0xff] }
 0x930   :  { %7490 = vst.msk [vmem:[#allocation4 + $0xd8] sm:$0xff] %vm7462_vm5, %v7325_v58  ;;  %10313 = vmatmul.mubr.msk.f32.gmra.mrb[22].mxu1 %vm7985_vm7, %v7937_v44  ;;  %v6808_v58 = vld [vmem:[#allocation3 + $0x2c0] sm:$0xff] }
 0x931   :  { %v6942_v53 = vpop.permute.xlu1 %6941  ;;  %6969 = vrot.lane.b32.xlu0 %v6799_v12, %s10433_s19  ;;  %v6807_v12 = vld [vmem:[#allocation3 + $0x2b8] sm:$0xff] }
 0x932   :  { %7106 = vst.msk [vmem:[#allocation4 + $0xe0] sm:$0xff] %vm7077_vm4, %v6942_v53 }
 0x933   :  { %7356 = vrot.lane.b32.xlu1 %v7185_v8, %s10434_s1  ;;  %v7710_v9 = vpop.permute.xlu0 %7709  ;;  %v7193_v8 = vld [vmem:[#allocation3 + $0x2c1] sm:$0xff] }
 0x934   :  { %7875 = vst.msk [vmem:[#allocation4 + $0xd8] sm:$0xff] %vm7847_vm6, %v7710_v9 }
 0x935   :  { %v7327_v16 = vpop.permute.xlu1 %7326  ;;  %v7938_v55 = vld [vmem:[#allocation4 + $0xd0] sm:$0xff]  ;;  %7354 = vrot.lane.b32.xlu0 %v7184_v22, %s10434_s1 }
 0x936   :  { %7491 = vst.msk [vmem:[#allocation4 + $0xe0] sm:$0xff] %vm7462_vm5, %v7327_v16  ;;  %10315 = vmatprep.mubr.msk.f32.mxu1 %vm7985_vm7, %v7938_v55  ;;  %v7192_v16 = vld [vmem:[#allocation3 + $0x2b9] sm:$0xff] }
 0x937   :  { %6587 = vrot.lane.b32.xlu1 %v6415_v18, %s10432_s3  ;;  %v6944_v43 = vpop.permute.xlu0 %6943 }
 0x938   :  { %7107 = vst.msk [vmem:[#allocation4 + $0xe8] sm:$0xff] %vm7077_vm4, %v6944_v43 }
 0x939   :  { %v7712_v30 = vpop.permute.xlu1 %7711  ;;  %7739 = vrot.lane.b32.xlu0 %v6415_v18, %s10435_s11 }
 0x93a   :  { %7876 = vst.msk [vmem:[#allocation4 + $0xe0] sm:$0xff] %vm7847_vm6, %v7712_v30 }
 0x93b   :  { %6589 = vrot.lane.b32.xlu1 %v6416_v24, %s10432_s3  ;;  %v7329_v49 = vpop.permute.xlu0 %7328  ;;  %v7939_v10 = vld [vmem:[#allocation4 + $0xd8] sm:$0xff] }
 0x93c   :  { %7492 = vst.msk [vmem:[#allocation4 + $0xe8] sm:$0xff] %vm7462_vm5, %v7329_v49  ;;  %10316 = vmatmul.mubr.msk.f32.gmra.mrb[24].mxu1 %vm7985_vm7, %v7939_v10  ;;  %v6423_v49 = vld [vmem:[#allocation3 + $0x2ba] sm:$0xff] }
 0x93d   :  { %v6562_v13 = vpop.permute.xlu1 %6561  ;;  %7741 = vrot.lane.b32.xlu0 %v6416_v24, %s10435_s11 }
 0x93e   :  { %6723 = vst.msk [vmem:[#allocation4 + $0xf8] sm:$0xff] %vm6691_vm3, %v6562_v13 }
 0x93f   :  { %6975 = vrot.lane.b32.xlu1 %v6802_v27, %s10433_s19  ;;  %v7714_v17 = vpop.permute.xlu0 %7713 }
 0x940   :  { %7877 = vst.msk [vmem:[#allocation4 + $0xe8] sm:$0xff] %vm7847_vm6, %v7714_v17 }
 0x941   :  { %v6948_v63 = vpop.permute.xlu1 %6947  ;;  %v7940_v38 = vld [vmem:[#allocation4 + $0xe0] sm:$0xff]  ;;  %6973 = vrot.lane.b32.xlu0 %v6801_v26, %s10433_s19 }
 0x942   :  { %7109 = vst.msk [vmem:[#allocation4 + $0xf8] sm:$0xff] %vm7077_vm4, %v6948_v63  ;;  %10318 = vmatprep.mubr.msk.f32.mxu1 %vm7985_vm7, %v7940_v38 }
 0x943   :  { %7360 = vrot.lane.b32.xlu1 %v7187_v54, %s10434_s1  ;;  %v6946_v48 = vpop.permute.xlu0 %6945 }
 0x944   :  { %7108 = vst.msk [vmem:[#allocation4 + $0xf0] sm:$0xff] %vm7077_vm4, %v6946_v48 }
 0x945   :  { %v7333_v15 = vpop.permute.xlu1 %7332  ;;  %7358 = vrot.lane.b32.xlu0 %v7186_v46, %s10434_s1  ;;  %v6424_v46 = vld [vmem:[#allocation3 + $0x2c2] sm:$0xff] }
 0x946   :  { %7494 = vst.msk [vmem:[#allocation4 + $0xf8] sm:$0xff] %vm7462_vm5, %v7333_v15 }
 0x947   :  { %6591 = vrot.lane.b32.xlu1 %v6417_v42, %s10432_s3  ;;  %v7331_v11 = vpop.permute.xlu0 %7330  ;;  %v7941_v21 = vld [vmem:[#allocation4 + $0xe8] sm:$0xff] }
 0x948   :  { %7493 = vst.msk [vmem:[#allocation4 + $0xf0] sm:$0xff] %vm7462_vm5, %v7331_v11  ;;  %10319 = vmatmul.mubr.msk.f32.gmra.mrb[26].mxu1 %vm7985_vm7, %v7941_v21  ;;  %v6810_v11 = vld [vmem:[#allocation3 + $0x2d8] sm:$0xff] }
 0x949   :  { %v6564_v6 = vpop.permute.xlu1 %6563  ;;  %7743 = vrot.lane.b32.xlu0 %v6417_v42, %s10435_s11 }
 0x94a   :  { %6724 = vst.msk [vmem:[#allocation4 + $0x100] sm:$0xff] %vm6691_vm3, %v6564_v6 }
 0x94b   :  { %6593 = vrot.lane.b32.xlu1 %v6418_v2, %s10432_s3  ;;  %v7716_v62 = vpop.permute.xlu0 %7715 }
 0x94c   :  { %7878 = vst.msk [vmem:[#allocation4 + $0xf0] sm:$0xff] %vm7847_vm6, %v7716_v62  ;;  %v6809_v62 = vld [vmem:[#allocation3 + $0x2d0] sm:$0xff] }
 0x94d   :  { %v6566_v19 = vpop.permute.xlu1 %6565  ;;  %7745 = vrot.lane.b32.xlu0 %v6418_v2, %s10435_s11 }
 0x94e   :  { %6725 = vst.msk [vmem:[#allocation4 + $0x108] sm:$0xff] %vm6691_vm3, %v6566_v19 }
 0x94f   :  { %6979 = vrot.lane.b32.xlu1 %v6804_v37, %s10433_s19  ;;  %v7718_v51 = vpop.permute.xlu0 %7717 }
 0x950   :  { %7879 = vst.msk [vmem:[#allocation4 + $0xf8] sm:$0xff] %vm7847_vm6, %v7718_v51 }
 0x951   :  { %v6952_v50 = vpop.permute.xlu1 %6951  ;;  %6977 = vrot.lane.b32.xlu0 %v6803_v45, %s10433_s19 }
 0x952   :  { %7111 = vst.msk [vmem:[#allocation4 + $0x108] sm:$0xff] %vm7077_vm4, %v6952_v50  ;;  %v7195_v50 = vld [vmem:[#allocation3 + $0x2d9] sm:$0xff] }
 0x953   :  { %7364 = vrot.lane.b32.xlu1 %v7189_v56, %s10434_s1  ;;  %v6950_v47 = vpop.permute.xlu0 %6949  ;;  %v7942_v52 = vld [vmem:[#allocation4 + $0xf0] sm:$0xff] }
 0x954   :  { %7110 = vst.msk [vmem:[#allocation4 + $0x100] sm:$0xff] %vm7077_vm4, %v6950_v47  ;;  %10321 = vmatprep.mubr.msk.f32.mxu1 %vm7985_vm7, %v7942_v52 }
 0x955   :  { %v7337_v41 = vpop.permute.xlu1 %7336  ;;  %7362 = vrot.lane.b32.xlu0 %v7188_v25, %s10434_s1 }
 0x956   :  { %7496 = vst.msk [vmem:[#allocation4 + $0x108] sm:$0xff] %vm7462_vm5, %v7337_v41 }
 0x957   :  { %6595 = vrot.lane.b32.xlu1 %v6419_v0, %s10432_s3  ;;  %v7335_v7 = vpop.permute.xlu0 %7334  ;;  %v7943_v35 = vld [vmem:[#allocation4 + $0xf8] sm:$0xff] }
 0x958   :  { %7495 = vst.msk [vmem:[#allocation4 + $0x100] sm:$0xff] %vm7462_vm5, %v7335_v7  ;;  %10322 = vmatmul.mubr.msk.f32.gmra.mrb[28].mxu1 %vm7985_vm7, %v7943_v35  ;;  %v7194_v35 = vld [vmem:[#allocation3 + $0x2d1] sm:$0xff] }
 0x959   :  { %v6568_v28 = vpop.permute.xlu1 %6567  ;;  %7747 = vrot.lane.b32.xlu0 %v6419_v0, %s10435_s11 }
 0x95a   :  { %6726 = vst.msk [vmem:[#allocation4 + $0x110] sm:$0xff] %vm6691_vm3, %v6568_v28 }
 0x95b   :  { %6597 = vrot.lane.b32.xlu1 %v6420_v20, %s10432_s3  ;;  %v7720_v36 = vpop.permute.xlu0 %7719 }
 0x95c   :  { %7880 = vst.msk [vmem:[#allocation4 + $0x100] sm:$0xff] %vm7847_vm6, %v7720_v36  ;;  %v6425_v36 = vld [vmem:[#allocation3 + $0x2d2] sm:$0xff] }
 0x95d   :  { %v6570_v3 = vpop.permute.xlu1 %6569  ;;  %7749 = vrot.lane.b32.xlu0 %v6420_v20, %s10435_s11 }
 0x95e   :  { %6727 = vst.msk [vmem:[#allocation4 + $0x118] sm:$0xff] %vm6691_vm3, %v6570_v3 }
 0x95f   :  { %6983 = vrot.lane.b32.xlu1 %v6806_v60, %s10433_s19  ;;  %v7722_v57 = vpop.permute.xlu0 %7721 }
 0x960   :  { %7881 = vst.msk [vmem:[#allocation4 + $0x108] sm:$0xff] %vm7847_vm6, %v7722_v57 }
 0x961   :  { %v6956_v34 = vpop.permute.xlu1 %6955  ;;  %6981 = vrot.lane.b32.xlu0 %v6805_v1, %s10433_s19 }
 0x962   :  { %7113 = vst.msk [vmem:[#allocation4 + $0x118] sm:$0xff] %vm7077_vm4, %v6956_v34  ;;  %v6426_v34 = vld [vmem:[#allocation3 + $0x2da] sm:$0xff] }
 0x963   :  { %7368 = vrot.lane.b32.xlu1 %v7191_v40, %s10434_s1  ;;  %v6954_v4 = vpop.permute.xlu0 %6953  ;;  %v7944_v29 = vld [vmem:[#allocation4 + $0x100] sm:$0xff] }
 0x964   :  { %7112 = vst.msk [vmem:[#allocation4 + $0x110] sm:$0xff] %vm7077_vm4, %v6954_v4  ;;  %10324 = vmatprep.mubr.msk.f32.mxu1 %vm7985_vm7, %v7944_v29 }
 0x965   :  { %v7341_v32 = vpop.permute.xlu1 %7340  ;;  %7366 = vrot.lane.b32.xlu0 %v7190_v23, %s10434_s1 }
 0x966   :  { %7498 = vst.msk [vmem:[#allocation4 + $0x118] sm:$0xff] %vm7462_vm5, %v7341_v32 }
 0x967   :  { %6599 = vrot.lane.b32.xlu1 %v6421_v39, %s10432_s3  ;;  %v7339_v33 = vpop.permute.xlu0 %7338  ;;  %v7945_v59 = vld [vmem:[#allocation4 + $0x108] sm:$0xff] }
 0x968   :  { %7497 = vst.msk [vmem:[#allocation4 + $0x110] sm:$0xff] %vm7462_vm5, %v7339_v33  ;;  %10325 = vmatmul.mubr.msk.f32.gmra.mrb[30].mxu1 %vm7985_vm7, %v7945_v59  ;;  %v6812_v59 = vld [vmem:[#allocation3 + $0x2f0] sm:$0xff] }
 0x969   :  { %v6572_v61 = vpop.permute.xlu1 %6571  ;;  %7751 = vrot.lane.b32.xlu0 %v6421_v39, %s10435_s11 }
 0x96a   :  { %6728 = vst.msk [vmem:[#allocation4 + $0x120] sm:$0xff] %vm6691_vm3, %v6572_v61 }
 0x96b   :  { %6601 = vrot.lane.b32.xlu1 %v6422_v5, %s10432_s3  ;;  %v7724_v14 = vpop.permute.xlu0 %7723 }
 0x96c   :  { %7882 = vst.msk [vmem:[#allocation4 + $0x110] sm:$0xff] %vm7847_vm6, %v7724_v14 }
 0x96d   :  { %v6574_v31 = vpop.permute.xlu1 %6573  ;;  %7753 = vrot.lane.b32.xlu0 %v6422_v5, %s10435_s11 }
 0x96e   :  { %6729 = vst.msk [vmem:[#allocation4 + $0x128] sm:$0xff] %vm6691_vm3, %v6574_v31 }
 0x96f   :  { %6987 = vrot.lane.b32.xlu1 %v6808_v58, %s10433_s19  ;;  %v7726_v44 = vpop.permute.xlu0 %7725 }
 0x970   :  { %7883 = vst.msk [vmem:[#allocation4 + $0x118] sm:$0xff] %vm7847_vm6, %v7726_v44  ;;  %v6811_v44 = vld [vmem:[#allocation3 + $0x2e8] sm:$0xff] }
 0x971   :  { %v6960_v53 = vpop.permute.xlu1 %6959  ;;  %6985 = vrot.lane.b32.xlu0 %v6807_v12, %s10433_s19 }
 0x972   :  { %7115 = vst.msk [vmem:[#allocation4 + $0x128] sm:$0xff] %vm7077_vm4, %v6960_v53 }
 0x973   :  { %7372 = vrot.lane.b32.xlu1 %v7193_v8, %s10434_s1  ;;  %v6958_v9 = vpop.permute.xlu0 %6957  ;;  %v7946_v22 = vld [vmem:[#allocation4 + $0x110] sm:$0xff] }
 0x974   :  { %7114 = vst.msk [vmem:[#allocation4 + $0x120] sm:$0xff] %vm7077_vm4, %v6958_v9  ;;  %10327 = vmatprep.mubr.msk.f32.mxu1 %vm7985_vm7, %v7946_v22  ;;  %v7197_v9 = vld [vmem:[#allocation3 + $0x2f1] sm:$0xff] }
 0x975   :  { %v7345_v55 = vpop.permute.xlu1 %7344  ;;  %v16610_v18 = vpop.f32.mrb[64].mxu0  ;;  %7370 = vrot.lane.b32.xlu0 %v7192_v16, %s10434_s1 }
 0x976   :  { %7500 = vst.msk [vmem:[#allocation4 + $0x128] sm:$0xff] %vm7462_vm5, %v7345_v55  ;;  %v8564_v43 = vsel %vm90_vm0, %v16610_v18, 0.0  ;;  %v8697_v30 = vmul.f32 %v16610_v18, %v16610_v18  ;;  %v16618_v24 = vpop.f32.mrb[65].mxu0 }
 0x977   :  { %v8563_v10 = vsel %vm90_vm0, %v16618_v24, 0.0  ;;  %v8696_v13 = vmul.f32 %v16618_v24, %v16618_v24  ;;  %6603 = vrot.lane.b32.xlu1 %v6423_v49, %s10432_s3  ;;  %v7343_v17 = vpop.permute.xlu0 %7342  ;;  %v7947_v63 = vld [vmem:[#allocation4 + $0x118] sm:$0xff] }
 0x978   :  { %v8761_v27 = vsel %vm90_vm0, %v8697_v30, 0.0  ;;  %v8565_v26 = vadd.f32 %v8564_v43, %v8563_v10  ;;  %7499 = vst.msk [vmem:[#allocation4 + $0x120] sm:$0xff] %vm7462_vm5, %v7343_v17  ;;  %10328 = vmatmul.mubr.msk.f32.gmra.mrb[32].mxu1 %vm7985_vm7, %v7947_v63  ;;  %v7196_v43 = vld [vmem:[#allocation3 + $0x2e9] sm:$0xff] }
 0x979   :  { %v8760_v38 = vsel %vm90_vm0, %v8696_v13, 0.0  ;;  %v6576_v54 = vpop.permute.xlu1 %6575  ;;  %7755 = vrot.lane.b32.xlu0 %v6423_v49, %s10435_s11  ;;  %v6427_v49 = vld [vmem:[#allocation3 + $0x2ea] sm:$0xff] }
 0x97a   :  { %v8762_v48 = vadd.f32 %v8761_v27, %v8760_v38  ;;  %6730 = vst.msk [vmem:[#allocation4 + $0x130] sm:$0xff] %vm6691_vm3, %v6576_v54 }
 0x97b   :  { %6605 = vrot.lane.b32.xlu1 %v6424_v46, %s10432_s3  ;;  %v7728_v15 = vpop.permute.xlu0 %7727 }
 0x97c   :  { %7884 = vst.msk [vmem:[#allocation4 + $0x120] sm:$0xff] %vm7847_vm6, %v7728_v15 }
 0x97d   :  { %v6578_v42 = vpop.permute.xlu1 %6577  ;;  %7757 = vrot.lane.b32.xlu0 %v6424_v46, %s10435_s11 }
 0x97e   :  { %6731 = vst.msk [vmem:[#allocation4 + $0x138] sm:$0xff] %vm6691_vm3, %v6578_v42 }
 0x97f   :  { %6991 = vrot.lane.b32.xlu1 %v6810_v11, %s10433_s19  ;;  %v7730_v21 = vpop.permute.xlu0 %7729  ;;  %v16636_v6 = vpop.f32.mrb[0].mxu1 }
 0x980   :  { %7885 = vst.msk [vmem:[#allocation4 + $0x128] sm:$0xff] %vm7847_vm6, %v7730_v21  ;;  %v16639_v2 = vpop.f32.mrb[1].mxu1  ;;  %v8699_v37 = vmul.f32 %v16636_v6, %v16636_v6  ;;  %v8568_v47 = vsel %vm90_vm0, %v16636_v6, 0.0 }
 0x981   :  { %v6964_v19 = vpop.permute.xlu1 %6963  ;;  %v8566_v51 = vsel %vm90_vm0, %v16639_v2, 0.0  ;;  %v8698_v45 = vmul.f32 %v16639_v2, %v16639_v2  ;;  %6989 = vrot.lane.b32.xlu0 %v6809_v62, %s10433_s19 }
 0x982   :  { %7117 = vst.msk [vmem:[#allocation4 + $0x138] sm:$0xff] %vm7077_vm4, %v6964_v19  ;;  %v8567_v56 = vadd.f32 %v8566_v51, %v8565_v26  ;;  %v8765_v20 = vsel %vm90_vm0, %v8699_v37, 0.0  ;;  %v6814_v51 = vld [vmem:[#allocation3 + $0x308] sm:$0xff] }
 0x983   :  { %7376 = vrot.lane.b32.xlu1 %v7195_v50, %s10434_s1  ;;  %v8763_v52 = vsel %vm90_vm0, %v8698_v45, 0.0  ;;  %v6962_v25 = vpop.permute.xlu0 %6961  ;;  %v7948_v41 = vld [vmem:[#allocation4 + $0x120] sm:$0xff] }
 0x984   :  { %v8569_v0 = vadd.f32 %v8568_v47, %v8567_v56  ;;  %v8764_v7 = vadd.f32 %v8763_v52, %v8762_v48  ;;  %7116 = vst.msk [vmem:[#allocation4 + $0x130] sm:$0xff] %vm7077_vm4, %v6962_v25  ;;  %10330 = vmatprep.mubr.msk.f32.mxu1 %vm7985_vm7, %v7948_v41  ;;  %v6428_v48 = vld [vmem:[#allocation3 + $0x2f2] sm:$0xff]  ;;  %v6813_v56 = vld [vmem:[#allocation3 + $0x300] sm:$0xff]  ;;  %v7199_v52 = vld [vmem:[#allocation3 + $0x309] sm:$0xff] }
 0x985   :  { %v7349_v28 = vpop.permute.xlu1 %7348  ;;  %7374 = vrot.lane.b32.xlu0 %v7194_v35, %s10434_s1  ;;  %v7198_v35 = vld [vmem:[#allocation3 + $0x301] sm:$0xff] }
 0x986   :  { %7502 = vst.msk [vmem:[#allocation4 + $0x138] sm:$0xff] %vm7462_vm5, %v7349_v28  ;;  %v8766_v3 = vadd.f32 %v8765_v20, %v8764_v7 }
 0x987   :  { %6607 = vrot.lane.b32.xlu1 %v6425_v36, %s10432_s3  ;;  %v7347_v60 = vpop.permute.xlu0 %7346  ;;  %v7949_v57 = vld [vmem:[#allocation4 + $0x128] sm:$0xff] }
 0x988   :  { %7501 = vst.msk [vmem:[#allocation4 + $0x130] sm:$0xff] %vm7462_vm5, %v7347_v60  ;;  %10331 = vmatmul.mubr.msk.f32.gmra.mrb[34].mxu1 %vm7985_vm7, %v7949_v57  ;;  %v6429_v60 = vld [vmem:[#allocation3 + $0x302] sm:$0xff] }
 0x989   :  { %v6580_v1 = vpop.permute.xlu1 %6579  ;;  %7759 = vrot.lane.b32.xlu0 %v6425_v36, %s10435_s11 }
 0x98a   :  { %6732 = vst.msk [vmem:[#allocation4 + $0x140] sm:$0xff] %vm6691_vm3, %v6580_v1 }
 0x98b   :  { %6609 = vrot.lane.b32.xlu1 %v6426_v34, %s10432_s3  ;;  %v7732_v40 = vpop.permute.xlu0 %7731  ;;  %v16664_v4 = vpop.f32.mrb[2].mxu1 }
 0x98c   :  { %7886 = vst.msk [vmem:[#allocation4 + $0x130] sm:$0xff] %vm7847_vm6, %v7732_v40  ;;  %v16667_v29 = vpop.f32.mrb[3].mxu1  ;;  %v8701_v32 = vmul.f32 %v16664_v4, %v16664_v4  ;;  %v8572_v5 = vsel %vm90_vm0, %v16664_v4, 0.0 }
 0x98d   :  { %v6582_v23 = vpop.permute.xlu1 %6581  ;;  %v8570_v39 = vsel %vm90_vm0, %v16667_v29, 0.0  ;;  %v8700_v33 = vmul.f32 %v16667_v29, %v16667_v29  ;;  %7761 = vrot.lane.b32.xlu0 %v6426_v34, %s10435_s11 }
 0x98e   :  { %6733 = vst.msk [vmem:[#allocation4 + $0x148] sm:$0xff] %vm6691_vm3, %v6582_v23  ;;  %v8571_v61 = vadd.f32 %v8570_v39, %v8569_v0  ;;  %v8769_v8 = vsel %vm90_vm0, %v8701_v32, 0.0 }
 0x98f   :  { %6995 = vrot.lane.b32.xlu1 %v6812_v59, %s10433_s19  ;;  %v8767_v14 = vsel %vm90_vm0, %v8700_v33, 0.0  ;;  %v7734_v31 = vpop.permute.xlu0 %7733 }
 0x990   :  { %v8768_v58 = vadd.f32 %v8767_v14, %v8766_v3  ;;  %7887 = vst.msk [vmem:[#allocation4 + $0x138] sm:$0xff] %vm7847_vm6, %v7734_v31  ;;  %v8573_v53 = vadd.f32 %v8572_v5, %v8571_v61  ;;  %v6430_v61 = vld [vmem:[#allocation3 + $0x30a] sm:$0xff] }
 0x991   :  { %v6968_v12 = vpop.permute.xlu1 %6967  ;;  %6993 = vrot.lane.b32.xlu0 %v6811_v44, %s10433_s19 }
 0x992   :  { %7119 = vst.msk [vmem:[#allocation4 + $0x148] sm:$0xff] %vm7077_vm4, %v6968_v12  ;;  %v8770_v22 = vadd.f32 %v8769_v8, %v8768_v58  ;;  %v6816_v58 = vld [vmem:[#allocation3 + $0x320] sm:$0xff]  ;;  %v6815_v8 = vld [vmem:[#allocation3 + $0x318] sm:$0xff] }
 0x993   :  { %7380 = vrot.lane.b32.xlu1 %v7197_v9, %s10434_s1  ;;  %v6966_v16 = vpop.permute.xlu0 %6965  ;;  %v7950_v55 = vld [vmem:[#allocation4 + $0x130] sm:$0xff] }
 0x994   :  { %7118 = vst.msk [vmem:[#allocation4 + $0x140] sm:$0xff] %vm7077_vm4, %v6966_v16  ;;  %10333 = vmatprep.mubr.msk.f32.mxu1 %vm7985_vm7, %v7950_v55 }
 0x995   :  { %v7353_v30 = vpop.permute.xlu1 %7352  ;;  %7378 = vrot.lane.b32.xlu0 %v7196_v43, %s10434_s1  ;;  %v7201_v43 = vld [vmem:[#allocation3 + $0x321] sm:$0xff] }
 0x996   :  { %7504 = vst.msk [vmem:[#allocation4 + $0x148] sm:$0xff] %vm7462_vm5, %v7353_v30 }
 0x997   :  { %6611 = vrot.lane.b32.xlu1 %v6427_v49, %s10432_s3  ;;  %v7351_v10 = vpop.permute.xlu0 %7350  ;;  %v16691_v13 = vpop.f32.mrb[4].mxu1  ;;  %v7951_v27 = vld [vmem:[#allocation4 + $0x138] sm:$0xff] }
 0x998   :  { %7503 = vst.msk [vmem:[#allocation4 + $0x140] sm:$0xff] %vm7462_vm5, %v7351_v10  ;;  %v16694_v17 = vpop.f32.mrb[5].mxu1  ;;  %10334 = vmatmul.mubr.msk.f32.gmra.mrb[36].mxu1 %vm7985_vm7, %v7951_v27  ;;  %v8703_v63 = vmul.f32 %v16691_v13, %v16691_v13  ;;  %v8576_v15 = vsel %vm90_vm0, %v16691_v13, 0.0 }
 0x999   :  { %v6584_v26 = vpop.permute.xlu1 %6583  ;;  %v8574_v38 = vsel %vm90_vm0, %v16694_v17, 0.0  ;;  %v8702_v54 = vmul.f32 %v16694_v17, %v16694_v17  ;;  %7763 = vrot.lane.b32.xlu0 %v6427_v49, %s10435_s11 }
 0x99a   :  { %6734 = vst.msk [vmem:[#allocation4 + $0x150] sm:$0xff] %vm6691_vm3, %v6584_v26  ;;  %v8575_v46 = vadd.f32 %v8574_v38, %v8573_v53  ;;  %v8773_v37 = vsel %vm90_vm0, %v8703_v63, 0.0  ;;  %v7200_v38 = vld [vmem:[#allocation3 + $0x319] sm:$0xff] }
 0x99b   :  { %6613 = vrot.lane.b32.xlu1 %v6428_v48, %s10432_s3  ;;  %v8771_v42 = vsel %vm90_vm0, %v8702_v54, 0.0  ;;  %v7736_v11 = vpop.permute.xlu0 %7735 }
 0x99c   :  { %v8772_v21 = vadd.f32 %v8771_v42, %v8770_v22  ;;  %7888 = vst.msk [vmem:[#allocation4 + $0x140] sm:$0xff] %vm7847_vm6, %v7736_v11  ;;  %v8577_v19 = vadd.f32 %v8576_v15, %v8575_v46  ;;  %v6431_v15 = vld [vmem:[#allocation3 + $0x31a] sm:$0xff] }
 0x99d   :  { %v6586_v62 = vpop.permute.xlu1 %6585  ;;  %7765 = vrot.lane.b32.xlu0 %v6428_v48, %s10435_s11 }
 0x99e   :  { %6735 = vst.msk [vmem:[#allocation4 + $0x158] sm:$0xff] %vm6691_vm3, %v6586_v62  ;;  %v8774_v45 = vadd.f32 %v8773_v37, %v8772_v21 }
 0x99f   :  { %6999 = vrot.lane.b32.xlu1 %v6814_v51, %s10433_s19  ;;  %v7738_v50 = vpop.permute.xlu0 %7737 }
 0x9a0   :  { %7889 = vst.msk [vmem:[#allocation4 + $0x148] sm:$0xff] %vm7847_vm6, %v7738_v50 }
 0x9a1   :  { %v6972_v47 = vpop.permute.xlu1 %6971  ;;  %6997 = vrot.lane.b32.xlu0 %v6813_v56, %s10433_s19 }
 0x9a2   :  { %7121 = vst.msk [vmem:[#allocation4 + $0x158] sm:$0xff] %vm7077_vm4, %v6972_v47 }
 0x9a3   :  { %7384 = vrot.lane.b32.xlu1 %v7199_v52, %s10434_s1  ;;  %v6970_v25 = vpop.permute.xlu0 %6969  ;;  %v16718_v41 = vpop.f32.mrb[6].mxu1  ;;  %v7952_v0 = vld [vmem:[#allocation4 + $0x140] sm:$0xff] }
 0x9a4   :  { %7120 = vst.msk [vmem:[#allocation4 + $0x150] sm:$0xff] %vm7077_vm4, %v6970_v25  ;;  %v16721_v7 = vpop.f32.mrb[7].mxu1  ;;  %10336 = vmatprep.mubr.msk.f32.mxu1 %vm7985_vm7, %v7952_v0  ;;  %v8705_v20 = vmul.f32 %v16718_v41, %v16718_v41  ;;  %v8580_v1 = vsel %vm90_vm0, %v16718_v41, 0.0  ;;  %v6818_v25 = vld [vmem:[#allocation3 + $0x338] sm:$0xff] }
 0x9a5   :  { %v7357_v28 = vpop.permute.xlu1 %7356  ;;  %v8578_v36 = vsel %vm90_vm0, %v16721_v7, 0.0  ;;  %v8704_v3 = vmul.f32 %v16721_v7, %v16721_v7  ;;  %7382 = vrot.lane.b32.xlu0 %v7198_v35, %s10434_s1 }
 0x9a6   :  { %7506 = vst.msk [vmem:[#allocation4 + $0x158] sm:$0xff] %vm7462_vm5, %v7357_v28  ;;  %v8579_v57 = vadd.f32 %v8578_v36, %v8577_v19  ;;  %v8777_v59 = vsel %vm90_vm0, %v8705_v20, 0.0  ;;  %v6432_v19 = vld [vmem:[#allocation3 + $0x322] sm:$0xff] }
 0x9a7   :  { %6615 = vrot.lane.b32.xlu1 %v6429_v60, %s10432_s3  ;;  %v8775_v34 = vsel %vm90_vm0, %v8704_v3, 0.0  ;;  %v7355_v40 = vpop.permute.xlu0 %7354  ;;  %v7953_v23 = vld [vmem:[#allocation4 + $0x148] sm:$0xff]  ;;  %v6817_v3 = vld [vmem:[#allocation3 + $0x330] sm:$0xff] }
 0x9a8   :  { %v8776_v32 = vadd.f32 %v8775_v34, %v8774_v45  ;;  %7505 = vst.msk [vmem:[#allocation4 + $0x150] sm:$0xff] %vm7462_vm5, %v7355_v40  ;;  %10337 = vmatmul.mubr.msk.f32.gmra.mrb[38].mxu1 %vm7985_vm7, %v7953_v23  ;;  %v8581_v33 = vadd.f32 %v8580_v1, %v8579_v57  ;;  %v7203_v34 = vld [vmem:[#allocation3 + $0x339] sm:$0xff] }
 0x9a9   :  { %v6588_v39 = vpop.permute.xlu1 %6587  ;;  %7767 = vrot.lane.b32.xlu0 %v6429_v60, %s10435_s11 }
 0x9aa   :  { %6736 = vst.msk [vmem:[#allocation4 + $0x160] sm:$0xff] %vm6691_vm3, %v6588_v39  ;;  %v8778_v5 = vadd.f32 %v8777_v59, %v8776_v32  ;;  %v7202_v39 = vld [vmem:[#allocation3 + $0x331] sm:$0xff] }
 0x9ab   :  { %6617 = vrot.lane.b32.xlu1 %v6430_v61, %s10432_s3  ;;  %v7740_v14 = vpop.permute.xlu0 %7739  ;;  %v6433_v59 = vld [vmem:[#allocation3 + $0x332] sm:$0xff] }
 0x9ac   :  { %7890 = vst.msk [vmem:[#allocation4 + $0x150] sm:$0xff] %vm7847_vm6, %v7740_v14 }
 0x9ad   :  { %v6590_v31 = vpop.permute.xlu1 %6589  ;;  %7769 = vrot.lane.b32.xlu0 %v6430_v61, %s10435_s11 }
 0x9ae   :  { %6737 = vst.msk [vmem:[#allocation4 + $0x168] sm:$0xff] %vm6691_vm3, %v6590_v31 }
 0x9af   :  { %7003 = vrot.lane.b32.xlu1 %v6816_v58, %s10433_s19  ;;  %v7742_v44 = vpop.permute.xlu0 %7741  ;;  %v16746_v12 = vpop.f32.mrb[8].mxu1 }
 0x9b0   :  { %7891 = vst.msk [vmem:[#allocation4 + $0x158] sm:$0xff] %vm7847_vm6, %v7742_v44  ;;  %v16749_v53 = vpop.f32.mrb[9].mxu1  ;;  %v8707_v22 = vmul.f32 %v16746_v12, %v16746_v12  ;;  %v8584_v49 = vsel %vm90_vm0, %v16746_v12, 0.0 }
 0x9b1   :  { %v6976_v9 = vpop.permute.xlu1 %6975  ;;  %v8582_v16 = vsel %vm90_vm0, %v16749_v53, 0.0  ;;  %v8706_v55 = vmul.f32 %v16749_v53, %v16749_v53  ;;  %7001 = vrot.lane.b32.xlu0 %v6815_v8, %s10433_s19 }
 0x9b2   :  { %7123 = vst.msk [vmem:[#allocation4 + $0x168] sm:$0xff] %vm7077_vm4, %v6976_v9  ;;  %v8583_v30 = vadd.f32 %v8582_v16, %v8581_v33  ;;  %v8781_v46 = vsel %vm90_vm0, %v8707_v22, 0.0  ;;  %v6434_v22 = vld [vmem:[#allocation3 + $0x33a] sm:$0xff] }
 0x9b3   :  { %7388 = vrot.lane.b32.xlu1 %v7201_v43, %s10434_s1  ;;  %v8779_v10 = vsel %vm90_vm0, %v8706_v55, 0.0  ;;  %v6974_v27 = vpop.permute.xlu0 %6973  ;;  %v7954_v26 = vld [vmem:[#allocation4 + $0x150] sm:$0xff] }
 0x9b4   :  { %v8780_v63 = vadd.f32 %v8779_v10, %v8778_v5  ;;  %7122 = vst.msk [vmem:[#allocation4 + $0x160] sm:$0xff] %vm7077_vm4, %v6974_v27  ;;  %10339 = vmatprep.mubr.msk.f32.mxu1 %vm7985_vm7, %v7954_v26  ;;  %v8585_v48 = vadd.f32 %v8584_v49, %v8583_v30  ;;  %v6820_v49 = vld [vmem:[#allocation3 + $0x350] sm:$0xff] }
 0x9b5   :  { %v7361_v54 = vpop.permute.xlu1 %7360  ;;  %7386 = vrot.lane.b32.xlu0 %v7200_v38, %s10434_s1  ;;  %v6819_v38 = vld [vmem:[#allocation3 + $0x348] sm:$0xff] }
 0x9b6   :  { %7508 = vst.msk [vmem:[#allocation4 + $0x168] sm:$0xff] %vm7462_vm5, %v7361_v54  ;;  %v8782_v42 = vadd.f32 %v8781_v46, %v8780_v63  ;;  %v7205_v46 = vld [vmem:[#allocation3 + $0x351] sm:$0xff] }
 0x9b7   :  { %6619 = vrot.lane.b32.xlu1 %v6431_v15, %s10432_s3  ;;  %v7359_v11 = vpop.permute.xlu0 %7358  ;;  %v7955_v21 = vld [vmem:[#allocation4 + $0x158] sm:$0xff] }
 0x9b8   :  { %7507 = vst.msk [vmem:[#allocation4 + $0x160] sm:$0xff] %vm7462_vm5, %v7359_v11  ;;  %10340 = vmatmul.mubr.msk.f32.gmra.mrb[40].mxu1 %vm7985_vm7, %v7955_v21 }
 0x9b9   :  { %v6592_v62 = vpop.permute.xlu1 %6591  ;;  %7771 = vrot.lane.b32.xlu0 %v6431_v15, %s10435_s11 }
 0x9ba   :  { %6738 = vst.msk [vmem:[#allocation4 + $0x170] sm:$0xff] %vm6691_vm3, %v6592_v62 }
 0x9bb   :  { %6621 = vrot.lane.b32.xlu1 %v6432_v19, %s10432_s3  ;;  %v7744_v37 = vpop.permute.xlu0 %7743  ;;  %v16774_v51 = vpop.f32.mrb[10].mxu1 }
 0x9bc   :  { %7892 = vst.msk [vmem:[#allocation4 + $0x160] sm:$0xff] %vm7847_vm6, %v7744_v37  ;;  %v16777_v45 = vpop.f32.mrb[11].mxu1  ;;  %v8709_v56 = vmul.f32 %v16774_v51, %v16774_v51  ;;  %v8588_v35 = vsel %vm90_vm0, %v16774_v51, 0.0 }
 0x9bd   :  { %v6594_v50 = vpop.permute.xlu1 %6593  ;;  %v8586_v47 = vsel %vm90_vm0, %v16777_v45, 0.0  ;;  %v8708_v52 = vmul.f32 %v16777_v45, %v16777_v45  ;;  %7773 = vrot.lane.b32.xlu0 %v6432_v19, %s10435_s11  ;;  %v7590_v19 = vld [vmem:[#allocation3 + $0x352] sm:$0xff] }
 0x9be   :  { %6739 = vst.msk [vmem:[#allocation4 + $0x178] sm:$0xff] %vm6691_vm3, %v6594_v50  ;;  %v8587_v0 = vadd.f32 %v8586_v47, %v8585_v48  ;;  %v8785_v1 = vsel %vm90_vm0, %v8709_v56, 0.0 }
 0x9bf   :  { %7007 = vrot.lane.b32.xlu1 %v6818_v25, %s10433_s19  ;;  %v8783_v28 = vsel %vm90_vm0, %v8708_v52, 0.0  ;;  %v7746_v20 = vpop.permute.xlu0 %7745 }
 0x9c0   :  { %v8784_v36 = vadd.f32 %v8783_v28, %v8782_v42  ;;  %7893 = vst.msk [vmem:[#allocation4 + $0x168] sm:$0xff] %vm7847_vm6, %v7746_v20  ;;  %v8589_v57 = vadd.f32 %v8588_v35, %v8587_v0  ;;  %v7204_v42 = vld [vmem:[#allocation3 + $0x349] sm:$0xff] }
 0x9c1   :  { %v6980_v60 = vpop.permute.xlu1 %6979  ;;  %7005 = vrot.lane.b32.xlu0 %v6817_v3, %s10433_s19  ;;  %v7589_v0 = vld [vmem:[#allocation3 + $0x34a] sm:$0xff] }
 0x9c2   :  { %7125 = vst.msk [vmem:[#allocation4 + $0x178] sm:$0xff] %vm7077_vm4, %v6980_v60  ;;  %v8786_v40 = vadd.f32 %v8785_v1, %v8784_v36 }
 0x9c3   :  { %7392 = vrot.lane.b32.xlu1 %v7203_v34, %s10434_s1  ;;  %v6978_v23 = vpop.permute.xlu0 %6977  ;;  %v7956_v32 = vld [vmem:[#allocation4 + $0x160] sm:$0xff] }
 0x9c4   :  { %7124 = vst.msk [vmem:[#allocation4 + $0x170] sm:$0xff] %vm7077_vm4, %v6978_v23  ;;  %10342 = vmatprep.mubr.msk.f32.mxu1 %vm7985_vm7, %v7956_v32 }
 0x9c5   :  { %v7365_v33 = vpop.permute.xlu1 %7364  ;;  %7390 = vrot.lane.b32.xlu0 %v7202_v39, %s10434_s1 }
 0x9c6   :  { %7510 = vst.msk [vmem:[#allocation4 + $0x178] sm:$0xff] %vm7462_vm5, %v7365_v33 }
 0x9c7   :  { %6623 = vrot.lane.b32.xlu1 %v6433_v59, %s10432_s3  ;;  %v7363_v61 = vpop.permute.xlu0 %7362  ;;  %v16801_v5 = vpop.f32.mrb[12].mxu1  ;;  %v7957_v14 = vld [vmem:[#allocation4 + $0x168] sm:$0xff] }
 0x9c8   :  { %7509 = vst.msk [vmem:[#allocation4 + $0x170] sm:$0xff] %vm7462_vm5, %v7363_v61  ;;  %v16804_v31 = vpop.f32.mrb[13].mxu1  ;;  %10343 = vmatmul.mubr.msk.f32.gmra.mrb[42].mxu1 %vm7985_vm7, %v7957_v14  ;;  %v8711_v44 = vmul.f32 %v16801_v5, %v16801_v5  ;;  %v8592_v55 = vsel %vm90_vm0, %v16801_v5, 0.0 }
 0x9c9   :  { %v6596_v58 = vpop.permute.xlu1 %6595  ;;  %v8590_v8 = vsel %vm90_vm0, %v16804_v31, 0.0  ;;  %v8710_v9 = vmul.f32 %v16804_v31, %v16804_v31  ;;  %7775 = vrot.lane.b32.xlu0 %v6433_v59, %s10435_s11 }
 0x9ca   :  { %6740 = vst.msk [vmem:[#allocation4 + $0x180] sm:$0xff] %vm6691_vm3, %v6596_v58  ;;  %v8591_v16 = vadd.f32 %v8590_v8, %v8589_v57  ;;  %v8789_v63 = vsel %vm90_vm0, %v8711_v44, 0.0 }
 0x9cb   :  { %6625 = vrot.lane.b32.xlu1 %v6434_v22, %s10432_s3  ;;  %v8787_v43 = vsel %vm90_vm0, %v8710_v9, 0.0  ;;  %v7748_v30 = vpop.permute.xlu0 %7747 }
 0x9cc   :  { %v8788_v10 = vadd.f32 %v8787_v43, %v8786_v40  ;;  %7894 = vst.msk [vmem:[#allocation4 + $0x170] sm:$0xff] %vm7847_vm6, %v7748_v30  ;;  %v8593_v26 = vadd.f32 %v8592_v55, %v8591_v16 }
 0x9cd   :  { %v6598_v27 = vpop.permute.xlu1 %6597  ;;  %7777 = vrot.lane.b32.xlu0 %v6434_v22, %s10435_s11 }
 0x9ce   :  { %6741 = vst.msk [vmem:[#allocation4 + $0x188] sm:$0xff] %vm6691_vm3, %v6598_v27  ;;  %v8790_v54 = vadd.f32 %v8789_v63, %v8788_v10 }
 0x9cf   :  { %7011 = vrot.lane.b32.xlu1 %v6820_v49, %s10433_s19  ;;  %v7750_v48 = vpop.permute.xlu0 %7749 }
 0x9d0   :  { %7895 = vst.msk [vmem:[#allocation4 + $0x178] sm:$0xff] %vm7847_vm6, %v7750_v48 }
 0x9d1   :  { %v6984_v15 = vpop.permute.xlu1 %6983  ;;  %7009 = vrot.lane.b32.xlu0 %v6819_v38, %s10433_s19 }
 0x9d2   :  { %7127 = vst.msk [vmem:[#allocation4 + $0x188] sm:$0xff] %vm7077_vm4, %v6984_v15 }
 0x9d3   :  { %7396 = vrot.lane.b32.xlu1 %v7205_v46, %s10434_s1  ;;  %v6982_v11 = vpop.permute.xlu0 %6981  ;;  %v16828_v21 = vpop.f32.mrb[14].mxu1  ;;  %v7958_v62 = vld [vmem:[#allocation4 + $0x170] sm:$0xff] }
 0x9d4   :  { %7126 = vst.msk [vmem:[#allocation4 + $0x180] sm:$0xff] %vm7077_vm4, %v6982_v11  ;;  %v16831_v37 = vpop.f32.mrb[15].mxu1  ;;  %10345 = vmatprep.mubr.msk.f32.mxu1 %vm7985_vm7, %v7958_v62  ;;  %v8713_v56 = vmul.f32 %v16828_v21, %v16828_v21  ;;  %v8596_v35 = vsel %vm90_vm0, %v16828_v21, 0.0 }
 0x9d5   :  { %v7369_v50 = vpop.permute.xlu1 %7368  ;;  %v8594_v47 = vsel %vm90_vm0, %v16831_v37, 0.0  ;;  %v8712_v52 = vmul.f32 %v16831_v37, %v16831_v37  ;;  %7394 = vrot.lane.b32.xlu0 %v7204_v42, %s10434_s1 }
 0x9d6   :  { %7512 = vst.msk [vmem:[#allocation4 + $0x188] sm:$0xff] %vm7462_vm5, %v7369_v50  ;;  %v8595_v25 = vadd.f32 %v8594_v47, %v8593_v26  ;;  %v8793_v1 = vsel %vm90_vm0, %v8713_v56, 0.0 }
 0x9d7   :  { %7781 = vrot.lane.b32.xlu1 %v7590_v19, %s10435_s11  ;;  %v8791_v28 = vsel %vm90_vm0, %v8712_v52, 0.0  ;;  %v7367_v20 = vpop.permute.xlu0 %7366  ;;  %v7959_v36 = vld [vmem:[#allocation4 + $0x178] sm:$0xff] }
 0x9d8   :  { %v8792_v3 = vadd.f32 %v8791_v28, %v8790_v54  ;;  %7511 = vst.msk [vmem:[#allocation4 + $0x180] sm:$0xff] %vm7462_vm5, %v7367_v20  ;;  %10346 = vmatmul.mubr.msk.f32.gmra.mrb[44].mxu1 %vm7985_vm7, %v7959_v36  ;;  %v8597_v57 = vadd.f32 %v8596_v35, %v8595_v25 }
 0x9d9   :  { %v6600_v60 = vpop.permute.xlu1 %6599  ;;  %7779 = vrot.lane.b32.xlu0 %v7589_v0, %s10435_s11 }
 0x9da   :  { %6742 = vst.msk [vmem:[#allocation4 + $0x190] sm:$0xff] %vm6691_vm3, %v6600_v60  ;;  %v8794_v34 = vadd.f32 %v8793_v1, %v8792_v3 }
 0x9db   :  { %v7752_v40 = vpop.permute.xlu0 %7751 }
 0x9dc   :  { %7896 = vst.msk [vmem:[#allocation4 + $0x180] sm:$0xff] %vm7847_vm6, %v7752_v40 }
 0x9dd   :  { %v6602_v23 = vpop.permute.xlu1 %6601 }
 0x9de   :  { %6743 = vst.msk [vmem:[#allocation4 + $0x198] sm:$0xff] %vm6691_vm3, %v6602_v23 }
 0x9df   :  { %v7754_v32 = vpop.permute.xlu0 %7753  ;;  %v16853_v39 = vpop.f32.mrb[16].mxu1 }
 0x9e0   :  { %7897 = vst.msk [vmem:[#allocation4 + $0x188] sm:$0xff] %vm7847_vm6, %v7754_v32  ;;  %v16856_v33 = vpop.f32.mrb[17].mxu1  ;;  %v8715_v61 = vmul.f32 %v16853_v39, %v16853_v39  ;;  %v8600_v8 = vsel %vm90_vm0, %v16853_v39, 0.0 }
 0x9e1   :  { %v6988_v59 = vpop.permute.xlu1 %6987  ;;  %v8598_v14 = vsel %vm90_vm0, %v16856_v33, 0.0  ;;  %v8714_v58 = vmul.f32 %v16856_v33, %v16856_v33 }
 0x9e2   :  { %7129 = vst.msk [vmem:[#allocation4 + $0x198] sm:$0xff] %vm7077_vm4, %v6988_v59  ;;  %v8599_v44 = vadd.f32 %v8598_v14, %v8597_v57  ;;  %v8797_v49 = vsel %vm90_vm0, %v8715_v61, 0.0 }
 0x9e3   :  { %v8795_v9 = vsel %vm90_vm0, %v8714_v58, 0.0  ;;  %v6986_v22 = vpop.permute.xlu0 %6985  ;;  %v7960_v16 = vld [vmem:[#allocation4 + $0x180] sm:$0xff] }
 0x9e4   :  { %v8796_v55 = vadd.f32 %v8795_v9, %v8794_v34  ;;  %7128 = vst.msk [vmem:[#allocation4 + $0x190] sm:$0xff] %vm7077_vm4, %v6986_v22  ;;  %10348 = vmatprep.mubr.msk.f32.mxu1 %vm7985_vm7, %v7960_v16  ;;  %v8601_v30 = vadd.f32 %v8600_v8, %v8599_v44 }
 0x9e5   :  { %v7373_v43 = vpop.permute.xlu1 %7372 }
 0x9e6   :  { %7514 = vst.msk [vmem:[#allocation4 + $0x198] sm:$0xff] %vm7462_vm5, %v7373_v43  ;;  %v8798_v10 = vadd.f32 %v8797_v49, %v8796_v55 }
 0x9e7   :  { %v7371_v27 = vpop.permute.xlu0 %7370  ;;  %v7961_v26 = vld [vmem:[#allocation4 + $0x188] sm:$0xff] }
 0x9e8   :  { %7513 = vst.msk [vmem:[#allocation4 + $0x190] sm:$0xff] %vm7462_vm5, %v7371_v27  ;;  %10349 = vmatmul.mubr.msk.f32.gmra.mrb[46].mxu1 %vm7985_vm7, %v7961_v26 }
 0x9e9   :  { %v6604_v63 = vpop.permute.xlu1 %6603 }
 0x9ea   :  { %6744 = vst.msk [vmem:[#allocation4 + $0x1a0] sm:$0xff] %vm6691_vm3, %v6604_v63 }
 0x9eb   :  { %v7756_v38 = vpop.permute.xlu0 %7755  ;;  %v16875_v54 = vpop.f32.mrb[18].mxu1 }
 0x9ec   :  { %7898 = vst.msk [vmem:[#allocation4 + $0x190] sm:$0xff] %vm7847_vm6, %v7756_v38  ;;  %v16878_v48 = vpop.f32.mrb[19].mxu1  ;;  %v8717_v15 = vmul.f32 %v16875_v54, %v16875_v54  ;;  %v8604_v19 = vsel %vm90_vm0, %v16875_v54, 0.0 }
 0x9ed   :  { %v6606_v46 = vpop.permute.xlu1 %6605  ;;  %v8602_v42 = vsel %vm90_vm0, %v16878_v48, 0.0  ;;  %v8716_v11 = vmul.f32 %v16878_v48, %v16878_v48 }
 0x9ee   :  { %6745 = vst.msk [vmem:[#allocation4 + $0x1a8] sm:$0xff] %vm6691_vm3, %v6606_v46  ;;  %v8603_v62 = vadd.f32 %v8602_v42, %v8601_v30  ;;  %v8801_v0 = vsel %vm90_vm0, %v8717_v15, 0.0 }
 0x9ef   :  { %v8799_v50 = vsel %vm90_vm0, %v8716_v11, 0.0  ;;  %v7758_v56 = vpop.permute.xlu0 %7757 }
 0x9f0   :  { %v8800_v47 = vadd.f32 %v8799_v50, %v8798_v10  ;;  %7899 = vst.msk [vmem:[#allocation4 + $0x198] sm:$0xff] %vm7847_vm6, %v7758_v56  ;;  %v8605_v25 = vadd.f32 %v8604_v19, %v8603_v62 }
 0x9f1   :  { %v6992_v52 = vpop.permute.xlu1 %6991 }
 0x9f2   :  { %7131 = vst.msk [vmem:[#allocation4 + $0x1a8] sm:$0xff] %vm7077_vm4, %v6992_v52  ;;  %v8802_v35 = vadd.f32 %v8801_v0, %v8800_v47 }
 0x9f3   :  { %v6990_v28 = vpop.permute.xlu0 %6989  ;;  %v7962_v20 = vld [vmem:[#allocation4 + $0x190] sm:$0xff] }
 0x9f4   :  { %7130 = vst.msk [vmem:[#allocation4 + $0x1a0] sm:$0xff] %vm7077_vm4, %v6990_v28  ;;  %10351 = vmatprep.mubr.msk.f32.mxu1 %vm7985_vm7, %v7962_v20 }
 0x9f5   :  { %v7377_v36 = vpop.permute.xlu1 %7376 }
 0x9f6   :  { %7516 = vst.msk [vmem:[#allocation4 + $0x1a8] sm:$0xff] %vm7462_vm5, %v7377_v36 }
 0x9f7   :  { %v7375_v3 = vpop.permute.xlu0 %7374  ;;  %v16896_v60 = vpop.f32.mrb[20].mxu1  ;;  %v7963_v57 = vld [vmem:[#allocation4 + $0x198] sm:$0xff] }
 0x9f8   :  { %7515 = vst.msk [vmem:[#allocation4 + $0x1a0] sm:$0xff] %vm7462_vm5, %v7375_v3  ;;  %v16899_v1 = vpop.f32.mrb[21].mxu1  ;;  %10352 = vmatmul.mubr.msk.f32.gmra.mrb[48].mxu1 %vm7985_vm7, %v7963_v57  ;;  %v8719_v40 = vmul.f32 %v16896_v60, %v16896_v60  ;;  %v8608_v61 = vsel %vm90_vm0, %v16896_v60, 0.0 }
 0x9f9   :  { %v6608_v34 = vpop.permute.xlu1 %6607  ;;  %v8606_v23 = vsel %vm90_vm0, %v16899_v1, 0.0  ;;  %v8718_v32 = vmul.f32 %v16899_v1, %v16899_v1 }
 0x9fa   :  { %6746 = vst.msk [vmem:[#allocation4 + $0x1b0] sm:$0xff] %vm6691_vm3, %v6608_v34  ;;  %v8607_v59 = vadd.f32 %v8606_v23, %v8605_v25  ;;  %v8805_v22 = vsel %vm90_vm0, %v8719_v40, 0.0 }
 0x9fb   :  { %v8803_v14 = vsel %vm90_vm0, %v8718_v32, 0.0  ;;  %v7760_v58 = vpop.permute.xlu0 %7759 }
 0x9fc   :  { %v8804_v44 = vadd.f32 %v8803_v14, %v8802_v35  ;;  %7900 = vst.msk [vmem:[#allocation4 + $0x1a0] sm:$0xff] %vm7847_vm6, %v7760_v58  ;;  %v8609_v9 = vadd.f32 %v8608_v61, %v8607_v59 }
 0x9fd   :  { %v6610_v8 = vpop.permute.xlu1 %6609 }
 0x9fe   :  { %6747 = vst.msk [vmem:[#allocation4 + $0x1b8] sm:$0xff] %vm6691_vm3, %v6610_v8  ;;  %v8806_v16 = vadd.f32 %v8805_v22, %v8804_v44 }
 0x9ff   :  { %v7762_v55 = vpop.permute.xlu0 %7761 }
 0xa00   :  { %7901 = vst.msk [vmem:[#allocation4 + $0x1a8] sm:$0xff] %vm7847_vm6, %v7762_v55 }
 0xa01   :  { %v6996_v43 = vpop.permute.xlu1 %6995 }
 0xa02   :  { %7133 = vst.msk [vmem:[#allocation4 + $0x1b8] sm:$0xff] %vm7077_vm4, %v6996_v43 }
 0xa03   :  { %v6994_v30 = vpop.permute.xlu0 %6993  ;;  %v16917_v49 = vpop.f32.mrb[22].mxu1  ;;  %v7964_v10 = vld [vmem:[#allocation4 + $0x1a0] sm:$0xff] }
 0xa04   :  { %7132 = vst.msk [vmem:[#allocation4 + $0x1b0] sm:$0xff] %vm7077_vm4, %v6994_v30  ;;  %v16920_v27 = vpop.f32.mrb[23].mxu1  ;;  %10354 = vmatprep.mubr.msk.f32.mxu1 %vm7985_vm7, %v7964_v10  ;;  %v8721_v63 = vmul.f32 %v16917_v49, %v16917_v49  ;;  %v8612_v42 = vsel %vm90_vm0, %v16917_v49, 0.0 }
 0xa05   :  { %v7381_v26 = vpop.permute.xlu1 %7380  ;;  %v8610_v38 = vsel %vm90_vm0, %v16920_v27, 0.0  ;;  %v8720_v46 = vmul.f32 %v16920_v27, %v16920_v27 }
 0xa06   :  { %7518 = vst.msk [vmem:[#allocation4 + $0x1b8] sm:$0xff] %vm7462_vm5, %v7381_v26  ;;  %v8611_v15 = vadd.f32 %v8610_v38, %v8609_v9  ;;  %v8809_v52 = vsel %vm90_vm0, %v8721_v63, 0.0 }
 0xa07   :  { %v8807_v11 = vsel %vm90_vm0, %v8720_v46, 0.0  ;;  %v7379_v62 = vpop.permute.xlu0 %7378  ;;  %v7965_v19 = vld [vmem:[#allocation4 + $0x1a8] sm:$0xff] }
 0xa08   :  { %v8808_v50 = vadd.f32 %v8807_v11, %v8806_v16  ;;  %7517 = vst.msk [vmem:[#allocation4 + $0x1b0] sm:$0xff] %vm7462_vm5, %v7379_v62  ;;  %10355 = vmatmul.mubr.msk.f32.gmra.mrb[50].mxu1 %vm7985_vm7, %v7965_v19  ;;  %v8613_v47 = vadd.f32 %v8612_v42, %v8611_v15 }
 0xa09   :  { %v6612_v56 = vpop.permute.xlu1 %6611 }
 0xa0a   :  { %6748 = vst.msk [vmem:[#allocation4 + $0x1c0] sm:$0xff] %vm6691_vm3, %v6612_v56  ;;  %v8810_v25 = vadd.f32 %v8809_v52, %v8808_v50 }
 0xa0b   :  { %v7764_v0 = vpop.permute.xlu0 %7763 }
 0xa0c   :  { %7902 = vst.msk [vmem:[#allocation4 + $0x1b0] sm:$0xff] %vm7847_vm6, %v7764_v0 }
 0xa0d   :  { %v6614_v35 = vpop.permute.xlu1 %6613 }
 0xa0e   :  { %6749 = vst.msk [vmem:[#allocation4 + $0x1c8] sm:$0xff] %vm6691_vm3, %v6614_v35 }
 0xa0f   :  { %v7766_v28 = vpop.permute.xlu0 %7765  ;;  %v16939_v20 = vpop.f32.mrb[24].mxu1 }
 0xa10   :  { %7903 = vst.msk [vmem:[#allocation4 + $0x1b8] sm:$0xff] %vm7847_vm6, %v7766_v28  ;;  %v16942_v36 = vpop.f32.mrb[25].mxu1  ;;  %v8723_v57 = vmul.f32 %v16939_v20, %v16939_v20  ;;  %v8616_v32 = vsel %vm90_vm0, %v16939_v20, 0.0 }
 0xa11   :  { %v7000_v3 = vpop.permute.xlu1 %6999  ;;  %v8614_v34 = vsel %vm90_vm0, %v16942_v36, 0.0  ;;  %v8722_v40 = vmul.f32 %v16942_v36, %v16942_v36 }
 0xa12   :  { %7135 = vst.msk [vmem:[#allocation4 + $0x1c8] sm:$0xff] %vm7077_vm4, %v7000_v3  ;;  %v8615_v23 = vadd.f32 %v8614_v34, %v8613_v47  ;;  %v8813_v9 = vsel %vm90_vm0, %v8723_v57, 0.0 }
 0xa13   :  { %v8811_v59 = vsel %vm90_vm0, %v8722_v40, 0.0  ;;  %v6998_v61 = vpop.permute.xlu0 %6997  ;;  %v7966_v14 = vld [vmem:[#allocation4 + $0x1b0] sm:$0xff] }
 0xa14   :  { %v8812_v58 = vadd.f32 %v8811_v59, %v8810_v25  ;;  %7134 = vst.msk [vmem:[#allocation4 + $0x1c0] sm:$0xff] %vm7077_vm4, %v6998_v61  ;;  %10357 = vmatprep.mubr.msk.f32.mxu1 %vm7985_vm7, %v7966_v14  ;;  %v8617_v8 = vadd.f32 %v8616_v32, %v8615_v23 }
 0xa15   :  { %v7385_v44 = vpop.permute.xlu1 %7384 }
 0xa16   :  { %7520 = vst.msk [vmem:[#allocation4 + $0x1c8] sm:$0xff] %vm7462_vm5, %v7385_v44  ;;  %v8814_v22 = vadd.f32 %v8813_v9, %v8812_v58 }
 0xa17   :  { %v7383_v16 = vpop.permute.xlu0 %7382  ;;  %v7967_v55 = vld [vmem:[#allocation4 + $0x1b8] sm:$0xff] }
 0xa18   :  { %7519 = vst.msk [vmem:[#allocation4 + $0x1c0] sm:$0xff] %vm7462_vm5, %v7383_v16  ;;  %10358 = vmatmul.mubr.msk.f32.gmra.mrb[52].mxu1 %vm7985_vm7, %v7967_v55 }
 0xa19   :  { %v6616_v43 = vpop.permute.xlu1 %6615 }
 0xa1a   :  { %6750 = vst.msk [vmem:[#allocation4 + $0x1d0] sm:$0xff] %vm6691_vm3, %v6616_v43 }
 0xa1b   :  { %v7768_v30 = vpop.permute.xlu0 %7767  ;;  %v16961_v10 = vpop.f32.mrb[26].mxu1 }
 0xa1c   :  { %7904 = vst.msk [vmem:[#allocation4 + $0x1c0] sm:$0xff] %vm7847_vm6, %v7768_v30  ;;  %v16964_v26 = vpop.f32.mrb[27].mxu1  ;;  %v8725_v38 = vmul.f32 %v16961_v10, %v16961_v10  ;;  %v8620_v11 = vsel %vm90_vm0, %v16961_v10, 0.0 }
 0xa1d   :  { %v6618_v63 = vpop.permute.xlu1 %6617  ;;  %v8618_v46 = vsel %vm90_vm0, %v16964_v26, 0.0  ;;  %v8724_v15 = vmul.f32 %v16964_v26, %v16964_v26 }
 0xa1e   :  { %6751 = vst.msk [vmem:[#allocation4 + $0x1d8] sm:$0xff] %vm6691_vm3, %v6618_v63  ;;  %v8619_v42 = vadd.f32 %v8618_v46, %v8617_v8  ;;  %v8817_v52 = vsel %vm90_vm0, %v8725_v38, 0.0 }
 0xa1f   :  { %v8815_v62 = vsel %vm90_vm0, %v8724_v15, 0.0  ;;  %v7770_v19 = vpop.permute.xlu0 %7769 }
 0xa20   :  { %v8816_v50 = vadd.f32 %v8815_v62, %v8814_v22  ;;  %7905 = vst.msk [vmem:[#allocation4 + $0x1c8] sm:$0xff] %vm7847_vm6, %v7770_v19  ;;  %v8621_v47 = vadd.f32 %v8620_v11, %v8619_v42 }
 0xa21   :  { %v7004_v56 = vpop.permute.xlu1 %7003 }
 0xa22   :  { %7137 = vst.msk [vmem:[#allocation4 + $0x1d8] sm:$0xff] %vm7077_vm4, %v7004_v56  ;;  %v8818_v25 = vadd.f32 %v8817_v52, %v8816_v50 }
 0xa23   :  { %v7002_v0 = vpop.permute.xlu0 %7001  ;;  %v7968_v35 = vld [vmem:[#allocation4 + $0x1c0] sm:$0xff] }
 0xa24   :  { %7136 = vst.msk [vmem:[#allocation4 + $0x1d0] sm:$0xff] %vm7077_vm4, %v7002_v0  ;;  %10360 = vmatprep.mubr.msk.f32.mxu1 %vm7985_vm7, %v7968_v35 }
 0xa25   :  { %v7389_v28 = vpop.permute.xlu1 %7388 }
 0xa26   :  { %7522 = vst.msk [vmem:[#allocation4 + $0x1d8] sm:$0xff] %vm7462_vm5, %v7389_v28 }
 0xa27   :  { %v7387_v3 = vpop.permute.xlu0 %7386  ;;  %v7969_v57 = vld [vmem:[#allocation4 + $0x1c8] sm:$0xff] }
 0xa28   :  { %7521 = vst.msk [vmem:[#allocation4 + $0x1d0] sm:$0xff] %vm7462_vm5, %v7387_v3  ;;  %10361 = vmatmul.mubr.msk.f32.gmra.mrb[54].mxu1 %vm7985_vm7, %v7969_v57 }
 0xa29   :  { %v6620_v34 = vpop.permute.xlu1 %6619 }
 0xa2a   :  { %6752 = vst.msk [vmem:[#allocation4 + $0x1e0] sm:$0xff] %vm6691_vm3, %v6620_v34 }
 0xa2b   :  { %v7772_v40 = vpop.permute.xlu0 %7771  ;;  %v16985_v23 = vpop.f32.mrb[28].mxu1 }
 0xa2c   :  { %7906 = vst.msk [vmem:[#allocation4 + $0x1d0] sm:$0xff] %vm7847_vm6, %v7772_v40  ;;  %v16988_v32 = vpop.f32.mrb[29].mxu1  ;;  %v8727_v61 = vmul.f32 %v16985_v23, %v16985_v23  ;;  %v8624_v8 = vsel %vm90_vm0, %v16985_v23, 0.0 }
 0xa2d   :  { %v6622_v59 = vpop.permute.xlu1 %6621  ;;  %v8622_v14 = vsel %vm90_vm0, %v16988_v32, 0.0  ;;  %v8726_v58 = vmul.f32 %v16988_v32, %v16988_v32 }
 0xa2e   :  { %6753 = vst.msk [vmem:[#allocation4 + $0x1e8] sm:$0xff] %vm6691_vm3, %v6622_v59  ;;  %v8623_v44 = vadd.f32 %v8622_v14, %v8621_v47  ;;  %v8821_v30 = vsel %vm90_vm0, %v8727_v61, 0.0 }
 0xa2f   :  { %v8819_v9 = vsel %vm90_vm0, %v8726_v58, 0.0  ;;  %v7774_v22 = vpop.permute.xlu0 %7773 }
 0xa30   :  { %v8820_v16 = vadd.f32 %v8819_v9, %v8818_v25  ;;  %7907 = vst.msk [vmem:[#allocation4 + $0x1d8] sm:$0xff] %vm7847_vm6, %v7774_v22  ;;  %v8625_v43 = vadd.f32 %v8624_v8, %v8623_v44 }
 0xa31   :  { %v7008_v55 = vpop.permute.xlu1 %7007 }
 0xa32   :  { %7139 = vst.msk [vmem:[#allocation4 + $0x1e8] sm:$0xff] %vm7077_vm4, %v7008_v55  ;;  %v8822_v63 = vadd.f32 %v8821_v30, %v8820_v16 }
 0xa33   :  { %v7006_v38 = vpop.permute.xlu0 %7005  ;;  %v7970_v46 = vld [vmem:[#allocation4 + $0x1d0] sm:$0xff] }
 0xa34   :  { %7138 = vst.msk [vmem:[#allocation4 + $0x1e0] sm:$0xff] %vm7077_vm4, %v7006_v38  ;;  %10363 = vmatprep.mubr.msk.f32.mxu1 %vm7985_vm7, %v7970_v46 }
 0xa35   :  { %v7393_v15 = vpop.permute.xlu1 %7392 }
 0xa36   :  { %7524 = vst.msk [vmem:[#allocation4 + $0x1e8] sm:$0xff] %vm7462_vm5, %v7393_v15 }
 0xa37   :  { %v7391_v42 = vpop.permute.xlu0 %7390  ;;  %v7971_v11 = vld [vmem:[#allocation4 + $0x1d8] sm:$0xff] }
 0xa38   :  { %7523 = vst.msk [vmem:[#allocation4 + $0x1e0] sm:$0xff] %vm7462_vm5, %v7391_v42  ;;  %10364 = vmatmul.mubr.msk.f32.gmra.mrb[56].mxu1 %vm7985_vm7, %v7971_v11 }
 0xa39   :  { %v6624_v62 = vpop.permute.xlu1 %6623 }
 0xa3a   :  { %6754 = vst.msk [vmem:[#allocation4 + $0x1f0] sm:$0xff] %vm6691_vm3, %v6624_v62 }
 0xa3b   :  { %v7776_v19 = vpop.permute.xlu0 %7775  ;;  %v17009_v50 = vpop.f32.mrb[30].mxu1 }
 0xa3c   :  { %7908 = vst.msk [vmem:[#allocation4 + $0x1e0] sm:$0xff] %vm7847_vm6, %v7776_v19  ;;  %v17012_v56 = vpop.f32.mrb[31].mxu1  ;;  %v8729_v52 = vmul.f32 %v17009_v50, %v17009_v50  ;;  %v8628_v28 = vsel %vm90_vm0, %v17009_v50, 0.0 }
 0xa3d   :  { %v6626_v47 = vpop.permute.xlu1 %6625  ;;  %v8626_v25 = vsel %vm90_vm0, %v17012_v56, 0.0  ;;  %v8728_v0 = vmul.f32 %v17012_v56, %v17012_v56 }
 0xa3e   :  { %6755 = vst.msk [vmem:[#allocation4 + $0x1f8] sm:$0xff] %vm6691_vm3, %v6626_v47  ;;  %v8627_v35 = vadd.f32 %v8626_v25, %v8625_v43  ;;  %v8825_v61 = vsel %vm90_vm0, %v8729_v52, 0.0 }
 0xa3f   :  { %v8823_v3 = vsel %vm90_vm0, %v8728_v0, 0.0  ;;  %v7778_v57 = vpop.permute.xlu0 %7777 }
 0xa40   :  { %v8824_v34 = vadd.f32 %v8823_v3, %v8822_v63  ;;  %7909 = vst.msk [vmem:[#allocation4 + $0x1e8] sm:$0xff] %vm7847_vm6, %v7778_v57  ;;  %v8629_v59 = vadd.f32 %v8628_v28, %v8627_v35 }
 0xa41   :  { %v7012_v40 = vpop.permute.xlu1 %7011 }
 0xa42   :  { %7141 = vst.msk [vmem:[#allocation4 + $0x1f8] sm:$0xff] %vm7077_vm4, %v7012_v40  ;;  %v8826_v14 = vadd.f32 %v8825_v61, %v8824_v34 }
 0xa43   :  { %v7010_v58 = vpop.permute.xlu0 %7009  ;;  %v7972_v44 = vld [vmem:[#allocation4 + $0x1e0] sm:$0xff] }
 0xa44   :  { %7140 = vst.msk [vmem:[#allocation4 + $0x1f0] sm:$0xff] %vm7077_vm4, %v7010_v58  ;;  %10366 = vmatprep.mubr.msk.f32.mxu1 %vm7985_vm7, %v7972_v44 }
 0xa45   :  { %v7397_v8 = vpop.permute.xlu1 %7396 }
 0xa46   :  { %7526 = vst.msk [vmem:[#allocation4 + $0x1f8] sm:$0xff] %vm7462_vm5, %v7397_v8 }
 0xa47   :  { %v7395_v9 = vpop.permute.xlu0 %7394  ;;  %v7973_v22 = vld [vmem:[#allocation4 + $0x1e8] sm:$0xff] }
 0xa48   :  { %7525 = vst.msk [vmem:[#allocation4 + $0x1f0] sm:$0xff] %vm7462_vm5, %v7395_v9  ;;  %10367 = vmatmul.mubr.msk.f32.gmra.mrb[58].mxu1 %vm7985_vm7, %v7973_v22 }
 0xa49   :  { %v7782_v16 = vpop.permute.xlu1 %7781 }
 0xa4a   :  { %7911 = vst.msk [vmem:[#allocation4 + $0x1f8] sm:$0xff] %vm7847_vm6, %v7782_v16 }
 0xa4b   :  { %v7780_v55 = vpop.permute.xlu0 %7779  ;;  %v17033_v43 = vpop.f32.mrb[32].mxu1 }
 0xa4c   :  { %7910 = vst.msk [vmem:[#allocation4 + $0x1f0] sm:$0xff] %vm7847_vm6, %v7780_v55  ;;  %v17036_v30 = vpop.f32.mrb[33].mxu1  ;;  %v8731_v63 = vmul.f32 %v17033_v43, %v17033_v43  ;;  %v8632_v42 = vsel %vm90_vm0, %v17033_v43, 0.0 }
 0xa4d   :  { %v8630_v38 = vsel %vm90_vm0, %v17036_v30, 0.0  ;;  %v8730_v46 = vmul.f32 %v17036_v30, %v17036_v30 }
 0xa4e   :  { %v8631_v15 = vadd.f32 %v8630_v38, %v8629_v59  ;;  %v8829_v47 = vsel %vm90_vm0, %v8731_v63, 0.0 }
 0xa4f   :  { %v8827_v11 = vsel %vm90_vm0, %v8730_v46, 0.0 }
 0xa50   :  { %v8828_v62 = vadd.f32 %v8827_v11, %v8826_v14  ;;  %v8633_v19 = vadd.f32 %v8632_v42, %v8631_v15 }
 0xa51   :  { %v7975_v52 = vld [vmem:[#allocation4 + $0x1f8] sm:$0xff] }
 0xa52   :  { %v8830_v25 = vadd.f32 %v8829_v47, %v8828_v62 }
 0xa53   :  { %v7974_v0 = vld [vmem:[#allocation4 + $0x1f0] sm:$0xff] }
 0xa54   :  { %10369 = vmatprep.mubr.msk.f32.mxu1 %vm7985_vm7, %v7974_v0 }
 0xa55   :  { %10370 = vmatmul.mubr.msk.f32.gmra.mrb[60].mxu1 %vm7985_vm7, %v7975_v52 }
 0xa5b   :  { %v17050_v35 = vpop.f32.mrb[34].mxu1 }
 0xa5c   :  { %v17052_v28 = vpop.f32.mrb[35].mxu1  ;;  %v8733_v3 = vmul.f32 %v17050_v35, %v17050_v35  ;;  %v8636_v59 = vsel %vm90_vm0, %v17050_v35, 0.0 }
 0xa5d   :  { %v8634_v57 = vsel %vm90_vm0, %v17052_v28, 0.0  ;;  %v8732_v34 = vmul.f32 %v17052_v28, %v17052_v28 }
 0xa5e   :  { %v8635_v40 = vadd.f32 %v8634_v57, %v8633_v19  ;;  %v8833_v44 = vsel %vm90_vm0, %v8733_v3, 0.0 }
 0xa5f   :  { %v8831_v61 = vsel %vm90_vm0, %v8732_v34, 0.0 }
 0xa60   :  { %v8832_v14 = vadd.f32 %v8831_v61, %v8830_v25  ;;  %v8637_v58 = vadd.f32 %v8636_v59, %v8635_v40 }
 0xa62   :  { %v8834_v8 = vadd.f32 %v8833_v44, %v8832_v14 }
 0xa6b   :  { %v17064_v9 = vpop.f32.mrb[36].mxu1 }
 0xa6c   :  { %v17066_v22 = vpop.f32.mrb[37].mxu1  ;;  %v8735_v16 = vmul.f32 %v17064_v9, %v17064_v9  ;;  %v8640_v46 = vsel %vm90_vm0, %v17064_v9, 0.0 }
 0xa6d   :  { %v8638_v55 = vsel %vm90_vm0, %v17066_v22, 0.0  ;;  %v8734_v63 = vmul.f32 %v17066_v22, %v17066_v22 }
 0xa6e   :  { %v8639_v38 = vadd.f32 %v8638_v55, %v8637_v58  ;;  %v8837_v62 = vsel %vm90_vm0, %v8735_v16, 0.0 }
 0xa6f   :  { %v8835_v15 = vsel %vm90_vm0, %v8734_v63, 0.0 }
 0xa70   :  { %v8836_v42 = vadd.f32 %v8835_v15, %v8834_v8  ;;  %v8641_v11 = vadd.f32 %v8640_v46, %v8639_v38 }
 0xa72   :  { %v8838_v19 = vadd.f32 %v8837_v62, %v8836_v42 }
 0xa7b   :  { %v17078_v47 = vpop.f32.mrb[38].mxu1 }
 0xa7c   :  { %19299 = vst [vmem:[#allocation23_spill] sm:$0xff] %v17078_v47  ;;  %v17080_v52 = vpop.f32.mrb[39].mxu1  ;;  %v8737_v25 = vmul.f32 %v17078_v47, %v17078_v47  ;;  %v8644_v34 = vsel %vm90_vm0, %v17078_v47, 0.0 }
 0xa7d   :  { %v8642_v0 = vsel %vm90_vm0, %v17080_v52, 0.0  ;;  %v8736_v3 = vmul.f32 %v17080_v52, %v17080_v52 }
 0xa7e   :  { %v8643_v57 = vadd.f32 %v8642_v0, %v8641_v11  ;;  %v8841_v14 = vsel %vm90_vm0, %v8737_v25, 0.0 }
 0xa7f   :  { %v8839_v40 = vsel %vm90_vm0, %v8736_v3, 0.0 }
 0xa80   :  { %v8840_v59 = vadd.f32 %v8839_v40, %v8838_v19  ;;  %v8645_v61 = vadd.f32 %v8644_v34, %v8643_v57 }
 0xa82   :  { %v8842_v58 = vadd.f32 %v8841_v14, %v8840_v59 }
 0xa8b   :  { %v17092_v44 = vpop.f32.mrb[40].mxu1 }
 0xa8c   :  { %19300 = vst [vmem:[#allocation26_spill] sm:$0xff] %v17092_v44  ;;  %v17094_v8 = vpop.f32.mrb[41].mxu1  ;;  %v8739_v16 = vmul.f32 %v17092_v44, %v17092_v44  ;;  %v8648_v46 = vsel %vm90_vm0, %v17092_v44, 0.0 }
 0xa8d   :  { %19301 = vst [vmem:[#allocation6_spill] sm:$0xff] %v17094_v8  ;;  %v8646_v55 = vsel %vm90_vm0, %v17094_v8, 0.0  ;;  %v8738_v63 = vmul.f32 %v17094_v8, %v17094_v8 }
 0xa8e   :  { %v8647_v38 = vadd.f32 %v8646_v55, %v8645_v61  ;;  %v8845_v62 = vsel %vm90_vm0, %v8739_v16, 0.0 }
 0xa8f   :  { %v8843_v15 = vsel %vm90_vm0, %v8738_v63, 0.0 }
 0xa90   :  { %v8844_v42 = vadd.f32 %v8843_v15, %v8842_v58  ;;  %v8649_v11 = vadd.f32 %v8648_v46, %v8647_v38 }
 0xa92   :  { %v8846_v19 = vadd.f32 %v8845_v62, %v8844_v42 }
 0xa9b   :  { %v17106_v25 = vpop.f32.mrb[42].mxu1 }
 0xa9c   :  { %19302 = vst [vmem:[#allocation25_spill] sm:$0xff] %v17106_v25  ;;  %v17108_v0 = vpop.f32.mrb[43].mxu1  ;;  %v8741_v3 = vmul.f32 %v17106_v25, %v17106_v25  ;;  %v8652_v59 = vsel %vm90_vm0, %v17106_v25, 0.0 }
 0xa9d   :  { %19303 = vst [vmem:[#allocation27_spill] sm:$0xff] %v17108_v0  ;;  %v8650_v57 = vsel %vm90_vm0, %v17108_v0, 0.0  ;;  %v8740_v34 = vmul.f32 %v17108_v0, %v17108_v0 }
 0xa9e   :  { %v8651_v40 = vadd.f32 %v8650_v57, %v8649_v11  ;;  %v8849_v16 = vsel %vm90_vm0, %v8741_v3, 0.0 }
 0xa9f   :  { %v8847_v61 = vsel %vm90_vm0, %v8740_v34, 0.0 }
 0xaa0   :  { %v8848_v14 = vadd.f32 %v8847_v61, %v8846_v19  ;;  %v8653_v58 = vadd.f32 %v8652_v59, %v8651_v40 }
 0xaa2   :  { %v8850_v55 = vadd.f32 %v8849_v16, %v8848_v14 }
 0xaab   :  { %v17120_v63 = vpop.f32.mrb[44].mxu1 }
 0xaac   :  { %19304 = vst [vmem:[#allocation11_spill] sm:$0xff] %v17120_v63  ;;  %v17122_v38 = vpop.f32.mrb[45].mxu1  ;;  %v8743_v46 = vmul.f32 %v17120_v63, %v17120_v63  ;;  %v8656_v62 = vsel %vm90_vm0, %v17120_v63, 0.0 }
 0xaad   :  { %19305 = vst [vmem:[#allocation14_spill] sm:$0xff] %v17122_v38  ;;  %v8654_v15 = vsel %vm90_vm0, %v17122_v38, 0.0  ;;  %v8742_v42 = vmul.f32 %v17122_v38, %v17122_v38 }
 0xaae   :  { %v8655_v11 = vadd.f32 %v8654_v15, %v8653_v58  ;;  %v8853_v34 = vsel %vm90_vm0, %v8743_v46, 0.0 }
 0xaaf   :  { %v8851_v19 = vsel %vm90_vm0, %v8742_v42, 0.0 }
 0xab0   :  { %v8852_v3 = vadd.f32 %v8851_v19, %v8850_v55  ;;  %v8657_v57 = vadd.f32 %v8656_v62, %v8655_v11 }
 0xab2   :  { %v8854_v40 = vadd.f32 %v8853_v34, %v8852_v3 }
 0xabb   :  { %v17134_v59 = vpop.f32.mrb[46].mxu1 }
 0xabc   :  { %19306 = vst [vmem:[#allocation13_spill] sm:$0xff] %v17134_v59  ;;  %v17136_v61 = vpop.f32.mrb[47].mxu1  ;;  %v8745_v14 = vmul.f32 %v17134_v59, %v17134_v59  ;;  %v8660_v55 = vsel %vm90_vm0, %v17134_v59, 0.0 }
 0xabd   :  { %19307 = vst [vmem:[#allocation16_spill] sm:$0xff] %v17136_v61  ;;  %v8658_v58 = vsel %vm90_vm0, %v17136_v61, 0.0  ;;  %v8744_v16 = vmul.f32 %v17136_v61, %v17136_v61 }
 0xabe   :  { %v8659_v15 = vadd.f32 %v8658_v58, %v8657_v57  ;;  %v8857_v62 = vsel %vm90_vm0, %v8745_v14, 0.0 }
 0xabf   :  { %v8855_v46 = vsel %vm90_vm0, %v8744_v16, 0.0 }
 0xac0   :  { %v8856_v42 = vadd.f32 %v8855_v46, %v8854_v40  ;;  %v8661_v11 = vadd.f32 %v8660_v55, %v8659_v15 }
 0xac2   :  { %v8858_v19 = vadd.f32 %v8857_v62, %v8856_v42 }
 0xacb   :  { %v17148_v3 = vpop.f32.mrb[48].mxu1 }
 0xacc   :  { %19308 = vst [vmem:[#allocation18_spill] sm:$0xff] %v17148_v3  ;;  %v17150_v34 = vpop.f32.mrb[49].mxu1  ;;  %v8747_v63 = vmul.f32 %v17148_v3, %v17148_v3  ;;  %v8664_v40 = vsel %vm90_vm0, %v17148_v3, 0.0 }
 0xacd   :  { %19309 = vst [vmem:[#allocation17_spill] sm:$0xff] %v17150_v34  ;;  %v8662_v57 = vsel %vm90_vm0, %v17150_v34, 0.0  ;;  %v8746_v58 = vmul.f32 %v17150_v34, %v17150_v34 }
 0xace   :  { %v8663_v59 = vadd.f32 %v8662_v57, %v8661_v11  ;;  %v8861_v55 = vsel %vm90_vm0, %v8747_v63, 0.0 }
 0xacf   :  { %v8859_v14 = vsel %vm90_vm0, %v8746_v58, 0.0 }
 0xad0   :  { %v8860_v16 = vadd.f32 %v8859_v14, %v8858_v19  ;;  %v8665_v15 = vadd.f32 %v8664_v40, %v8663_v59 }
 0xad2   :  { %v8862_v46 = vadd.f32 %v8861_v55, %v8860_v16 }
 0xadb   :  { %v17162_v42 = vpop.f32.mrb[50].mxu1 }
 0xadc   :  { %19310 = vst [vmem:[#allocation20_spill] sm:$0xff] %v17162_v42  ;;  %v17164_v62 = vpop.f32.mrb[51].mxu1  ;;  %v8749_v61 = vmul.f32 %v17162_v42, %v17162_v42  ;;  %v8668_v59 = vsel %vm90_vm0, %v17162_v42, 0.0 }
 0xadd   :  { %19311 = vst [vmem:[#allocation19_spill] sm:$0xff] %v17164_v62  ;;  %v8666_v11 = vsel %vm90_vm0, %v17164_v62, 0.0  ;;  %v8748_v57 = vmul.f32 %v17164_v62, %v17164_v62 }
 0xade   :  { %v8667_v3 = vadd.f32 %v8666_v11, %v8665_v15  ;;  %v8865_v40 = vsel %vm90_vm0, %v8749_v61, 0.0 }
 0xadf   :  { %v8863_v63 = vsel %vm90_vm0, %v8748_v57, 0.0 }
 0xae0   :  { %v8864_v19 = vadd.f32 %v8863_v63, %v8862_v46  ;;  %v8669_v58 = vadd.f32 %v8668_v59, %v8667_v3 }
 0xae2   :  { %v8866_v14 = vadd.f32 %v8865_v40, %v8864_v19 }
 0xaeb   :  { %v17176_v16 = vpop.f32.mrb[52].mxu1 }
 0xaec   :  { %19312 = vst [vmem:[#allocation22_spill] sm:$0xff] %v17176_v16  ;;  %v17178_v55 = vpop.f32.mrb[53].mxu1  ;;  %v8751_v34 = vmul.f32 %v17176_v16, %v17176_v16  ;;  %v8672_v3 = vsel %vm90_vm0, %v17176_v16, 0.0 }
 0xaed   :  { %19313 = vst [vmem:[#allocation21_spill] sm:$0xff] %v17178_v55  ;;  %v8670_v15 = vsel %vm90_vm0, %v17178_v55, 0.0  ;;  %v8750_v11 = vmul.f32 %v17178_v55, %v17178_v55 }
 0xaee   :  { %v8671_v42 = vadd.f32 %v8670_v15, %v8669_v58  ;;  %v8869_v59 = vsel %vm90_vm0, %v8751_v34, 0.0 }
 0xaef   :  { %v8867_v61 = vsel %vm90_vm0, %v8750_v11, 0.0 }
 0xaf0   :  { %v8868_v46 = vadd.f32 %v8867_v61, %v8866_v14  ;;  %v8673_v57 = vadd.f32 %v8672_v3, %v8671_v42 }
 0xaf2   :  { %v8870_v63 = vadd.f32 %v8869_v59, %v8868_v46 }
 0xafb   :  { %v17190_v19 = vpop.f32.mrb[54].mxu1 }
 0xafc   :  { %19314 = vst [vmem:[#allocation24_spill] sm:$0xff] %v17190_v19  ;;  %v17192_v40 = vpop.f32.mrb[55].mxu1  ;;  %v8753_v62 = vmul.f32 %v17190_v19, %v17190_v19  ;;  %v8676_v42 = vsel %vm90_vm0, %v17190_v19, 0.0 }
 0xafd   :  { %19315 = vst [vmem:[#allocation5_spill] sm:$0xff] %v17192_v40  ;;  %v8674_v58 = vsel %vm90_vm0, %v17192_v40, 0.0  ;;  %v8752_v15 = vmul.f32 %v17192_v40, %v17192_v40 }
 0xafe   :  { %v8675_v16 = vadd.f32 %v8674_v58, %v8673_v57  ;;  %v8873_v3 = vsel %vm90_vm0, %v8753_v62, 0.0 }
 0xaff   :  { %v8871_v34 = vsel %vm90_vm0, %v8752_v15, 0.0 }
 0xb00   :  { %v8872_v14 = vadd.f32 %v8871_v34, %v8870_v63  ;;  %v8677_v11 = vadd.f32 %v8676_v42, %v8675_v16 }
 0xb02   :  { %v8874_v61 = vadd.f32 %v8873_v3, %v8872_v14 }
 0xb0b   :  { %v17204_v46 = vpop.f32.mrb[56].mxu1 }
 0xb0c   :  { %19316 = vst [vmem:[#allocation8_spill] sm:$0xff] %v17204_v46  ;;  %v17206_v59 = vpop.f32.mrb[57].mxu1  ;;  %v8755_v55 = vmul.f32 %v17204_v46, %v17204_v46  ;;  %v8680_v16 = vsel %vm90_vm0, %v17204_v46, 0.0 }
 0xb0d   :  { %19317 = vst [vmem:[#allocation7_spill] sm:$0xff] %v17206_v59  ;;  %v8678_v57 = vsel %vm90_vm0, %v17206_v59, 0.0  ;;  %v8754_v58 = vmul.f32 %v17206_v59, %v17206_v59 }
 0xb0e   :  { %v8679_v19 = vadd.f32 %v8678_v57, %v8677_v11  ;;  %v8877_v42 = vsel %vm90_vm0, %v8755_v55, 0.0 }
 0xb0f   :  { %v8875_v62 = vsel %vm90_vm0, %v8754_v58, 0.0 }
 0xb10   :  { %v8876_v63 = vadd.f32 %v8875_v62, %v8874_v61  ;;  %v8681_v15 = vadd.f32 %v8680_v16, %v8679_v19 }
 0xb12   :  { %v8878_v34 = vadd.f32 %v8877_v42, %v8876_v63 }
 0xb1b   :  { %v17218_v14 = vpop.f32.mrb[58].mxu1 }
 0xb1c   :  { %19318 = vst [vmem:[#allocation10_spill] sm:$0xff] %v17218_v14  ;;  %v17220_v3 = vpop.f32.mrb[59].mxu1  ;;  %v8757_v40 = vmul.f32 %v17218_v14, %v17218_v14  ;;  %v8684_v19 = vsel %vm90_vm0, %v17218_v14, 0.0 }
 0xb1d   :  { %19319 = vst [vmem:[#allocation9_spill] sm:$0xff] %v17220_v3  ;;  %v8682_v11 = vsel %vm90_vm0, %v17220_v3, 0.0  ;;  %v8756_v57 = vmul.f32 %v17220_v3, %v17220_v3 }
 0xb1e   :  { %v8683_v46 = vadd.f32 %v8682_v11, %v8681_v15  ;;  %v8881_v16 = vsel %vm90_vm0, %v8757_v40, 0.0 }
 0xb1f   :  { %v8879_v55 = vsel %vm90_vm0, %v8756_v57, 0.0 }
 0xb20   :  { %v8880_v61 = vadd.f32 %v8879_v55, %v8878_v34  ;;  %v8685_v58 = vadd.f32 %v8684_v19, %v8683_v46 }
 0xb22   :  { %v8882_v62 = vadd.f32 %v8881_v16, %v8880_v61 }
 0xb28   :  { %v17232_v63 = vpop.f32.mrb[60].mxu1 }
 0xb29   :  { %19320 = vst [vmem:[#allocation12_spill] sm:$0xff] %v17232_v63  ;;  %v17234_v42 = vpop.f32.mrb[61].mxu1  ;;  %v8759_v59 = vmul.f32 %v17232_v63, %v17232_v63  ;;  %v8688_v46 = vsel %vm90_vm0, %v17232_v63, 0.0 }
 0xb2a   :  { %19321 = vst [vmem:[#allocation15_spill] sm:$0xff] %v17234_v42  ;;  %v8686_v15 = vsel %vm90_vm0, %v17234_v42, 0.0  ;;  %v8758_v11 = vmul.f32 %v17234_v42, %v17234_v42 }
 0xb2b   :  { %v8687_v14 = vadd.f32 %v8686_v15, %v8685_v58  ;;  %v8885_v19 = vsel %vm90_vm0, %v8759_v59, 0.0 }
 0xb2c   :  { %v8883_v40 = vsel %vm90_vm0, %v8758_v11, 0.0 }
 0xb2d   :  { %v8689_v34 = vadd.f32 %v8688_v46, %v8687_v14  ;;  %v8884_v57 = vadd.f32 %v8883_v40, %v8882_v62  ;;  %v19342_v14 = vld [vmem:[#allocation10_spill] sm:$0xff] }
 0xb2f   :  { %v8690_v55 = vrot.slane %v8689_v34, 4  ;;  %v8886_v61 = vadd.f32 %v8885_v19, %v8884_v57 }
 0xb30   :  { %v19344_v57 = vld [vmem:[#allocation12_spill] sm:$0xff] }
 0xb31   :  { %v8691_v16 = vadd.f32 %v8690_v55, %v8689_v34  ;;  %v8887_v3 = vrot.slane %v8886_v61, 4  ;;  %v19323_v55 = vld [vmem:[#allocation6_spill] sm:$0xff]  ;;  %v19343_v19 = vld [vmem:[#allocation15_spill] sm:$0xff] }
 0xb33   :  { %v8692_v38 = vrot.slane %v8691_v16, 2  ;;  %v8888_v25 = vadd.f32 %v8887_v3, %v8886_v61  ;;  %v19324_v61 = vld [vmem:[#allocation26_spill] sm:$0xff] }
 0xb35   :  { %v8693_v0 = vadd.f32 %v8692_v38, %v8691_v16  ;;  %v8889_v44 = vrot.slane %v8888_v25, 2  ;;  %v19325_v16 = vld [vmem:[#allocation27_spill] sm:$0xff]  ;;  %v19341_v38 = vld [vmem:[#allocation9_spill] sm:$0xff] }
 0xb37   :  { %v8694_v8 = vrot.slane %v8693_v0, 1  ;;  %v8890_v42 = vadd.f32 %v8889_v44, %v8888_v25  ;;  %v19340_v44 = vld [vmem:[#allocation8_spill] sm:$0xff] }
 0xb39   :  { %v8695_v58 = vadd.f32 %v8694_v8, %v8693_v0  ;;  %v8891_v15 = vrot.slane %v8890_v42, 1  ;;  %v19339_v8 = vld [vmem:[#allocation7_spill] sm:$0xff] }
 0xb3b   :  { %v8892_v47 = vadd.f32 %v8891_v15, %v8890_v42  ;;  %v17246_v63 = vmul.f32 0.001953125, %v8695_v58  ;;  %v19326_v58 = vld [vmem:[#allocation25_spill] sm:$0xff]  ;;  %v19327_v15 = vld [vmem:[#allocation14_spill] sm:$0xff] }
 0xb3d   :  { %v17248_v11 = vmul.f32 0.001953125, %v8892_v47  ;;  %v17252_v59 = vmul.f32 %v17246_v63, %v17246_v63  ;;  %v19338_v47 = vld [vmem:[#allocation24_spill] sm:$0xff]  ;;  %v19345_v40 = vsub.f32 %v16618_v24, %v17246_v63  ;;  %v19346_v42 = vsub.f32 %v16610_v18, %v17246_v63 }
 0xb3e   :  { %v19347_v3 = vsub.f32 %v16639_v2, %v17246_v63 }
 0xb3f   :  { %v8896_v0 = vsub.f32 %v17248_v11, %v17252_v59  ;;  %v19322_v59 = vld [vmem:[#allocation23_spill] sm:$0xff] }
 0xb41   :  { %v8961_v11 = vadd.f32 1e-05, %v8896_v0 }
 0xb43   :  { %10421 = vrsqrt.f32 %v8961_v11  ;;  %v19348_v11 = vsub.f32 %v16636_v6, %v17246_v63 }
 0xb4d   :  { %v17384_v34 = vpop.eup %10421 }
 0xb4e   :  { %v17390_v46 = vmul.f32 %v17384_v34, %v19345_v40  ;;  %v17396_v62 = vmul.f32 %v17384_v34, %v19346_v42  ;;  %v17402_v0 = vmul.f32 %v17384_v34, %v19347_v3  ;;  %v17408_v24 = vmul.f32 %v17384_v34, %v19348_v11 }
 0xb4f   :  { %v19349_v40 = vsub.f32 %v16667_v29, %v17246_v63  ;;  %v19350_v42 = vsub.f32 %v16664_v4, %v17246_v63  ;;  %v19351_v3 = vsub.f32 %v16694_v17, %v17246_v63  ;;  %v19352_v11 = vsub.f32 %v16691_v13, %v17246_v63 }
 0xb51   :  { %v17414_v18 = vmul.f32 %v17384_v34, %v19349_v40  ;;  %v17420_v2 = vmul.f32 %v17384_v34, %v19350_v42  ;;  %v17426_v6 = vmul.f32 %v17384_v34, %v19351_v3  ;;  %v17432_v29 = vmul.f32 %v17384_v34, %v19352_v11 }
 0xb52   :  { %v19353_v40 = vsub.f32 %v16721_v7, %v17246_v63  ;;  %v19354_v42 = vsub.f32 %v16718_v41, %v17246_v63  ;;  %v19355_v3 = vsub.f32 %v16749_v53, %v17246_v63  ;;  %v19356_v11 = vsub.f32 %v16746_v12, %v17246_v63 }
 0xb54   :  { %v17438_v4 = vmul.f32 %v17384_v34, %v19353_v40  ;;  %v17444_v17 = vmul.f32 %v17384_v34, %v19354_v42  ;;  %v17450_v13 = vmul.f32 %v17384_v34, %v19355_v3  ;;  %v17456_v7 = vmul.f32 %v17384_v34, %v19356_v11 }
 0xb55   :  { %v19357_v40 = vsub.f32 %v16777_v45, %v17246_v63  ;;  %v19358_v42 = vsub.f32 %v16774_v51, %v17246_v63  ;;  %v19359_v3 = vsub.f32 %v16804_v31, %v17246_v63  ;;  %v19360_v11 = vsub.f32 %v16801_v5, %v17246_v63 }
 0xb57   :  { %v17462_v41 = vmul.f32 %v17384_v34, %v19357_v40  ;;  %v17468_v53 = vmul.f32 %v17384_v34, %v19358_v42  ;;  %v17474_v12 = vmul.f32 %v17384_v34, %v19359_v3  ;;  %v17480_v45 = vmul.f32 %v17384_v34, %v19360_v11 }
 0xb58   :  { %v19361_v40 = vsub.f32 %v16831_v37, %v17246_v63  ;;  %v19362_v42 = vsub.f32 %v16828_v21, %v17246_v63  ;;  %v19363_v3 = vsub.f32 %v16856_v33, %v17246_v63  ;;  %v19364_v11 = vsub.f32 %v16853_v39, %v17246_v63 }
 0xb5a   :  { %v17486_v51 = vmul.f32 %v17384_v34, %v19361_v40  ;;  %v17492_v31 = vmul.f32 %v17384_v34, %v19362_v42  ;;  %v17498_v5 = vmul.f32 %v17384_v34, %v19363_v3  ;;  %v17504_v37 = vmul.f32 %v17384_v34, %v19364_v11 }
 0xb5b   :  { %v19365_v40 = vsub.f32 %v16878_v48, %v17246_v63  ;;  %v19366_v42 = vsub.f32 %v16875_v54, %v17246_v63  ;;  %v19367_v3 = vsub.f32 %v16899_v1, %v17246_v63  ;;  %v19368_v11 = vsub.f32 %v16896_v60, %v17246_v63 }
 0xb5d   :  { %v17510_v21 = vmul.f32 %v17384_v34, %v19365_v40  ;;  %v17516_v33 = vmul.f32 %v17384_v34, %v19366_v42  ;;  %v17522_v39 = vmul.f32 %v17384_v34, %v19367_v3  ;;  %v17528_v48 = vmul.f32 %v17384_v34, %v19368_v11 }
 0xb5e   :  { %v19369_v40 = vsub.f32 %v16920_v27, %v17246_v63  ;;  %v19370_v42 = vsub.f32 %v16917_v49, %v17246_v63  ;;  %v19371_v3 = vsub.f32 %v16942_v36, %v17246_v63  ;;  %v19372_v11 = vsub.f32 %v16939_v20, %v17246_v63 }
 0xb60   :  { %v17534_v54 = vmul.f32 %v17384_v34, %v19369_v40  ;;  %v17540_v1 = vmul.f32 %v17384_v34, %v19370_v42  ;;  %v17546_v60 = vmul.f32 %v17384_v34, %v19371_v3  ;;  %v17552_v27 = vmul.f32 %v17384_v34, %v19372_v11 }
 0xb61   :  { %v19373_v40 = vsub.f32 %v16964_v26, %v17246_v63  ;;  %v19374_v42 = vsub.f32 %v16961_v10, %v17246_v63  ;;  %v19375_v3 = vsub.f32 %v16988_v32, %v17246_v63  ;;  %v19376_v11 = vsub.f32 %v16985_v23, %v17246_v63 }
 0xb63   :  { %v17558_v49 = vmul.f32 %v17384_v34, %v19373_v40  ;;  %v17564_v36 = vmul.f32 %v17384_v34, %v19374_v42  ;;  %v17570_v20 = vmul.f32 %v17384_v34, %v19375_v3  ;;  %v17576_v26 = vmul.f32 %v17384_v34, %v19376_v11 }
 0xb64   :  { %v19377_v40 = vsub.f32 %v17012_v56, %v17246_v63  ;;  %v19378_v42 = vsub.f32 %v17009_v50, %v17246_v63  ;;  %v19379_v3 = vsub.f32 %v17036_v30, %v17246_v63  ;;  %v19380_v11 = vsub.f32 %v17033_v43, %v17246_v63 }
 0xb66   :  { %v17582_v10 = vmul.f32 %v17384_v34, %v19377_v40  ;;  %v17588_v32 = vmul.f32 %v17384_v34, %v19378_v42  ;;  %v17594_v23 = vmul.f32 %v17384_v34, %v19379_v3  ;;  %v17600_v56 = vmul.f32 %v17384_v34, %v19380_v11 }
 0xb67   :  { %v19381_v40 = vsub.f32 %v17052_v28, %v17246_v63  ;;  %v19382_v42 = vsub.f32 %v17050_v35, %v17246_v63  ;;  %v19383_v3 = vsub.f32 %v17066_v22, %v17246_v63  ;;  %v19384_v11 = vsub.f32 %v17064_v9, %v17246_v63 }
 0xb69   :  { %v17606_v50 = vmul.f32 %v17384_v34, %v19381_v40  ;;  %v17612_v30 = vmul.f32 %v17384_v34, %v19382_v42  ;;  %v17618_v43 = vmul.f32 %v17384_v34, %v19383_v3  ;;  %v17624_v28 = vmul.f32 %v17384_v34, %v19384_v11 }
 0xb6a   :  { %v19385_v40 = vsub.f32 %v17080_v52, %v17246_v63  ;;  %v19386_v42 = vsub.f32 %v19322_v59, %v17246_v63  ;;  %v19387_v3 = vsub.f32 %v19323_v55, %v17246_v63  ;;  %v19388_v11 = vsub.f32 %v19324_v61, %v17246_v63 }
 0xb6c   :  { %v17630_v35 = vmul.f32 %v17384_v34, %v19385_v40  ;;  %v17636_v22 = vmul.f32 %v17384_v34, %v19386_v42  ;;  %v17642_v9 = vmul.f32 %v17384_v34, %v19387_v3  ;;  %v17648_v52 = vmul.f32 %v17384_v34, %v19388_v11  ;;  %v19395_v11 = vld [vmem:[#allocation11_spill] sm:$0xff] }
 0xb6d   :  { %v19389_v40 = vsub.f32 %v19325_v16, %v17246_v63  ;;  %v19391_v42 = vsub.f32 %v19326_v58, %v17246_v63  ;;  %v19393_v3 = vsub.f32 %v19327_v15, %v17246_v63  ;;  %v19396_v25 = vsub.f32 %v19395_v11, %v17246_v63 }
 0xb6f   :  { %v17654_v59 = vmul.f32 %v17384_v34, %v19389_v40  ;;  %v17660_v55 = vmul.f32 %v17384_v34, %v19391_v42  ;;  %v17666_v61 = vmul.f32 %v17384_v34, %v19393_v3  ;;  %v17672_v16 = vmul.f32 %v17384_v34, %v19396_v25  ;;  %v19398_v40 = vld [vmem:[#allocation16_spill] sm:$0xff]  ;;  %v19401_v42 = vld [vmem:[#allocation13_spill] sm:$0xff]  ;;  %v19407_v25 = vld [vmem:[#allocation18_spill] sm:$0xff] }
 0xb70   :  { %v19404_v3 = vld [vmem:[#allocation17_spill] sm:$0xff] }
 0xb71   :  { %19390 = vst [vmem:[#allocation23_spill] sm:$0xff] %v17654_v59  ;;  %19392 = vst [vmem:[#allocation6_spill] sm:$0xff] %v17660_v55  ;;  %v19399_v59 = vsub.f32 %v19398_v40, %v17246_v63  ;;  %v19402_v55 = vsub.f32 %v19401_v42, %v17246_v63 }
 0xb72   :  { %19394 = vst [vmem:[#allocation26_spill] sm:$0xff] %v17666_v61  ;;  %19397 = vst [vmem:[#allocation27_spill] sm:$0xff] %v17672_v16  ;;  %v19405_v61 = vsub.f32 %v19404_v3, %v17246_v63  ;;  %v19408_v16 = vsub.f32 %v19407_v25, %v17246_v63 }
 0xb73   :  { %v17678_v58 = vmul.f32 %v17384_v34, %v19399_v59  ;;  %v17684_v15 = vmul.f32 %v17384_v34, %v19402_v55  ;;  %v19410_v59 = vld [vmem:[#allocation19_spill] sm:$0xff]  ;;  %v19412_v55 = vld [vmem:[#allocation20_spill] sm:$0xff] }
 0xb74   :  { %v17690_v11 = vmul.f32 %v17384_v34, %v19405_v61  ;;  %v17696_v40 = vmul.f32 %v17384_v34, %v19408_v16  ;;  %v19415_v61 = vld [vmem:[#allocation21_spill] sm:$0xff]  ;;  %v19417_v16 = vld [vmem:[#allocation22_spill] sm:$0xff] }
 0xb75   :  { %19400 = vst [vmem:[#allocation25_spill] sm:$0xff] %v17678_v58  ;;  %19403 = vst [vmem:[#allocation14_spill] sm:$0xff] %v17684_v15  ;;  %v19411_v58 = vsub.f32 %v19410_v59, %v17246_v63  ;;  %v19413_v15 = vsub.f32 %v19412_v55, %v17246_v63  ;;  %v19420_v55 = vld [vmem:[#allocation5_spill] sm:$0xff] }
 0xb76   :  { %19406 = vst [vmem:[#allocation24_spill] sm:$0xff] %v17690_v11  ;;  %19409 = vst [vmem:[#allocation7_spill] sm:$0xff] %v17696_v40  ;;  %v19416_v11 = vsub.f32 %v19415_v61, %v17246_v63  ;;  %v19418_v40 = vsub.f32 %v19417_v16, %v17246_v63 }
 0xb77   :  { %v17702_v42 = vmul.f32 %v17384_v34, %v19411_v58  ;;  %v17708_v3 = vmul.f32 %v17384_v34, %v19413_v15  ;;  %v17725_v58 = vld [vmem:[%s19001_s5] ss:$0 sm:$0xff]  ;;  %v19421_v15 = vsub.f32 %v19420_v55, %v17246_v63 }
 0xb78   :  { %v17714_v25 = vmul.f32 %v17384_v34, %v19416_v11  ;;  %v17720_v59 = vmul.f32 %v17384_v34, %v19418_v40  ;;  %v19422_v11 = vsub.f32 %v19338_v47, %v17246_v63  ;;  %v19423_v40 = vsub.f32 %v19339_v8, %v17246_v63 }
 0xb79   :  { %19414 = vst [vmem:[#allocation8_spill] sm:$0xff] %v17708_v3  ;;  %v17731_v3 = vmul.f32 %v17384_v34, %v19421_v15  ;;  %v19425_v15 = vsub.f32 %v19341_v38, %v17246_v63 }
 0xb7a   :  { %19419 = vst [vmem:[#allocation9_spill] sm:$0xff] %v17720_v59  ;;  %v17737_v61 = vmul.f32 %v17384_v34, %v19422_v11  ;;  %v17743_v16 = vmul.f32 %v17384_v34, %v19423_v40  ;;  %v19424_v59 = vsub.f32 %v19340_v44, %v17246_v63  ;;  %v19426_v11 = vsub.f32 %v19342_v14, %v17246_v63 }
 0xb7b   :  { %v17755_v47 = vmul.f32 %v17384_v34, %v19425_v15  ;;  %v19427_v40 = vsub.f32 %v19343_v19, %v17246_v63  ;;  %v17777_v15 = vmul.f32 %v17725_v58, %v17390_v46  ;;  %v17781_v14 = vmul.f32 %v17725_v58, %v17396_v62 }
 0xb7c   :  { %v17749_v55 = vmul.f32 %v17384_v34, %v19424_v59  ;;  %v17761_v8 = vmul.f32 %v17384_v34, %v19426_v11  ;;  %v19428_v59 = vsub.f32 %v19344_v57, %v17246_v63  ;;  %v17785_v19 = vmul.f32 %v17725_v58, %v17402_v0 }
 0xb7d   :  { %v17767_v44 = vmul.f32 %v17384_v34, %v19427_v40  ;;  %v17789_v11 = vmul.f32 %v17725_v58, %v17408_v24  ;;  %v17793_v63 = vmul.f32 %v17725_v58, %v17414_v18  ;;  %v17797_v46 = vmul.f32 %v17725_v58, %v17420_v2  ;;  %v19435_v40 = vld [vmem:[#allocation26_spill] sm:$0xff] }
 0xb7e   :  { %v17773_v38 = vmul.f32 %v17384_v34, %v19428_v59  ;;  %v17801_v62 = vmul.f32 %v17725_v58, %v17426_v6  ;;  %v17805_v34 = vmul.f32 %v17725_v58, %v17432_v29  ;;  %v17809_v57 = vmul.f32 %v17725_v58, %v17438_v4  ;;  %v19436_v59 = vld [vmem:[#allocation27_spill] sm:$0xff] }
 0xb7f   :  { %v17813_v0 = vmul.f32 %v17725_v58, %v17444_v17  ;;  %v17817_v24 = vmul.f32 %v17725_v58, %v17450_v13  ;;  %v17821_v18 = vmul.f32 %v17725_v58, %v17456_v7  ;;  %v17825_v2 = vmul.f32 %v17725_v58, %v17462_v41 }
 0xb80   :  { %v17829_v6 = vmul.f32 %v17725_v58, %v17468_v53  ;;  %v17833_v29 = vmul.f32 %v17725_v58, %v17474_v12  ;;  %v17837_v4 = vmul.f32 %v17725_v58, %v17480_v45  ;;  %v17841_v17 = vmul.f32 %v17725_v58, %v17486_v51 }
 0xb81   :  { %v17845_v13 = vmul.f32 %v17725_v58, %v17492_v31  ;;  %v17849_v7 = vmul.f32 %v17725_v58, %v17498_v5  ;;  %v17853_v41 = vmul.f32 %v17725_v58, %v17504_v37  ;;  %v17857_v53 = vmul.f32 %v17725_v58, %v17510_v21 }
 0xb82   :  { %v17861_v12 = vmul.f32 %v17725_v58, %v17516_v33  ;;  %v17865_v45 = vmul.f32 %v17725_v58, %v17522_v39  ;;  %v17869_v51 = vmul.f32 %v17725_v58, %v17528_v48  ;;  %v17873_v31 = vmul.f32 %v17725_v58, %v17534_v54 }
 0xb83   :  { %v17877_v5 = vmul.f32 %v17725_v58, %v17540_v1  ;;  %v17881_v37 = vmul.f32 %v17725_v58, %v17546_v60  ;;  %v17885_v21 = vmul.f32 %v17725_v58, %v17552_v27  ;;  %v17889_v33 = vmul.f32 %v17725_v58, %v17558_v49 }
 0xb84   :  { %v17893_v39 = vmul.f32 %v17725_v58, %v17564_v36  ;;  %v17897_v48 = vmul.f32 %v17725_v58, %v17570_v20  ;;  %v17901_v54 = vmul.f32 %v17725_v58, %v17576_v26  ;;  %v17905_v1 = vmul.f32 %v17725_v58, %v17582_v10 }
 0xb85   :  { %v17909_v60 = vmul.f32 %v17725_v58, %v17588_v32  ;;  %v17913_v27 = vmul.f32 %v17725_v58, %v17594_v23  ;;  %v17917_v49 = vmul.f32 %v17725_v58, %v17600_v56  ;;  %v17921_v36 = vmul.f32 %v17725_v58, %v17606_v50 }
 0xb86   :  { %v17925_v20 = vmul.f32 %v17725_v58, %v17612_v30  ;;  %v17929_v26 = vmul.f32 %v17725_v58, %v17618_v43  ;;  %v17933_v10 = vmul.f32 %v17725_v58, %v17624_v28  ;;  %v17937_v32 = vmul.f32 %v17725_v58, %v17630_v35  ;;  %v19431_v30 = vld [vmem:[#allocation23_spill] sm:$0xff]  ;;  %v19433_v28 = vld [vmem:[#allocation6_spill] sm:$0xff] }
 0xb87   :  { %v17941_v23 = vmul.f32 %v17725_v58, %v17636_v22  ;;  %v17945_v56 = vmul.f32 %v17725_v58, %v17642_v9  ;;  %v17949_v50 = vmul.f32 %v17725_v58, %v17648_v52  ;;  %v17953_v43 = vmul.f32 %v17725_v58, %v19431_v30 }
 0xb88   :  { %v17957_v35 = vmul.f32 %v17725_v58, %v19433_v28  ;;  %v17961_v22 = vmul.f32 %v17725_v58, %v19435_v40  ;;  %v17965_v9 = vmul.f32 %v17725_v58, %v19436_v59  ;;  %v17985_v59 = vmul.f32 %v17725_v58, %v17702_v42 }
 0xb89   :  { %19429 = vst [vmem:[#allocation10_spill] sm:$0xff] %v17945_v56  ;;  %19430 = vst [vmem:[#allocation15_spill] sm:$0xff] %v17949_v50  ;;  %v19438_v56 = vld [vmem:[#allocation25_spill] sm:$0xff]  ;;  %v19439_v50 = vld [vmem:[#allocation14_spill] sm:$0xff]  ;;  %v18006_v42 = vmul.f32 %v17725_v58, %v17731_v3  ;;  %v18026_v3 = vmul.f32 %v17725_v58, %v17761_v8 }
 0xb8a   :  { %19432 = vst [vmem:[#allocation12_spill] sm:$0xff] %v17953_v43  ;;  %19434 = vst [vmem:[#allocation11_spill] sm:$0xff] %v17957_v35  ;;  %v17969_v52 = vmul.f32 %v17725_v58, %v19438_v56  ;;  %v17973_v30 = vmul.f32 %v17725_v58, %v19439_v50  ;;  %v19441_v43 = vld [vmem:[#allocation24_spill] sm:$0xff]  ;;  %v19442_v35 = vld [vmem:[#allocation7_spill] sm:$0xff]  ;;  %v17993_v50 = vmul.f32 %v17725_v58, %v17714_v25 }
 0xb8b   :  { %19437 = vst [vmem:[#allocation16_spill] sm:$0xff] %v17965_v9  ;;  %v17977_v28 = vmul.f32 %v17725_v58, %v19441_v43  ;;  %v17981_v40 = vmul.f32 %v17725_v58, %v19442_v35  ;;  %v19443_v9 = vld [vmem:[#allocation8_spill] sm:$0xff]  ;;  %v18002_v35 = vld [vmem:[%s19002_s6] ss:$0 sm:$0xff]  ;;  %v18014_v25 = vmul.f32 %v17725_v58, %v17743_v16  ;;  %v18034_v16 = vmul.f32 %v17725_v58, %v17773_v38 }
 0xb8c   :  { %19440 = vst [vmem:[#allocation13_spill] sm:$0xff] %v17973_v30  ;;  %v17989_v56 = vmul.f32 %v17725_v58, %v19443_v9  ;;  %v19444_v30 = vld [vmem:[#allocation9_spill] sm:$0xff]  ;;  %v18010_v9 = vmul.f32 %v17725_v58, %v17737_v61  ;;  %v18030_v61 = vmul.f32 %v17725_v58, %v17767_v44  ;;  %v18046_v8 = vadd.f32 %v18002_v35, %v17785_v19 }
 0xb8d   :  { %v17997_v43 = vmul.f32 %v17725_v58, %v19444_v30  ;;  %v18018_v30 = vmul.f32 %v17725_v58, %v17749_v55  ;;  %v18038_v55 = vadd.f32 %v18002_v35, %v17777_v15  ;;  %v18050_v44 = vadd.f32 %v18002_v35, %v17789_v11 }
 0xb8e   :  { %v18058_v38 = vadd.f32 %v18002_v35, %v17797_v46  ;;  %v18062_v15 = vadd.f32 %v18002_v35, %v17801_v62  ;;  %v18070_v19 = vadd.f32 %v18002_v35, %v17809_v57  ;;  %v18074_v11 = vadd.f32 %v18002_v35, %v17813_v0 }
 0xb8f   :  { %19445 = vst [vmem:[#allocation17_spill] sm:$0xff] %v17997_v43  ;;  %v18022_v43 = vmul.f32 %v17725_v58, %v17755_v47  ;;  %v18042_v47 = vadd.f32 %v18002_v35, %v17781_v14  ;;  %v18054_v58 = vadd.f32 %v18002_v35, %v17793_v63  ;;  %v18066_v14 = vadd.f32 %v18002_v35, %v17805_v34 }
 0xb90   :  { %v18078_v63 = vadd.f32 %v18002_v35, %v17817_v24  ;;  %v18082_v46 = vadd.f32 %v18002_v35, %v17821_v18  ;;  %v18086_v62 = vadd.f32 %v18002_v35, %v17825_v2  ;;  %v18090_v34 = vadd.f32 %v18002_v35, %v17829_v6 }
 0xb91   :  { %v18094_v57 = vadd.f32 %v18002_v35, %v17833_v29  ;;  %v18098_v0 = vadd.f32 %v18002_v35, %v17837_v4  ;;  %v18102_v24 = vadd.f32 %v18002_v35, %v17841_v17  ;;  %v18106_v18 = vadd.f32 %v18002_v35, %v17845_v13 }
 0xb92   :  { %v18110_v2 = vadd.f32 %v18002_v35, %v17849_v7  ;;  %v18114_v6 = vadd.f32 %v18002_v35, %v17853_v41  ;;  %v18118_v29 = vadd.f32 %v18002_v35, %v17857_v53  ;;  %v18122_v4 = vadd.f32 %v18002_v35, %v17861_v12 }
 0xb93   :  { %v18126_v17 = vadd.f32 %v18002_v35, %v17865_v45  ;;  %v18130_v13 = vadd.f32 %v18002_v35, %v17869_v51  ;;  %v18134_v7 = vadd.f32 %v18002_v35, %v17873_v31  ;;  %v18138_v41 = vadd.f32 %v18002_v35, %v17877_v5 }
 0xb94   :  { %v18142_v53 = vadd.f32 %v18002_v35, %v17881_v37  ;;  %v18146_v12 = vadd.f32 %v18002_v35, %v17885_v21  ;;  %v18150_v45 = vadd.f32 %v18002_v35, %v17889_v33  ;;  %v18154_v51 = vadd.f32 %v18002_v35, %v17893_v39 }
 0xb95   :  { %v18158_v31 = vadd.f32 %v18002_v35, %v17897_v48  ;;  %v18162_v5 = vadd.f32 %v18002_v35, %v17901_v54  ;;  %v18166_v37 = vadd.f32 %v18002_v35, %v17905_v1  ;;  %v18170_v21 = vadd.f32 %v18002_v35, %v17909_v60 }
 0xb96   :  { %v18174_v33 = vadd.f32 %v18002_v35, %v17913_v27  ;;  %v18178_v39 = vadd.f32 %v18002_v35, %v17917_v49  ;;  %v18182_v48 = vadd.f32 %v18002_v35, %v17921_v36  ;;  %v18186_v54 = vadd.f32 %v18002_v35, %v17925_v20  ;;  %v19454_v36 = vld [vmem:[#allocation10_spill] sm:$0xff] }
 0xb97   :  { %v18190_v1 = vadd.f32 %v18002_v35, %v17929_v26  ;;  %v18194_v60 = vadd.f32 %v18002_v35, %v17933_v10  ;;  %v18198_v27 = vadd.f32 %v18002_v35, %v17937_v32  ;;  %v18202_v49 = vadd.f32 %v18002_v35, %v17941_v23 }
 0xb98   :  { %19446 = vst [vmem:[#allocation18_spill] sm:$0xff] %v18174_v33  ;;  %19447 = vst [vmem:[#allocation19_spill] sm:$0xff] %v18178_v39  ;;  %v18206_v20 = vadd.f32 %v18002_v35, %v19454_v36  ;;  %v18222_v23 = vadd.f32 %v18002_v35, %v17961_v22  ;;  %v9949_v22 = vld [vmem:[%s18996_s0 + $0x39] sm:$0xff]  ;;  %v9971_v33 = vld [vmem:[%s18996_s0 + $0x141] sm:$0xff] }
 0xb99   :  { %19448 = vst [vmem:[#allocation20_spill] sm:$0xff] %v18182_v48  ;;  %19449 = vst [vmem:[#allocation21_spill] sm:$0xff] %v18186_v54  ;;  %v19456_v54 = vld [vmem:[#allocation15_spill] sm:$0xff]  ;;  %v18374_v48 = vadd.f32 %v9949_v22, %v18050_v44  ;;  %v9970_v39 = vld [vmem:[%s18996_s0 + $0x139] sm:$0xff] }
 0xb9a   :  { %19450 = vst [vmem:[#allocation22_spill] sm:$0xff] %v18190_v1  ;;  %19451 = vst [vmem:[#allocation5_spill] sm:$0xff] %v18194_v60  ;;  %v18210_v26 = vadd.f32 %v18002_v35, %v19456_v54  ;;  %v19458_v1 = vld [vmem:[#allocation12_spill] sm:$0xff]  ;;  %v19460_v60 = vld [vmem:[#allocation11_spill] sm:$0xff] }
 0xb9b   :  { %19452 = vst [vmem:[#allocation23_spill] sm:$0xff] %v18198_v27  ;;  %19453 = vst [vmem:[#allocation6_spill] sm:$0xff] %v18202_v49  ;;  %v18214_v10 = vadd.f32 %v18002_v35, %v19458_v1  ;;  %v18218_v32 = vadd.f32 %v18002_v35, %v19460_v60  ;;  %v19463_v49 = vld [vmem:[#allocation16_spill] sm:$0xff]  ;;  %v9947_v1 = vld [vmem:[%s18996_s0 + $0x21] sm:$0xff] }
 0xb9c   :  { %19455 = vst [vmem:[#allocation26_spill] sm:$0xff] %v18206_v20  ;;  %19457 = vst [vmem:[#allocation27_spill] sm:$0xff] %v18210_v26  ;;  %v18226_v36 = vadd.f32 %v18002_v35, %v19463_v49  ;;  %v9946_v54 = vld [vmem:[%s18996_s0 + $0x19] sm:$0xff]  ;;  %v9948_v60 = vld [vmem:[%s18996_s0 + $0x31] sm:$0xff]  ;;  %v18242_v49 = vadd.f32 %v18002_v35, %v17969_v52 }
 0xb9d   :  { %19459 = vst [vmem:[#allocation25_spill] sm:$0xff] %v18214_v10  ;;  %19461 = vst [vmem:[#allocation14_spill] sm:$0xff] %v18218_v32  ;;  %v18250_v32 = vadd.f32 %v18002_v35, %v17977_v28  ;;  %v18254_v10 = vadd.f32 %v18002_v35, %v17981_v40  ;;  %v9950_v26 = vld [vmem:[%s18996_s0 + $0x49] sm:$0xff]  ;;  %v9951_v52 = vld [vmem:[%s18996_s0 + $0x51] sm:$0xff]  ;;  %v18270_v40 = vadd.f32 %v18002_v35, %v17985_v59 }
 0xb9e   :  { %19462 = vst [vmem:[#allocation24_spill] sm:$0xff] %v18222_v23  ;;  %19464 = vst [vmem:[#allocation7_spill] sm:$0xff] %v18226_v36  ;;  %v19466_v36 = vld [vmem:[#allocation13_spill] sm:$0xff]  ;;  %v9953_v28 = vld [vmem:[%s18996_s0 + $0x69] sm:$0xff]  ;;  %v18371_v27 = vadd.f32 %v9948_v60, %v18046_v8  ;;  %v18389_v8 = vadd.f32 %v9950_v26, %v18054_v58  ;;  %v18392_v44 = vadd.f32 %v9951_v52, %v18058_v38 }
 0xb9f   :  { %19465 = vst [vmem:[#allocation8_spill] sm:$0xff] %v18242_v49  ;;  %v18246_v23 = vadd.f32 %v18002_v35, %v19466_v36  ;;  %19468 = vst [vmem:[#allocation10_spill] sm:$0xff] %v18250_v32  ;;  %v9952_v36 = vld [vmem:[%s18996_s0 + $0x61] sm:$0xff]  ;;  %v18278_v32 = vadd.f32 %v18002_v35, %v17993_v50  ;;  %v9954_v20 = vld [vmem:[%s18996_s0 + $0x79] sm:$0xff] }
 0xba0   :  { %19469 = vst [vmem:[#allocation15_spill] sm:$0xff] %v18254_v10  ;;  %19470 = vst [vmem:[#allocation12_spill] sm:$0xff] %v18270_v40  ;;  %v18274_v10 = vadd.f32 %v18002_v35, %v17989_v56  ;;  %v9955_v59 = vld [vmem:[%s18996_s0 + $0x81] sm:$0xff]  ;;  %v9956_v56 = vld [vmem:[%s18996_s0 + $0x91] sm:$0xff] }
 0xba1   :  { %19467 = vst [vmem:[#allocation9_spill] sm:$0xff] %v18246_v23  ;;  %19472 = vst [vmem:[#allocation16_spill] sm:$0xff] %v18278_v32  ;;  %v19473_v23 = vld [vmem:[#allocation17_spill] sm:$0xff]  ;;  %v18306_v32 = vadd.f32 %v18002_v35, %v18014_v25  ;;  %v9958_v40 = vld [vmem:[%s18996_s0 + $0xa9] sm:$0xff]  ;;  %v18419_v26 = vadd.f32 %v9956_v56, %v18078_v63 }
 0xba2   :  { %19471 = vst [vmem:[#allocation11_spill] sm:$0xff] %v18274_v10  ;;  %v18282_v49 = vadd.f32 %v18002_v35, %v19473_v23  ;;  %v9957_v50 = vld [vmem:[%s18996_s0 + $0x99] sm:$0xff]  ;;  %v18298_v23 = vadd.f32 %v18002_v35, %v18006_v42  ;;  %v18310_v10 = vadd.f32 %v18002_v35, %v18018_v30  ;;  %v9959_v42 = vld [vmem:[%s18996_s0 + $0xb1] sm:$0xff]  ;;  %v9961_v25 = vld [vmem:[%s18996_s0 + $0xc9] sm:$0xff]  ;;  %v18326_v30 = vadd.f32 %v18002_v35, %v18022_v43 }
 0xba3   :  { %19477 = vst [vmem:[#allocation29_spill] sm:$0xff] %v18306_v32  ;;  %v18334_v32 = vadd.f32 %v18002_v35, %v18030_v61  ;;  %v9963_v43 = vld [vmem:[%s18996_s0 + $0xe1] sm:$0xff]  ;;  %v9965_v61 = vld [vmem:[%s18996_s0 + $0xf9] sm:$0xff]  ;;  %v9974_v60 = vld [vmem:[%s18996_s0 + $0x169] sm:$0xff]  ;;  %v18422_v52 = vadd.f32 %v9957_v50, %v18082_v46  ;;  %v18437_v63 = vadd.f32 %v9958_v40, %v18086_v62  ;;  %v18440_v46 = vadd.f32 %v9959_v42, %v18090_v34 }
 0xba4   :  { %19474 = vst [vmem:[#allocation13_spill] sm:$0xff] %v18282_v49  ;;  %19475 = vst [vmem:[#allocation17_spill] sm:$0xff] %v18298_v23  ;;  %v18302_v49 = vadd.f32 %v18002_v35, %v18010_v9  ;;  %v9960_v9 = vld [vmem:[%s18996_s0 + $0xc1] sm:$0xff]  ;;  %v9962_v23 = vld [vmem:[%s18996_s0 + $0xd9] sm:$0xff]  ;;  %v18470_v42 = vadd.f32 %v9965_v61, %v18114_v6 }
 0xba5   :  { %19478 = vst [vmem:[#allocation30_spill] sm:$0xff] %v18310_v10  ;;  %19479 = vst [vmem:[#allocation31_spill] sm:$0xff] %v18326_v30  ;;  %v18330_v10 = vadd.f32 %v18002_v35, %v18026_v3  ;;  %v9964_v3 = vld [vmem:[%s18996_s0 + $0xf1] sm:$0xff]  ;;  %v18368_v30 = vadd.f32 %v9947_v1, %v18042_v47  ;;  %v9973_v47 = vld [vmem:[%s18996_s0 + $0x159] sm:$0xff]  ;;  %v18398_v1 = vadd.f32 %v9953_v28, %v18066_v14 }
 0xba6   :  { %19476 = vst [vmem:[#allocation28_spill] sm:$0xff] %v18302_v49  ;;  %19481 = vst [vmem:[#allocation33_spill] sm:$0xff] %v18334_v32  ;;  %v18338_v49 = vadd.f32 %v18002_v35, %v18034_v16  ;;  %v9966_v35 = vld [vmem:[%s18996_s0 + $0x109] sm:$0xff]  ;;  %v9967_v16 = vld [vmem:[%s18996_s0 + $0x111] sm:$0xff]  ;;  %v18416_v14 = vadd.f32 %v9955_v59, %v18074_v11  ;;  %v18446_v59 = vadd.f32 %v9961_v25, %v18098_v0 }
 0xba7   :  { %19480 = vst [vmem:[#allocation32_spill] sm:$0xff] %v18330_v10  ;;  %v9969_v32 = vld [vmem:[%s18996_s0 + $0x129] sm:$0xff]  ;;  %v18365_v10 = vadd.f32 %v9946_v54, %v18038_v55  ;;  %v9972_v55 = vld [vmem:[%s18996_s0 + $0x151] sm:$0xff]  ;;  %v18395_v54 = vadd.f32 %v9952_v36, %v18062_v15  ;;  %v9976_v58 = vld [vmem:[%s18996_s0 + $0x181] sm:$0xff]  ;;  %v18413_v15 = vadd.f32 %v9954_v20, %v18070_v19  ;;  %v18443_v20 = vadd.f32 %v9960_v9, %v18094_v57 }
 0xba8   :  { %19482 = vst [vmem:[#allocation34_spill] sm:$0xff] %v18338_v49  ;;  %v9968_v49 = vld [vmem:[%s18996_s0 + $0x121] sm:$0xff]  ;;  %v9975_v22 = vld [vmem:[%s18996_s0 + $0x171] sm:$0xff]  ;;  %v9977_v38 = vld [vmem:[%s18996_s0 + $0x189] sm:$0xff]  ;;  %v18461_v57 = vadd.f32 %v9962_v23, %v18102_v24  ;;  %v18464_v0 = vadd.f32 %v9963_v43, %v18106_v18  ;;  %v18467_v40 = vadd.f32 %v9964_v3, %v18110_v2  ;;  %v18482_v18 = vadd.f32 %v9966_v35, %v18118_v29 }
 0xba9   :  { %v9978_v36 = vld [vmem:[%s18996_s0 + $0x1c9] sm:$0xff]  ;;  %v9979_v28 = vld [vmem:[%s18996_s0 + $0x1d1] sm:$0xff]  ;;  %v9980_v19 = vld [vmem:[%s18996_s0 + $0x1e1] sm:$0xff]  ;;  %v18485_v2 = vadd.f32 %v9967_v16, %v18122_v4  ;;  %v18488_v6 = vadd.f32 %v9968_v49, %v18126_v17  ;;  %v18491_v23 = vadd.f32 %v9969_v32, %v18130_v13  ;;  %v18503_v4 = vadd.f32 %v9970_v39, %v18134_v7 }
 0xbaa   :  { %v9981_v11 = vld [vmem:[%s18996_s0 + $0x1e9] sm:$0xff]  ;;  %v9982_v56 = vld [vmem:[%s18996_s0 + $0x1f9] sm:$0xff]  ;;  %v9983_v50 = vld [vmem:[%s18996_s0 + $0x201] sm:$0xff]  ;;  %v18506_v17 = vadd.f32 %v9971_v33, %v18138_v41  ;;  %v18509_v13 = vadd.f32 %v9972_v55, %v18142_v53  ;;  %v18512_v32 = vadd.f32 %v9973_v47, %v18146_v12  ;;  %v18524_v41 = vadd.f32 %v9974_v60, %v18150_v45 }
 0xbab   :  { %v9984_v62 = vld [vmem:[%s18996_s0 + $0x211] sm:$0xff]  ;;  %v9985_v34 = vld [vmem:[%s18996_s0 + $0x219] sm:$0xff]  ;;  %v9986_v9 = vld [vmem:[%s18996_s0 + $0x229] sm:$0xff]  ;;  %v18527_v53 = vadd.f32 %v9975_v22, %v18154_v51  ;;  %v18530_v12 = vadd.f32 %v9976_v58, %v18158_v31  ;;  %v18533_v33 = vadd.f32 %v9977_v38, %v18162_v5  ;;  %v18545_v51 = vadd.f32 %v9978_v36, %v18166_v37 }
 0xbac   :  { %v9987_v25 = vld [vmem:[%s18996_s0 + $0x231] sm:$0xff]  ;;  %v9988_v24 = vld [vmem:[%s18996_s0 + $0x241] sm:$0xff]  ;;  %v9989_v43 = vld [vmem:[%s18996_s0 + $0x249] sm:$0xff]  ;;  %v18548_v31 = vadd.f32 %v9979_v28, %v18170_v21 }
 0xbad   :  { %v9990_v3 = vld [vmem:[%s18996_s0 + $0x259] sm:$0xff]  ;;  %v9991_v29 = vld [vmem:[%s18996_s0 + $0x261] sm:$0xff]  ;;  %v9992_v49 = vld [vmem:[%s18996_s0 + $0x271] sm:$0xff] }
 0xbae   :  { %v9993_v61 = vld [vmem:[%s18996_s0 + $0x279] sm:$0xff]  ;;  %v9994_v7 = vld [vmem:[%s18996_s0 + $0x289] sm:$0xff]  ;;  %v9995_v39 = vld [vmem:[%s18996_s0 + $0x291] sm:$0xff] }
 0xbaf   :  { %v9996_v35 = vld [vmem:[%s18996_s0 + $0x2a1] sm:$0xff]  ;;  %v9997_v45 = vld [vmem:[%s18996_s0 + $0x2a9] sm:$0xff]  ;;  %v9998_v60 = vld [vmem:[%s18996_s0 + $0x2b9] sm:$0xff] }
 0xbb0   :  { %v19483_v5 = vld [vmem:[#allocation18_spill] sm:$0xff]  ;;  %v19485_v55 = vld [vmem:[#allocation19_spill] sm:$0xff]  ;;  %v19487_v21 = vld [vmem:[#allocation20_spill] sm:$0xff] }
 0xbb1   :  { %v18551_v16 = vadd.f32 %v9980_v19, %v19483_v5  ;;  %v18554_v47 = vadd.f32 %v9981_v11, %v19485_v55  ;;  %v9999_v22 = vld [vmem:[%s18996_s0 + $0x2c1] sm:$0xff]  ;;  %v10000_v37 = vld [vmem:[%s18996_s0 + $0x2d1] sm:$0xff]  ;;  %v18566_v58 = vadd.f32 %v9982_v56, %v19487_v21  ;;  %v10001_v55 = vld [vmem:[%s18996_s0 + $0x2d9] sm:$0xff] }
 0xbb2   :  { %v19489_v38 = vld [vmem:[#allocation21_spill] sm:$0xff]  ;;  %v19491_v28 = vld [vmem:[#allocation22_spill] sm:$0xff]  ;;  %v10003_v56 = vld [vmem:[%s18996_s0 + $0x2f1] sm:$0xff] }
 0xbb3   :  { %19484 = vst [vmem:[#allocation18_spill] sm:$0xff] %v18551_v16  ;;  %19486 = vst [vmem:[#allocation19_spill] sm:$0xff] %v18554_v47  ;;  %v18569_v36 = vadd.f32 %v9983_v50, %v19489_v38  ;;  %v18572_v19 = vadd.f32 %v9984_v62, %v19491_v28  ;;  %v19493_v11 = vld [vmem:[#allocation5_spill] sm:$0xff]  ;;  %v10002_v47 = vld [vmem:[%s18996_s0 + $0x2e9] sm:$0xff] }
 0xbb4   :  { %19488 = vst [vmem:[#allocation20_spill] sm:$0xff] %v18566_v58  ;;  %v18575_v5 = vadd.f32 %v9985_v34, %v19493_v11  ;;  %v19495_v50 = vld [vmem:[#allocation23_spill] sm:$0xff]  ;;  %v19497_v62 = vld [vmem:[#allocation6_spill] sm:$0xff]  ;;  %v19517_v58 = vld [vmem:[#allocation16_spill] sm:$0xff] }
 0xbb5   :  { %19490 = vst [vmem:[#allocation21_spill] sm:$0xff] %v18569_v36  ;;  %19492 = vst [vmem:[#allocation22_spill] sm:$0xff] %v18572_v19  ;;  %v18587_v21 = vadd.f32 %v9986_v9, %v19495_v50  ;;  %v18590_v38 = vadd.f32 %v9987_v25, %v19497_v62  ;;  %v19499_v34 = vld [vmem:[#allocation26_spill] sm:$0xff]  ;;  %v19501_v11 = vld [vmem:[#allocation27_spill] sm:$0xff]  ;;  %v18647_v16 = vadd.f32 %v10000_v37, %v19517_v58 }
 0xbb6   :  { %19494 = vst [vmem:[#allocation5_spill] sm:$0xff] %v18575_v5  ;;  %v18593_v28 = vadd.f32 %v9988_v24, %v19499_v34  ;;  %v18596_v5 = vadd.f32 %v9989_v43, %v19501_v11  ;;  %v10004_v19 = vld [vmem:[%s18996_s0 + $0x301] sm:$0xff]  ;;  %v10005_v36 = vld [vmem:[%s18996_s0 + $0x309] sm:$0xff]  ;;  %v10006_v9 = vld [vmem:[%s18996_s0 + $0x319] sm:$0xff] }
 0xbb7   :  { %19496 = vst [vmem:[#allocation23_spill] sm:$0xff] %v18587_v21  ;;  %19498 = vst [vmem:[#allocation6_spill] sm:$0xff] %v18590_v38  ;;  %v19503_v25 = vld [vmem:[#allocation25_spill] sm:$0xff]  ;;  %v19505_v24 = vld [vmem:[#allocation14_spill] sm:$0xff] }
 0xbb8   :  { %19500 = vst [vmem:[#allocation26_spill] sm:$0xff] %v18593_v28  ;;  %19502 = vst [vmem:[#allocation27_spill] sm:$0xff] %v18596_v5  ;;  %v18608_v50 = vadd.f32 %v9990_v3, %v19503_v25  ;;  %v18611_v62 = vadd.f32 %v9991_v29, %v19505_v24  ;;  %v19507_v43 = vld [vmem:[#allocation24_spill] sm:$0xff]  ;;  %v19509_v11 = vld [vmem:[#allocation7_spill] sm:$0xff] }
 0xbb9   :  { %v18614_v34 = vadd.f32 %v9992_v49, %v19507_v43  ;;  %v18617_v5 = vadd.f32 %v9993_v61, %v19509_v11  ;;  %v10007_v28 = vld [vmem:[%s18996_s0 + $0x321] sm:$0xff]  ;;  %v10008_v38 = vld [vmem:[%s18996_s0 + $0x331] sm:$0xff]  ;;  %v10009_v3 = vld [vmem:[%s18996_s0 + $0x339] sm:$0xff] }
 0xbba   :  { %19504 = vst [vmem:[#allocation25_spill] sm:$0xff] %v18608_v50  ;;  %19506 = vst [vmem:[#allocation14_spill] sm:$0xff] %v18611_v62  ;;  %v19511_v29 = vld [vmem:[#allocation8_spill] sm:$0xff]  ;;  %v19512_v49 = vld [vmem:[#allocation9_spill] sm:$0xff] }
 0xbbb   :  { %19508 = vst [vmem:[#allocation24_spill] sm:$0xff] %v18614_v34  ;;  %19510 = vst [vmem:[#allocation7_spill] sm:$0xff] %v18617_v5  ;;  %v18629_v25 = vadd.f32 %v9994_v7, %v19511_v29  ;;  %v18632_v24 = vadd.f32 %v9995_v39, %v19512_v49  ;;  %v19513_v61 = vld [vmem:[#allocation10_spill] sm:$0xff]  ;;  %v19514_v11 = vld [vmem:[#allocation15_spill] sm:$0xff] }
 0xbbc   :  { %v18635_v43 = vadd.f32 %v9996_v35, %v19513_v61  ;;  %v18638_v5 = vadd.f32 %v9997_v45, %v19514_v11  ;;  %v19515_v34 = vld [vmem:[#allocation12_spill] sm:$0xff]  ;;  %v19516_v50 = vld [vmem:[#allocation11_spill] sm:$0xff]  ;;  %v19518_v7 = vld [vmem:[#allocation13_spill] sm:$0xff] }
 0xbbd   :  { %v18641_v62 = vadd.f32 %v9998_v60, %v19515_v34  ;;  %v18644_v21 = vadd.f32 %v9999_v22, %v19516_v50  ;;  %v18650_v29 = vadd.f32 %v10001_v55, %v19518_v7  ;;  %v19519_v39 = vld [vmem:[#allocation17_spill] sm:$0xff]  ;;  %v19520_v35 = vld [vmem:[#allocation28_spill] sm:$0xff]  ;;  %v19522_v60 = vld [vmem:[#allocation30_spill] sm:$0xff] }
 0xbbe   :  { %v18653_v49 = vadd.f32 %v10002_v47, %v19519_v39  ;;  %v18656_v61 = vadd.f32 %v10003_v56, %v19520_v35  ;;  %v19521_v45 = vld [vmem:[#allocation29_spill] sm:$0xff]  ;;  %v18662_v34 = vadd.f32 %v10005_v36, %v19522_v60  ;;  %v19523_v22 = vld [vmem:[#allocation31_spill] sm:$0xff]  ;;  %v19524_v37 = vld [vmem:[#allocation32_spill] sm:$0xff]  ;;  %v9297_v56 = vmax.f32 %v18365_v10, 0.0 }
 0xbbf   :  { %v18659_v11 = vadd.f32 %v10004_v19, %v19521_v45  ;;  %v18665_v50 = vadd.f32 %v10006_v9, %v19523_v22  ;;  %v18668_v58 = vadd.f32 %v10007_v28, %v19524_v37  ;;  %v19525_v55 = vld [vmem:[#allocation33_spill] sm:$0xff]  ;;  %v19526_v47 = vld [vmem:[#allocation34_spill] sm:$0xff]  ;;  %v9298_v19 = vmax.f32 %v18368_v30, 0.0 }
 0xbc0   :  { %v18671_v7 = vadd.f32 %v10008_v38, %v19525_v55  ;;  %v18674_v39 = vadd.f32 %v10009_v3, %v19526_v47  ;;  %v9299_v35 = vmax.f32 %v18371_v27, 0.0  ;;  %v9300_v36 = vmax.f32 %v18374_v48, 0.0  ;;  %9361 = vst.msk [vmem:[%s19003_s7] sm:$0xff] %vm90_vm0, %v9297_v56  ;;  %v19532_v22 = vld [vmem:[#allocation5_spill] sm:$0xff]  ;;  %v19533_v55 = vld [vmem:[#allocation23_spill] sm:$0xff]  ;;  %v19534_v56 = vld [vmem:[#allocation6_spill] sm:$0xff] }
 0xbc1   :  { %v9301_v9 = vmax.f32 %v18389_v8, 0.0  ;;  %v9302_v45 = vmax.f32 %v18392_v44, 0.0  ;;  %v9303_v28 = vmax.f32 %v18395_v54, 0.0  ;;  %v9304_v38 = vmax.f32 %v18398_v1, 0.0  ;;  %9362 = vst.msk [vmem:[%s19003_s7 + $0x8] sm:$0xff] %vm90_vm0, %v9298_v19 }
 0xbc2   :  { %v9305_v60 = vmax.f32 %v18413_v15, 0.0  ;;  %v9306_v3 = vmax.f32 %v18416_v14, 0.0  ;;  %v9307_v10 = vmax.f32 %v18419_v26, 0.0  ;;  %v9308_v30 = vmax.f32 %v18422_v52, 0.0  ;;  %9363 = vst.msk [vmem:[%s19003_s7 + $0x10] sm:$0xff] %vm90_vm0, %v9299_v35  ;;  %9364 = vst.msk [vmem:[%s19003_s7 + $0x18] sm:$0xff] %vm90_vm0, %v9300_v36 }
 0xbc3   :  { %v9309_v48 = vmax.f32 %v18437_v63, 0.0  ;;  %v9310_v27 = vmax.f32 %v18440_v46, 0.0  ;;  %v9311_v8 = vmax.f32 %v18443_v20, 0.0  ;;  %v9312_v44 = vmax.f32 %v18446_v59, 0.0  ;;  %9365 = vst.msk [vmem:[%s19003_s7 + $0x20] sm:$0xff] %vm90_vm0, %v9301_v9  ;;  %9366 = vst.msk [vmem:[%s19003_s7 + $0x28] sm:$0xff] %vm90_vm0, %v9302_v45 }
 0xbc4   :  { %9367 = vst.msk [vmem:[%s19003_s7 + $0x30] sm:$0xff] %vm90_vm0, %v9303_v28  ;;  %9368 = vst.msk [vmem:[%s19003_s7 + $0x38] sm:$0xff] %vm90_vm0, %v9304_v38  ;;  %v9313_v54 = vmax.f32 %v18461_v57, 0.0  ;;  %v9314_v1 = vmax.f32 %v18464_v0, 0.0  ;;  %v9315_v15 = vmax.f32 %v18467_v40, 0.0  ;;  %v9316_v14 = vmax.f32 %v18470_v42, 0.0 }
 0xbc5   :  { %9369 = vst.msk [vmem:[%s19003_s7 + $0x40] sm:$0xff] %vm90_vm0, %v9305_v60  ;;  %9370 = vst.msk [vmem:[%s19003_s7 + $0x48] sm:$0xff] %vm90_vm0, %v9306_v3  ;;  %v9317_v26 = vmax.f32 %v18482_v18, 0.0  ;;  %v9318_v52 = vmax.f32 %v18485_v2, 0.0  ;;  %v9319_v63 = vmax.f32 %v18488_v6, 0.0  ;;  %v9320_v46 = vmax.f32 %v18491_v23, 0.0 }
 0xbc6   :  { %9371 = vst.msk [vmem:[%s19003_s7 + $0x50] sm:$0xff] %vm90_vm0, %v9307_v10  ;;  %9372 = vst.msk [vmem:[%s19003_s7 + $0x58] sm:$0xff] %vm90_vm0, %v9308_v30  ;;  %v9321_v20 = vmax.f32 %v18503_v4, 0.0  ;;  %v9322_v59 = vmax.f32 %v18506_v17, 0.0  ;;  %v9323_v57 = vmax.f32 %v18509_v13, 0.0  ;;  %v9324_v0 = vmax.f32 %v18512_v32, 0.0 }
 0xbc7   :  { %9373 = vst.msk [vmem:[%s19003_s7 + $0x60] sm:$0xff] %vm90_vm0, %v9309_v48  ;;  %9374 = vst.msk [vmem:[%s19003_s7 + $0x68] sm:$0xff] %vm90_vm0, %v9310_v27  ;;  %v9325_v40 = vmax.f32 %v18524_v41, 0.0  ;;  %v9326_v42 = vmax.f32 %v18527_v53, 0.0  ;;  %v9327_v18 = vmax.f32 %v18530_v12, 0.0  ;;  %v9328_v2 = vmax.f32 %v18533_v33, 0.0 }
 0xbc8   :  { %9375 = vst.msk [vmem:[%s19003_s7 + $0x70] sm:$0xff] %vm90_vm0, %v9311_v8  ;;  %9376 = vst.msk [vmem:[%s19003_s7 + $0x78] sm:$0xff] %vm90_vm0, %v9312_v44  ;;  %v9329_v6 = vmax.f32 %v18545_v51, 0.0  ;;  %v9330_v23 = vmax.f32 %v18548_v31, 0.0  ;;  %v19527_v4 = vld [vmem:[#allocation18_spill] sm:$0xff]  ;;  %v19528_v13 = vld [vmem:[#allocation19_spill] sm:$0xff] }
 0xbc9   :  { %9377 = vst.msk [vmem:[%s19003_s7 + $0x80] sm:$0xff] %vm90_vm0, %v9313_v54  ;;  %9378 = vst.msk [vmem:[%s19003_s7 + $0x88] sm:$0xff] %vm90_vm0, %v9314_v1  ;;  %v9331_v17 = vmax.f32 %v19527_v4, 0.0  ;;  %v9332_v32 = vmax.f32 %v19528_v13, 0.0  ;;  %v19529_v41 = vld [vmem:[#allocation20_spill] sm:$0xff]  ;;  %v19530_v12 = vld [vmem:[#allocation21_spill] sm:$0xff] }
 0xbca   :  { %9379 = vst.msk [vmem:[%s19003_s7 + $0x90] sm:$0xff] %vm90_vm0, %v9315_v15  ;;  %9380 = vst.msk [vmem:[%s19003_s7 + $0x98] sm:$0xff] %vm90_vm0, %v9316_v14  ;;  %v9333_v53 = vmax.f32 %v19529_v41, 0.0  ;;  %v9334_v33 = vmax.f32 %v19530_v12, 0.0  ;;  %v19531_v51 = vld [vmem:[#allocation22_spill] sm:$0xff]  ;;  %v9336_v37 = vmax.f32 %v19532_v22, 0.0 }
 0xbcb   :  { %9381 = vst.msk [vmem:[%s19003_s7 + $0xa0] sm:$0xff] %vm90_vm0, %v9317_v26  ;;  %9382 = vst.msk [vmem:[%s19003_s7 + $0xa8] sm:$0xff] %vm90_vm0, %v9318_v52  ;;  %v9335_v31 = vmax.f32 %v19531_v51, 0.0  ;;  %v9337_v47 = vmax.f32 %v19533_v55, 0.0  ;;  %v9338_v19 = vmax.f32 %v19534_v56, 0.0  ;;  %v19535_v35 = vld [vmem:[#allocation26_spill] sm:$0xff] }
 0xbcc   :  { %9383 = vst.msk [vmem:[%s19003_s7 + $0xb0] sm:$0xff] %vm90_vm0, %v9319_v63  ;;  %9384 = vst.msk [vmem:[%s19003_s7 + $0xb8] sm:$0xff] %vm90_vm0, %v9320_v46  ;;  %v9339_v36 = vmax.f32 %v19535_v35, 0.0  ;;  %v19536_v9 = vld [vmem:[#allocation27_spill] sm:$0xff]  ;;  %v19537_v28 = vld [vmem:[#allocation25_spill] sm:$0xff]  ;;  %v9345_v8 = vmax.f32 %v18629_v25, 0.0 }
 0xbcd   :  { %9385 = vst.msk [vmem:[%s19003_s7 + $0xc0] sm:$0xff] %vm90_vm0, %v9321_v20  ;;  %9386 = vst.msk [vmem:[%s19003_s7 + $0xc8] sm:$0xff] %vm90_vm0, %v9322_v59  ;;  %v9340_v45 = vmax.f32 %v19536_v9, 0.0  ;;  %v9341_v38 = vmax.f32 %v19537_v28, 0.0  ;;  %v19538_v60 = vld [vmem:[#allocation14_spill] sm:$0xff]  ;;  %v19539_v10 = vld [vmem:[#allocation24_spill] sm:$0xff] }
 0xbce   :  { %9387 = vst.msk [vmem:[%s19003_s7 + $0xd0] sm:$0xff] %vm90_vm0, %v9323_v57  ;;  %9388 = vst.msk [vmem:[%s19003_s7 + $0xd8] sm:$0xff] %vm90_vm0, %v9324_v0  ;;  %v9342_v3 = vmax.f32 %v19538_v60, 0.0  ;;  %v9343_v30 = vmax.f32 %v19539_v10, 0.0  ;;  %v19540_v48 = vld [vmem:[#allocation7_spill] sm:$0xff]  ;;  %v9346_v44 = vmax.f32 %v18632_v24, 0.0 }
 0xbcf   :  { %9389 = vst.msk [vmem:[%s19003_s7 + $0xe0] sm:$0xff] %vm90_vm0, %v9325_v40  ;;  %9390 = vst.msk [vmem:[%s19003_s7 + $0xe8] sm:$0xff] %vm90_vm0, %v9326_v42  ;;  %v9344_v27 = vmax.f32 %v19540_v48, 0.0  ;;  %v9347_v54 = vmax.f32 %v18635_v43, 0.0  ;;  %v9348_v1 = vmax.f32 %v18638_v5, 0.0  ;;  %v9349_v5 = vmax.f32 %v18641_v62, 0.0 }
 0xbd0   :  { %9391 = vst.msk [vmem:[%s19003_s7 + $0xf0] sm:$0xff] %vm90_vm0, %v9327_v18  ;;  %9392 = vst.msk [vmem:[%s19003_s7 + $0xf8] sm:$0xff] %vm90_vm0, %v9328_v2  ;;  %v9350_v25 = vmax.f32 %v18644_v21, 0.0  ;;  %v9351_v24 = vmax.f32 %v18647_v16, 0.0  ;;  %v9352_v43 = vmax.f32 %v18650_v29, 0.0  ;;  %v9353_v16 = vmax.f32 %v18653_v49, 0.0 }
 0xbd1   :  { %9393 = vst.msk [vmem:[%s19003_s7 + $0x100] sm:$0xff] %vm90_vm0, %v9329_v6  ;;  %9394 = vst.msk [vmem:[%s19003_s7 + $0x108] sm:$0xff] %vm90_vm0, %v9330_v23  ;;  %v9354_v21 = vmax.f32 %v18656_v61, 0.0  ;;  %v9355_v62 = vmax.f32 %v18659_v11, 0.0  ;;  %v9356_v29 = vmax.f32 %v18662_v34, 0.0  ;;  %v9357_v49 = vmax.f32 %v18665_v50, 0.0 }
 0xbd2   :  { %9395 = vst.msk [vmem:[%s19003_s7 + $0x110] sm:$0xff] %vm90_vm0, %v9331_v17  ;;  %9396 = vst.msk [vmem:[%s19003_s7 + $0x118] sm:$0xff] %vm90_vm0, %v9332_v32  ;;  %v9358_v61 = vmax.f32 %v18668_v58, 0.0  ;;  %v9359_v11 = vmax.f32 %v18671_v7, 0.0  ;;  %v9360_v34 = vmax.f32 %v18674_v39, 0.0 }
 0xbd3   :  { %9397 = vst.msk [vmem:[%s19003_s7 + $0x120] sm:$0xff] %vm90_vm0, %v9333_v53  ;;  %9398 = vst.msk [vmem:[%s19003_s7 + $0x128] sm:$0xff] %vm90_vm0, %v9334_v33 }
 0xbd4   :  { %9399 = vst.msk [vmem:[%s19003_s7 + $0x130] sm:$0xff] %vm90_vm0, %v9335_v31  ;;  %9400 = vst.msk [vmem:[%s19003_s7 + $0x138] sm:$0xff] %vm90_vm0, %v9336_v37 }
 0xbd5   :  { %9401 = vst.msk [vmem:[%s19003_s7 + $0x140] sm:$0xff] %vm90_vm0, %v9337_v47  ;;  %9402 = vst.msk [vmem:[%s19003_s7 + $0x148] sm:$0xff] %vm90_vm0, %v9338_v19 }
 0xbd6   :  { %9403 = vst.msk [vmem:[%s19003_s7 + $0x150] sm:$0xff] %vm90_vm0, %v9339_v36  ;;  %9404 = vst.msk [vmem:[%s19003_s7 + $0x158] sm:$0xff] %vm90_vm0, %v9340_v45 }
 0xbd7   :  { %9405 = vst.msk [vmem:[%s19003_s7 + $0x160] sm:$0xff] %vm90_vm0, %v9341_v38  ;;  %9406 = vst.msk [vmem:[%s19003_s7 + $0x168] sm:$0xff] %vm90_vm0, %v9342_v3 }
 0xbd8   :  { %9407 = vst.msk [vmem:[%s19003_s7 + $0x170] sm:$0xff] %vm90_vm0, %v9343_v30  ;;  %9408 = vst.msk [vmem:[%s19003_s7 + $0x178] sm:$0xff] %vm90_vm0, %v9344_v27 }
 0xbd9   :  { %9409 = vst.msk [vmem:[%s19003_s7 + $0x180] sm:$0xff] %vm90_vm0, %v9345_v8  ;;  %9410 = vst.msk [vmem:[%s19003_s7 + $0x188] sm:$0xff] %vm90_vm0, %v9346_v44 }
 0xbda   :  { %9411 = vst.msk [vmem:[%s19003_s7 + $0x190] sm:$0xff] %vm90_vm0, %v9347_v54  ;;  %9412 = vst.msk [vmem:[%s19003_s7 + $0x198] sm:$0xff] %vm90_vm0, %v9348_v1 }
 0xbdb   :  { %9413 = vst.msk [vmem:[%s19003_s7 + $0x1a0] sm:$0xff] %vm90_vm0, %v9349_v5  ;;  %9414 = vst.msk [vmem:[%s19003_s7 + $0x1a8] sm:$0xff] %vm90_vm0, %v9350_v25 }
 0xbdc   :  { %9415 = vst.msk [vmem:[%s19003_s7 + $0x1b0] sm:$0xff] %vm90_vm0, %v9351_v24  ;;  %9416 = vst.msk [vmem:[%s19003_s7 + $0x1b8] sm:$0xff] %vm90_vm0, %v9352_v43 }
 0xbdd   :  { %9417 = vst.msk [vmem:[%s19003_s7 + $0x1c0] sm:$0xff] %vm90_vm0, %v9353_v16  ;;  %9418 = vst.msk [vmem:[%s19003_s7 + $0x1c8] sm:$0xff] %vm90_vm0, %v9354_v21 }
 0xbde   :  { %9419 = vst.msk [vmem:[%s19003_s7 + $0x1d0] sm:$0xff] %vm90_vm0, %v9355_v62  ;;  %9420 = vst.msk [vmem:[%s19003_s7 + $0x1d8] sm:$0xff] %vm90_vm0, %v9356_v29 }
 0xbdf   :  { %9421 = vst.msk [vmem:[%s19003_s7 + $0x1e0] sm:$0xff] %vm90_vm0, %v9357_v49  ;;  %9422 = vst.msk [vmem:[%s19003_s7 + $0x1e8] sm:$0xff] %vm90_vm0, %v9358_v61 }
 0xbe0   :  { %9423 = vst.msk [vmem:[%s19003_s7 + $0x1f0] sm:$0xff] %vm90_vm0, %v9359_v11  ;;  %9424 = vst.msk [vmem:[%s19003_s7 + $0x1f8] sm:$0xff] %vm90_vm0, %v9360_v34 }

</bundles_post_ra>
